<compile_context>
chip_gen: v7x
topology: tpu7x:2x2x1
jax: 0.10.0
libtpu: 0.0.40
codegen_flags: <defaults>
</compile_context>

<pallas_src>
import numpy as np
import jax
import jax.numpy as jnp
from jax import lax
from jax.experimental import pallas as pl
from jax.experimental.pallas import tpu as pltpu

EPS = 1e-5  # nn.InstanceNorm3d default eps


# ----------------------------- fused Pallas kernel ---------------------------

def _make_fused_kernel(C, D, H, W, Sp_pad):
    Dp, Hp, Wp = D + 2, H + 2, W + 2
    S = D * H * W
    inv_S = 1.0 / S
    # read-offsets into the flattened padded volume for the 27 conv taps
    tap_offs = [(kd - 1) * Hp * Wp + (kh - 1) * Wp + (kw - 1)
                for kd in range(3) for kh in range(3) for kw in range(3)]

    def shift_read(a, off):
        # out[:, q] = a[:, q + off]; wrapped lanes only ever land on halo /
        # lane-tail positions (masked, overwritten, or never read) -- proven
        # for 3x3x3 taps with pad=1 on this layout.
        s = (-off) % Sp_pad
        if s == 0:
            return a
        return pltpu.roll(a, shift=s, axis=1)

    def conv27(src, w_all):
        # Tap accumulation: 27x  (C,C)bf16 @ (C,Sp_pad)bf16 single-pass MXU
        # pushes accumulated in f32.  No materialized (27C, Sp_pad) stack.
        acc = None
        for t, off in enumerate(tap_offs):
            w_t = w_all[t * C:(t + 1) * C, :].astype(jnp.bfloat16)    # (C, C)
            tap = shift_read(src, off).astype(jnp.bfloat16)           # (C, Sp_pad)
            p = jnp.dot(w_t, tap, preferred_element_type=jnp.float32)
            acc = p if acc is None else acc + p
        return acc

    def inorm(y, m_int):
        # masked InstanceNorm over the S interior voxels, single fused sweep
        ym = y * m_int
        mean = jnp.sum(ym, axis=1, keepdims=True) * inv_S
        ex2 = jnp.sum(ym * y, axis=1, keepdims=True) * inv_S
        var = ex2 - mean * mean
        return (y - mean) * lax.rsqrt(var + EPS)

    def reflect_fill(v, lo, hi, off):
        # ReflectionPad3d(1) halo rebuild along one axis: low halo <- +off
        # plane, high halo <- -off plane; two selects on boolean masks.
        return jnp.where(lo, shift_read(v, off),
                         jnp.where(hi, shift_read(v, -off), v))

    def kernel(xpad_ref, masks_ref, w1_ref, w2_ref, o_ref):
        xpad = xpad_ref[...]                     # (C, Sp_pad) f32, valid halo
        m = masks_ref[...]                       # (8, Sp_pad) f32 0/1 masks
        m_int = m[0:1, :]                        # interior voxels
        w_lo, w_hi = m[1:2, :] != 0.0, m[2:3, :] != 0.0
        h_lo, h_hi = m[3:4, :] != 0.0, m[4:5, :] != 0.0
        d_lo, d_hi = m[5:6, :] != 0.0, m[6:7, :] != 0.0
        m_valid = m[7:8, :]                      # q < Sp (drop lane tail)

        w1 = w1_ref[...]                         # (27C, C) f32, cast per tap
        w2 = w2_ref[...]

        # conv1 -> InstanceNorm -> ReLU   (conv bias cancels under IN -> dropped)
        h = jnp.maximum(inorm(conv27(xpad, w1), m_int), 0.0)

        # rebuild h's ReflectionPad3d(1) halo entirely in VMEM (W, H, D order)
        h = reflect_fill(h, w_lo, w_hi, 2)
        h = reflect_fill(h, h_lo, h_hi, 2 * Wp)
        h = reflect_fill(h, d_lo, d_hi, 2 * Hp * Wp)

        # conv2 -> InstanceNorm -> residual add
        out = xpad + inorm(conv27(h, w2), m_int)

        # padded-flat is the block's external format: rebuild the output halo
        # so the next block consumes o_ref directly (no HBM pad/slice between
        # blocks); zero the lane tail to keep the slab clean across a stack.
        out = reflect_fill(out, w_lo, w_hi, 2)
        out = reflect_fill(out, h_lo, h_hi, 2 * Wp)
        out = reflect_fill(out, d_lo, d_hi, 2 * Hp * Wp)
        o_ref[...] = out * m_valid

    return kernel


# ------------------------------ layout helpers --------------------------------

def _build_masks(D, H, W, Sp_pad):
    Dp, Hp, Wp = D + 2, H + 2, W + 2
    Sp = Dp * Hp * Wp
    q = np.arange(Sp_pad)
    wq, hq, dq = q % Wp, (q // Wp) % Hp, q // (Hp * Wp)
    valid = q < Sp
    mk = lambda c: (valid & c).astype(np.float32)
    return jnp.asarray(np.stack([
        mk((dq >= 1) & (dq <= D) & (hq >= 1) & (hq <= H) & (wq >= 1) & (wq <= W)),
        mk(wq == 0), mk(wq == Wp - 1),
        mk(hq == 0), mk(hq == Hp - 1),
        mk(dq == 0), mk(dq == Dp - 1),
        valid.astype(np.float32),
    ], axis=0))                                                    # (8, Sp_pad)


def to_padded_flat(x):
    """(N,C,D,H,W) -> padded-flat (N,C,Sp_pad): ReflectionPad3d(1) + lane pad."""
    N, C, D, H, W = x.shape
    Sp = (D + 2) * (H + 2) * (W + 2)
    Sp_pad = ((Sp + 127) // 128) * 128
    xp = jnp.pad(x.astype(jnp.float32),
                 ((0, 0), (0, 0), (1, 1), (1, 1), (1, 1)), mode="reflect")
    return jnp.pad(xp.reshape(N, C, Sp), ((0, 0), (0, 0), (0, Sp_pad - Sp)))


def from_padded_flat(xf, spatial):
    """padded-flat (N,C,Sp_pad) -> (N,C,D,H,W): drop lane tail + halo."""
    D, H, W = spatial
    Dp, Hp, Wp = D + 2, H + 2, W + 2
    Sp = Dp * Hp * Wp
    N, C, _ = xf.shape
    v = xf[:, :, :Sp].reshape(N, C, Dp, Hp, Wp)
    return v[:, :, 1:-1, 1:-1, 1:-1]


# --------------------------------- wrappers -----------------------------------

def resnet_block3d_padded(x_flat, w1, b1, w2, b2, spatial):
    """One ResnetBlock3d on the padded-flat (N, C, Sp_pad) layout (in AND out).

    b1/b2 accepted for parameter fidelity but unused: a conv bias is a
    per-channel constant that cancels exactly under affine-free InstanceNorm.
    """
    del b1, b2
    N, C, Sp_pad = x_flat.shape
    D, H, W = spatial
    K = 27 * C
    # (C_out, C_in, kd, kh, kw) -> (kd, kh, kw, C_out, C_in) -> (27*C_out, C_in)
    # row-block order matches tap_offs; cast to bf16 happens in-kernel per tap.
    w1_t = jnp.transpose(w1, (2, 3, 4, 0, 1)).reshape(K, C).astype(jnp.float32)
    w2_t = jnp.transpose(w2, (2, 3, 4, 0, 1)).reshape(K, C).astype(jnp.float32)
    masks = _build_masks(D, H, W, Sp_pad)

    return pl.pallas_call(
        _make_fused_kernel(C, D, H, W, Sp_pad),
        out_shape=jax.ShapeDtypeStruct((N, C, Sp_pad), jnp.float32),
        grid=(N,),
        in_specs=[
            pl.BlockSpec((None, C, Sp_pad), lambda n: (n, 0, 0)),  # x (per batch)
            pl.BlockSpec((8, Sp_pad), lambda n: (0, 0)),           # masks (shared)
            pl.BlockSpec((K, C), lambda n: (0, 0)),                # w1 taps
            pl.BlockSpec((K, C), lambda n: (0, 0)),                # w2 taps
        ],
        out_specs=pl.BlockSpec((None, C, Sp_pad), lambda n: (n, 0, 0)),
        compiler_params=pltpu.CompilerParams(
            dimension_semantics=("parallel",)),
    )(x_flat, masks, w1_t, w2_t)


def resnet_block3d(x, w1, b1, w2, b2):
    """Standalone block: (N,C,D,H,W) in/out (pads + slices once)."""
    _, _, D, H, W = x.shape
    yf = resnet_block3d_padded(to_padded_flat(x), w1, b1, w2, b2, (D, H, W))
    return from_padded_flat(yf, (D, H, W))


def resnet_stack3d(x, blocks):
    """Chain of ResnetBlock3d's on the padded-flat layout: one HBM pad + one
    slice for the whole stack instead of per block."""
    _, _, D, H, W = x.shape
    xf = to_padded_flat(x)
    for (w1, b1, w2, b2) in blocks:
        xf = resnet_block3d_padded(xf, w1, b1, w2, b2, (D, H, W))
    return from_padded_flat(xf, (D, H, W))


# ------------------------------ pure-JAX reference ----------------------------

def _ref_block(x, w1, b1, w2, b2):
    def conv(v, w, b):
        vp = jnp.pad(v, ((0, 0), (0, 0), (1, 1), (1, 1), (1, 1)), mode="reflect")
        y = lax.conv_general_dilated(
            vp, w, window_strides=(1, 1, 1), padding="VALID",
            dimension_numbers=("NCDHW", "OIDHW", "NCDHW"),
            precision=lax.Precision.HIGHEST)
        return y + b[None, :, None, None, None]

    def inorm(y):
        mean = y.mean(axis=(2, 3, 4), keepdims=True)
        var = ((y - mean) ** 2).mean(axis=(2, 3, 4), keepdims=True)
        return (y - mean) * lax.rsqrt(var + EPS)

    h = jnp.maximum(inorm(conv(x, w1, b1)), 0.0)
    return x + inorm(conv(h, w2, b2))


# ----------------------------------- main -------------------------------------

if __name__ == "__main__":
    # small shapes: batch=2, dim(channels)=8, spatial D=H=W=8, two chained blocks
    N, C, D, H, W = 2, 8, 8, 8, 8
    n_blocks = 2

    key = jax.random.PRNGKey(0)
    kx, *pk = jax.random.split(key, 1 + 4 * n_blocks)
    x = jax.random.normal(kx, (N, C, D, H, W), dtype=jnp.float32)
    blocks = []
    for i in range(n_blocks):
        kw1, kb1, kw2, kb2 = pk[4 * i:4 * i + 4]
        blocks.append(
            (0.1 * jax.random.normal(kw1, (C, C, 3, 3, 3), dtype=jnp.float32),
             0.1 * jax.random.normal(kb1, (C,), dtype=jnp.float32),
             0.1 * jax.random.normal(kw2, (C, C, 3, 3, 3), dtype=jnp.float32),
             0.1 * jax.random.normal(kb2, (C,), dtype=jnp.float32)))

    out = jax.block_until_ready(jax.jit(resnet_stack3d)(x, blocks))
    assert out.shape == (N, C, D, H, W)

    ref = x
    for (w1, b1, w2, b2) in blocks:
        ref = _ref_block(ref, w1, b1, w2, b2)
    ref = jax.block_until_ready(ref)

    # bf16 single-pass MXU inside the kernel vs an f32 HIGHEST-precision
    # reference across two chained blocks: expected max |err| ~1e-2.
    err_max = float(jnp.max(jnp.abs(out - ref)))
    err_mean = float(jnp.mean(jnp.abs(out - ref)))
    assert err_mean < 2e-2, err_mean
    assert bool(jnp.allclose(out, ref, atol=5e-2, rtol=2e-2)), (err_max, err_mean)

    # TODO(synk): nn.Dropout(0.5) branch (use_dropout=True) not implemented;
    # would use pltpu.prng_seed + pltpu.prng_random_bits in-kernel.
    print("KERNEL_OK")
</pallas_src>

<mosaic_0001>
module attributes {stable_mosaic.version = 11 : i64} {
  func.func @kernel(%arg0: i32, %arg1: memref<1x8x1024xf32, #tpu.memory_space<vmem>>, %arg2: memref<8x1024xf32, #tpu.memory_space<vmem>>, %arg3: memref<216x8xf32, #tpu.memory_space<vmem>>, %arg4: memref<216x8xf32, #tpu.memory_space<vmem>>, %arg5: memref<1x8x1024xf32, #tpu.memory_space<vmem>>) attributes {dimension_semantics = [#tpu.dimension_semantics<parallel>], iteration_bounds = array<i64: 2>, scalar_prefetch = 0 : i64, scratch_operands = 0 : i64, tpu.core_type = #tpu.core_type<tc>, window_params = [{transform_indices = @transform_0, window_bounds = array<i64: 1, 8, 1024>}, {pipeline_mode = #tpu.pipeline_mode<synchronous>, transform_indices = @transform_1, window_bounds = array<i64: 8, 1024>}, {pipeline_mode = #tpu.pipeline_mode<synchronous>, transform_indices = @transform_2, window_bounds = array<i64: 216, 8>}, {pipeline_mode = #tpu.pipeline_mode<synchronous>, transform_indices = @transform_3, window_bounds = array<i64: 216, 8>}, {transform_indices = @transform_4, window_bounds = array<i64: 1, 8, 1024>}]} {
    %c0 = arith.constant 0 : index
    %c0_0 = arith.constant 0 : index
    %c0_1 = arith.constant 0 : index
    %0 = vector.load %arg1[%c0, %c0_0, %c0_1] : memref<1x8x1024xf32, #tpu.memory_space<vmem>>, vector<1x8x1024xf32>
    %1 = vector.shape_cast %0 : vector<1x8x1024xf32> to vector<8x1024xf32>
    %c0_2 = arith.constant 0 : index
    %c0_3 = arith.constant 0 : index
    %2 = vector.load %arg2[%c0_2, %c0_3] : memref<8x1024xf32, #tpu.memory_space<vmem>>, vector<8x1024xf32>
    %3 = vector.extract_strided_slice %2 {offsets = [0, 0], sizes = [1, 1024], strides = [1, 1]} : vector<8x1024xf32> to vector<1x1024xf32>
    %4 = vector.extract_strided_slice %2 {offsets = [1, 0], sizes = [1, 1024], strides = [1, 1]} : vector<8x1024xf32> to vector<1x1024xf32>
    %cst = arith.constant 0.000000e+00 : f32
    %5 = vector.broadcast %cst : f32 to vector<1x1024xf32>
    %6 = arith.cmpf one, %4, %5 : vector<1x1024xf32>
    %7 = vector.extract_strided_slice %2 {offsets = [2, 0], sizes = [1, 1024], strides = [1, 1]} : vector<8x1024xf32> to vector<1x1024xf32>
    %cst_4 = arith.constant 0.000000e+00 : f32
    %8 = vector.broadcast %cst_4 : f32 to vector<1x1024xf32>
    %9 = arith.cmpf one, %7, %8 : vector<1x1024xf32>
    %10 = vector.extract_strided_slice %2 {offsets = [3, 0], sizes = [1, 1024], strides = [1, 1]} : vector<8x1024xf32> to vector<1x1024xf32>
    %cst_5 = arith.constant 0.000000e+00 : f32
    %11 = vector.broadcast %cst_5 : f32 to vector<1x1024xf32>
    %12 = arith.cmpf one, %10, %11 : vector<1x1024xf32>
    %13 = vector.extract_strided_slice %2 {offsets = [4, 0], sizes = [1, 1024], strides = [1, 1]} : vector<8x1024xf32> to vector<1x1024xf32>
    %cst_6 = arith.constant 0.000000e+00 : f32
    %14 = vector.broadcast %cst_6 : f32 to vector<1x1024xf32>
    %15 = arith.cmpf one, %13, %14 : vector<1x1024xf32>
    %16 = vector.extract_strided_slice %2 {offsets = [5, 0], sizes = [1, 1024], strides = [1, 1]} : vector<8x1024xf32> to vector<1x1024xf32>
    %cst_7 = arith.constant 0.000000e+00 : f32
    %17 = vector.broadcast %cst_7 : f32 to vector<1x1024xf32>
    %18 = arith.cmpf one, %16, %17 : vector<1x1024xf32>
    %19 = vector.extract_strided_slice %2 {offsets = [6, 0], sizes = [1, 1024], strides = [1, 1]} : vector<8x1024xf32> to vector<1x1024xf32>
    %cst_8 = arith.constant 0.000000e+00 : f32
    %20 = vector.broadcast %cst_8 : f32 to vector<1x1024xf32>
    %21 = arith.cmpf one, %19, %20 : vector<1x1024xf32>
    %22 = vector.extract_strided_slice %2 {offsets = [7, 0], sizes = [1, 1024], strides = [1, 1]} : vector<8x1024xf32> to vector<1x1024xf32>
    %c0_9 = arith.constant 0 : index
    %c0_10 = arith.constant 0 : index
    %23 = vector.load %arg3[%c0_9, %c0_10] : memref<216x8xf32, #tpu.memory_space<vmem>>, vector<216x8xf32>
    %c0_11 = arith.constant 0 : index
    %c0_12 = arith.constant 0 : index
    %24 = vector.load %arg4[%c0_11, %c0_12] : memref<216x8xf32, #tpu.memory_space<vmem>>, vector<216x8xf32>
    %25 = vector.extract_strided_slice %23 {offsets = [0, 0], sizes = [8, 8], strides = [1, 1]} : vector<216x8xf32> to vector<8x8xf32>
    %26 = arith.truncf %25 : vector<8x8xf32> to vector<8x8xbf16>
    %c111_i32 = arith.constant 111 : i32
    %27 = tpu.dynamic_rotate %1 by %c111_i32 dim 1 : vector<8x1024xf32>, i32 -> vector<8x1024xf32>
    %28 = arith.truncf %27 : vector<8x1024xf32> to vector<8x1024xbf16>
    %cst_13 = arith.constant dense<0.000000e+00> : vector<8x1024xf32>
    %29 = tpu.matmul %26, %28, %cst_13 {dimension_numbers = #tpu.dot_dimension_numbers<[1], [0], [0], [1], [0, 0, 1, 1], [], []>} : vector<8x8xbf16>, vector<8x1024xbf16>, vector<8x1024xf32> -> vector<8x1024xf32>
    %30 = vector.extract_strided_slice %23 {offsets = [8, 0], sizes = [8, 8], strides = [1, 1]} : vector<216x8xf32> to vector<8x8xf32>
    %31 = arith.truncf %30 : vector<8x8xf32> to vector<8x8xbf16>
    %c110_i32 = arith.constant 110 : i32
    %32 = tpu.dynamic_rotate %1 by %c110_i32 dim 1 : vector<8x1024xf32>, i32 -> vector<8x1024xf32>
    %33 = arith.truncf %32 : vector<8x1024xf32> to vector<8x1024xbf16>
    %cst_14 = arith.constant dense<0.000000e+00> : vector<8x1024xf32>
    %34 = tpu.matmul %31, %33, %cst_14 {dimension_numbers = #tpu.dot_dimension_numbers<[1], [0], [0], [1], [0, 0, 1, 1], [], []>} : vector<8x8xbf16>, vector<8x1024xbf16>, vector<8x1024xf32> -> vector<8x1024xf32>
    %35 = arith.addf %29, %34 : vector<8x1024xf32>
    %36 = vector.extract_strided_slice %23 {offsets = [16, 0], sizes = [8, 8], strides = [1, 1]} : vector<216x8xf32> to vector<8x8xf32>
    %37 = arith.truncf %36 : vector<8x8xf32> to vector<8x8xbf16>
    %c109_i32 = arith.constant 109 : i32
    %38 = tpu.dynamic_rotate %1 by %c109_i32 dim 1 : vector<8x1024xf32>, i32 -> vector<8x1024xf32>
    %39 = arith.truncf %38 : vector<8x1024xf32> to vector<8x1024xbf16>
    %cst_15 = arith.constant dense<0.000000e+00> : vector<8x1024xf32>
    %40 = tpu.matmul %37, %39, %cst_15 {dimension_numbers = #tpu.dot_dimension_numbers<[1], [0], [0], [1], [0, 0, 1, 1], [], []>} : vector<8x8xbf16>, vector<8x1024xbf16>, vector<8x1024xf32> -> vector<8x1024xf32>
    %41 = arith.addf %35, %40 : vector<8x1024xf32>
    %42 = vector.extract_strided_slice %23 {offsets = [24, 0], sizes = [8, 8], strides = [1, 1]} : vector<216x8xf32> to vector<8x8xf32>
    %43 = arith.truncf %42 : vector<8x8xf32> to vector<8x8xbf16>
    %c101_i32 = arith.constant 101 : i32
    %44 = tpu.dynamic_rotate %1 by %c101_i32 dim 1 : vector<8x1024xf32>, i32 -> vector<8x1024xf32>
    %45 = arith.truncf %44 : vector<8x1024xf32> to vector<8x1024xbf16>
    %cst_16 = arith.constant dense<0.000000e+00> : vector<8x1024xf32>
    %46 = tpu.matmul %43, %45, %cst_16 {dimension_numbers = #tpu.dot_dimension_numbers<[1], [0], [0], [1], [0, 0, 1, 1], [], []>} : vector<8x8xbf16>, vector<8x1024xbf16>, vector<8x1024xf32> -> vector<8x1024xf32>
    %47 = arith.addf %41, %46 : vector<8x1024xf32>
    %48 = vector.extract_strided_slice %23 {offsets = [32, 0], sizes = [8, 8], strides = [1, 1]} : vector<216x8xf32> to vector<8x8xf32>
    %49 = arith.truncf %48 : vector<8x8xf32> to vector<8x8xbf16>
    %c100_i32 = arith.constant 100 : i32
    %50 = tpu.dynamic_rotate %1 by %c100_i32 dim 1 : vector<8x1024xf32>, i32 -> vector<8x1024xf32>
    %51 = arith.truncf %50 : vector<8x1024xf32> to vector<8x1024xbf16>
    %cst_17 = arith.constant dense<0.000000e+00> : vector<8x1024xf32>
    %52 = tpu.matmul %49, %51, %cst_17 {dimension_numbers = #tpu.dot_dimension_numbers<[1], [0], [0], [1], [0, 0, 1, 1], [], []>} : vector<8x8xbf16>, vector<8x1024xbf16>, vector<8x1024xf32> -> vector<8x1024xf32>
    %53 = arith.addf %47, %52 : vector<8x1024xf32>
    %54 = vector.extract_strided_slice %23 {offsets = [40, 0], sizes = [8, 8], strides = [1, 1]} : vector<216x8xf32> to vector<8x8xf32>
    %55 = arith.truncf %54 : vector<8x8xf32> to vector<8x8xbf16>
    %c99_i32 = arith.constant 99 : i32
    %56 = tpu.dynamic_rotate %1 by %c99_i32 dim 1 : vector<8x1024xf32>, i32 -> vector<8x1024xf32>
    %57 = arith.truncf %56 : vector<8x1024xf32> to vector<8x1024xbf16>
    %cst_18 = arith.constant dense<0.000000e+00> : vector<8x1024xf32>
    %58 = tpu.matmul %55, %57, %cst_18 {dimension_numbers = #tpu.dot_dimension_numbers<[1], [0], [0], [1], [0, 0, 1, 1], [], []>} : vector<8x8xbf16>, vector<8x1024xbf16>, vector<8x1024xf32> -> vector<8x1024xf32>
    %59 = arith.addf %53, %58 : vector<8x1024xf32>
    %60 = vector.extract_strided_slice %23 {offsets = [48, 0], sizes = [8, 8], strides = [1, 1]} : vector<216x8xf32> to vector<8x8xf32>
    %61 = arith.truncf %60 : vector<8x8xf32> to vector<8x8xbf16>
    %c91_i32 = arith.constant 91 : i32
    %62 = tpu.dynamic_rotate %1 by %c91_i32 dim 1 : vector<8x1024xf32>, i32 -> vector<8x1024xf32>
    %63 = arith.truncf %62 : vector<8x1024xf32> to vector<8x1024xbf16>
    %cst_19 = arith.constant dense<0.000000e+00> : vector<8x1024xf32>
    %64 = tpu.matmul %61, %63, %cst_19 {dimension_numbers = #tpu.dot_dimension_numbers<[1], [0], [0], [1], [0, 0, 1, 1], [], []>} : vector<8x8xbf16>, vector<8x1024xbf16>, vector<8x1024xf32> -> vector<8x1024xf32>
    %65 = arith.addf %59, %64 : vector<8x1024xf32>
    %66 = vector.extract_strided_slice %23 {offsets = [56, 0], sizes = [8, 8], strides = [1, 1]} : vector<216x8xf32> to vector<8x8xf32>
    %67 = arith.truncf %66 : vector<8x8xf32> to vector<8x8xbf16>
    %c90_i32 = arith.constant 90 : i32
    %68 = tpu.dynamic_rotate %1 by %c90_i32 dim 1 : vector<8x1024xf32>, i32 -> vector<8x1024xf32>
    %69 = arith.truncf %68 : vector<8x1024xf32> to vector<8x1024xbf16>
    %cst_20 = arith.constant dense<0.000000e+00> : vector<8x1024xf32>
    %70 = tpu.matmul %67, %69, %cst_20 {dimension_numbers = #tpu.dot_dimension_numbers<[1], [0], [0], [1], [0, 0, 1, 1], [], []>} : vector<8x8xbf16>, vector<8x1024xbf16>, vector<8x1024xf32> -> vector<8x1024xf32>
    %71 = arith.addf %65, %70 : vector<8x1024xf32>
    %72 = vector.extract_strided_slice %23 {offsets = [64, 0], sizes = [8, 8], strides = [1, 1]} : vector<216x8xf32> to vector<8x8xf32>
    %73 = arith.truncf %72 : vector<8x8xf32> to vector<8x8xbf16>
    %c89_i32 = arith.constant 89 : i32
    %74 = tpu.dynamic_rotate %1 by %c89_i32 dim 1 : vector<8x1024xf32>, i32 -> vector<8x1024xf32>
    %75 = arith.truncf %74 : vector<8x1024xf32> to vector<8x1024xbf16>
    %cst_21 = arith.constant dense<0.000000e+00> : vector<8x1024xf32>
    %76 = tpu.matmul %73, %75, %cst_21 {dimension_numbers = #tpu.dot_dimension_numbers<[1], [0], [0], [1], [0, 0, 1, 1], [], []>} : vector<8x8xbf16>, vector<8x1024xbf16>, vector<8x1024xf32> -> vector<8x1024xf32>
    %77 = arith.addf %71, %76 : vector<8x1024xf32>
    %78 = vector.extract_strided_slice %23 {offsets = [72, 0], sizes = [8, 8], strides = [1, 1]} : vector<216x8xf32> to vector<8x8xf32>
    %79 = arith.truncf %78 : vector<8x8xf32> to vector<8x8xbf16>
    %c11_i32 = arith.constant 11 : i32
    %80 = tpu.dynamic_rotate %1 by %c11_i32 dim 1 : vector<8x1024xf32>, i32 -> vector<8x1024xf32>
    %81 = arith.truncf %80 : vector<8x1024xf32> to vector<8x1024xbf16>
    %cst_22 = arith.constant dense<0.000000e+00> : vector<8x1024xf32>
    %82 = tpu.matmul %79, %81, %cst_22 {dimension_numbers = #tpu.dot_dimension_numbers<[1], [0], [0], [1], [0, 0, 1, 1], [], []>} : vector<8x8xbf16>, vector<8x1024xbf16>, vector<8x1024xf32> -> vector<8x1024xf32>
    %83 = arith.addf %77, %82 : vector<8x1024xf32>
    %84 = vector.extract_strided_slice %23 {offsets = [80, 0], sizes = [8, 8], strides = [1, 1]} : vector<216x8xf32> to vector<8x8xf32>
    %85 = arith.truncf %84 : vector<8x8xf32> to vector<8x8xbf16>
    %c10_i32 = arith.constant 10 : i32
    %86 = tpu.dynamic_rotate %1 by %c10_i32 dim 1 : vector<8x1024xf32>, i32 -> vector<8x1024xf32>
    %87 = arith.truncf %86 : vector<8x1024xf32> to vector<8x1024xbf16>
    %cst_23 = arith.constant dense<0.000000e+00> : vector<8x1024xf32>
    %88 = tpu.matmul %85, %87, %cst_23 {dimension_numbers = #tpu.dot_dimension_numbers<[1], [0], [0], [1], [0, 0, 1, 1], [], []>} : vector<8x8xbf16>, vector<8x1024xbf16>, vector<8x1024xf32> -> vector<8x1024xf32>
    %89 = arith.addf %83, %88 : vector<8x1024xf32>
    %90 = vector.extract_strided_slice %23 {offsets = [88, 0], sizes = [8, 8], strides = [1, 1]} : vector<216x8xf32> to vector<8x8xf32>
    %91 = arith.truncf %90 : vector<8x8xf32> to vector<8x8xbf16>
    %c9_i32 = arith.constant 9 : i32
    %92 = tpu.dynamic_rotate %1 by %c9_i32 dim 1 : vector<8x1024xf32>, i32 -> vector<8x1024xf32>
    %93 = arith.truncf %92 : vector<8x1024xf32> to vector<8x1024xbf16>
    %cst_24 = arith.constant dense<0.000000e+00> : vector<8x1024xf32>
    %94 = tpu.matmul %91, %93, %cst_24 {dimension_numbers = #tpu.dot_dimension_numbers<[1], [0], [0], [1], [0, 0, 1, 1], [], []>} : vector<8x8xbf16>, vector<8x1024xbf16>, vector<8x1024xf32> -> vector<8x1024xf32>
    %95 = arith.addf %89, %94 : vector<8x1024xf32>
    %96 = vector.extract_strided_slice %23 {offsets = [96, 0], sizes = [8, 8], strides = [1, 1]} : vector<216x8xf32> to vector<8x8xf32>
    %97 = arith.truncf %96 : vector<8x8xf32> to vector<8x8xbf16>
    %c1_i32 = arith.constant 1 : i32
    %98 = tpu.dynamic_rotate %1 by %c1_i32 dim 1 : vector<8x1024xf32>, i32 -> vector<8x1024xf32>
    %99 = arith.truncf %98 : vector<8x1024xf32> to vector<8x1024xbf16>
    %cst_25 = arith.constant dense<0.000000e+00> : vector<8x1024xf32>
    %100 = tpu.matmul %97, %99, %cst_25 {dimension_numbers = #tpu.dot_dimension_numbers<[1], [0], [0], [1], [0, 0, 1, 1], [], []>} : vector<8x8xbf16>, vector<8x1024xbf16>, vector<8x1024xf32> -> vector<8x1024xf32>
    %101 = arith.addf %95, %100 : vector<8x1024xf32>
    %102 = vector.extract_strided_slice %23 {offsets = [104, 0], sizes = [8, 8], strides = [1, 1]} : vector<216x8xf32> to vector<8x8xf32>
    %103 = arith.truncf %102 : vector<8x8xf32> to vector<8x8xbf16>
    %104 = arith.truncf %1 : vector<8x1024xf32> to vector<8x1024xbf16>
    %cst_26 = arith.constant dense<0.000000e+00> : vector<8x1024xf32>
    %105 = tpu.matmul %103, %104, %cst_26 {dimension_numbers = #tpu.dot_dimension_numbers<[1], [0], [0], [1], [0, 0, 1, 1], [], []>} : vector<8x8xbf16>, vector<8x1024xbf16>, vector<8x1024xf32> -> vector<8x1024xf32>
    %106 = arith.addf %101, %105 : vector<8x1024xf32>
    %107 = vector.extract_strided_slice %23 {offsets = [112, 0], sizes = [8, 8], strides = [1, 1]} : vector<216x8xf32> to vector<8x8xf32>
    %108 = arith.truncf %107 : vector<8x8xf32> to vector<8x8xbf16>
    %c1023_i32 = arith.constant 1023 : i32
    %109 = tpu.dynamic_rotate %1 by %c1023_i32 dim 1 : vector<8x1024xf32>, i32 -> vector<8x1024xf32>
    %110 = arith.truncf %109 : vector<8x1024xf32> to vector<8x1024xbf16>
    %cst_27 = arith.constant dense<0.000000e+00> : vector<8x1024xf32>
    %111 = tpu.matmul %108, %110, %cst_27 {dimension_numbers = #tpu.dot_dimension_numbers<[1], [0], [0], [1], [0, 0, 1, 1], [], []>} : vector<8x8xbf16>, vector<8x1024xbf16>, vector<8x1024xf32> -> vector<8x1024xf32>
    %112 = arith.addf %106, %111 : vector<8x1024xf32>
    %113 = vector.extract_strided_slice %23 {offsets = [120, 0], sizes = [8, 8], strides = [1, 1]} : vector<216x8xf32> to vector<8x8xf32>
    %114 = arith.truncf %113 : vector<8x8xf32> to vector<8x8xbf16>
    %c1015_i32 = arith.constant 1015 : i32
    %115 = tpu.dynamic_rotate %1 by %c1015_i32 dim 1 : vector<8x1024xf32>, i32 -> vector<8x1024xf32>
    %116 = arith.truncf %115 : vector<8x1024xf32> to vector<8x1024xbf16>
    %cst_28 = arith.constant dense<0.000000e+00> : vector<8x1024xf32>
    %117 = tpu.matmul %114, %116, %cst_28 {dimension_numbers = #tpu.dot_dimension_numbers<[1], [0], [0], [1], [0, 0, 1, 1], [], []>} : vector<8x8xbf16>, vector<8x1024xbf16>, vector<8x1024xf32> -> vector<8x1024xf32>
    %118 = arith.addf %112, %117 : vector<8x1024xf32>
    %119 = vector.extract_strided_slice %23 {offsets = [128, 0], sizes = [8, 8], strides = [1, 1]} : vector<216x8xf32> to vector<8x8xf32>
    %120 = arith.truncf %119 : vector<8x8xf32> to vector<8x8xbf16>
    %c1014_i32 = arith.constant 1014 : i32
    %121 = tpu.dynamic_rotate %1 by %c1014_i32 dim 1 : vector<8x1024xf32>, i32 -> vector<8x1024xf32>
    %122 = arith.truncf %121 : vector<8x1024xf32> to vector<8x1024xbf16>
    %cst_29 = arith.constant dense<0.000000e+00> : vector<8x1024xf32>
    %123 = tpu.matmul %120, %122, %cst_29 {dimension_numbers = #tpu.dot_dimension_numbers<[1], [0], [0], [1], [0, 0, 1, 1], [], []>} : vector<8x8xbf16>, vector<8x1024xbf16>, vector<8x1024xf32> -> vector<8x1024xf32>
    %124 = arith.addf %118, %123 : vector<8x1024xf32>
    %125 = vector.extract_strided_slice %23 {offsets = [136, 0], sizes = [8, 8], strides = [1, 1]} : vector<216x8xf32> to vector<8x8xf32>
    %126 = arith.truncf %125 : vector<8x8xf32> to vector<8x8xbf16>
    %c1013_i32 = arith.constant 1013 : i32
    %127 = tpu.dynamic_rotate %1 by %c1013_i32 dim 1 : vector<8x1024xf32>, i32 -> vector<8x1024xf32>
    %128 = arith.truncf %127 : vector<8x1024xf32> to vector<8x1024xbf16>
    %cst_30 = arith.constant dense<0.000000e+00> : vector<8x1024xf32>
    %129 = tpu.matmul %126, %128, %cst_30 {dimension_numbers = #tpu.dot_dimension_numbers<[1], [0], [0], [1], [0, 0, 1, 1], [], []>} : vector<8x8xbf16>, vector<8x1024xbf16>, vector<8x1024xf32> -> vector<8x1024xf32>
    %130 = arith.addf %124, %129 : vector<8x1024xf32>
    %131 = vector.extract_strided_slice %23 {offsets = [144, 0], sizes = [8, 8], strides = [1, 1]} : vector<216x8xf32> to vector<8x8xf32>
    %132 = arith.truncf %131 : vector<8x8xf32> to vector<8x8xbf16>
    %c935_i32 = arith.constant 935 : i32
    %133 = tpu.dynamic_rotate %1 by %c935_i32 dim 1 : vector<8x1024xf32>, i32 -> vector<8x1024xf32>
    %134 = arith.truncf %133 : vector<8x1024xf32> to vector<8x1024xbf16>
    %cst_31 = arith.constant dense<0.000000e+00> : vector<8x1024xf32>
    %135 = tpu.matmul %132, %134, %cst_31 {dimension_numbers = #tpu.dot_dimension_numbers<[1], [0], [0], [1], [0, 0, 1, 1], [], []>} : vector<8x8xbf16>, vector<8x1024xbf16>, vector<8x1024xf32> -> vector<8x1024xf32>
    %136 = arith.addf %130, %135 : vector<8x1024xf32>
    %137 = vector.extract_strided_slice %23 {offsets = [152, 0], sizes = [8, 8], strides = [1, 1]} : vector<216x8xf32> to vector<8x8xf32>
    %138 = arith.truncf %137 : vector<8x8xf32> to vector<8x8xbf16>
    %c934_i32 = arith.constant 934 : i32
    %139 = tpu.dynamic_rotate %1 by %c934_i32 dim 1 : vector<8x1024xf32>, i32 -> vector<8x1024xf32>
    %140 = arith.truncf %139 : vector<8x1024xf32> to vector<8x1024xbf16>
    %cst_32 = arith.constant dense<0.000000e+00> : vector<8x1024xf32>
    %141 = tpu.matmul %138, %140, %cst_32 {dimension_numbers = #tpu.dot_dimension_numbers<[1], [0], [0], [1], [0, 0, 1, 1], [], []>} : vector<8x8xbf16>, vector<8x1024xbf16>, vector<8x1024xf32> -> vector<8x1024xf32>
    %142 = arith.addf %136, %141 : vector<8x1024xf32>
    %143 = vector.extract_strided_slice %23 {offsets = [160, 0], sizes = [8, 8], strides = [1, 1]} : vector<216x8xf32> to vector<8x8xf32>
    %144 = arith.truncf %143 : vector<8x8xf32> to vector<8x8xbf16>
    %c933_i32 = arith.constant 933 : i32
    %145 = tpu.dynamic_rotate %1 by %c933_i32 dim 1 : vector<8x1024xf32>, i32 -> vector<8x1024xf32>
    %146 = arith.truncf %145 : vector<8x1024xf32> to vector<8x1024xbf16>
    %cst_33 = arith.constant dense<0.000000e+00> : vector<8x1024xf32>
    %147 = tpu.matmul %144, %146, %cst_33 {dimension_numbers = #tpu.dot_dimension_numbers<[1], [0], [0], [1], [0, 0, 1, 1], [], []>} : vector<8x8xbf16>, vector<8x1024xbf16>, vector<8x1024xf32> -> vector<8x1024xf32>
    %148 = arith.addf %142, %147 : vector<8x1024xf32>
    %149 = vector.extract_strided_slice %23 {offsets = [168, 0], sizes = [8, 8], strides = [1, 1]} : vector<216x8xf32> to vector<8x8xf32>
    %150 = arith.truncf %149 : vector<8x8xf32> to vector<8x8xbf16>
    %c925_i32 = arith.constant 925 : i32
    %151 = tpu.dynamic_rotate %1 by %c925_i32 dim 1 : vector<8x1024xf32>, i32 -> vector<8x1024xf32>
    %152 = arith.truncf %151 : vector<8x1024xf32> to vector<8x1024xbf16>
    %cst_34 = arith.constant dense<0.000000e+00> : vector<8x1024xf32>
    %153 = tpu.matmul %150, %152, %cst_34 {dimension_numbers = #tpu.dot_dimension_numbers<[1], [0], [0], [1], [0, 0, 1, 1], [], []>} : vector<8x8xbf16>, vector<8x1024xbf16>, vector<8x1024xf32> -> vector<8x1024xf32>
    %154 = arith.addf %148, %153 : vector<8x1024xf32>
    %155 = vector.extract_strided_slice %23 {offsets = [176, 0], sizes = [8, 8], strides = [1, 1]} : vector<216x8xf32> to vector<8x8xf32>
    %156 = arith.truncf %155 : vector<8x8xf32> to vector<8x8xbf16>
    %c924_i32 = arith.constant 924 : i32
    %157 = tpu.dynamic_rotate %1 by %c924_i32 dim 1 : vector<8x1024xf32>, i32 -> vector<8x1024xf32>
    %158 = arith.truncf %157 : vector<8x1024xf32> to vector<8x1024xbf16>
    %cst_35 = arith.constant dense<0.000000e+00> : vector<8x1024xf32>
    %159 = tpu.matmul %156, %158, %cst_35 {dimension_numbers = #tpu.dot_dimension_numbers<[1], [0], [0], [1], [0, 0, 1, 1], [], []>} : vector<8x8xbf16>, vector<8x1024xbf16>, vector<8x1024xf32> -> vector<8x1024xf32>
    %160 = arith.addf %154, %159 : vector<8x1024xf32>
    %161 = vector.extract_strided_slice %23 {offsets = [184, 0], sizes = [8, 8], strides = [1, 1]} : vector<216x8xf32> to vector<8x8xf32>
    %162 = arith.truncf %161 : vector<8x8xf32> to vector<8x8xbf16>
    %c923_i32 = arith.constant 923 : i32
    %163 = tpu.dynamic_rotate %1 by %c923_i32 dim 1 : vector<8x1024xf32>, i32 -> vector<8x1024xf32>
    %164 = arith.truncf %163 : vector<8x1024xf32> to vector<8x1024xbf16>
    %cst_36 = arith.constant dense<0.000000e+00> : vector<8x1024xf32>
    %165 = tpu.matmul %162, %164, %cst_36 {dimension_numbers = #tpu.dot_dimension_numbers<[1], [0], [0], [1], [0, 0, 1, 1], [], []>} : vector<8x8xbf16>, vector<8x1024xbf16>, vector<8x1024xf32> -> vector<8x1024xf32>
    %166 = arith.addf %160, %165 : vector<8x1024xf32>
    %167 = vector.extract_strided_slice %23 {offsets = [192, 0], sizes = [8, 8], strides = [1, 1]} : vector<216x8xf32> to vector<8x8xf32>
    %168 = arith.truncf %167 : vector<8x8xf32> to vector<8x8xbf16>
    %c915_i32 = arith.constant 915 : i32
    %169 = tpu.dynamic_rotate %1 by %c915_i32 dim 1 : vector<8x1024xf32>, i32 -> vector<8x1024xf32>
    %170 = arith.truncf %169 : vector<8x1024xf32> to vector<8x1024xbf16>
    %cst_37 = arith.constant dense<0.000000e+00> : vector<8x1024xf32>
    %171 = tpu.matmul %168, %170, %cst_37 {dimension_numbers = #tpu.dot_dimension_numbers<[1], [0], [0], [1], [0, 0, 1, 1], [], []>} : vector<8x8xbf16>, vector<8x1024xbf16>, vector<8x1024xf32> -> vector<8x1024xf32>
    %172 = arith.addf %166, %171 : vector<8x1024xf32>
    %173 = vector.extract_strided_slice %23 {offsets = [200, 0], sizes = [8, 8], strides = [1, 1]} : vector<216x8xf32> to vector<8x8xf32>
    %174 = arith.truncf %173 : vector<8x8xf32> to vector<8x8xbf16>
    %c914_i32 = arith.constant 914 : i32
    %175 = tpu.dynamic_rotate %1 by %c914_i32 dim 1 : vector<8x1024xf32>, i32 -> vector<8x1024xf32>
    %176 = arith.truncf %175 : vector<8x1024xf32> to vector<8x1024xbf16>
    %cst_38 = arith.constant dense<0.000000e+00> : vector<8x1024xf32>
    %177 = tpu.matmul %174, %176, %cst_38 {dimension_numbers = #tpu.dot_dimension_numbers<[1], [0], [0], [1], [0, 0, 1, 1], [], []>} : vector<8x8xbf16>, vector<8x1024xbf16>, vector<8x1024xf32> -> vector<8x1024xf32>
    %178 = arith.addf %172, %177 : vector<8x1024xf32>
    %179 = vector.extract_strided_slice %23 {offsets = [208, 0], sizes = [8, 8], strides = [1, 1]} : vector<216x8xf32> to vector<8x8xf32>
    %180 = arith.truncf %179 : vector<8x8xf32> to vector<8x8xbf16>
    %c913_i32 = arith.constant 913 : i32
    %181 = tpu.dynamic_rotate %1 by %c913_i32 dim 1 : vector<8x1024xf32>, i32 -> vector<8x1024xf32>
    %182 = arith.truncf %181 : vector<8x1024xf32> to vector<8x1024xbf16>
    %cst_39 = arith.constant dense<0.000000e+00> : vector<8x1024xf32>
    %183 = tpu.matmul %180, %182, %cst_39 {dimension_numbers = #tpu.dot_dimension_numbers<[1], [0], [0], [1], [0, 0, 1, 1], [], []>} : vector<8x8xbf16>, vector<8x1024xbf16>, vector<8x1024xf32> -> vector<8x1024xf32>
    %184 = arith.addf %178, %183 : vector<8x1024xf32>
    %185 = vector.broadcast %3 : vector<1x1024xf32> to vector<8x1024xf32>
    %186 = arith.mulf %184, %185 : vector<8x1024xf32>
    %cst_40 = arith.constant dense<0.000000e+00> : vector<8xf32>
    %187 = vector.multi_reduction <add>, %186, %cst_40 [1] : vector<8x1024xf32> to vector<8xf32>
    %188 = vector.shape_cast %187 : vector<8xf32> to vector<8x1xf32>
    %cst_41 = arith.constant 0.001953125 : f32
    %189 = vector.broadcast %cst_41 : f32 to vector<8x1xf32>
    %190 = arith.mulf %188, %189 : vector<8x1xf32>
    %191 = arith.mulf %186, %184 : vector<8x1024xf32>
    %cst_42 = arith.constant dense<0.000000e+00> : vector<8xf32>
    %192 = vector.multi_reduction <add>, %191, %cst_42 [1] : vector<8x1024xf32> to vector<8xf32>
    %193 = vector.shape_cast %192 : vector<8xf32> to vector<8x1xf32>
    %cst_43 = arith.constant 0.001953125 : f32
    %194 = vector.broadcast %cst_43 : f32 to vector<8x1xf32>
    %195 = arith.mulf %193, %194 : vector<8x1xf32>
    %196 = arith.mulf %190, %190 : vector<8x1xf32>
    %197 = arith.subf %195, %196 : vector<8x1xf32>
    %198 = vector.broadcast %190 : vector<8x1xf32> to vector<8x1024xf32>
    %199 = arith.subf %184, %198 : vector<8x1024xf32>
    %cst_44 = arith.constant 9.99999974E-6 : f32
    %200 = vector.broadcast %cst_44 : f32 to vector<8x1xf32>
    %201 = arith.addf %197, %200 : vector<8x1xf32>
    %202 = math.rsqrt %201 : vector<8x1xf32>
    %203 = vector.broadcast %202 : vector<8x1xf32> to vector<8x1024xf32>
    %204 = arith.mulf %199, %203 : vector<8x1024xf32>
    %cst_45 = arith.constant 0.000000e+00 : f32
    %205 = vector.broadcast %cst_45 : f32 to vector<8x1024xf32>
    %206 = arith.maximumf %204, %205 : vector<8x1024xf32>
    %c1022_i32 = arith.constant 1022 : i32
    %207 = tpu.dynamic_rotate %206 by %c1022_i32 dim 1 : vector<8x1024xf32>, i32 -> vector<8x1024xf32>
    %c2_i32 = arith.constant 2 : i32
    %208 = tpu.dynamic_rotate %206 by %c2_i32 dim 1 : vector<8x1024xf32>, i32 -> vector<8x1024xf32>
    %209 = vector.shape_cast %9 : vector<1x1024xi1> to vector<1x1024xi1>
    %210 = vector.broadcast %209 : vector<1x1024xi1> to vector<8x1024xi1>
    %211 = arith.select %210, %208, %206 : vector<8x1024xi1>, vector<8x1024xf32>
    %212 = vector.shape_cast %6 : vector<1x1024xi1> to vector<1x1024xi1>
    %213 = vector.broadcast %212 : vector<1x1024xi1> to vector<8x1024xi1>
    %214 = arith.select %213, %207, %211 : vector<8x1024xi1>, vector<8x1024xf32>
    %c1004_i32 = arith.constant 1004 : i32
    %215 = tpu.dynamic_rotate %214 by %c1004_i32 dim 1 : vector<8x1024xf32>, i32 -> vector<8x1024xf32>
    %c20_i32 = arith.constant 20 : i32
    %216 = tpu.dynamic_rotate %214 by %c20_i32 dim 1 : vector<8x1024xf32>, i32 -> vector<8x1024xf32>
    %217 = vector.shape_cast %15 : vector<1x1024xi1> to vector<1x1024xi1>
    %218 = vector.broadcast %217 : vector<1x1024xi1> to vector<8x1024xi1>
    %219 = arith.select %218, %216, %214 : vector<8x1024xi1>, vector<8x1024xf32>
    %220 = vector.shape_cast %12 : vector<1x1024xi1> to vector<1x1024xi1>
    %221 = vector.broadcast %220 : vector<1x1024xi1> to vector<8x1024xi1>
    %222 = arith.select %221, %215, %219 : vector<8x1024xi1>, vector<8x1024xf32>
    %c824_i32 = arith.constant 824 : i32
    %223 = tpu.dynamic_rotate %222 by %c824_i32 dim 1 : vector<8x1024xf32>, i32 -> vector<8x1024xf32>
    %c200_i32 = arith.constant 200 : i32
    %224 = tpu.dynamic_rotate %222 by %c200_i32 dim 1 : vector<8x1024xf32>, i32 -> vector<8x1024xf32>
    %225 = vector.shape_cast %21 : vector<1x1024xi1> to vector<1x1024xi1>
    %226 = vector.broadcast %225 : vector<1x1024xi1> to vector<8x1024xi1>
    %227 = arith.select %226, %224, %222 : vector<8x1024xi1>, vector<8x1024xf32>
    %228 = vector.shape_cast %18 : vector<1x1024xi1> to vector<1x1024xi1>
    %229 = vector.broadcast %228 : vector<1x1024xi1> to vector<8x1024xi1>
    %230 = arith.select %229, %223, %227 : vector<8x1024xi1>, vector<8x1024xf32>
    %231 = vector.extract_strided_slice %24 {offsets = [0, 0], sizes = [8, 8], strides = [1, 1]} : vector<216x8xf32> to vector<8x8xf32>
    %232 = arith.truncf %231 : vector<8x8xf32> to vector<8x8xbf16>
    %c111_i32_46 = arith.constant 111 : i32
    %233 = tpu.dynamic_rotate %230 by %c111_i32_46 dim 1 : vector<8x1024xf32>, i32 -> vector<8x1024xf32>
    %234 = arith.truncf %233 : vector<8x1024xf32> to vector<8x1024xbf16>
    %cst_47 = arith.constant dense<0.000000e+00> : vector<8x1024xf32>
    %235 = tpu.matmul %232, %234, %cst_47 {dimension_numbers = #tpu.dot_dimension_numbers<[1], [0], [0], [1], [0, 0, 1, 1], [], []>} : vector<8x8xbf16>, vector<8x1024xbf16>, vector<8x1024xf32> -> vector<8x1024xf32>
    %236 = vector.extract_strided_slice %24 {offsets = [8, 0], sizes = [8, 8], strides = [1, 1]} : vector<216x8xf32> to vector<8x8xf32>
    %237 = arith.truncf %236 : vector<8x8xf32> to vector<8x8xbf16>
    %c110_i32_48 = arith.constant 110 : i32
    %238 = tpu.dynamic_rotate %230 by %c110_i32_48 dim 1 : vector<8x1024xf32>, i32 -> vector<8x1024xf32>
    %239 = arith.truncf %238 : vector<8x1024xf32> to vector<8x1024xbf16>
    %cst_49 = arith.constant dense<0.000000e+00> : vector<8x1024xf32>
    %240 = tpu.matmul %237, %239, %cst_49 {dimension_numbers = #tpu.dot_dimension_numbers<[1], [0], [0], [1], [0, 0, 1, 1], [], []>} : vector<8x8xbf16>, vector<8x1024xbf16>, vector<8x1024xf32> -> vector<8x1024xf32>
    %241 = arith.addf %235, %240 : vector<8x1024xf32>
    %242 = vector.extract_strided_slice %24 {offsets = [16, 0], sizes = [8, 8], strides = [1, 1]} : vector<216x8xf32> to vector<8x8xf32>
    %243 = arith.truncf %242 : vector<8x8xf32> to vector<8x8xbf16>
    %c109_i32_50 = arith.constant 109 : i32
    %244 = tpu.dynamic_rotate %230 by %c109_i32_50 dim 1 : vector<8x1024xf32>, i32 -> vector<8x1024xf32>
    %245 = arith.truncf %244 : vector<8x1024xf32> to vector<8x1024xbf16>
    %cst_51 = arith.constant dense<0.000000e+00> : vector<8x1024xf32>
    %246 = tpu.matmul %243, %245, %cst_51 {dimension_numbers = #tpu.dot_dimension_numbers<[1], [0], [0], [1], [0, 0, 1, 1], [], []>} : vector<8x8xbf16>, vector<8x1024xbf16>, vector<8x1024xf32> -> vector<8x1024xf32>
    %247 = arith.addf %241, %246 : vector<8x1024xf32>
    %248 = vector.extract_strided_slice %24 {offsets = [24, 0], sizes = [8, 8], strides = [1, 1]} : vector<216x8xf32> to vector<8x8xf32>
    %249 = arith.truncf %248 : vector<8x8xf32> to vector<8x8xbf16>
    %c101_i32_52 = arith.constant 101 : i32
    %250 = tpu.dynamic_rotate %230 by %c101_i32_52 dim 1 : vector<8x1024xf32>, i32 -> vector<8x1024xf32>
    %251 = arith.truncf %250 : vector<8x1024xf32> to vector<8x1024xbf16>
    %cst_53 = arith.constant dense<0.000000e+00> : vector<8x1024xf32>
    %252 = tpu.matmul %249, %251, %cst_53 {dimension_numbers = #tpu.dot_dimension_numbers<[1], [0], [0], [1], [0, 0, 1, 1], [], []>} : vector<8x8xbf16>, vector<8x1024xbf16>, vector<8x1024xf32> -> vector<8x1024xf32>
    %253 = arith.addf %247, %252 : vector<8x1024xf32>
    %254 = vector.extract_strided_slice %24 {offsets = [32, 0], sizes = [8, 8], strides = [1, 1]} : vector<216x8xf32> to vector<8x8xf32>
    %255 = arith.truncf %254 : vector<8x8xf32> to vector<8x8xbf16>
    %c100_i32_54 = arith.constant 100 : i32
    %256 = tpu.dynamic_rotate %230 by %c100_i32_54 dim 1 : vector<8x1024xf32>, i32 -> vector<8x1024xf32>
    %257 = arith.truncf %256 : vector<8x1024xf32> to vector<8x1024xbf16>
    %cst_55 = arith.constant dense<0.000000e+00> : vector<8x1024xf32>
    %258 = tpu.matmul %255, %257, %cst_55 {dimension_numbers = #tpu.dot_dimension_numbers<[1], [0], [0], [1], [0, 0, 1, 1], [], []>} : vector<8x8xbf16>, vector<8x1024xbf16>, vector<8x1024xf32> -> vector<8x1024xf32>
    %259 = arith.addf %253, %258 : vector<8x1024xf32>
    %260 = vector.extract_strided_slice %24 {offsets = [40, 0], sizes = [8, 8], strides = [1, 1]} : vector<216x8xf32> to vector<8x8xf32>
    %261 = arith.truncf %260 : vector<8x8xf32> to vector<8x8xbf16>
    %c99_i32_56 = arith.constant 99 : i32
    %262 = tpu.dynamic_rotate %230 by %c99_i32_56 dim 1 : vector<8x1024xf32>, i32 -> vector<8x1024xf32>
    %263 = arith.truncf %262 : vector<8x1024xf32> to vector<8x1024xbf16>
    %cst_57 = arith.constant dense<0.000000e+00> : vector<8x1024xf32>
    %264 = tpu.matmul %261, %263, %cst_57 {dimension_numbers = #tpu.dot_dimension_numbers<[1], [0], [0], [1], [0, 0, 1, 1], [], []>} : vector<8x8xbf16>, vector<8x1024xbf16>, vector<8x1024xf32> -> vector<8x1024xf32>
    %265 = arith.addf %259, %264 : vector<8x1024xf32>
    %266 = vector.extract_strided_slice %24 {offsets = [48, 0], sizes = [8, 8], strides = [1, 1]} : vector<216x8xf32> to vector<8x8xf32>
    %267 = arith.truncf %266 : vector<8x8xf32> to vector<8x8xbf16>
    %c91_i32_58 = arith.constant 91 : i32
    %268 = tpu.dynamic_rotate %230 by %c91_i32_58 dim 1 : vector<8x1024xf32>, i32 -> vector<8x1024xf32>
    %269 = arith.truncf %268 : vector<8x1024xf32> to vector<8x1024xbf16>
    %cst_59 = arith.constant dense<0.000000e+00> : vector<8x1024xf32>
    %270 = tpu.matmul %267, %269, %cst_59 {dimension_numbers = #tpu.dot_dimension_numbers<[1], [0], [0], [1], [0, 0, 1, 1], [], []>} : vector<8x8xbf16>, vector<8x1024xbf16>, vector<8x1024xf32> -> vector<8x1024xf32>
    %271 = arith.addf %265, %270 : vector<8x1024xf32>
    %272 = vector.extract_strided_slice %24 {offsets = [56, 0], sizes = [8, 8], strides = [1, 1]} : vector<216x8xf32> to vector<8x8xf32>
    %273 = arith.truncf %272 : vector<8x8xf32> to vector<8x8xbf16>
    %c90_i32_60 = arith.constant 90 : i32
    %274 = tpu.dynamic_rotate %230 by %c90_i32_60 dim 1 : vector<8x1024xf32>, i32 -> vector<8x1024xf32>
    %275 = arith.truncf %274 : vector<8x1024xf32> to vector<8x1024xbf16>
    %cst_61 = arith.constant dense<0.000000e+00> : vector<8x1024xf32>
    %276 = tpu.matmul %273, %275, %cst_61 {dimension_numbers = #tpu.dot_dimension_numbers<[1], [0], [0], [1], [0, 0, 1, 1], [], []>} : vector<8x8xbf16>, vector<8x1024xbf16>, vector<8x1024xf32> -> vector<8x1024xf32>
    %277 = arith.addf %271, %276 : vector<8x1024xf32>
    %278 = vector.extract_strided_slice %24 {offsets = [64, 0], sizes = [8, 8], strides = [1, 1]} : vector<216x8xf32> to vector<8x8xf32>
    %279 = arith.truncf %278 : vector<8x8xf32> to vector<8x8xbf16>
    %c89_i32_62 = arith.constant 89 : i32
    %280 = tpu.dynamic_rotate %230 by %c89_i32_62 dim 1 : vector<8x1024xf32>, i32 -> vector<8x1024xf32>
    %281 = arith.truncf %280 : vector<8x1024xf32> to vector<8x1024xbf16>
    %cst_63 = arith.constant dense<0.000000e+00> : vector<8x1024xf32>
    %282 = tpu.matmul %279, %281, %cst_63 {dimension_numbers = #tpu.dot_dimension_numbers<[1], [0], [0], [1], [0, 0, 1, 1], [], []>} : vector<8x8xbf16>, vector<8x1024xbf16>, vector<8x1024xf32> -> vector<8x1024xf32>
    %283 = arith.addf %277, %282 : vector<8x1024xf32>
    %284 = vector.extract_strided_slice %24 {offsets = [72, 0], sizes = [8, 8], strides = [1, 1]} : vector<216x8xf32> to vector<8x8xf32>
    %285 = arith.truncf %284 : vector<8x8xf32> to vector<8x8xbf16>
    %c11_i32_64 = arith.constant 11 : i32
    %286 = tpu.dynamic_rotate %230 by %c11_i32_64 dim 1 : vector<8x1024xf32>, i32 -> vector<8x1024xf32>
    %287 = arith.truncf %286 : vector<8x1024xf32> to vector<8x1024xbf16>
    %cst_65 = arith.constant dense<0.000000e+00> : vector<8x1024xf32>
    %288 = tpu.matmul %285, %287, %cst_65 {dimension_numbers = #tpu.dot_dimension_numbers<[1], [0], [0], [1], [0, 0, 1, 1], [], []>} : vector<8x8xbf16>, vector<8x1024xbf16>, vector<8x1024xf32> -> vector<8x1024xf32>
    %289 = arith.addf %283, %288 : vector<8x1024xf32>
    %290 = vector.extract_strided_slice %24 {offsets = [80, 0], sizes = [8, 8], strides = [1, 1]} : vector<216x8xf32> to vector<8x8xf32>
    %291 = arith.truncf %290 : vector<8x8xf32> to vector<8x8xbf16>
    %c10_i32_66 = arith.constant 10 : i32
    %292 = tpu.dynamic_rotate %230 by %c10_i32_66 dim 1 : vector<8x1024xf32>, i32 -> vector<8x1024xf32>
    %293 = arith.truncf %292 : vector<8x1024xf32> to vector<8x1024xbf16>
    %cst_67 = arith.constant dense<0.000000e+00> : vector<8x1024xf32>
    %294 = tpu.matmul %291, %293, %cst_67 {dimension_numbers = #tpu.dot_dimension_numbers<[1], [0], [0], [1], [0, 0, 1, 1], [], []>} : vector<8x8xbf16>, vector<8x1024xbf16>, vector<8x1024xf32> -> vector<8x1024xf32>
    %295 = arith.addf %289, %294 : vector<8x1024xf32>
    %296 = vector.extract_strided_slice %24 {offsets = [88, 0], sizes = [8, 8], strides = [1, 1]} : vector<216x8xf32> to vector<8x8xf32>
    %297 = arith.truncf %296 : vector<8x8xf32> to vector<8x8xbf16>
    %c9_i32_68 = arith.constant 9 : i32
    %298 = tpu.dynamic_rotate %230 by %c9_i32_68 dim 1 : vector<8x1024xf32>, i32 -> vector<8x1024xf32>
    %299 = arith.truncf %298 : vector<8x1024xf32> to vector<8x1024xbf16>
    %cst_69 = arith.constant dense<0.000000e+00> : vector<8x1024xf32>
    %300 = tpu.matmul %297, %299, %cst_69 {dimension_numbers = #tpu.dot_dimension_numbers<[1], [0], [0], [1], [0, 0, 1, 1], [], []>} : vector<8x8xbf16>, vector<8x1024xbf16>, vector<8x1024xf32> -> vector<8x1024xf32>
    %301 = arith.addf %295, %300 : vector<8x1024xf32>
    %302 = vector.extract_strided_slice %24 {offsets = [96, 0], sizes = [8, 8], strides = [1, 1]} : vector<216x8xf32> to vector<8x8xf32>
    %303 = arith.truncf %302 : vector<8x8xf32> to vector<8x8xbf16>
    %c1_i32_70 = arith.constant 1 : i32
    %304 = tpu.dynamic_rotate %230 by %c1_i32_70 dim 1 : vector<8x1024xf32>, i32 -> vector<8x1024xf32>
    %305 = arith.truncf %304 : vector<8x1024xf32> to vector<8x1024xbf16>
    %cst_71 = arith.constant dense<0.000000e+00> : vector<8x1024xf32>
    %306 = tpu.matmul %303, %305, %cst_71 {dimension_numbers = #tpu.dot_dimension_numbers<[1], [0], [0], [1], [0, 0, 1, 1], [], []>} : vector<8x8xbf16>, vector<8x1024xbf16>, vector<8x1024xf32> -> vector<8x1024xf32>
    %307 = arith.addf %301, %306 : vector<8x1024xf32>
    %308 = vector.extract_strided_slice %24 {offsets = [104, 0], sizes = [8, 8], strides = [1, 1]} : vector<216x8xf32> to vector<8x8xf32>
    %309 = arith.truncf %308 : vector<8x8xf32> to vector<8x8xbf16>
    %310 = arith.truncf %230 : vector<8x1024xf32> to vector<8x1024xbf16>
    %cst_72 = arith.constant dense<0.000000e+00> : vector<8x1024xf32>
    %311 = tpu.matmul %309, %310, %cst_72 {dimension_numbers = #tpu.dot_dimension_numbers<[1], [0], [0], [1], [0, 0, 1, 1], [], []>} : vector<8x8xbf16>, vector<8x1024xbf16>, vector<8x1024xf32> -> vector<8x1024xf32>
    %312 = arith.addf %307, %311 : vector<8x1024xf32>
    %313 = vector.extract_strided_slice %24 {offsets = [112, 0], sizes = [8, 8], strides = [1, 1]} : vector<216x8xf32> to vector<8x8xf32>
    %314 = arith.truncf %313 : vector<8x8xf32> to vector<8x8xbf16>
    %c1023_i32_73 = arith.constant 1023 : i32
    %315 = tpu.dynamic_rotate %230 by %c1023_i32_73 dim 1 : vector<8x1024xf32>, i32 -> vector<8x1024xf32>
    %316 = arith.truncf %315 : vector<8x1024xf32> to vector<8x1024xbf16>
    %cst_74 = arith.constant dense<0.000000e+00> : vector<8x1024xf32>
    %317 = tpu.matmul %314, %316, %cst_74 {dimension_numbers = #tpu.dot_dimension_numbers<[1], [0], [0], [1], [0, 0, 1, 1], [], []>} : vector<8x8xbf16>, vector<8x1024xbf16>, vector<8x1024xf32> -> vector<8x1024xf32>
    %318 = arith.addf %312, %317 : vector<8x1024xf32>
    %319 = vector.extract_strided_slice %24 {offsets = [120, 0], sizes = [8, 8], strides = [1, 1]} : vector<216x8xf32> to vector<8x8xf32>
    %320 = arith.truncf %319 : vector<8x8xf32> to vector<8x8xbf16>
    %c1015_i32_75 = arith.constant 1015 : i32
    %321 = tpu.dynamic_rotate %230 by %c1015_i32_75 dim 1 : vector<8x1024xf32>, i32 -> vector<8x1024xf32>
    %322 = arith.truncf %321 : vector<8x1024xf32> to vector<8x1024xbf16>
    %cst_76 = arith.constant dense<0.000000e+00> : vector<8x1024xf32>
    %323 = tpu.matmul %320, %322, %cst_76 {dimension_numbers = #tpu.dot_dimension_numbers<[1], [0], [0], [1], [0, 0, 1, 1], [], []>} : vector<8x8xbf16>, vector<8x1024xbf16>, vector<8x1024xf32> -> vector<8x1024xf32>
    %324 = arith.addf %318, %323 : vector<8x1024xf32>
    %325 = vector.extract_strided_slice %24 {offsets = [128, 0], sizes = [8, 8], strides = [1, 1]} : vector<216x8xf32> to vector<8x8xf32>
    %326 = arith.truncf %325 : vector<8x8xf32> to vector<8x8xbf16>
    %c1014_i32_77 = arith.constant 1014 : i32
    %327 = tpu.dynamic_rotate %230 by %c1014_i32_77 dim 1 : vector<8x1024xf32>, i32 -> vector<8x1024xf32>
    %328 = arith.truncf %327 : vector<8x1024xf32> to vector<8x1024xbf16>
    %cst_78 = arith.constant dense<0.000000e+00> : vector<8x1024xf32>
    %329 = tpu.matmul %326, %328, %cst_78 {dimension_numbers = #tpu.dot_dimension_numbers<[1], [0], [0], [1], [0, 0, 1, 1], [], []>} : vector<8x8xbf16>, vector<8x1024xbf16>, vector<8x1024xf32> -> vector<8x1024xf32>
    %330 = arith.addf %324, %329 : vector<8x1024xf32>
    %331 = vector.extract_strided_slice %24 {offsets = [136, 0], sizes = [8, 8], strides = [1, 1]} : vector<216x8xf32> to vector<8x8xf32>
    %332 = arith.truncf %331 : vector<8x8xf32> to vector<8x8xbf16>
    %c1013_i32_79 = arith.constant 1013 : i32
    %333 = tpu.dynamic_rotate %230 by %c1013_i32_79 dim 1 : vector<8x1024xf32>, i32 -> vector<8x1024xf32>
    %334 = arith.truncf %333 : vector<8x1024xf32> to vector<8x1024xbf16>
    %cst_80 = arith.constant dense<0.000000e+00> : vector<8x1024xf32>
    %335 = tpu.matmul %332, %334, %cst_80 {dimension_numbers = #tpu.dot_dimension_numbers<[1], [0], [0], [1], [0, 0, 1, 1], [], []>} : vector<8x8xbf16>, vector<8x1024xbf16>, vector<8x1024xf32> -> vector<8x1024xf32>
    %336 = arith.addf %330, %335 : vector<8x1024xf32>
    %337 = vector.extract_strided_slice %24 {offsets = [144, 0], sizes = [8, 8], strides = [1, 1]} : vector<216x8xf32> to vector<8x8xf32>
    %338 = arith.truncf %337 : vector<8x8xf32> to vector<8x8xbf16>
    %c935_i32_81 = arith.constant 935 : i32
    %339 = tpu.dynamic_rotate %230 by %c935_i32_81 dim 1 : vector<8x1024xf32>, i32 -> vector<8x1024xf32>
    %340 = arith.truncf %339 : vector<8x1024xf32> to vector<8x1024xbf16>
    %cst_82 = arith.constant dense<0.000000e+00> : vector<8x1024xf32>
    %341 = tpu.matmul %338, %340, %cst_82 {dimension_numbers = #tpu.dot_dimension_numbers<[1], [0], [0], [1], [0, 0, 1, 1], [], []>} : vector<8x8xbf16>, vector<8x1024xbf16>, vector<8x1024xf32> -> vector<8x1024xf32>
    %342 = arith.addf %336, %341 : vector<8x1024xf32>
    %343 = vector.extract_strided_slice %24 {offsets = [152, 0], sizes = [8, 8], strides = [1, 1]} : vector<216x8xf32> to vector<8x8xf32>
    %344 = arith.truncf %343 : vector<8x8xf32> to vector<8x8xbf16>
    %c934_i32_83 = arith.constant 934 : i32
    %345 = tpu.dynamic_rotate %230 by %c934_i32_83 dim 1 : vector<8x1024xf32>, i32 -> vector<8x1024xf32>
    %346 = arith.truncf %345 : vector<8x1024xf32> to vector<8x1024xbf16>
    %cst_84 = arith.constant dense<0.000000e+00> : vector<8x1024xf32>
    %347 = tpu.matmul %344, %346, %cst_84 {dimension_numbers = #tpu.dot_dimension_numbers<[1], [0], [0], [1], [0, 0, 1, 1], [], []>} : vector<8x8xbf16>, vector<8x1024xbf16>, vector<8x1024xf32> -> vector<8x1024xf32>
    %348 = arith.addf %342, %347 : vector<8x1024xf32>
    %349 = vector.extract_strided_slice %24 {offsets = [160, 0], sizes = [8, 8], strides = [1, 1]} : vector<216x8xf32> to vector<8x8xf32>
    %350 = arith.truncf %349 : vector<8x8xf32> to vector<8x8xbf16>
    %c933_i32_85 = arith.constant 933 : i32
    %351 = tpu.dynamic_rotate %230 by %c933_i32_85 dim 1 : vector<8x1024xf32>, i32 -> vector<8x1024xf32>
    %352 = arith.truncf %351 : vector<8x1024xf32> to vector<8x1024xbf16>
    %cst_86 = arith.constant dense<0.000000e+00> : vector<8x1024xf32>
    %353 = tpu.matmul %350, %352, %cst_86 {dimension_numbers = #tpu.dot_dimension_numbers<[1], [0], [0], [1], [0, 0, 1, 1], [], []>} : vector<8x8xbf16>, vector<8x1024xbf16>, vector<8x1024xf32> -> vector<8x1024xf32>
    %354 = arith.addf %348, %353 : vector<8x1024xf32>
    %355 = vector.extract_strided_slice %24 {offsets = [168, 0], sizes = [8, 8], strides = [1, 1]} : vector<216x8xf32> to vector<8x8xf32>
    %356 = arith.truncf %355 : vector<8x8xf32> to vector<8x8xbf16>
    %c925_i32_87 = arith.constant 925 : i32
    %357 = tpu.dynamic_rotate %230 by %c925_i32_87 dim 1 : vector<8x1024xf32>, i32 -> vector<8x1024xf32>
    %358 = arith.truncf %357 : vector<8x1024xf32> to vector<8x1024xbf16>
    %cst_88 = arith.constant dense<0.000000e+00> : vector<8x1024xf32>
    %359 = tpu.matmul %356, %358, %cst_88 {dimension_numbers = #tpu.dot_dimension_numbers<[1], [0], [0], [1], [0, 0, 1, 1], [], []>} : vector<8x8xbf16>, vector<8x1024xbf16>, vector<8x1024xf32> -> vector<8x1024xf32>
    %360 = arith.addf %354, %359 : vector<8x1024xf32>
    %361 = vector.extract_strided_slice %24 {offsets = [176, 0], sizes = [8, 8], strides = [1, 1]} : vector<216x8xf32> to vector<8x8xf32>
    %362 = arith.truncf %361 : vector<8x8xf32> to vector<8x8xbf16>
    %c924_i32_89 = arith.constant 924 : i32
    %363 = tpu.dynamic_rotate %230 by %c924_i32_89 dim 1 : vector<8x1024xf32>, i32 -> vector<8x1024xf32>
    %364 = arith.truncf %363 : vector<8x1024xf32> to vector<8x1024xbf16>
    %cst_90 = arith.constant dense<0.000000e+00> : vector<8x1024xf32>
    %365 = tpu.matmul %362, %364, %cst_90 {dimension_numbers = #tpu.dot_dimension_numbers<[1], [0], [0], [1], [0, 0, 1, 1], [], []>} : vector<8x8xbf16>, vector<8x1024xbf16>, vector<8x1024xf32> -> vector<8x1024xf32>
    %366 = arith.addf %360, %365 : vector<8x1024xf32>
    %367 = vector.extract_strided_slice %24 {offsets = [184, 0], sizes = [8, 8], strides = [1, 1]} : vector<216x8xf32> to vector<8x8xf32>
    %368 = arith.truncf %367 : vector<8x8xf32> to vector<8x8xbf16>
    %c923_i32_91 = arith.constant 923 : i32
    %369 = tpu.dynamic_rotate %230 by %c923_i32_91 dim 1 : vector<8x1024xf32>, i32 -> vector<8x1024xf32>
    %370 = arith.truncf %369 : vector<8x1024xf32> to vector<8x1024xbf16>
    %cst_92 = arith.constant dense<0.000000e+00> : vector<8x1024xf32>
    %371 = tpu.matmul %368, %370, %cst_92 {dimension_numbers = #tpu.dot_dimension_numbers<[1], [0], [0], [1], [0, 0, 1, 1], [], []>} : vector<8x8xbf16>, vector<8x1024xbf16>, vector<8x1024xf32> -> vector<8x1024xf32>
    %372 = arith.addf %366, %371 : vector<8x1024xf32>
    %373 = vector.extract_strided_slice %24 {offsets = [192, 0], sizes = [8, 8], strides = [1, 1]} : vector<216x8xf32> to vector<8x8xf32>
    %374 = arith.truncf %373 : vector<8x8xf32> to vector<8x8xbf16>
    %c915_i32_93 = arith.constant 915 : i32
    %375 = tpu.dynamic_rotate %230 by %c915_i32_93 dim 1 : vector<8x1024xf32>, i32 -> vector<8x1024xf32>
    %376 = arith.truncf %375 : vector<8x1024xf32> to vector<8x1024xbf16>
    %cst_94 = arith.constant dense<0.000000e+00> : vector<8x1024xf32>
    %377 = tpu.matmul %374, %376, %cst_94 {dimension_numbers = #tpu.dot_dimension_numbers<[1], [0], [0], [1], [0, 0, 1, 1], [], []>} : vector<8x8xbf16>, vector<8x1024xbf16>, vector<8x1024xf32> -> vector<8x1024xf32>
    %378 = arith.addf %372, %377 : vector<8x1024xf32>
    %379 = vector.extract_strided_slice %24 {offsets = [200, 0], sizes = [8, 8], strides = [1, 1]} : vector<216x8xf32> to vector<8x8xf32>
    %380 = arith.truncf %379 : vector<8x8xf32> to vector<8x8xbf16>
    %c914_i32_95 = arith.constant 914 : i32
    %381 = tpu.dynamic_rotate %230 by %c914_i32_95 dim 1 : vector<8x1024xf32>, i32 -> vector<8x1024xf32>
    %382 = arith.truncf %381 : vector<8x1024xf32> to vector<8x1024xbf16>
    %cst_96 = arith.constant dense<0.000000e+00> : vector<8x1024xf32>
    %383 = tpu.matmul %380, %382, %cst_96 {dimension_numbers = #tpu.dot_dimension_numbers<[1], [0], [0], [1], [0, 0, 1, 1], [], []>} : vector<8x8xbf16>, vector<8x1024xbf16>, vector<8x1024xf32> -> vector<8x1024xf32>
    %384 = arith.addf %378, %383 : vector<8x1024xf32>
    %385 = vector.extract_strided_slice %24 {offsets = [208, 0], sizes = [8, 8], strides = [1, 1]} : vector<216x8xf32> to vector<8x8xf32>
    %386 = arith.truncf %385 : vector<8x8xf32> to vector<8x8xbf16>
    %c913_i32_97 = arith.constant 913 : i32
    %387 = tpu.dynamic_rotate %230 by %c913_i32_97 dim 1 : vector<8x1024xf32>, i32 -> vector<8x1024xf32>
    %388 = arith.truncf %387 : vector<8x1024xf32> to vector<8x1024xbf16>
    %cst_98 = arith.constant dense<0.000000e+00> : vector<8x1024xf32>
    %389 = tpu.matmul %386, %388, %cst_98 {dimension_numbers = #tpu.dot_dimension_numbers<[1], [0], [0], [1], [0, 0, 1, 1], [], []>} : vector<8x8xbf16>, vector<8x1024xbf16>, vector<8x1024xf32> -> vector<8x1024xf32>
    %390 = arith.addf %384, %389 : vector<8x1024xf32>
    %391 = vector.broadcast %3 : vector<1x1024xf32> to vector<8x1024xf32>
    %392 = arith.mulf %390, %391 : vector<8x1024xf32>
    %cst_99 = arith.constant dense<0.000000e+00> : vector<8xf32>
    %393 = vector.multi_reduction <add>, %392, %cst_99 [1] : vector<8x1024xf32> to vector<8xf32>
    %394 = vector.shape_cast %393 : vector<8xf32> to vector<8x1xf32>
    %cst_100 = arith.constant 0.001953125 : f32
    %395 = vector.broadcast %cst_100 : f32 to vector<8x1xf32>
    %396 = arith.mulf %394, %395 : vector<8x1xf32>
    %397 = arith.mulf %392, %390 : vector<8x1024xf32>
    %cst_101 = arith.constant dense<0.000000e+00> : vector<8xf32>
    %398 = vector.multi_reduction <add>, %397, %cst_101 [1] : vector<8x1024xf32> to vector<8xf32>
    %399 = vector.shape_cast %398 : vector<8xf32> to vector<8x1xf32>
    %cst_102 = arith.constant 0.001953125 : f32
    %400 = vector.broadcast %cst_102 : f32 to vector<8x1xf32>
    %401 = arith.mulf %399, %400 : vector<8x1xf32>
    %402 = arith.mulf %396, %396 : vector<8x1xf32>
    %403 = arith.subf %401, %402 : vector<8x1xf32>
    %404 = vector.broadcast %396 : vector<8x1xf32> to vector<8x1024xf32>
    %405 = arith.subf %390, %404 : vector<8x1024xf32>
    %cst_103 = arith.constant 9.99999974E-6 : f32
    %406 = vector.broadcast %cst_103 : f32 to vector<8x1xf32>
    %407 = arith.addf %403, %406 : vector<8x1xf32>
    %408 = math.rsqrt %407 : vector<8x1xf32>
    %409 = vector.broadcast %408 : vector<8x1xf32> to vector<8x1024xf32>
    %410 = arith.mulf %405, %409 : vector<8x1024xf32>
    %411 = arith.addf %1, %410 : vector<8x1024xf32>
    %c1022_i32_104 = arith.constant 1022 : i32
    %412 = tpu.dynamic_rotate %411 by %c1022_i32_104 dim 1 : vector<8x1024xf32>, i32 -> vector<8x1024xf32>
    %c2_i32_105 = arith.constant 2 : i32
    %413 = tpu.dynamic_rotate %411 by %c2_i32_105 dim 1 : vector<8x1024xf32>, i32 -> vector<8x1024xf32>
    %414 = vector.shape_cast %9 : vector<1x1024xi1> to vector<1x1024xi1>
    %415 = vector.broadcast %414 : vector<1x1024xi1> to vector<8x1024xi1>
    %416 = arith.select %415, %413, %411 : vector<8x1024xi1>, vector<8x1024xf32>
    %417 = vector.shape_cast %6 : vector<1x1024xi1> to vector<1x1024xi1>
    %418 = vector.broadcast %417 : vector<1x1024xi1> to vector<8x1024xi1>
    %419 = arith.select %418, %412, %416 : vector<8x1024xi1>, vector<8x1024xf32>
    %c1004_i32_106 = arith.constant 1004 : i32
    %420 = tpu.dynamic_rotate %419 by %c1004_i32_106 dim 1 : vector<8x1024xf32>, i32 -> vector<8x1024xf32>
    %c20_i32_107 = arith.constant 20 : i32
    %421 = tpu.dynamic_rotate %419 by %c20_i32_107 dim 1 : vector<8x1024xf32>, i32 -> vector<8x1024xf32>
    %422 = vector.shape_cast %15 : vector<1x1024xi1> to vector<1x1024xi1>
    %423 = vector.broadcast %422 : vector<1x1024xi1> to vector<8x1024xi1>
    %424 = arith.select %423, %421, %419 : vector<8x1024xi1>, vector<8x1024xf32>
    %425 = vector.shape_cast %12 : vector<1x1024xi1> to vector<1x1024xi1>
    %426 = vector.broadcast %425 : vector<1x1024xi1> to vector<8x1024xi1>
    %427 = arith.select %426, %420, %424 : vector<8x1024xi1>, vector<8x1024xf32>
    %c824_i32_108 = arith.constant 824 : i32
    %428 = tpu.dynamic_rotate %427 by %c824_i32_108 dim 1 : vector<8x1024xf32>, i32 -> vector<8x1024xf32>
    %c200_i32_109 = arith.constant 200 : i32
    %429 = tpu.dynamic_rotate %427 by %c200_i32_109 dim 1 : vector<8x1024xf32>, i32 -> vector<8x1024xf32>
    %430 = vector.shape_cast %21 : vector<1x1024xi1> to vector<1x1024xi1>
    %431 = vector.broadcast %430 : vector<1x1024xi1> to vector<8x1024xi1>
    %432 = arith.select %431, %429, %427 : vector<8x1024xi1>, vector<8x1024xf32>
    %433 = vector.shape_cast %18 : vector<1x1024xi1> to vector<1x1024xi1>
    %434 = vector.broadcast %433 : vector<1x1024xi1> to vector<8x1024xi1>
    %435 = arith.select %434, %428, %432 : vector<8x1024xi1>, vector<8x1024xf32>
    %436 = vector.broadcast %22 : vector<1x1024xf32> to vector<8x1024xf32>
    %437 = arith.mulf %435, %436 : vector<8x1024xf32>
    %c0_110 = arith.constant 0 : index
    %c0_111 = arith.constant 0 : index
    %c0_112 = arith.constant 0 : index
    %438 = vector.load %arg5[%c0_110, %c0_111, %c0_112] : memref<1x8x1024xf32, #tpu.memory_space<vmem>>, vector<1x8x1024xf32>
    %439 = vector.shape_cast %438 : vector<1x8x1024xf32> to vector<8x1024xf32>
    %440 = vector.shape_cast %437 : vector<8x1024xf32> to vector<1x8x1024xf32>
    tpu.vector_store %arg5[%c0_110, %c0_111, %c0_112], %440 {strides = array<i32>} : memref<1x8x1024xf32, #tpu.memory_space<vmem>>, vector<1x8x1024xf32>,
    return
  }
  func.func @transform_0(%arg0: i32) -> (i32, i32, i32) {
    %c0_i32 = arith.constant 0 : i32
    %c0_i32_0 = arith.constant 0 : i32
    %c0_i32_1 = arith.constant 0 : i32
    return %arg0, %c0_i32, %c0_i32_0 : i32, i32, i32
  }
  func.func @transform_1(%arg0: i32) -> (i32, i32) {
    %c0_i32 = arith.constant 0 : i32
    %c0_i32_0 = arith.constant 0 : i32
    %c0_i32_1 = arith.constant 0 : i32
    return %c0_i32, %c0_i32_0 : i32, i32
  }
  func.func @transform_2(%arg0: i32) -> (i32, i32) {
    %c0_i32 = arith.constant 0 : i32
    %c0_i32_0 = arith.constant 0 : i32
    %c0_i32_1 = arith.constant 0 : i32
    return %c0_i32, %c0_i32_0 : i32, i32
  }
  func.func @transform_3(%arg0: i32) -> (i32, i32) {
    %c0_i32 = arith.constant 0 : i32
    %c0_i32_0 = arith.constant 0 : i32
    %c0_i32_1 = arith.constant 0 : i32
    return %c0_i32, %c0_i32_0 : i32, i32
  }
  func.func @transform_4(%arg0: i32) -> (i32, i32, i32) {
    %c0_i32 = arith.constant 0 : i32
    %c0_i32_0 = arith.constant 0 : i32
    %c0_i32_1 = arith.constant 0 : i32
    return %arg0, %c0_i32, %c0_i32_0 : i32, i32, i32
  }
}

</mosaic_0001>

<bundles_post_ra>
// kernel: resnet_stack3d.2
= control target key start
LH: loop header
LB: loop body
LE: loop exit
PB: predicated region body
PF: predicated region fallthrough
CT: control target
= control target key end

     0   :  { %s15968_s15 = smov 0   ;;  %s20000_s0 = inlined_call_operand.vmem [shape: f32[2,8,1024], index: 0, kind: input, shape index: {}]   ;;  %s20001_s1 = inlined_call_operand.vmem [shape: f32[8,1024], index: 1, kind: input, shape index: {}]   ;;  %s20002_s2 = inlined_call_operand.vmem [shape: f32[216,8], index: 2, kind: input, shape index: {}]   ;;  %s20003_s3 = inlined_call_operand.vmem [shape: f32[216,8], index: 3, kind: input, shape index: {}]   ;;  %s20004_s4 = inlined_call_operand.vmem [shape: f32[2,8,1024], index: 4, kind: output, shape index: {}]  }
   0x1 LB: > { %s13656_s16 = sadd.s32 4294967295, %s15908_s15   ;;  %p13660_p0 = scmp.ge.s32.totalorder %s15908_s15, 1  ;;  %s15908_s15 = sphi %s15968_s15, %s14_s15  }
   0x2   : > { %p162_p1 = scmp.lt.s32.totalorder %s15908_s15, 3 }
   0x4   : > { %p163_p2 = pnand %p13660_p0, %p162_p1 }
   0x6   : > { %166 = sbr.rel (%p163_p2) target bundleno = 2710 (0xa96), region = 36 }
   0xd   : > { %p188_p3 = scmp.lt.s32.totalorder %s13656_s16, 1  ;;  %v20052_v0 = vmov 0   ;;  %s15911_s21 = smov 110   ;;  %v294_v12 = vlaneseq  ;;  %vm20058_vm1 = vcmask 1043456   ;;  %v224_v21 = vld [vmem:[%s20002_s2 + $0x8] sm:$0xff]  ;;  %vm20057_vm2 = vcmask 64512  }
   0xe   : > { %449 = vmatprep.mubr.bf16.mxu1 %v20052_v0  ;;  %408 = vmatprep.mubr.bf16.mxu0 %v20052_v0  ;;  %s15912_s22 = smov 111   ;;  %s15913_s23 = smov 109   ;;  %v16157_v32 = vpack.c.bf16 %v224_v21, %v224_v21 }
   0xf   : > { %s20864_s16 = smov (!%p188_p3, %s13656_s16), 1  ;;  %s15914_s24 = smov 101   ;;  %v16134_v13 = vand.u32 127, %v294_v12 }
  0x10   : > { %s20005_s17 = sshll.u32 %s20864_s16, 6  ;;  %s15915_s25 = smov 100  }
  0x11   : > { %s15984_s20 = scalar_lea.vmem %s20000_s0, %s20005_s17  ;;  %s15916_s26 = smov 99   ;;  %vm20059_vm0 = vcmp.lt.s32.totalorder %v16134_v13, 110  ;;  %vm20056_vm3 = vcmp.lt.s32.totalorder %v16134_v13, 111  ;;  %vm20051_vm4 = vcmp.lt.s32.totalorder %v16134_v13, 109  ;;  %vm20050_vm5 = vcmp.lt.s32.totalorder %v16134_v13, 101 }
  0x12   : > { %v15989_v1 = vld [vmem:[%s15984_s20 + $0x10] sm:$0xff]  ;;  %v15992_v2 = vld [vmem:[%s15984_s20 + $0x18] sm:$0xff]  ;;  %v199_v3 = vld [vmem:[%s15984_s20] sm:$0xff]  ;;  %s15917_s27 = smov 91   ;;  %s15918_s28 = smov 90   ;;  %vm20049_vm6 = vcmp.lt.s32.totalorder %v16134_v13, 100 }
  0x13   : > { %v15997_v4 = vpack.i.bf16 %v15992_v2, %v15989_v1  ;;  %v16000_v5 = vld [vmem:[%s15984_s20 + $0x8] sm:$0xff]  ;;  %v16003_v6 = vld [vmem:[%s15984_s20 + $0x20] sm:$0xff]  ;;  %v16020_v10 = vld [vmem:[%s15984_s20 + $0x38] sm:$0xff]  ;;  %s15919_s29 = smov 89   ;;  %s15920_s30 = smov 11   ;;  %vm20048_vm7 = vcmp.lt.s32.totalorder %v16134_v13, 99 }
  0x14   : > { %v16006_v7 = vpack.i.bf16 %v16000_v5, %v199_v3  ;;  %v16009_v8 = vld [vmem:[%s15984_s20 + $0x28] sm:$0xff]  ;;  %v16027_v11 = vld [vmem:[%s15984_s20 + $0x30] sm:$0xff]  ;;  %s15921_s5 = smov 10   ;;  %s15922_s6 = smov 9   ;;  %vm20047_vm8 = vcmp.lt.s32.totalorder %v16134_v13, 91  ;;  %vm20046_vm9 = vcmp.lt.s32.totalorder %v16134_v13, 90 }
  0x15   : > { %14980 = vrot.lane.b32.xlu1 %v15997_v4, %s15911_s21  ;;  %v16015_v9 = vpack.i.bf16 %v16009_v8, %v16003_v6  ;;  %s15923_s9 = smov 1   ;;  %s15924_s10 = smov 127   ;;  %vm20045_vm10 = vcmp.lt.s32.totalorder %v16134_v13, 89  ;;  %vm20044_vm11 = vcmp.lt.s32.totalorder %v16134_v13, 11  ;;  %vm20043_vm12 = vcmp.lt.s32.totalorder %v16134_v13, 10 }
  0x16   : > { %14975 = vrot.lane.b32.xlu0 %v16006_v7, %s15911_s21  ;;  %s15925_s13 = smov 119   ;;  %s20038_s19 = smov 118   ;;  %vm20042_vm13 = vcmp.lt.s32.totalorder %v16134_v13, 9  ;;  %vm20016_vm14 = vcmp.lt.s32.totalorder %v16134_v13, 1  ;;  %vm20017_vm15 = vcmp.lt.s32.totalorder %v16134_v13, 127 }
  0x17   : > { %s20036_s11 = smov 117   ;;  %s20034_s18 = smov 39  }
  0x18   : > { %s20032_s12 = smov 38   ;;  %s20030_s14 = smov 37  }
  0x19   : > { %14985 = vrot.lane.b32.xlu1 %v16015_v9, %s15911_s21  ;;  %s20006_s7 = smov 29   ;;  %s20008_s17 = smov 28  }
  0x1a   : > { %328 = vrot.lane.b32.xlu0 %v16020_v10, %s15911_s21  ;;  %s20028_s8 = smov 17  }
  0x1d   : > { %14990 = vrot.lane.b32.xlu1 %v16006_v7, %s15912_s22 }
  0x1e   : > { %326 = vrot.lane.b32.xlu0 %v16027_v11, %s15911_s21 }
  0x21   : > { %14995 = vrot.lane.b32.xlu1 %v15997_v4, %s15912_s22 }
  0x22   : > { %292 = vrot.lane.b32.xlu0 %v16020_v10, %s15912_s22 }
  0x25   : > { %290 = vrot.lane.b32.xlu1 %v16027_v11, %s15912_s22 }
  0x26   : > { %15000 = vrot.lane.b32.xlu0 %v16015_v9, %s15912_s22 }
  0x29   : > { %746 = vrot.lane.b32.xlu1 %v16020_v10, %s15913_s23 }
  0x2a   : > { %15005 = vrot.lane.b32.xlu0 %v16006_v7, %s15913_s23 }
  0x2d   : > { %15015 = vrot.lane.b32.xlu1 %v16015_v9, %s15913_s23 }
  0x2e   : > { %15010 = vrot.lane.b32.xlu0 %v15997_v4, %s15913_s23 }
  0x31   : > { %15020 = vrot.lane.b32.xlu1 %v16006_v7, %s15914_s24 }
  0x32   : > { %744 = vrot.lane.b32.xlu0 %v16027_v11, %s15913_s23 }
  0x35   : > { %15025 = vrot.lane.b32.xlu1 %v15997_v4, %s15914_s24 }
  0x36   : > { %979 = vrot.lane.b32.xlu0 %v16020_v10, %s15914_s24 }
  0x39   : > { %977 = vrot.lane.b32.xlu1 %v16027_v11, %s15914_s24 }
  0x3a   : > { %15030 = vrot.lane.b32.xlu0 %v16015_v9, %s15914_s24 }
  0x3d   : > { %1212 = vrot.lane.b32.xlu1 %v16020_v10, %s15915_s25 }
  0x3e   : > { %15035 = vrot.lane.b32.xlu0 %v16006_v7, %s15915_s25 }
  0x41   : > { %15045 = vrot.lane.b32.xlu1 %v16015_v9, %s15915_s25 }
  0x42   : > { %15040 = vrot.lane.b32.xlu0 %v15997_v4, %s15915_s25 }
  0x45   : > { %15050 = vrot.lane.b32.xlu1 %v16006_v7, %s15916_s26 }
  0x46   : > { %1210 = vrot.lane.b32.xlu0 %v16027_v11, %s15915_s25 }
  0x49   : > { %15055 = vrot.lane.b32.xlu1 %v15997_v4, %s15916_s26 }
  0x4a   : > { %1445 = vrot.lane.b32.xlu0 %v16020_v10, %s15916_s26 }
  0x4d   : > { %1443 = vrot.lane.b32.xlu1 %v16027_v11, %s15916_s26 }
  0x4e   : > { %15060 = vrot.lane.b32.xlu0 %v16015_v9, %s15916_s26 }
  0x51   : > { %1678 = vrot.lane.b32.xlu1 %v16020_v10, %s15917_s27 }
  0x52   : > { %15065 = vrot.lane.b32.xlu0 %v16006_v7, %s15917_s27 }
  0x55   : > { %15075 = vrot.lane.b32.xlu1 %v16015_v9, %s15917_s27 }
  0x56   : > { %15070 = vrot.lane.b32.xlu0 %v15997_v4, %s15917_s27 }
  0x59   : > { %15080 = vrot.lane.b32.xlu1 %v16006_v7, %s15918_s28 }
  0x5a   : > { %1676 = vrot.lane.b32.xlu0 %v16027_v11, %s15917_s27 }
  0x5d   : > { %15085 = vrot.lane.b32.xlu1 %v15997_v4, %s15918_s28 }
  0x5e   : > { %1911 = vrot.lane.b32.xlu0 %v16020_v10, %s15918_s28 }
  0x61   : > { %1909 = vrot.lane.b32.xlu1 %v16027_v11, %s15918_s28 }
  0x62   : > { %15090 = vrot.lane.b32.xlu0 %v16015_v9, %s15918_s28 }
  0x65   : > { %2144 = vrot.lane.b32.xlu1 %v16020_v10, %s15919_s29 }
  0x66   : > { %15095 = vrot.lane.b32.xlu0 %v16006_v7, %s15919_s29 }
  0x69   : > { %15105 = vrot.lane.b32.xlu1 %v16015_v9, %s15919_s29 }
  0x6a   : > { %15100 = vrot.lane.b32.xlu0 %v15997_v4, %s15919_s29 }
  0x6d   : > { %15110 = vrot.lane.b32.xlu1 %v16006_v7, %s15920_s30 }
  0x6e   : > { %2142 = vrot.lane.b32.xlu0 %v16027_v11, %s15919_s29 }
  0x71   : > { %15115 = vrot.lane.b32.xlu1 %v15997_v4, %s15920_s30 }
  0x72   : > { %2377 = vrot.lane.b32.xlu0 %v16020_v10, %s15920_s30 }
  0x75   : > { %2375 = vrot.lane.b32.xlu1 %v16027_v11, %s15920_s30 }
  0x76   : > { %15120 = vrot.lane.b32.xlu0 %v16015_v9, %s15920_s30 }
  0x79   : > { %2610 = vrot.lane.b32.xlu1 %v16020_v10, %s15921_s5 }
  0x7a   : > { %15125 = vrot.lane.b32.xlu0 %v16006_v7, %s15921_s5 }
  0x7d   : > { %15135 = vrot.lane.b32.xlu1 %v16015_v9, %s15921_s5 }
  0x7e   : > { %15130 = vrot.lane.b32.xlu0 %v15997_v4, %s15921_s5 }
  0x81   : > { %15140 = vrot.lane.b32.xlu1 %v16006_v7, %s15922_s6 }
  0x82   : > { %2608 = vrot.lane.b32.xlu0 %v16027_v11, %s15921_s5 }
  0x85   : > { %15145 = vrot.lane.b32.xlu1 %v15997_v4, %s15922_s6 }
  0x86   : > { %2843 = vrot.lane.b32.xlu0 %v16020_v10, %s15922_s6 }
  0x87   : > { %v14981_v14 = vpop.permute.xlu1 %14980 }
  0x88   : > { %v14983_v15 = vunpack.i.h.bf16 %v14981_v14  ;;  %v14982_v16 = vunpack.i.l.bf16 %v14981_v14  ;;  %v14976_v17 = vpop.permute.xlu0 %14975 }
  0x89   : > { %v14978_v18 = vunpack.i.h.bf16 %v14976_v17  ;;  %v14977_v19 = vunpack.i.l.bf16 %v14976_v17  ;;  %2841 = vrot.lane.b32.xlu1 %v16027_v11, %s15922_s6  ;;  %v16211_v17 = vpack.i.bf16 %v16003_v6, %v15992_v2 }
  0x8a   : > { %v335_v20 = vsel %vm20059_vm0, %v14982_v16, %v14983_v15  ;;  %15150 = vrot.lane.b32.xlu0 %v16015_v9, %s15922_s6 }
  0x8b   : > { %v14986_v22 = vpop.permute.xlu1 %14985  ;;  %v337_v23 = vsel %vm20059_vm0, %v14977_v19, %v14978_v18  ;;  %v342_v24 = vpack.c.bf16 %v335_v20, %v335_v20  ;;  %v336_v25 = vsel %vm20059_vm0, %v14978_v18, %v14982_v16  ;;  %v223_v18 = vld [vmem:[%s20002_s2] sm:$0xff] }
  0x8c   : > { %v329_v26 = vpop.permute.xlu0 %328  ;;  %v14988_v27 = vunpack.i.h.bf16 %v14986_v22  ;;  %v14987_v28 = vunpack.i.l.bf16 %v14986_v22  ;;  %v340_v29 = vpack.c.bf16 %v337_v23, %v337_v23  ;;  %v341_v30 = vpack.c.bf16 %v336_v25, %v336_v25 }
  0x8d   : > { %13667 = vmatprep.subr.msk.bf16.mxu1 %vm20058_vm1, %v342_v24  ;;  %v338_v31 = vsel %vm20059_vm0, %v329_v26, %v14977_v19  ;;  %3076 = vrot.lane.b32.xlu1 %v16020_v10, %s15923_s9 }
  0x8e   : > { %13665 = vmatprep.subr.msk.bf16.mxu0 %vm20058_vm1, %v340_v29  ;;  %v359_v33 = vsel %vm20058_vm1, %v341_v30, 0  ;;  %v339_v34 = vpack.c.bf16 %v338_v31, %v338_v31  ;;  %v333_v35 = vsel %vm20059_vm0, %v14987_v28, %v14988_v27  ;;  %v334_v36 = vsel %vm20059_vm0, %v14983_v15, %v14987_v28  ;;  %15155 = vrot.lane.b32.xlu0 %v16006_v7, %s15923_s9 }
  0x8f   : > { %418 = vmatpush1.bf16.msra.mxu1 %v359_v33  ;;  %v14991_v37 = vpop.permute.xlu1 %14990  ;;  %v344_v38 = vpack.c.bf16 %v333_v35, %v333_v35  ;;  %v343_v39 = vpack.c.bf16 %v334_v36, %v334_v36 }
  0x90   : > { %v327_v40 = vpop.permute.xlu0 %326  ;;  %v353_v41 = vsel %vm20058_vm1, %v339_v34, 0  ;;  %v14993_v42 = vunpack.i.h.bf16 %v14991_v37  ;;  %v14992_v43 = vunpack.i.l.bf16 %v14991_v37 }
  0x91   : > { %v331_v44 = vsel %vm20059_vm0, %v327_v40, %v329_v26  ;;  %v332_v45 = vsel %vm20059_vm0, %v14988_v27, %v327_v40  ;;  %377 = vmatpush1.bf16.msra.mxu0 %v353_v41  ;;  %15165 = vrot.lane.b32.xlu1 %v16015_v9, %s15923_s9  ;;  %v365_v48 = vsel %vm20058_vm1, %v343_v39, 0  ;;  %v277_v26 = vpack.c.bf16 %v223_v18, %v223_v18 }
  0x92   : > { %v345_v46 = vpack.c.bf16 %v332_v45, %v332_v45  ;;  %v346_v47 = vpack.c.bf16 %v331_v44, %v331_v44  ;;  %13668 = vmatmul.mubr.msk.bf16.vlgmr.msra.gmra.mrb[0].mxu1 %vm20057_vm2, %v16157_v32  ;;  %13669 = vmatprep.subr.msk.bf16.mxu0 %vm20058_vm1, %v344_v38  ;;  %v303_v49 = vsel %vm20056_vm3, %v14992_v43, %v14993_v42 }
  0x93   : > { %v14996_v50 = vpop.permute.xlu1 %14995  ;;  %531 = vmatprep.mubr.bf16.mxu1 %v20052_v0  ;;  %v306_v51 = vpack.c.bf16 %v303_v49, %v303_v49  ;;  %15160 = vrot.lane.b32.xlu0 %v15997_v4, %s15923_s9 }
  0x94   : > { %13666 = vmatmul.mubr.msk.bf16.vlgmr.msra.gmra.mrb[0].mxu0 %vm20057_vm2, %v16157_v32  ;;  %13671 = vmatprep.subr.msk.bf16.mxu1 %vm20058_vm1, %v346_v47  ;;  %v371_v52 = vsel %vm20058_vm1, %v345_v46, 0  ;;  %v14998_v53 = vunpack.i.h.bf16 %v14996_v50  ;;  %v14997_v54 = vunpack.i.l.bf16 %v14996_v50  ;;  %v293_v55 = vpop.permute.xlu0 %292 }
  0x95   : > { %459 = vmatpush1.bf16.msra.mxu0 %v365_v48  ;;  %500 = vmatpush1.bf16.msra.mxu1 %v371_v52  ;;  %v304_v56 = vsel %vm20056_vm3, %v293_v55, %v14992_v43 }
  0x96   : > { %v305_v57 = vpack.c.bf16 %v304_v56, %v304_v56  ;;  %490 = vmatprep.mubr.bf16.mxu0 %v20052_v0  ;;  %v301_v58 = vsel %vm20056_vm3, %v14997_v54, %v14998_v53  ;;  %v302_v59 = vsel %vm20056_vm3, %v14993_v42, %v14997_v54  ;;  %13673 = vmatprep.subr.msk.bf16.mxu0 %vm20058_vm1, %v306_v51 }
  0x97   : > { %v291_v60 = vpop.permute.xlu1 %290  ;;  %v308_v61 = vpack.c.bf16 %v301_v58, %v301_v58  ;;  %v307_v62 = vpack.c.bf16 %v302_v59, %v302_v59  ;;  %3074 = vrot.lane.b32.xlu0 %v16027_v11, %s15923_s9  ;;  %15170 = vrot.lane.b32.xlu1 %v16006_v7, %s15924_s10 }
  0x98   : > { %v297_v63 = vsel %vm20056_vm3, %v291_v60, %v293_v55  ;;  %v15001_v3 = vpop.permute.xlu0 %15000  ;;  %v544_v16 = vsel %vm20058_vm1, %v305_v57, 0  ;;  %v225_v57 = vld [vmem:[%s20002_s2 + $0x10] sm:$0xff] }
  0x99   : > { %v312_v4 = vpack.c.bf16 %v297_v63, %v297_v63  ;;  %v15003_v9 = vunpack.i.h.bf16 %v15001_v3  ;;  %v15002_v14 = vunpack.i.l.bf16 %v15001_v3  ;;  %13675 = vmatprep.subr.msk.bf16.mxu1 %vm20058_vm1, %v308_v61  ;;  %v550_v15 = vsel %vm20058_vm1, %v307_v62, 0 }
  0x9a   : > { %13672 = vmatmul.mubr.msk.bf16.vlgmr.msra.gmra.mrb[4].mxu1 %vm20057_vm2, %v16157_v32  ;;  %v731_v3 = vpack.c.bf16 %v225_v57, %v225_v57 }
  0x9b   : > { %609 = vmatpush1.bf16.msra.mxu1 %v550_v15  ;;  %640 = vmatprep.mubr.bf16.mxu1 %v20052_v0  ;;  %v299_v19 = vsel %vm20056_vm3, %v15002_v14, %v15003_v9  ;;  %v300_v20 = vsel %vm20056_vm3, %v14998_v53, %v15002_v14  ;;  %v298_v21 = vsel %vm20056_vm3, %v15003_v9, %v291_v60  ;;  %v747_v22 = vpop.permute.xlu1 %746 }
  0x9c   : > { %13670 = vmatmul.mubr.msk.bf16.vlgmr.msra.gmra.mrb[4].mxu0 %vm20057_vm2, %v16157_v32  ;;  %13679 = vmatprep.subr.msk.bf16.mxu1 %vm20058_vm1, %v312_v4  ;;  %v15006_v2 = vpop.permute.xlu0 %15005  ;;  %v310_v6 = vpack.c.bf16 %v299_v19, %v299_v19  ;;  %v311_v23 = vpack.c.bf16 %v298_v21, %v298_v21  ;;  %v309_v27 = vpack.c.bf16 %v300_v20, %v300_v20 }
  0x9d   : > { %568 = vmatpush1.bf16.msra.mxu0 %v544_v16  ;;  %599 = vmatprep.mubr.bf16.mxu0 %v20052_v0  ;;  %v15008_v24 = vunpack.i.h.bf16 %v15006_v2  ;;  %v15007_v25 = vunpack.i.l.bf16 %v15006_v2  ;;  %v16238_v32 = vpack.i.bf16 %v16027_v11, %v16009_v8 }
  0x9e   : > { %13677 = vmatprep.subr.msk.bf16.mxu0 %vm20058_vm1, %v310_v6  ;;  %15175 = vrot.lane.b32.xlu1 %v16211_v17, %s15924_s10  ;;  %v562_v30 = vsel %vm20058_vm1, %v311_v23, 0  ;;  %v556_v35 = vsel %vm20058_vm1, %v309_v27, 0 }
  0x9f   : > { %v15016_v28 = vpop.permute.xlu1 %15015  ;;  %v755_v29 = vsel %vm20051_vm4, %v15007_v25, %v15008_v24  ;;  %3507 = vrot.lane.b32.xlu0 %v15989_v1, %s15924_s10  ;;  %v756_v36 = vsel %vm20051_vm4, %v747_v22, %v15007_v25 }
  0xa0   : > { %v15011_v31 = vpop.permute.xlu0 %15010  ;;  %v758_v37 = vpack.c.bf16 %v755_v29, %v755_v29  ;;  %v15018_v38 = vunpack.i.h.bf16 %v15016_v28  ;;  %v15017_v39 = vunpack.i.l.bf16 %v15016_v28  ;;  %v757_v46 = vpack.c.bf16 %v756_v36, %v756_v36 }
  0xa1   : > { %v15013_v33 = vunpack.i.h.bf16 %v15011_v31  ;;  %v15012_v34 = vunpack.i.l.bf16 %v15011_v31 }
  0xa2   : > { %13676 = vmatmul.mubr.msk.bf16.vlgmr.msra.gmra.mrb[0].mxu1 %vm20057_vm2, %v277_v26  ;;  %3517 = vrot.lane.b32.xlu1 %v16020_v10, %s15924_s10  ;;  %v751_v47 = vsel %vm20051_vm4, %v15017_v39, %v15018_v38  ;;  %v769_v55 = vsel %vm20058_vm1, %v757_v46, 0 }
  0xa3   : > { %691 = vmatpush1.bf16.msra.mxu1 %v562_v30  ;;  %722 = vmatprep.mubr.bf16.mxu1 %v20052_v0  ;;  %v753_v8 = vsel %vm20051_vm4, %v15012_v34, %v15013_v33  ;;  %v754_v40 = vsel %vm20051_vm4, %v15008_v24, %v15012_v34  ;;  %v15021_v41 = vpop.permute.xlu1 %15020  ;;  %v762_v56 = vpack.c.bf16 %v751_v47, %v751_v47 }
  0xa4   : > { %13674 = vmatmul.mubr.msk.bf16.vlgmr.msra.gmra.mrb[0].mxu0 %vm20057_vm2, %v277_v26  ;;  %v745_v42 = vpop.permute.xlu0 %744  ;;  %v760_v43 = vpack.c.bf16 %v753_v8, %v753_v8  ;;  %v759_v44 = vpack.c.bf16 %v754_v40, %v754_v40  ;;  %15180 = vrot.lane.b32.xlu0 %v16238_v32, %s15924_s10  ;;  %v15022_v58 = vunpack.i.l.bf16 %v15021_v41  ;;  %v752_v59 = vsel %vm20051_vm4, %v15013_v33, %v15017_v39 }
  0xa5   : > { %650 = vmatpush1.bf16.msra.mxu0 %v556_v35  ;;  %681 = vmatprep.mubr.bf16.mxu0 %v20052_v0  ;;  %v749_v45 = vsel %vm20051_vm4, %v745_v42, %v747_v22  ;;  %v750_v52 = vsel %vm20051_vm4, %v15018_v38, %v745_v42  ;;  %v15023_v62 = vunpack.i.h.bf16 %v15021_v41  ;;  %v761_v4 = vpack.c.bf16 %v752_v59, %v752_v59 }
  0xa6   : > { %13683 = vmatprep.subr.msk.bf16.mxu1 %vm20058_vm1, %v760_v43  ;;  %13681 = vmatprep.subr.msk.bf16.mxu0 %vm20058_vm1, %v758_v37  ;;  %v764_v49 = vpack.c.bf16 %v749_v45, %v749_v45  ;;  %v775_v50 = vsel %vm20058_vm1, %v759_v44, 0  ;;  %v763_v60 = vpack.c.bf16 %v750_v52, %v750_v52  ;;  %v226_v37 = vld [vmem:[%s20002_s2 + $0x18] sm:$0xff] }
  0xa7   : > { %v16261_v48 = vpop.permute.xlu1 %15025  ;;  %3740 = vrot.lane.b32.xlu1 %v15989_v1, %s15925_s13  ;;  %v988_v9 = vsel %vm20050_vm5, %v15022_v58, %v15023_v62  ;;  %v781_v19 = vsel %vm20058_vm1, %v761_v4, 0  ;;  %v964_v43 = vpack.c.bf16 %v226_v37, %v226_v37 }
  0xa8   : > { %v980_v51 = vpop.permute.xlu0 %979  ;;  %15185 = vrot.lane.b32.xlu0 %v16006_v7, %s15925_s13  ;;  %v15028_v53 = vunpack.i.h.bf16 %v16261_v48  ;;  %v15027_v54 = vunpack.i.l.bf16 %v16261_v48  ;;  %v787_v14 = vsel %vm20058_vm1, %v763_v60, 0  ;;  %v991_v21 = vpack.c.bf16 %v988_v9, %v988_v9 }
  0xa9   : > { %v989_v22 = vsel %vm20050_vm5, %v980_v51, %v15022_v58 }
  0xaa   : > { %13680 = vmatmul.mubr.msk.bf16.vlgmr.msra.gmra.mrb[4].mxu1 %vm20057_vm2, %v277_v26  ;;  %v986_v63 = vsel %vm20050_vm5, %v15027_v54, %v15028_v53  ;;  %v987_v18 = vsel %vm20050_vm5, %v15023_v62, %v15027_v54  ;;  %v990_v25 = vpack.c.bf16 %v989_v22, %v989_v22 }
  0xab   : > { %834 = vmatpush1.bf16.msra.mxu1 %v775_v50  ;;  %865 = vmatprep.mubr.bf16.mxu1 %v20052_v0  ;;  %v993_v15 = vpack.c.bf16 %v986_v63, %v986_v63  ;;  %v978_v20 = vpop.permute.xlu1 %977  ;;  %v992_v23 = vpack.c.bf16 %v987_v18, %v987_v18 }
  0xac   : > { %13678 = vmatmul.mubr.msk.bf16.vlgmr.msra.gmra.mrb[4].mxu0 %vm20057_vm2, %v277_v26  ;;  %13687 = vmatprep.subr.msk.bf16.mxu1 %vm20058_vm1, %v764_v49  ;;  %v15031_v61 = vpop.permute.xlu0 %15030  ;;  %v982_v24 = vsel %vm20050_vm5, %v978_v20, %v980_v51  ;;  %v1002_v35 = vsel %vm20058_vm1, %v990_v25, 0 }
  0xad   : > { %793 = vmatpush1.bf16.msra.mxu0 %v769_v55  ;;  %824 = vmatprep.mubr.bf16.mxu0 %v20052_v0  ;;  %v15033_v2 = vunpack.i.h.bf16 %v15031_v61  ;;  %v15032_v6 = vunpack.i.l.bf16 %v15031_v61  ;;  %v997_v29 = vpack.c.bf16 %v982_v24, %v982_v24  ;;  %v1008_v30 = vsel %vm20058_vm1, %v992_v23, 0 }
  0xae   : > { %13685 = vmatprep.subr.msk.bf16.mxu0 %vm20058_vm1, %v762_v56  ;;  %15190 = vrot.lane.b32.xlu0 %v16211_v17, %s15925_s13 }
  0xaf   : > { %15195 = vrot.lane.b32.xlu1 %v16238_v32, %s15925_s13  ;;  %v1213_v27 = vpop.permute.xlu1 %1212  ;;  %v984_v28 = vsel %vm20050_vm5, %v15032_v6, %v15033_v2  ;;  %v983_v31 = vsel %vm20050_vm5, %v15033_v2, %v978_v20  ;;  %v985_v39 = vsel %vm20050_vm5, %v15028_v53, %v15032_v6 }
  0xb0   : > { %v16296_v16 = vpop.permute.xlu0 %15035  ;;  %v995_v36 = vpack.c.bf16 %v984_v28, %v984_v28  ;;  %v996_v8 = vpack.c.bf16 %v983_v31, %v983_v31  ;;  %v994_v44 = vpack.c.bf16 %v985_v39, %v985_v39 }
  0xb1   : > { %v15037_v38 = vunpack.i.l.bf16 %v16296_v16  ;;  %v15038_v41 = vunpack.i.h.bf16 %v16296_v16  ;;  %v227_v16 = vld [vmem:[%s20002_s2 + $0x20] sm:$0xff] }
  0xb2   : > { %13684 = vmatmul.mubr.msk.bf16.vlgmr.msra.gmra.mrb[0].mxu1 %vm20057_vm2, %v731_v3  ;;  %3750 = vrot.lane.b32.xlu0 %v16020_v10, %s15925_s13  ;;  %v1020_v46 = vsel %vm20058_vm1, %v996_v8, 0  ;;  %v1014_v50 = vsel %vm20058_vm1, %v994_v44, 0  ;;  %v1197_v6 = vpack.c.bf16 %v227_v16, %v227_v16 }
  0xb3   : > { %916 = vmatpush1.bf16.msra.mxu1 %v787_v14  ;;  %947 = vmatprep.mubr.bf16.mxu1 %v20052_v0  ;;  %v15046_v40 = vpop.permute.xlu1 %15045  ;;  %v1221_v45 = vsel %vm20049_vm6, %v15037_v38, %v15038_v41  ;;  %v1222_v53 = vsel %vm20049_vm6, %v1213_v27, %v15037_v38 }
  0xb4   : > { %13682 = vmatmul.mubr.msk.bf16.vlgmr.msra.gmra.mrb[0].mxu0 %vm20057_vm2, %v731_v3  ;;  %13691 = vmatprep.subr.msk.bf16.mxu1 %vm20058_vm1, %v993_v15  ;;  %v16313_v26 = vpop.permute.xlu0 %15040  ;;  %v1224_v52 = vpack.c.bf16 %v1221_v45, %v1221_v45  ;;  %v15048_v54 = vunpack.i.h.bf16 %v15046_v40  ;;  %v15047_v55 = vunpack.i.l.bf16 %v15046_v40  ;;  %v1223_v58 = vpack.c.bf16 %v1222_v53, %v1222_v53 }
  0xb5   : > { %875 = vmatpush1.bf16.msra.mxu0 %v781_v19  ;;  %906 = vmatprep.mubr.bf16.mxu0 %v20052_v0  ;;  %v15043_v33 = vunpack.i.h.bf16 %v16313_v26  ;;  %v15042_v34 = vunpack.i.l.bf16 %v16313_v26 }
  0xb6   : > { %13689 = vmatprep.subr.msk.bf16.mxu0 %vm20058_vm1, %v991_v21  ;;  %15200 = vrot.lane.b32.xlu1 %v16006_v7, %s20038_s19  ;;  %v1217_v61 = vsel %vm20049_vm6, %v15047_v55, %v15048_v54  ;;  %v1235_v14 = vsel %vm20058_vm1, %v1223_v58, 0 }
  0xb7   : > { %3973 = vrot.lane.b32.xlu0 %v15989_v1, %s20038_s19  ;;  %v1219_v42 = vsel %vm20049_vm6, %v15042_v34, %v15043_v33  ;;  %v16356_v48 = vpop.permute.xlu1 %15050  ;;  %v1220_v49 = vsel %vm20049_vm6, %v15038_v41, %v15042_v34  ;;  %v1228_v15 = vpack.c.bf16 %v1217_v61, %v1217_v61  ;;  %v1218_v19 = vsel %vm20049_vm6, %v15043_v33, %v15047_v55 }
  0xb8   : > { %v1226_v47 = vpack.c.bf16 %v1219_v42, %v1219_v42  ;;  %v1211_v51 = vpop.permute.xlu0 %1210  ;;  %v1225_v56 = vpack.c.bf16 %v1220_v49, %v1220_v49  ;;  %v15052_v18 = vunpack.i.l.bf16 %v16356_v48  ;;  %v15053_v22 = vunpack.i.h.bf16 %v16356_v48  ;;  %v228_v48 = vld [vmem:[%s20002_s2 + $0x28] sm:$0xff] }
  0xb9   : > { %v1215_v57 = vsel %vm20049_vm6, %v1211_v51, %v1213_v27  ;;  %v1227_v23 = vpack.c.bf16 %v1218_v19, %v1218_v19  ;;  %v1430_v55 = vpack.c.bf16 %v228_v48, %v228_v48  ;;  %v16572_v48 = vld [vmem:[%s15984_s20 + $0x8] sm:$0xff] }
  0xba   : > { %13688 = vmatmul.mubr.msk.bf16.vlgmr.msra.gmra.mrb[4].mxu1 %vm20057_vm2, %v731_v3  ;;  %15205 = vrot.lane.b32.xlu1 %v16211_v17, %s20038_s19  ;;  %v1230_v62 = vpack.c.bf16 %v1215_v57, %v1215_v57  ;;  %v1241_v63 = vsel %vm20058_vm1, %v1225_v56, 0  ;;  %v1454_v24 = vsel %vm20048_vm7, %v15052_v18, %v15053_v22 }
  0xbb   : > { %1067 = vmatpush1.bf16.msra.mxu1 %v1008_v30  ;;  %1098 = vmatprep.mubr.bf16.mxu1 %v20052_v0  ;;  %v16373_v59 = vpop.permute.xlu1 %15055  ;;  %v1457_v31 = vpack.c.bf16 %v1454_v24, %v1454_v24  ;;  %v16517_v24 = vld [vmem:[%s15984_s20 + $0x10] sm:$0xff] }
  0xbc   : > { %13686 = vmatmul.mubr.msk.bf16.vlgmr.msra.gmra.mrb[4].mxu0 %vm20057_vm2, %v731_v3  ;;  %13695 = vmatprep.subr.msk.bf16.mxu1 %vm20058_vm1, %v997_v29  ;;  %v1446_v60 = vpop.permute.xlu0 %1445  ;;  %v1216_v3 = vsel %vm20049_vm6, %v15048_v54, %v1211_v51  ;;  %v15058_v4 = vunpack.i.h.bf16 %v16373_v59  ;;  %v15057_v9 = vunpack.i.l.bf16 %v16373_v59  ;;  %v1247_v29 = vsel %vm20058_vm1, %v1227_v23, 0  ;;  %v16512_v23 = vld [vmem:[%s15984_s20] sm:$0xff] }
  0xbd   : > { %1026 = vmatpush1.bf16.msra.mxu0 %v1002_v35  ;;  %1057 = vmatprep.mubr.bf16.mxu0 %v20052_v0  ;;  %v1229_v20 = vpack.c.bf16 %v1216_v3, %v1216_v3  ;;  %v1455_v33 = vsel %vm20048_vm7, %v1446_v60, %v15052_v18 }
  0xbe   : > { %13693 = vmatprep.subr.msk.bf16.mxu0 %vm20058_vm1, %v995_v36  ;;  %3983 = vrot.lane.b32.xlu1 %v16020_v10, %s20038_s19  ;;  %v1452_v2 = vsel %vm20048_vm7, %v15057_v9, %v15058_v4  ;;  %v1453_v28 = vsel %vm20048_vm7, %v15053_v22, %v15057_v9  ;;  %v1456_v38 = vpack.c.bf16 %v1455_v33, %v1455_v33 }
  0xbf   : > { %15210 = vrot.lane.b32.xlu0 %v16238_v32, %s20038_s19  ;;  %v1253_v25 = vsel %vm20058_vm1, %v1229_v20, 0  ;;  %v1459_v26 = vpack.c.bf16 %v1452_v2, %v1452_v2  ;;  %v1444_v30 = vpop.permute.xlu1 %1443  ;;  %v1458_v36 = vpack.c.bf16 %v1453_v28, %v1453_v28  ;;  %s15937_s19 = smov 2  }
  0xc0   : > { %v15061_v21 = vpop.permute.xlu0 %15060  ;;  %v1448_v37 = vsel %vm20048_vm7, %v1444_v30, %v1446_v60 }
  0xc1   : > { %v15063_v34 = vunpack.i.h.bf16 %v15061_v21  ;;  %v15062_v35 = vunpack.i.l.bf16 %v15061_v21  ;;  %v1463_v41 = vpack.c.bf16 %v1448_v37, %v1448_v37  ;;  %v1474_v42 = vsel %vm20058_vm1, %v1458_v36, 0  ;;  %v16549_v36 = vld [vmem:[%s15984_s20 + $0x20] sm:$0xff] }
  0xc2   : > { %13692 = vmatmul.mubr.msk.bf16.vlgmr.msra.gmra.mrb[0].mxu1 %vm20057_vm2, %v964_v43  ;;  %4206 = vrot.lane.b32.xlu1 %v15989_v1, %s20036_s11 }
  0xc3   : > { %1149 = vmatpush1.bf16.msra.mxu1 %v1020_v46  ;;  %1180 = vmatprep.mubr.bf16.mxu1 %v20052_v0  ;;  %v1679_v8 = vpop.permute.xlu1 %1678  ;;  %v1450_v40 = vsel %vm20048_vm7, %v15062_v35, %v15063_v34  ;;  %v1468_v46 = vsel %vm20058_vm1, %v1456_v38, 0 }
  0xc4   : > { %13690 = vmatmul.mubr.msk.bf16.vlgmr.msra.gmra.mrb[0].mxu0 %vm20057_vm2, %v964_v43  ;;  %13699 = vmatprep.subr.msk.bf16.mxu1 %vm20058_vm1, %v1226_v47  ;;  %v16416_v27 = vpop.permute.xlu0 %15065  ;;  %v1461_v47 = vpack.c.bf16 %v1450_v40, %v1450_v40 }
  0xc5   : > { %1108 = vmatpush1.bf16.msra.mxu0 %v1014_v50  ;;  %1139 = vmatprep.mubr.bf16.mxu0 %v20052_v0  ;;  %v15067_v49 = vunpack.i.l.bf16 %v16416_v27  ;;  %v1451_v50 = vsel %vm20048_vm7, %v15058_v4, %v15062_v35  ;;  %v15068_v53 = vunpack.i.h.bf16 %v16416_v27  ;;  %v16531_v27 = vld [vmem:[%s15984_s20 + $0x28] sm:$0xff]  ;;  %v16546_v35 = vld [vmem:[%s15984_s20 + $0x18] sm:$0xff] }
  0xc6   : > { %13697 = vmatprep.subr.msk.bf16.mxu0 %vm20058_vm1, %v1224_v52  ;;  %15215 = vrot.lane.b32.xlu0 %v16006_v7, %s20036_s11  ;;  %v1460_v56 = vpack.c.bf16 %v1451_v50, %v1451_v50  ;;  %v15269_v28 = vpack.i.bf16 %v16027_v11, %v16531_v27  ;;  %v16553_v37 = vpack.i.bf16 %v16549_v36, %v16546_v35 }
  0xc7   : > { %15225 = vrot.lane.b32.xlu1 %v16238_v32, %s20036_s11  ;;  %v15076_v52 = vpop.permute.xlu1 %15075  ;;  %v1687_v57 = vsel %vm20047_vm8, %v15067_v49, %v15068_v53 }
  0xc8   : > { %v16433_v39 = vpop.permute.xlu0 %15070  ;;  %v15078_v3 = vunpack.i.h.bf16 %v15076_v52  ;;  %v15077_v4 = vunpack.i.l.bf16 %v15076_v52 }
  0xc9   : > { %v15073_v44 = vunpack.i.h.bf16 %v16433_v39  ;;  %v15072_v45 = vunpack.i.l.bf16 %v16433_v39 }
  0xca   : > { %13696 = vmatmul.mubr.msk.bf16.vlgmr.msra.gmra.mrb[4].mxu1 %vm20057_vm2, %v964_v43  ;;  %15220 = vrot.lane.b32.xlu0 %v16211_v17, %s20036_s11  ;;  %v1683_v18 = vsel %vm20047_vm8, %v15077_v4, %v15078_v3 }
  0xcb   : > { %1300 = vmatpush1.bf16.msra.mxu1 %v1241_v63  ;;  %1331 = vmatprep.mubr.bf16.mxu1 %v20052_v0  ;;  %v1685_v54 = vsel %vm20047_vm8, %v15072_v45, %v15073_v44  ;;  %v16476_v60 = vpop.permute.xlu1 %15080  ;;  %v1686_v61 = vsel %vm20047_vm8, %v15068_v53, %v15072_v45 }
  0xcc   : > { %13694 = vmatmul.mubr.msk.bf16.vlgmr.msra.gmra.mrb[4].mxu0 %vm20057_vm2, %v964_v43  ;;  %13703 = vmatprep.subr.msk.bf16.mxu1 %vm20058_vm1, %v1230_v62  ;;  %v1449_v43 = vsel %vm20048_vm7, %v15063_v34, %v1444_v30  ;;  %v1692_v59 = vpack.c.bf16 %v1685_v54, %v1685_v54  ;;  %v1480_v62 = vsel %vm20058_vm1, %v1460_v56, 0  ;;  %v1677_v63 = vpop.permute.xlu0 %1676  ;;  %v1691_v9 = vpack.c.bf16 %v1686_v61, %v1686_v61 }
  0xcd   : > { %1259 = vmatpush1.bf16.msra.mxu0 %v1235_v14  ;;  %1290 = vmatprep.mubr.bf16.mxu0 %v20052_v0  ;;  %v1462_v51 = vpack.c.bf16 %v1449_v43, %v1449_v43  ;;  %v1681_v14 = vsel %vm20047_vm8, %v1677_v63, %v1679_v8  ;;  %v1682_v21 = vsel %vm20047_vm8, %v15078_v3, %v1677_v63 }
  0xce   : > { %13701 = vmatprep.subr.msk.bf16.mxu0 %vm20058_vm1, %v1228_v15  ;;  %4216 = vrot.lane.b32.xlu0 %v16020_v10, %s20036_s11  ;;  %v1696_v19 = vpack.c.bf16 %v1681_v14, %v1681_v14  ;;  %v1707_v20 = vsel %vm20058_vm1, %v1691_v9, 0  ;;  %s15938_s11 = smov 126  }
  0xcf   : > { %15230 = vrot.lane.b32.xlu1 %v16006_v7, %s20034_s18  ;;  %v1486_v58 = vsel %vm20058_vm1, %v1462_v51, 0  ;;  %v16493_v15 = vpop.permute.xlu1 %15085 }
  0xd0   : > { %v16495_v16 = vpop.permute.xlu0 %1911  ;;  %v15088_v22 = vunpack.i.h.bf16 %v16493_v15  ;;  %v15087_v2 = vunpack.i.l.bf16 %v16493_v15 }
  0xd2   : > { %13700 = vmatmul.mubr.msk.bf16.vlgmr.msra.gmra.mrb[0].mxu1 %vm20057_vm2, %v1197_v6  ;;  %4439 = vrot.lane.b32.xlu0 %v15989_v1, %s20034_s18  ;;  %v1918_v33 = vsel %vm20046_vm9, %v15087_v2, %v15088_v22 }
  0xd3   : > { %1382 = vmatpush1.bf16.msra.mxu1 %v1253_v25  ;;  %1413 = vmatprep.mubr.bf16.mxu1 %v20052_v0  ;;  %v229_v25 = vld [vmem:[%s20002_s2 + $0x30] sm:$0xff]  ;;  %v1910_v43 = vpop.permute.xlu1 %1909 }
  0xd4   : > { %13698 = vmatmul.mubr.msk.bf16.vlgmr.msra.gmra.mrb[0].mxu0 %vm20057_vm2, %v1197_v6  ;;  %13707 = vmatprep.subr.msk.bf16.mxu1 %vm20058_vm1, %v1459_v26  ;;  %v15082_v26 = vunpack.i.l.bf16 %v16476_v60  ;;  %v15091_v30 = vpop.permute.xlu0 %15090  ;;  %v1663_v34 = vpack.c.bf16 %v229_v25, %v229_v25  ;;  %v1914_v51 = vsel %vm20046_vm9, %v1910_v43, %v16495_v16 }
  0xd5   : > { %1341 = vmatpush1.bf16.msra.mxu0 %v1247_v29  ;;  %1372 = vmatprep.mubr.bf16.mxu0 %v20052_v0  ;;  %v1695_v29 = vpack.c.bf16 %v1682_v21, %v1682_v21 }
  0xd6   : > { %13705 = vmatprep.subr.msk.bf16.mxu0 %vm20058_vm1, %v1457_v31  ;;  %15235 = vrot.lane.b32.xlu1 %v16211_v17, %s20034_s18  ;;  %v15083_v31 = vunpack.i.h.bf16 %v16476_v60  ;;  %v1921_v45 = vsel %vm20046_vm9, %v16495_v16, %v15082_v26 }
  0xd7   : > { %15240 = vrot.lane.b32.xlu0 %v16238_v32, %s20034_s18  ;;  %v1719_v39 = vsel %vm20058_vm1, %v1695_v29, 0  ;;  %v1922_v52 = vpack.c.bf16 %v1921_v45, %v1921_v45  ;;  %v2145_v54 = vpop.permute.xlu1 %2144 }
  0xd8   : > { %v1920_v38 = vsel %vm20046_vm9, %v15082_v26, %v15083_v31  ;;  %v16559_v40 = vpop.permute.xlu0 %15095 }
  0xd9   : > { %v15098_v15 = vunpack.i.h.bf16 %v16559_v40 }
  0xda   : > { %13704 = vmatmul.mubr.msk.bf16.vlgmr.msra.gmra.mrb[4].mxu1 %vm20057_vm2, %v1197_v6  ;;  %4449 = vrot.lane.b32.xlu1 %v16020_v10, %s20034_s18  ;;  %s15939_s18 = smov 20  }
  0xdb   : > { %1533 = vmatpush1.bf16.msra.mxu1 %v1474_v42  ;;  %1564 = vmatprep.mubr.bf16.mxu1 %v20052_v0 }
  0xdc   : > { %13702 = vmatmul.mubr.msk.bf16.vlgmr.msra.gmra.mrb[4].mxu0 %vm20057_vm2, %v1197_v6  ;;  %13711 = vmatprep.subr.msk.bf16.mxu1 %vm20058_vm1, %v1463_v41  ;;  %v1694_v6 = vpack.c.bf16 %v1683_v18, %v1683_v18  ;;  %v1919_v41 = vsel %vm20046_vm9, %v15083_v31, %v15087_v2  ;;  %v16585_v53 = vpop.permute.xlu0 %15100 }
  0xdd   : > { %1492 = vmatpush1.bf16.msra.mxu0 %v1468_v46  ;;  %1523 = vmatprep.mubr.bf16.mxu0 %v20052_v0  ;;  %v15093_v46 = vunpack.i.h.bf16 %v15091_v30  ;;  %v1924_v50 = vpack.c.bf16 %v1919_v41, %v1919_v41  ;;  %v15103_v60 = vunpack.i.h.bf16 %v16585_v53  ;;  %v15102_v61 = vunpack.i.l.bf16 %v16585_v53 }
  0xde   : > { %13709 = vmatprep.subr.msk.bf16.mxu0 %vm20058_vm1, %v1461_v47  ;;  %15245 = vrot.lane.b32.xlu0 %v16006_v7, %s20032_s12  ;;  %v1690_v7 = vpack.c.bf16 %v1687_v57, %v1687_v57  ;;  %v15092_v47 = vunpack.i.l.bf16 %v15091_v30  ;;  %v1929_v57 = vpack.c.bf16 %v1914_v51, %v1914_v51 }
  0xdf   : > { %4672 = vrot.lane.b32.xlu1 %v15989_v1, %s20032_s12  ;;  %v1688_v1 = vsel %vm20047_vm8, %v1679_v8, %v15067_v49  ;;  %v1925_v8 = vpack.c.bf16 %v1918_v33, %v1918_v33  ;;  %v16576_v49 = vpack.i.bf16 %v16572_v48, %v16512_v23  ;;  %v2151_v16 = vsel %vm20045_vm10, %v15102_v61, %v15103_v60 }
  0xe0   : > { %v1916_v56 = vsel %vm20046_vm9, %v15092_v47, %v15093_v46  ;;  %v1917_v3 = vsel %vm20046_vm9, %v15088_v22, %v15092_v47  ;;  %v2158_v22 = vpack.c.bf16 %v2151_v16, %v2151_v16 }
  0xe1   : > { %v1927_v63 = vpack.c.bf16 %v1916_v56, %v1916_v56 }
  0xe2   : > { %13708 = vmatmul.mubr.msk.bf16.vlgmr.msra.gmra.mrb[0].mxu1 %vm20057_vm2, %v1430_v55  ;;  %15250 = vrot.lane.b32.xlu0 %v16211_v17, %s20032_s12  ;;  %v1689_v17 = vpack.c.bf16 %v1688_v1, %v1688_v1  ;;  %v15097_v1 = vunpack.i.l.bf16 %v16559_v40 }
  0xe3   : > { %1615 = vmatpush1.bf16.msra.mxu1 %v1486_v58  ;;  %1646 = vmatprep.mubr.bf16.mxu1 %v20052_v0  ;;  %v1940_v58 = vsel %vm20058_vm1, %v1924_v50, 0 }
  0xe4   : > { %13706 = vmatmul.mubr.msk.bf16.vlgmr.msra.gmra.mrb[0].mxu0 %vm20057_vm2, %v1430_v55  ;;  %13715 = vmatprep.subr.msk.bf16.mxu1 %vm20058_vm1, %v1692_v59  ;;  %v1915_v59 = vsel %vm20046_vm9, %v15093_v46, %v1910_v43  ;;  %v2154_v26 = vsel %vm20045_vm10, %v2145_v54, %v15097_v1 }
  0xe5   : > { %1574 = vmatpush1.bf16.msra.mxu0 %v1480_v62  ;;  %1605 = vmatprep.mubr.bf16.mxu0 %v20052_v0  ;;  %v1934_v62 = vsel %vm20058_vm1, %v1922_v52, 0  ;;  %v1928_v14 = vpack.c.bf16 %v1915_v59, %v1915_v59  ;;  %v2155_v31 = vpack.c.bf16 %v2154_v26, %v2154_v26 }
  0xe6   : > { %13713 = vmatprep.subr.msk.bf16.mxu0 %vm20058_vm1, %v1690_v7  ;;  %4682 = vrot.lane.b32.xlu0 %v16020_v10, %s20032_s12  ;;  %v1701_v10 = vsel %vm20058_vm1, %v1689_v17, 0  ;;  %v230_v7 = vld [vmem:[%s20002_s2 + $0x38] sm:$0xff]  ;;  %v15106_v17 = vpop.permute.xlu1 %15105 }
  0xe7   : > { %15255 = vrot.lane.b32.xlu1 %v16238_v32, %s20032_s12  ;;  %v15259_v32 = vpack.i.bf16 %v16000_v5, %v16512_v23  ;;  %v1684_v5 = vsel %vm20047_vm8, %v15073_v44, %v15077_v4  ;;  %v1923_v44 = vpack.c.bf16 %v1920_v38, %v1920_v38  ;;  %v16616_v4 = vld [vmem:[%s15984_s20 + $0x30] sm:$0xff]  ;;  %v1896_v18 = vpack.c.bf16 %v230_v7, %v230_v7  ;;  %s15940_s12 = smov 108  }
  0xe8   : > { %v1693_v11 = vpack.c.bf16 %v1684_v5, %v1684_v5  ;;  %v16620_v9 = vpack.i.bf16 %v16616_v4, %v16531_v27  ;;  %v1952_v21 = vsel %vm20058_vm1, %v1928_v14, 0  ;;  %v15108_v5 = vunpack.i.h.bf16 %v15106_v17 }
  0xea   : > { %13712 = vmatmul.mubr.msk.bf16.vlgmr.msra.gmra.mrb[4].mxu1 %vm20057_vm2, %v1430_v55  ;;  %4905 = vrot.lane.b32.xlu0 %v16517_v24, %s20030_s14  ;;  %v1713_v42 = vsel %vm20058_vm1, %v1693_v11, 0  ;;  %v16638_v2 = vpop.permute.xlu1 %15110 }
  0xeb   : > { %1766 = vmatpush1.bf16.msra.mxu1 %v1707_v20  ;;  %1797 = vmatprep.mubr.bf16.mxu1 %v20052_v0  ;;  %v2153_v20 = vsel %vm20045_vm10, %v15097_v1, %v15098_v15  ;;  %v15112_v45 = vunpack.i.l.bf16 %v16638_v2  ;;  %v15113_v51 = vunpack.i.h.bf16 %v16638_v2 }
  0xec   : > { %13710 = vmatmul.mubr.msk.bf16.vlgmr.msra.gmra.mrb[4].mxu0 %vm20057_vm2, %v1430_v55  ;;  %13719 = vmatprep.subr.msk.bf16.mxu1 %vm20058_vm1, %v1696_v19  ;;  %v16588_v55 = vld [vmem:[%s15984_s20 + $0x38] sm:$0xff]  ;;  %v1926_v19 = vpack.c.bf16 %v1917_v3, %v1917_v3  ;;  %v2156_v25 = vpack.c.bf16 %v2153_v20, %v2153_v20 }
  0xed   : > { %1725 = vmatpush1.bf16.msra.mxu0 %v1701_v10  ;;  %1756 = vmatprep.mubr.bf16.mxu0 %v20052_v0  ;;  %v2152_v10 = vsel %vm20045_vm10, %v15098_v15, %v15102_v61  ;;  %v2386_v56 = vsel %vm20044_vm11, %v15112_v45, %v15113_v51 }
  0xee   : > { %13717 = vmatprep.subr.msk.bf16.mxu0 %vm20058_vm1, %v1694_v6  ;;  %15260 = vrot.lane.b32.xlu1 %v15259_v32, %s20030_s14  ;;  %v1946_v6 = vsel %vm20058_vm1, %v1926_v19, 0  ;;  %v2143_v32 = vpop.permute.xlu0 %2142  ;;  %v2157_v29 = vpack.c.bf16 %v2152_v10, %v2152_v10  ;;  %v16655_v33 = vpop.permute.xlu1 %15115 }
  0xef   : > { %15270 = vrot.lane.b32.xlu0 %v15269_v28, %s20030_s14  ;;  %v15107_v28 = vunpack.i.l.bf16 %v15106_v17  ;;  %v2147_v30 = vsel %vm20045_vm10, %v2143_v32, %v2145_v54  ;;  %v15118_v40 = vunpack.i.h.bf16 %v16655_v33  ;;  %v15117_v41 = vunpack.i.l.bf16 %v16655_v33 }
  0xf0   : > { %v2162_v38 = vpack.c.bf16 %v2147_v30, %v2147_v30 }
  0xf1   : > { %v2149_v11 = vsel %vm20045_vm10, %v15107_v28, %v15108_v5  ;;  %v2150_v46 = vsel %vm20045_vm10, %v15103_v60, %v15107_v28  ;;  %v2384_v52 = vsel %vm20044_vm11, %v15117_v41, %v15118_v40  ;;  %v2385_v60 = vsel %vm20044_vm11, %v15113_v51, %v15117_v41 }
  0xf2   : > { %13716 = vmatmul.mubr.msk.bf16.vlgmr.msra.gmra.mrb[0].mxu1 %vm20057_vm2, %v1663_v34  ;;  %15265 = vrot.lane.b32.xlu1 %v16553_v37, %s20030_s14  ;;  %v2160_v43 = vpack.c.bf16 %v2149_v11, %v2149_v11  ;;  %v2159_v54 = vpack.c.bf16 %v2150_v46, %v2150_v46  ;;  %v2390_v14 = vpack.c.bf16 %v2385_v60, %v2385_v60 }
  0xf3   : > { %1848 = vmatpush1.bf16.msra.mxu1 %v1719_v39  ;;  %1879 = vmatprep.mubr.bf16.mxu1 %v20052_v0  ;;  %v2173_v39 = vsel %vm20058_vm1, %v2157_v29, 0 }
  0xf4   : > { %13714 = vmatmul.mubr.msk.bf16.vlgmr.msra.gmra.mrb[0].mxu0 %vm20057_vm2, %v1663_v34  ;;  %13723 = vmatprep.subr.msk.bf16.mxu1 %vm20058_vm1, %v1925_v8  ;;  %v2148_v8 = vsel %vm20045_vm10, %v15108_v5, %v2143_v32  ;;  %v2179_v61 = vsel %vm20058_vm1, %v2159_v54, 0 }
  0xf5   : > { %1807 = vmatpush1.bf16.msra.mxu0 %v1713_v42  ;;  %1838 = vmatprep.mubr.bf16.mxu0 %v20052_v0  ;;  %v2167_v42 = vsel %vm20058_vm1, %v2155_v31, 0  ;;  %v2161_v47 = vpack.c.bf16 %v2148_v8, %v2148_v8 }
  0xf6   : > { %13721 = vmatprep.subr.msk.bf16.mxu0 %vm20058_vm1, %v1923_v44  ;;  %4915 = vrot.lane.b32.xlu1 %v16588_v55, %s20030_s14  ;;  %v231_v44 = vld [vmem:[%s20002_s2 + $0x40] sm:$0xff]  ;;  %s15941_s14 = smov 72  }
  0xf7   : > { %15275 = vrot.lane.b32.xlu0 %v16576_v49, %s20006_s7  ;;  %v2129_v53 = vpack.c.bf16 %v231_v44, %v231_v44 }
  0xfa   : > { %13720 = vmatmul.mubr.msk.bf16.vlgmr.msra.gmra.mrb[4].mxu1 %vm20057_vm2, %v1663_v34  ;;  %5138 = vrot.lane.b32.xlu1 %v16517_v24, %s20006_s7 }
  0xfb   : > { %1999 = vmatpush1.bf16.msra.mxu1 %v1940_v58  ;;  %2030 = vmatprep.mubr.bf16.mxu1 %v20052_v0  ;;  %v2391_v58 = vpack.c.bf16 %v2384_v52, %v2384_v52 }
  0xfc   : > { %13718 = vmatmul.mubr.msk.bf16.vlgmr.msra.gmra.mrb[4].mxu0 %vm20057_vm2, %v1663_v34  ;;  %13727 = vmatprep.subr.msk.bf16.mxu1 %vm20058_vm1, %v1929_v57  ;;  %v2378_v34 = vpop.permute.xlu0 %2377  ;;  %v2185_v57 = vsel %vm20058_vm1, %v2161_v47, 0 }
  0xfd   : > { %1958 = vmatpush1.bf16.msra.mxu0 %v1934_v62  ;;  %1989 = vmatprep.mubr.bf16.mxu0 %v20052_v0  ;;  %v2376_v62 = vpop.permute.xlu1 %2375  ;;  %v2387_v7 = vsel %vm20044_vm11, %v2378_v34, %v15112_v45 }
  0xfe   : > { %13725 = vmatprep.subr.msk.bf16.mxu0 %vm20058_vm1, %v1927_v63  ;;  %15280 = vrot.lane.b32.xlu0 %v16553_v37, %s20006_s7  ;;  %v2389_v63 = vpack.c.bf16 %v2386_v56, %v2386_v56  ;;  %v2380_v17 = vsel %vm20044_vm11, %v2376_v62, %v2378_v34  ;;  %v2388_v15 = vpack.c.bf16 %v2387_v7, %v2387_v7 }
  0xff   : > { %15285 = vrot.lane.b32.xlu1 %v16620_v9, %s20006_s7  ;;  %v2395_v20 = vpack.c.bf16 %v2380_v17, %v2380_v17 }
 0x100   : > { %v15121_v50 = vpop.permute.xlu0 %15120 }
 0x101   : > { %v15123_v1 = vunpack.i.h.bf16 %v15121_v50  ;;  %v15122_v3 = vunpack.i.l.bf16 %v15121_v50 }
 0x102   : > { %13724 = vmatmul.mubr.msk.bf16.vlgmr.msra.gmra.mrb[0].mxu1 %vm20057_vm2, %v1896_v18  ;;  %5148 = vrot.lane.b32.xlu0 %v16588_v55, %s20006_s7  ;;  %s20010_s7 = smov 27  }
 0x103   : > { %2081 = vmatpush1.bf16.msra.mxu1 %v1952_v21  ;;  %2112 = vmatprep.mubr.bf16.mxu1 %v20052_v0  ;;  %v2382_v19 = vsel %vm20044_vm11, %v15122_v3, %v15123_v1  ;;  %v2406_v21 = vsel %vm20058_vm1, %v2390_v14, 0  ;;  %v2383_v5 = vsel %vm20044_vm11, %v15118_v40, %v15122_v3 }
 0x104   : > { %13722 = vmatmul.mubr.msk.bf16.vlgmr.msra.gmra.mrb[0].mxu0 %vm20057_vm2, %v1896_v18  ;;  %13731 = vmatprep.subr.msk.bf16.mxu1 %vm20058_vm1, %v2158_v22  ;;  %v16698_v59 = vpop.permute.xlu0 %15125  ;;  %v2381_v22 = vsel %vm20044_vm11, %v15123_v1, %v2376_v62  ;;  %v2393_v32 = vpack.c.bf16 %v2382_v19, %v2382_v19  ;;  %v2392_v34 = vpack.c.bf16 %v2383_v5, %v2383_v5 }
 0x105   : > { %2040 = vmatpush1.bf16.msra.mxu0 %v1946_v6  ;;  %2071 = vmatprep.mubr.bf16.mxu0 %v20052_v0  ;;  %v2400_v6 = vsel %vm20058_vm1, %v2388_v15, 0  ;;  %v15127_v26 = vunpack.i.l.bf16 %v16698_v59  ;;  %v2394_v28 = vpack.c.bf16 %v2381_v22, %v2381_v22  ;;  %v15128_v30 = vunpack.i.h.bf16 %v16698_v59 }
 0x106   : > { %13729 = vmatprep.subr.msk.bf16.mxu0 %vm20058_vm1, %v2156_v25  ;;  %15290 = vrot.lane.b32.xlu1 %v16576_v49, %s20008_s17  ;;  %v232_v25 = vld [vmem:[%s20002_s2 + $0x48] sm:$0xff]  ;;  %v2412_v41 = vsel %vm20058_vm1, %v2392_v34, 0 }
 0x107   : > { %5371 = vrot.lane.b32.xlu0 %v16517_v24, %s20008_s17  ;;  %v2362_v33 = vpack.c.bf16 %v232_v25, %v232_v25  ;;  %v2619_v11 = vsel %vm20043_vm12, %v15127_v26, %v15128_v30 }
 0x108   : > { %v16715_v16 = vpop.permute.xlu0 %15130 }
 0x109   : > { %v15133_v2 = vunpack.i.h.bf16 %v16715_v16  ;;  %v15132_v10 = vunpack.i.l.bf16 %v16715_v16 }
 0x10a   : > { %13728 = vmatmul.mubr.msk.bf16.vlgmr.msra.gmra.mrb[4].mxu1 %vm20057_vm2, %v1896_v18  ;;  %15295 = vrot.lane.b32.xlu1 %v16553_v37, %s20008_s17 }
 0x10b   : > { %2232 = vmatpush1.bf16.msra.mxu1 %v2173_v39  ;;  %2263 = vmatprep.mubr.bf16.mxu1 %v20052_v0  ;;  %v2617_v31 = vsel %vm20043_vm12, %v15132_v10, %v15133_v2  ;;  %v2618_v40 = vsel %vm20043_vm12, %v15128_v30, %v15132_v10 }
 0x10c   : > { %13726 = vmatmul.mubr.msk.bf16.vlgmr.msra.gmra.mrb[4].mxu0 %vm20057_vm2, %v1896_v18  ;;  %13735 = vmatprep.subr.msk.bf16.mxu1 %vm20058_vm1, %v2162_v38  ;;  %v2611_v18 = vpop.permute.xlu1 %2610  ;;  %v2418_v38 = vsel %vm20058_vm1, %v2394_v28, 0  ;;  %v2624_v39 = vpack.c.bf16 %v2617_v31, %v2617_v31  ;;  %v2623_v47 = vpack.c.bf16 %v2618_v40, %v2618_v40 }
 0x10d   : > { %2191 = vmatpush1.bf16.msra.mxu0 %v2167_v42  ;;  %2222 = vmatprep.mubr.bf16.mxu0 %v20052_v0  ;;  %v2609_v42 = vpop.permute.xlu0 %2608  ;;  %v2620_v44 = vsel %vm20043_vm12, %v2611_v18, %v15127_v26 }
 0x10e   : > { %13733 = vmatprep.subr.msk.bf16.mxu0 %vm20058_vm1, %v2160_v43  ;;  %5381 = vrot.lane.b32.xlu1 %v16588_v55, %s20008_s17  ;;  %v2622_v43 = vpack.c.bf16 %v2619_v11, %v2619_v11  ;;  %v2613_v50 = vsel %vm20043_vm12, %v2609_v42, %v2611_v18  ;;  %v2621_v51 = vpack.c.bf16 %v2620_v44, %v2620_v44 }
 0x10f   : > { %15300 = vrot.lane.b32.xlu0 %v16620_v9, %s20008_s17  ;;  %s20014_s17 = smov 19   ;;  %v2628_v56 = vpack.c.bf16 %v2613_v50, %v2613_v50 }
 0x110   : > { %v15136_v29 = vpop.permute.xlu1 %15135 }
 0x111   : > { %v15138_v45 = vunpack.i.h.bf16 %v15136_v29  ;;  %v15137_v46 = vunpack.i.l.bf16 %v15136_v29 }
 0x112   : > { %13732 = vmatmul.mubr.msk.bf16.vlgmr.msra.gmra.mrb[0].mxu1 %vm20057_vm2, %v2129_v53  ;;  %5604 = vrot.lane.b32.xlu1 %v16517_v24, %s20010_s7 }
 0x113   : > { %2314 = vmatpush1.bf16.msra.mxu1 %v2185_v57  ;;  %2345 = vmatprep.mubr.bf16.mxu1 %v20052_v0  ;;  %v2615_v54 = vsel %vm20043_vm12, %v15137_v46, %v15138_v45  ;;  %v2639_v57 = vsel %vm20058_vm1, %v2623_v47, 0  ;;  %v2616_v1 = vsel %vm20043_vm12, %v15133_v2, %v15137_v46 }
 0x114   : > { %13730 = vmatmul.mubr.msk.bf16.vlgmr.msra.gmra.mrb[0].mxu0 %vm20057_vm2, %v2129_v53  ;;  %13739 = vmatprep.subr.msk.bf16.mxu1 %vm20058_vm1, %v2391_v58  ;;  %v16758_v8 = vpop.permute.xlu1 %15140  ;;  %v2614_v58 = vsel %vm20043_vm12, %v15138_v45, %v2609_v42  ;;  %v2626_v62 = vpack.c.bf16 %v2615_v54, %v2615_v54  ;;  %v2625_v18 = vpack.c.bf16 %v2616_v1, %v2616_v1 }
 0x115   : > { %2273 = vmatpush1.bf16.msra.mxu0 %v2179_v61  ;;  %2304 = vmatprep.mubr.bf16.mxu0 %v20052_v0  ;;  %v2633_v61 = vsel %vm20058_vm1, %v2621_v51, 0  ;;  %v15142_v7 = vunpack.i.l.bf16 %v16758_v8  ;;  %v2627_v3 = vpack.c.bf16 %v2614_v58, %v2614_v58  ;;  %v15143_v17 = vunpack.i.h.bf16 %v16758_v8 }
 0x116   : > { %13737 = vmatprep.subr.msk.bf16.mxu0 %vm20058_vm1, %v2389_v63  ;;  %15305 = vrot.lane.b32.xlu0 %v16576_v49, %s20010_s7  ;;  %v233_v63 = vld [vmem:[%s20002_s2 + $0x50] sm:$0xff]  ;;  %v2645_v10 = vsel %vm20058_vm1, %v2625_v18, 0  ;;  %v235_v18 = vld [vmem:[%s20002_s2 + $0x60] sm:$0xff] }
 0x117   : > { %15315 = vrot.lane.b32.xlu1 %v16620_v9, %s20010_s7  ;;  %v2595_v16 = vpack.c.bf16 %v233_v63, %v233_v63  ;;  %v2852_v19 = vsel %vm20042_vm13, %v15142_v7, %v15143_v17 }
 0x118   : > { %v16775_v52 = vpop.permute.xlu1 %15145 }
 0x119   : > { %v15148_v59 = vunpack.i.h.bf16 %v16775_v52  ;;  %v15147_v60 = vunpack.i.l.bf16 %v16775_v52 }
 0x11a   : > { %13736 = vmatmul.mubr.msk.bf16.vlgmr.msra.gmra.mrb[4].mxu1 %vm20057_vm2, %v2129_v53  ;;  %15310 = vrot.lane.b32.xlu0 %v16553_v37, %s20010_s7 }
 0x11b   : > { %2465 = vmatpush1.bf16.msra.mxu1 %v2406_v21  ;;  %2496 = vmatprep.mubr.bf16.mxu1 %v20052_v0  ;;  %v2850_v15 = vsel %vm20042_vm13, %v15147_v60, %v15148_v59  ;;  %v2851_v2 = vsel %vm20042_vm13, %v15143_v17, %v15147_v60 }
 0x11c   : > { %13734 = vmatmul.mubr.msk.bf16.vlgmr.msra.gmra.mrb[4].mxu0 %vm20057_vm2, %v2129_v53  ;;  %13743 = vmatprep.subr.msk.bf16.mxu1 %vm20058_vm1, %v2395_v20  ;;  %v2844_v53 = vpop.permute.xlu0 %2843  ;;  %v2651_v20 = vsel %vm20058_vm1, %v2627_v3, 0  ;;  %v2857_v21 = vpack.c.bf16 %v2850_v15, %v2850_v15  ;;  %v2856_v28 = vpack.c.bf16 %v2851_v2, %v2851_v2 }
 0x11d   : > { %2424 = vmatpush1.bf16.msra.mxu0 %v2400_v6  ;;  %2455 = vmatprep.mubr.bf16.mxu0 %v20052_v0  ;;  %v2842_v6 = vpop.permute.xlu1 %2841  ;;  %v2853_v25 = vsel %vm20042_vm13, %v2844_v53, %v15142_v7 }
 0x11e   : > { %13741 = vmatprep.subr.msk.bf16.mxu0 %vm20058_vm1, %v2393_v32  ;;  %5614 = vrot.lane.b32.xlu0 %v16588_v55, %s20010_s7  ;;  %s20012_s7 = smov 18   ;;  %v2855_v32 = vpack.c.bf16 %v2852_v19, %v2852_v19  ;;  %v2846_v29 = vsel %vm20042_vm13, %v2842_v6, %v2844_v53  ;;  %v2854_v30 = vpack.c.bf16 %v2853_v25, %v2853_v25  ;;  %v2872_v11 = vsel %vm20058_vm1, %v2856_v28, 0 }
 0x11f   : > { %15320 = vrot.lane.b32.xlu1 %v16576_v49, %s20014_s17  ;;  %v2861_v34 = vpack.c.bf16 %v2846_v29, %v2846_v29  ;;  %v3296_v25 = vpack.c.bf16 %v16572_v48, %v16572_v48  ;;  %v3302_v29 = vpack.c.bf16 %v16588_v55, %v16588_v55 }
 0x120   : > { %v15151_v14 = vpop.permute.xlu0 %15150  ;;  %v2866_v40 = vsel %vm20058_vm1, %v2854_v30, 0 }
 0x121   : > { %v15153_v26 = vunpack.i.h.bf16 %v15151_v14  ;;  %v15152_v5 = vunpack.i.l.bf16 %v15151_v14  ;;  %v3077_v42 = vpop.permute.xlu1 %3076 }
 0x122   : > { %13740 = vmatmul.mubr.msk.bf16.vlgmr.msra.gmra.mrb[0].mxu1 %vm20057_vm2, %v2362_v33  ;;  %5837 = vrot.lane.b32.xlu0 %v16517_v24, %s20014_s17 }
 0x123   : > { %2547 = vmatpush1.bf16.msra.mxu1 %v2418_v38  ;;  %2578 = vmatprep.mubr.bf16.mxu1 %v20052_v0  ;;  %v2847_v38 = vsel %vm20042_vm13, %v15153_v26, %v2842_v6  ;;  %v2849_v45 = vsel %vm20042_vm13, %v15148_v59, %v15152_v5 }
 0x124   : > { %13738 = vmatmul.mubr.msk.bf16.vlgmr.msra.gmra.mrb[0].mxu0 %vm20057_vm2, %v2362_v33  ;;  %13747 = vmatprep.subr.msk.bf16.mxu1 %vm20058_vm1, %v2624_v39  ;;  %v16818_v22 = vpop.permute.xlu0 %15155  ;;  %v2860_v46 = vpack.c.bf16 %v2847_v38, %v2847_v38  ;;  %v2858_v52 = vpack.c.bf16 %v2849_v45, %v2849_v45 }
 0x125   : > { %2506 = vmatpush1.bf16.msra.mxu0 %v2412_v41  ;;  %2537 = vmatprep.mubr.bf16.mxu0 %v20052_v0  ;;  %v15157_v44 = vunpack.i.l.bf16 %v16818_v22  ;;  %v15158_v47 = vunpack.i.h.bf16 %v16818_v22 }
 0x126   : > { %13745 = vmatprep.subr.msk.bf16.mxu0 %vm20058_vm1, %v2622_v43  ;;  %15325 = vrot.lane.b32.xlu1 %v16553_v37, %s20014_s17  ;;  %v234_v43 = vld [vmem:[%s20002_s2 + $0x58] sm:$0xff]  ;;  %v2884_v54 = vsel %vm20058_vm1, %v2860_v46, 0  ;;  %v2878_v59 = vsel %vm20058_vm1, %v2858_v52, 0 }
 0x127   : > { %15330 = vrot.lane.b32.xlu0 %v16620_v9, %s20014_s17  ;;  %v2828_v51 = vpack.c.bf16 %v234_v43, %v234_v43  ;;  %v3085_v53 = vsel %vm20016_vm14, %v15157_v44, %v15158_v47 }
 0x128   : > { %v16835_v31 = vpop.permute.xlu0 %15160 }
 0x129   : > { %v15163_v39 = vunpack.i.h.bf16 %v16835_v31  ;;  %v15162_v8 = vunpack.i.l.bf16 %v16835_v31 }
 0x12a   : > { %13744 = vmatmul.mubr.msk.bf16.vlgmr.msra.gmra.mrb[4].mxu1 %vm20057_vm2, %v2362_v33  ;;  %5847 = vrot.lane.b32.xlu1 %v16588_v55, %s20014_s17 }
 0x12b   : > { %2698 = vmatpush1.bf16.msra.mxu1 %v2639_v57  ;;  %2729 = vmatprep.mubr.bf16.mxu1 %v20052_v0  ;;  %v3083_v50 = vsel %vm20016_vm14, %v15162_v8, %v15163_v39  ;;  %v3084_v58 = vsel %vm20016_vm14, %v15158_v47, %v15162_v8 }
 0x12c   : > { %13742 = vmatmul.mubr.msk.bf16.vlgmr.msra.gmra.mrb[4].mxu0 %vm20057_vm2, %v2362_v33  ;;  %13751 = vmatprep.subr.msk.bf16.mxu1 %vm20058_vm1, %v2628_v56  ;;  %v2848_v33 = vsel %vm20042_vm13, %v15152_v5, %v15153_v26  ;;  %v15166_v56 = vpop.permute.xlu1 %15165  ;;  %v3090_v57 = vpack.c.bf16 %v3083_v50, %v3083_v50  ;;  %v3075_v60 = vpop.permute.xlu0 %3074  ;;  %v3089_v63 = vpack.c.bf16 %v3084_v58, %v3084_v58 }
 0x12d   : > { %2657 = vmatpush1.bf16.msra.mxu0 %v2633_v61  ;;  %2688 = vmatprep.mubr.bf16.mxu0 %v20052_v0  ;;  %v2859_v41 = vpack.c.bf16 %v2848_v33, %v2848_v33  ;;  %v3088_v61 = vpack.c.bf16 %v3085_v53, %v3085_v53  ;;  %v3079_v7 = vsel %vm20016_vm14, %v3075_v60, %v3077_v42 }
 0x12e   : > { %13749 = vmatprep.subr.msk.bf16.mxu0 %vm20058_vm1, %v2626_v62  ;;  %15335 = vrot.lane.b32.xlu0 %v16576_v49, %s20012_s7  ;;  %v15167_v62 = vunpack.i.l.bf16 %v15166_v56  ;;  %v3094_v3 = vpack.c.bf16 %v3079_v7, %v3079_v7  ;;  %v3105_v14 = vsel %vm20058_vm1, %v3089_v63, 0  ;;  %v3297_v26 = vpack.c.bf16 %v16517_v24, %v16517_v24  ;;  %v237_v63 = vld [vmem:[%s20002_s2 + $0x70] sm:$0xff] }
 0x12f   : > { %6070 = vrot.lane.b32.xlu1 %v16517_v24, %s20012_s7  ;;  %v3300_v33 = vpack.c.bf16 %v16531_v27, %v16531_v27 }
 0x130   : > { %v3082_v19 = vsel %vm20016_vm14, %v15163_v39, %v15167_v62  ;;  %v15171_v6 = vpop.permute.xlu1 %15170  ;;  %v3508_v48 = vpop.permute.xlu0 %3507  ;;  %v3313_v28 = vsel %vm20058_vm1, %v3297_v26, 0  ;;  %v3299_v39 = vpack.c.bf16 %v16549_v36, %v16549_v36 }
 0x131   : > { %v3091_v22 = vpack.c.bf16 %v3082_v19, %v3082_v19  ;;  %v15172_v8 = vunpack.i.l.bf16 %v15171_v6 }
 0x132   : > { %13748 = vmatmul.mubr.msk.bf16.vlgmr.msra.gmra.mrb[0].mxu1 %vm20057_vm2, %v2595_v16  ;;  %15340 = vrot.lane.b32.xlu0 %v16553_v37, %s20012_s7 }
 0x133   : > { %2780 = vmatpush1.bf16.msra.mxu1 %v2651_v20  ;;  %2811 = vmatprep.mubr.bf16.mxu1 %v20052_v0 }
 0x134   : > { %13746 = vmatmul.mubr.msk.bf16.vlgmr.msra.gmra.mrb[0].mxu0 %vm20057_vm2, %v2595_v16  ;;  %13755 = vmatprep.subr.msk.bf16.mxu1 %vm20058_vm1, %v2857_v21  ;;  %v3061_v21 = vpack.c.bf16 %v235_v18, %v235_v18  ;;  %v16926_v5 = vpop.permute.xlu1 %15175 }
 0x135   : > { %2739 = vmatpush1.bf16.msra.mxu0 %v2645_v10  ;;  %2770 = vmatprep.mubr.bf16.mxu0 %v20052_v0  ;;  %v3298_v10 = vpack.c.bf16 %v16546_v35, %v16546_v35  ;;  %v3295_v35 = vpack.c.bf16 %v16512_v23, %v16512_v23  ;;  %v15178_v30 = vunpack.i.h.bf16 %v16926_v5  ;;  %v236_v23 = vld [vmem:[%s20002_s2 + $0x68] sm:$0xff] }
 0x136   : > { %13753 = vmatprep.subr.msk.bf16.mxu0 %vm20058_vm1, %v2855_v32  ;;  %6080 = vrot.lane.b32.xlu0 %v16588_v55, %s20012_s7  ;;  %v3111_v32 = vsel %vm20058_vm1, %v3091_v22, 0  ;;  %v3294_v38 = vpack.c.bf16 %v236_v23, %v236_v23 }
 0x137   : > { %15345 = vrot.lane.b32.xlu1 %v16620_v9, %s20012_s7  ;;  %v3307_v31 = vsel %vm20058_vm1, %v3295_v35, 0 }
 0x138   : > { %v3518_v46 = vpop.permute.xlu1 %3517 }
 0x139   : > { %v3527_v52 = vsel %vm20017_vm15, %v3518_v46, %v15172_v8 }
 0x13a   : > { %13752 = vmatmul.mubr.msk.bf16.vlgmr.msra.gmra.mrb[4].mxu1 %vm20057_vm2, %v2595_v16  ;;  %6303 = vrot.lane.b32.xlu0 %v16517_v24, %s20028_s8  ;;  %v15177_v24 = vunpack.i.l.bf16 %v16926_v5  ;;  %v3535_v58 = vpack.c.bf16 %v3527_v52, %v3527_v52 }
 0x13b   : > { %2931 = vmatpush1.bf16.msra.mxu1 %v2872_v11  ;;  %2962 = vmatprep.mubr.bf16.mxu1 %v20052_v0  ;;  %v15181_v11 = vpop.permute.xlu0 %15180 }
 0x13c   : > { %13750 = vmatmul.mubr.msk.bf16.vlgmr.msra.gmra.mrb[4].mxu0 %vm20057_vm2, %v2595_v16  ;;  %13759 = vmatprep.subr.msk.bf16.mxu1 %vm20058_vm1, %v2861_v34  ;;  %v3301_v34 = vpack.c.bf16 %v16616_v4, %v16616_v4  ;;  %v3523_v27 = vsel %vm20017_vm15, %v15177_v24, %v15178_v30  ;;  %v3524_v43 = vsel %vm20017_vm15, %v3508_v48, %v15177_v24  ;;  %v15183_v36 = vunpack.i.h.bf16 %v15181_v11 }
 0x13d   : > { %2890 = vmatpush1.bf16.msra.mxu0 %v2866_v40  ;;  %2921 = vmatprep.mubr.bf16.mxu0 %v20052_v0  ;;  %v3531_v4 = vpack.c.bf16 %v3523_v27, %v3523_v27  ;;  %v15182_v47 = vunpack.i.l.bf16 %v15181_v11  ;;  %v238_v27 = vld [vmem:[%s20002_s2 + $0x78] sm:$0xff] }
 0x13e   : > { %13757 = vmatprep.subr.msk.bf16.mxu0 %vm20058_vm1, %v2859_v41  ;;  %15350 = vrot.lane.b32.xlu1 %v16576_v49, %s20028_s8  ;;  %v3086_v49 = vsel %vm20016_vm14, %v3077_v42, %v15157_v44  ;;  %v3325_v41 = vsel %vm20058_vm1, %v3301_v34, 0  ;;  %v3319_v44 = vsel %vm20058_vm1, %v3299_v39, 0 }
 0x13f   : > { %15360 = vrot.lane.b32.xlu0 %v16620_v9, %s20028_s8  ;;  %v15168_v9 = vunpack.i.h.bf16 %v15166_v56  ;;  %v16955_v42 = vpop.permute.xlu0 %15185  ;;  %v3741_v56 = vpop.permute.xlu1 %3740 }
 0x140   : > { %v15188_v7 = vunpack.i.h.bf16 %v16955_v42 }
 0x141   : > { %v3081_v1 = vsel %vm20016_vm14, %v15167_v62, %v15168_v9  ;;  %v3080_v17 = vsel %vm20016_vm14, %v15168_v9, %v3075_v60  ;;  %v3520_v60 = vsel %vm20017_vm15, %v15183_v36, %v3518_v46  ;;  %vm20018_vm14 = vcmp.lt.s32.totalorder %v16134_v13, 119 }
 0x142   : > { %13756 = vmatmul.mubr.msk.bf16.vlgmr.msra.gmra.mrb[0].mxu1 %vm20057_vm2, %v2828_v51  ;;  %15355 = vrot.lane.b32.xlu1 %v16553_v37, %s20028_s8  ;;  %v3087_v37 = vpack.c.bf16 %v3086_v49, %v3086_v49  ;;  %v3092_v16 = vpack.c.bf16 %v3081_v1, %v3081_v1  ;;  %v3093_v20 = vpack.c.bf16 %v3080_v17, %v3080_v17 }
 0x143   : > { %3013 = vmatpush1.bf16.msra.mxu1 %v2884_v54  ;;  %3044 = vmatprep.mubr.bf16.mxu1 %v20052_v0  ;;  %v16970_v54 = vpop.permute.xlu0 %15190  ;;  %v3534_v1 = vpack.c.bf16 %v3520_v60, %v3520_v60  ;;  %v3502_v17 = vpack.c.bf16 %v237_v63, %v237_v63  ;;  %v3758_v18 = vsel %vm20018_vm14, %v15188_v7, %v3741_v56 }
 0x144   : > { %13754 = vmatmul.mubr.msk.bf16.vlgmr.msra.gmra.mrb[0].mxu0 %vm20057_vm2, %v2828_v51  ;;  %13763 = vmatprep.subr.msk.bf16.mxu1 %vm20058_vm1, %v3090_v57  ;;  %v3099_v15 = vsel %vm20058_vm1, %v3087_v37, 0  ;;  %v3117_v2 = vsel %vm20058_vm1, %v3093_v20, 0  ;;  %v3521_v57 = vsel %vm20017_vm15, %v15182_v47, %v15183_v36  ;;  %v15192_v49 = vunpack.i.l.bf16 %v16970_v54 }
 0x145   : > { %2972 = vmatpush1.bf16.msra.mxu0 %v2878_v59  ;;  %3003 = vmatprep.mubr.bf16.mxu0 %v20052_v0  ;;  %v3533_v62 = vpack.c.bf16 %v3521_v57, %v3521_v57  ;;  %v3522_v37 = vsel %vm20017_vm15, %v15178_v30, %v15182_v47  ;;  %v3558_v19 = vsel %vm20058_vm1, %v3534_v1, 0 }
 0x146   : > { %13761 = vmatprep.subr.msk.bf16.mxu0 %vm20058_vm1, %v3088_v61  ;;  %6313 = vrot.lane.b32.xlu1 %v16588_v55, %s20028_s8  ;;  %v15173_v55 = vunpack.i.h.bf16 %v15171_v6  ;;  %v15193_v61 = vunpack.i.h.bf16 %v16970_v54  ;;  %v3757_v22 = vsel %vm20018_vm14, %v3741_v56, %v15192_v49  ;;  %s15942_s8 = smov 56  }
 0x147   : > { %v3751_v6 = vpop.permute.xlu0 %3750  ;;  %v3763_v35 = vpack.c.bf16 %v3757_v22, %v3757_v22 }
 0x148   : > { %v3525_v40 = vsel %vm20017_vm15, %v15173_v55, %v3508_v48  ;;  %v3526_v50 = vsel %vm20017_vm15, %v15172_v8, %v15173_v55  ;;  %vm20019_vm15 = vcmp.lt.s32.totalorder %v16134_v13, 118 }
 0x149   : > { %v3529_v45 = vpack.c.bf16 %v3525_v40, %v3525_v40  ;;  %v3528_v53 = vpack.c.bf16 %v3526_v50, %v3526_v50 }
 0x14a   : > { %13760 = vmatmul.mubr.msk.bf16.vlgmr.msra.gmra.mrb[4].mxu1 %vm20057_vm2, %v2828_v51 }
 0x14b   : > { %3164 = vmatpush1.bf16.msra.mxu1 %v3105_v14  ;;  %3195 = vmatprep.mubr.bf16.mxu1 %v20052_v0  ;;  %v3540_v9 = vsel %vm20058_vm1, %v3528_v53, 0  ;;  %v3756_v14 = vsel %vm20018_vm14, %v15192_v49, %v15193_v61 }
 0x14c   : > { %13758 = vmatmul.mubr.msk.bf16.vlgmr.msra.gmra.mrb[4].mxu0 %vm20057_vm2, %v2828_v51  ;;  %13767 = vmatprep.subr.msk.bf16.mxu1 %vm20058_vm1, %v3094_v3  ;;  %v3530_v51 = vpack.c.bf16 %v3524_v43, %v3524_v43  ;;  %v15196_v3 = vpop.permute.xlu1 %15195  ;;  %v3764_v20 = vpack.c.bf16 %v3756_v14, %v3756_v14  ;;  %v239_v14 = vld [vmem:[%s20002_s2 + $0x80] sm:$0xff] }
 0x14d   : > { %3123 = vmatpush1.bf16.msra.mxu0 %v3099_v15  ;;  %3154 = vmatprep.mubr.bf16.mxu0 %v20052_v0  ;;  %v3532_v15 = vpack.c.bf16 %v3522_v37, %v3522_v37 }
 0x14e   : > { %13765 = vmatprep.subr.msk.bf16.mxu0 %vm20058_vm1, %v3092_v16  ;;  %v3546_v59 = vsel %vm20058_vm1, %v3530_v51, 0  ;;  %v15187_v16 = vunpack.i.l.bf16 %v16955_v42 }
 0x150   : > { %v3759_v26 = vsel %vm20018_vm14, %v15187_v16, %v15188_v7  ;;  %v3760_v5 = vsel %vm20018_vm14, %v3751_v6, %v15187_v16 }
 0x151   : > { %v3761_v48 = vpack.c.bf16 %v3759_v26, %v3759_v26  ;;  %v3768_v24 = vpack.c.bf16 %v3760_v5, %v3760_v5 }
 0x152   : > { %13764 = vmatmul.mubr.msk.bf16.vlgmr.msra.gmra.mrb[0].mxu1 %vm20057_vm2, %v3061_v21 }
 0x153   : > { %3246 = vmatpush1.bf16.msra.mxu1 %v3117_v2  ;;  %3277 = vmatprep.mubr.bf16.mxu1 %v20052_v0  ;;  %v3552_v2 = vsel %vm20058_vm1, %v3532_v15, 0  ;;  %v3773_v34 = vsel %vm20058_vm1, %v3761_v48, 0 }
 0x154   : > { %13762 = vmatmul.mubr.msk.bf16.vlgmr.msra.gmra.mrb[0].mxu0 %vm20057_vm2, %v3061_v21  ;;  %13771 = vmatprep.subr.msk.bf16.mxu1 %vm20058_vm1, %v3298_v10  ;;  %v3762_v10 = vpack.c.bf16 %v3758_v18, %v3758_v18 }
 0x155   : > { %3205 = vmatpush1.bf16.msra.mxu0 %v3111_v32  ;;  %3236 = vmatprep.mubr.bf16.mxu0 %v20052_v0  ;;  %v15198_v32 = vunpack.i.h.bf16 %v15196_v3 }
 0x156   : > { %13769 = vmatprep.subr.msk.bf16.mxu0 %vm20058_vm1, %v3296_v25  ;;  %v15197_v25 = vunpack.i.l.bf16 %v15196_v3 }
 0x158   : > { %v3754_v30 = vsel %vm20018_vm14, %v15197_v25, %v15198_v32  ;;  %v3755_v39 = vsel %vm20018_vm14, %v15193_v61, %v15197_v25 }
 0x159   : > { %v3766_v11 = vpack.c.bf16 %v3754_v30, %v3754_v30  ;;  %v3765_v42 = vpack.c.bf16 %v3755_v39, %v3755_v39 }
 0x15a   : > { %13768 = vmatmul.mubr.msk.bf16.vlgmr.msra.gmra.mrb[4].mxu1 %vm20057_vm2, %v3061_v21 }
 0x15b   : > { %3372 = vmatpush1.bf16.msra.mxu1 %v3313_v28  ;;  %3403 = vmatprep.mubr.bf16.mxu1 %v20052_v0  ;;  %v3785_v50 = vsel %vm20058_vm1, %v3765_v42, 0 }
 0x15c   : > { %13766 = vmatmul.mubr.msk.bf16.vlgmr.msra.gmra.mrb[4].mxu0 %vm20057_vm2, %v3061_v21  ;;  %13775 = vmatprep.subr.msk.bf16.mxu1 %vm20058_vm1, %v3302_v29  ;;  %v16999_v21 = vpop.permute.xlu1 %15200  ;;  %v3974_v29 = vpop.permute.xlu0 %3973 }
 0x15d   : > { %3331 = vmatpush1.bf16.msra.mxu0 %v3307_v31  ;;  %3362 = vmatprep.mubr.bf16.mxu0 %v20052_v0  ;;  %v3779_v31 = vsel %vm20058_vm1, %v3763_v35, 0  ;;  %v15202_v43 = vunpack.i.l.bf16 %v16999_v21 }
 0x15e   : > { %13773 = vmatprep.subr.msk.bf16.mxu0 %vm20058_vm1, %v3300_v33  ;;  %v3753_v33 = vsel %vm20018_vm14, %v15198_v32, %v3751_v6  ;;  %vm20020_vm14 = vcmp.lt.s32.totalorder %v16134_v13, 117 }
 0x15f   : > { %v3767_v8 = vpack.c.bf16 %v3753_v33, %v3753_v33 }
 0x160   : > { %v17014_v28 = vpop.permute.xlu1 %15205  ;;  %v15211_v40 = vpop.permute.xlu0 %15210 }
 0x161   : > { %v15208_v23 = vunpack.i.h.bf16 %v17014_v28  ;;  %v15207_v55 = vunpack.i.l.bf16 %v17014_v28  ;;  %v15213_v53 = vunpack.i.h.bf16 %v15211_v40  ;;  %v15212_v54 = vunpack.i.l.bf16 %v15211_v40 }
 0x162   : > { %13772 = vmatmul.mubr.msk.bf16.vlgmr.msra.gmra.mrb[0].mxu1 %vm20057_vm2, %v3294_v38 }
 0x163   : > { %3454 = vmatpush1.bf16.msra.mxu1 %v3325_v41  ;;  %3485 = vmatprep.mubr.bf16.mxu1 %v20052_v0  ;;  %v3989_v41 = vsel %vm20019_vm15, %v15207_v55, %v15208_v23  ;;  %v3990_v47 = vsel %vm20019_vm15, %v3974_v29, %v15207_v55  ;;  %v3987_v49 = vsel %vm20019_vm15, %v15212_v54, %v15213_v53 }
 0x164   : > { %13770 = vmatmul.mubr.msk.bf16.vlgmr.msra.gmra.mrb[0].mxu0 %vm20057_vm2, %v3294_v38  ;;  %13779 = vmatprep.subr.msk.bf16.mxu1 %vm20058_vm1, %v3531_v4  ;;  %v3735_v4 = vpack.c.bf16 %v238_v27, %v238_v27  ;;  %v3997_v46 = vpack.c.bf16 %v3989_v41, %v3989_v41  ;;  %v17043_v36 = vpop.permute.xlu0 %15215  ;;  %v3984_v52 = vpop.permute.xlu1 %3983  ;;  %v3996_v57 = vpack.c.bf16 %v3990_v47, %v3990_v47  ;;  %v240_v41 = vld [vmem:[%s20002_s2 + $0x88] sm:$0xff] }
 0x165   : > { %3413 = vmatpush1.bf16.msra.mxu0 %v3319_v44  ;;  %3444 = vmatprep.mubr.bf16.mxu0 %v20052_v0  ;;  %v3986_v63 = vsel %vm20019_vm15, %v15213_v53, %v3984_v52  ;;  %v3999_v3 = vpack.c.bf16 %v3987_v49, %v3987_v49  ;;  %v3988_v15 = vsel %vm20019_vm15, %v15208_v23, %v15212_v54  ;;  %v15217_v22 = vunpack.i.l.bf16 %v17043_v36 }
 0x166   : > { %13777 = vmatprep.subr.msk.bf16.mxu0 %vm20058_vm1, %v3529_v45  ;;  %v3791_v45 = vsel %vm20058_vm1, %v3767_v8, 0  ;;  %v4000_v16 = vpack.c.bf16 %v3986_v63, %v3986_v63 }
 0x168   : > { %v17058_v60 = vpop.permute.xlu0 %15220  ;;  %v4207_v61 = vpop.permute.xlu1 %4206 }
 0x169   : > { %v15223_v7 = vunpack.i.h.bf16 %v17058_v60  ;;  %v15222_v37 = vunpack.i.l.bf16 %v17058_v60 }
 0x16a   : > { %13776 = vmatmul.mubr.msk.bf16.vlgmr.msra.gmra.mrb[4].mxu1 %vm20057_vm2, %v3294_v38 }
 0x16b   : > { %3605 = vmatpush1.bf16.msra.mxu1 %v3546_v59  ;;  %3636 = vmatprep.mubr.bf16.mxu1 %v20052_v0  ;;  %v4223_v25 = vsel %vm20020_vm14, %v4207_v61, %v15222_v37 }
 0x16c   : > { %13774 = vmatmul.mubr.msk.bf16.vlgmr.msra.gmra.mrb[4].mxu0 %vm20057_vm2, %v3294_v38  ;;  %13783 = vmatprep.subr.msk.bf16.mxu1 %vm20058_vm1, %v3535_v58  ;;  %v15203_v38 = vunpack.i.h.bf16 %v16999_v21  ;;  %v3993_v58 = vsel %vm20019_vm15, %v3984_v52, %v15202_v43  ;;  %v15226_v18 = vpop.permute.xlu1 %15225  ;;  %v3998_v21 = vpack.c.bf16 %v3988_v15, %v3988_v15  ;;  %v4217_v5 = vpop.permute.xlu0 %4216  ;;  %v4229_v30 = vpack.c.bf16 %v4223_v25, %v4223_v25 }
 0x16d   : > { %3564 = vmatpush1.bf16.msra.mxu0 %v3540_v9  ;;  %3595 = vmatprep.mubr.bf16.mxu0 %v20052_v0  ;;  %v4001_v9 = vpack.c.bf16 %v3993_v58, %v3993_v58  ;;  %v15228_v48 = vunpack.i.h.bf16 %v15226_v18  ;;  %v15227_v28 = vunpack.i.l.bf16 %v15226_v18 }
 0x16e   : > { %13781 = vmatprep.subr.msk.bf16.mxu0 %vm20058_vm1, %v3533_v62  ;;  %v3991_v44 = vsel %vm20019_vm15, %v15203_v38, %v3974_v29  ;;  %v3992_v56 = vsel %vm20019_vm15, %v15202_v43, %v15203_v38  ;;  %v4012_v62 = vsel %vm20058_vm1, %v3996_v57, 0  ;;  %v4018_v26 = vsel %vm20058_vm1, %v3998_v21, 0 }
 0x16f   : > { %v3995_v51 = vpack.c.bf16 %v3991_v44, %v3991_v44  ;;  %v3994_v59 = vpack.c.bf16 %v3992_v56, %v3992_v56  ;;  %v4220_v55 = vsel %vm20020_vm14, %v15227_v28, %v15228_v48  ;;  %v4219_v27 = vsel %vm20020_vm14, %v15228_v48, %v4217_v5 }
 0x170   : > { %v17087_v32 = vpop.permute.xlu1 %15230  ;;  %v4440_v23 = vpop.permute.xlu0 %4439  ;;  %v4232_v40 = vpack.c.bf16 %v4220_v55, %v4220_v55  ;;  %vm20021_vm15 = vcmp.lt.s32.totalorder %v16134_v13, 39  ;;  %v4221_v42 = vsel %vm20020_vm14, %v15223_v7, %v15227_v28  ;;  %v4233_v43 = vpack.c.bf16 %v4219_v27, %v4219_v27 }
 0x171   : > { %v4006_v1 = vsel %vm20058_vm1, %v3994_v59, 0  ;;  %v15232_v47 = vunpack.i.l.bf16 %v17087_v32 }
 0x172   : > { %13780 = vmatmul.mubr.msk.bf16.vlgmr.msra.gmra.mrb[0].mxu1 %vm20057_vm2, %v3502_v17 }
 0x173   : > { %3687 = vmatpush1.bf16.msra.mxu1 %v3558_v19  ;;  %3718 = vmatprep.mubr.bf16.mxu1 %v20052_v0  ;;  %v4222_v19 = vsel %vm20020_vm14, %v15222_v37, %v15223_v7 }
 0x174   : > { %13778 = vmatmul.mubr.msk.bf16.vlgmr.msra.gmra.mrb[0].mxu0 %vm20057_vm2, %v3502_v17  ;;  %13787 = vmatprep.subr.msk.bf16.mxu1 %vm20058_vm1, %v3764_v20  ;;  %v3968_v20 = vpack.c.bf16 %v239_v14, %v239_v14  ;;  %v4230_v6 = vpack.c.bf16 %v4222_v19, %v4222_v19  ;;  %v17102_v33 = vpop.permute.xlu1 %15235  ;;  %v15241_v44 = vpop.permute.xlu0 %15240  ;;  %v241_v19 = vld [vmem:[%s20002_s2 + $0x90] sm:$0xff] }
 0x175   : > { %3646 = vmatpush1.bf16.msra.mxu0 %v3552_v2  ;;  %3677 = vmatprep.mubr.bf16.mxu0 %v20052_v0  ;;  %v15238_v38 = vunpack.i.h.bf16 %v17102_v33  ;;  %v15237_v39 = vunpack.i.l.bf16 %v17102_v33  ;;  %v15243_v59 = vunpack.i.h.bf16 %v15241_v44  ;;  %v15242_v60 = vunpack.i.l.bf16 %v15241_v44 }
 0x176   : > { %13785 = vmatprep.subr.msk.bf16.mxu0 %vm20058_vm1, %v3762_v10  ;;  %v4024_v10 = vsel %vm20058_vm1, %v4000_v16, 0 }
 0x177   : > { %v4456_v54 = vsel %vm20021_vm15, %v4440_v23, %v15237_v39  ;;  %v4453_v37 = vsel %vm20021_vm15, %v15242_v60, %v15243_v59  ;;  %v4454_v21 = vsel %vm20021_vm15, %v15238_v38, %v15242_v60 }
 0x178   : > { %v17131_v53 = vpop.permute.xlu0 %15245  ;;  %v4450_v58 = vpop.permute.xlu1 %4449  ;;  %v4462_v49 = vpack.c.bf16 %v4456_v54, %v4456_v54  ;;  %v4465_v18 = vpack.c.bf16 %v4453_v37, %v4453_v37 }
 0x179   : > { %v4452_v14 = vsel %vm20021_vm15, %v15243_v59, %v4450_v58  ;;  %v15247_v25 = vunpack.i.l.bf16 %v17131_v53 }
 0x17a   : > { %13784 = vmatmul.mubr.msk.bf16.vlgmr.msra.gmra.mrb[4].mxu1 %vm20057_vm2, %v3502_v17 }
 0x17b   : > { %3838 = vmatpush1.bf16.msra.mxu1 %v3779_v31  ;;  %3869 = vmatprep.mubr.bf16.mxu1 %v20052_v0 }
 0x17c   : > { %13782 = vmatmul.mubr.msk.bf16.vlgmr.msra.gmra.mrb[4].mxu0 %vm20057_vm2, %v3502_v17  ;;  %13791 = vmatprep.subr.msk.bf16.mxu1 %vm20058_vm1, %v3768_v24  ;;  %v15218_v17 = vunpack.i.h.bf16 %v17043_v36  ;;  %v4226_v24 = vsel %vm20020_vm14, %v4217_v5, %v15217_v22  ;;  %v4231_v36 = vpack.c.bf16 %v4221_v42, %v4221_v42  ;;  %v17146_v63 = vpop.permute.xlu0 %15250  ;;  %v4673_v7 = vpop.permute.xlu1 %4672 }
 0x17d   : > { %3797 = vmatpush1.bf16.msra.mxu0 %v3773_v34  ;;  %3828 = vmatprep.mubr.bf16.mxu0 %v20052_v0  ;;  %v4234_v34 = vpack.c.bf16 %v4226_v24, %v4226_v24  ;;  %v15252_v15 = vunpack.i.l.bf16 %v17146_v63 }
 0x17e   : > { %13789 = vmatprep.subr.msk.bf16.mxu0 %vm20058_vm1, %v3766_v11  ;;  %v4224_v2 = vsel %vm20020_vm14, %v15218_v17, %v4207_v61  ;;  %v4225_v29 = vsel %vm20020_vm14, %v15217_v22, %v15218_v17  ;;  %v4245_v11 = vsel %vm20058_vm1, %v4229_v30, 0  ;;  %v4251_v56 = vsel %vm20058_vm1, %v4231_v36, 0 }
 0x17f   : > { %v4228_v35 = vpack.c.bf16 %v4224_v2, %v4224_v2  ;;  %v4227_v31 = vpack.c.bf16 %v4225_v29, %v4225_v29  ;;  %v15253_v17 = vunpack.i.h.bf16 %v17146_v63  ;;  %vm20022_vm14 = vcmp.lt.s32.totalorder %v16134_v13, 38 }
 0x180   : > { %v4466_v22 = vpack.c.bf16 %v4452_v14, %v4452_v14  ;;  %v15256_v2 = vpop.permute.xlu1 %15255  ;;  %v4689_v28 = vsel %vm20022_vm14, %v4673_v7, %v15252_v15  ;;  %v4683_v24 = vpop.permute.xlu0 %4682 }
 0x181   : > { %v4239_v8 = vsel %vm20058_vm1, %v4227_v31, 0  ;;  %v15258_v31 = vunpack.i.h.bf16 %v15256_v2  ;;  %v15257_v33 = vunpack.i.l.bf16 %v15256_v2  ;;  %v4695_v55 = vpack.c.bf16 %v4689_v28, %v4689_v28 }
 0x182   : > { %13788 = vmatmul.mubr.msk.bf16.vlgmr.msra.gmra.mrb[0].mxu1 %vm20057_vm2, %v3735_v4 }
 0x183   : > { %3920 = vmatpush1.bf16.msra.mxu1 %v3791_v45  ;;  %3951 = vmatprep.mubr.bf16.mxu1 %v20052_v0  ;;  %v4455_v45 = vsel %vm20021_vm15, %v15237_v39, %v15238_v38  ;;  %v4686_v39 = vsel %vm20022_vm14, %v15257_v33, %v15258_v31  ;;  %v4687_v36 = vsel %vm20022_vm14, %v15253_v17, %v15257_v33 }
 0x184   : > { %13786 = vmatmul.mubr.msk.bf16.vlgmr.msra.gmra.mrb[0].mxu0 %vm20057_vm2, %v3735_v4  ;;  %13795 = vmatprep.subr.msk.bf16.mxu1 %vm20058_vm1, %v3997_v46  ;;  %v4201_v46 = vpack.c.bf16 %v240_v41, %v240_v41  ;;  %v4463_v52 = vpack.c.bf16 %v4455_v45, %v4455_v45  ;;  %v17175_v48 = vpop.permute.xlu1 %15260  ;;  %v4906_v38 = vpop.permute.xlu0 %4905  ;;  %v4685_v41 = vsel %vm20022_vm14, %v15258_v31, %v4683_v24  ;;  %v242_v45 = vld [vmem:[%s20002_s2 + $0x98] sm:$0xff] }
 0x185   : > { %3879 = vmatpush1.bf16.msra.mxu0 %v3785_v50  ;;  %3910 = vmatprep.mubr.bf16.mxu0 %v20052_v0  ;;  %v4698_v44 = vpack.c.bf16 %v4686_v39, %v4686_v39  ;;  %v15262_v54 = vunpack.i.l.bf16 %v17175_v48 }
 0x186   : > { %13793 = vmatprep.subr.msk.bf16.mxu0 %vm20058_vm1, %v3995_v51  ;;  %v4257_v51 = vsel %vm20058_vm1, %v4233_v43, 0 }
 0x188   : > { %v17190_v27 = vpop.permute.xlu1 %15265 }
 0x189   : > { %v15267_v42 = vunpack.i.l.bf16 %v17190_v27 }
 0x18a   : > { %13792 = vmatmul.mubr.msk.bf16.vlgmr.msra.gmra.mrb[4].mxu1 %vm20057_vm2, %v3735_v4 }
 0x18b   : > { %4071 = vmatpush1.bf16.msra.mxu1 %v4012_v62  ;;  %4102 = vmatprep.mubr.bf16.mxu1 %v20052_v0 }
 0x18c   : > { %13790 = vmatmul.mubr.msk.bf16.vlgmr.msra.gmra.mrb[4].mxu0 %vm20057_vm2, %v3735_v4  ;;  %13799 = vmatprep.subr.msk.bf16.mxu1 %vm20058_vm1, %v4001_v9  ;;  %v15233_v4 = vunpack.i.h.bf16 %v17087_v32  ;;  %v4459_v9 = vsel %vm20021_vm15, %v4450_v58, %v15232_v47  ;;  %v4464_v32 = vpack.c.bf16 %v4454_v21, %v4454_v21 }
 0x18d   : > { %4030 = vmatpush1.bf16.msra.mxu0 %v4006_v1  ;;  %4061 = vmatprep.mubr.bf16.mxu0 %v20052_v0  ;;  %v4467_v1 = vpack.c.bf16 %v4459_v9, %v4459_v9  ;;  %v4916_v9 = vpop.permute.xlu1 %4915 }
 0x18e   : > { %13797 = vmatprep.subr.msk.bf16.mxu0 %vm20058_vm1, %v3999_v3  ;;  %v4457_v50 = vsel %vm20021_vm15, %v15233_v4, %v4440_v23  ;;  %v4458_v61 = vsel %vm20021_vm15, %v15232_v47, %v15233_v4  ;;  %v4478_v3 = vsel %vm20058_vm1, %v4462_v49, 0  ;;  %v4484_v29 = vsel %vm20058_vm1, %v4464_v32, 0 }
 0x18f   : > { %v4461_v57 = vpack.c.bf16 %v4457_v50, %v4457_v50  ;;  %v4460_v62 = vpack.c.bf16 %v4458_v61, %v4458_v61  ;;  %v15268_v4 = vunpack.i.h.bf16 %v17190_v27  ;;  %vm20023_vm15 = vcmp.lt.s32.totalorder %v16134_v13, 37  ;;  %v15271_v50 = vpop.permute.xlu0 %15270 }
 0x190   : > { %v4699_v47 = vpack.c.bf16 %v4685_v41, %v4685_v41  ;;  %v4922_v60 = vsel %vm20023_vm15, %v4906_v38, %v15267_v42  ;;  %v15272_v63 = vunpack.i.l.bf16 %v15271_v50 }
 0x191   : > { %v4472_v16 = vsel %vm20058_vm1, %v4460_v62, 0  ;;  %v15273_v62 = vunpack.i.h.bf16 %v15271_v50  ;;  %v4928_v37 = vpack.c.bf16 %v4922_v60, %v4922_v60 }
 0x192   : > { %13796 = vmatmul.mubr.msk.bf16.vlgmr.msra.gmra.mrb[0].mxu1 %vm20057_vm2, %v3968_v20  ;;  %v4920_v32 = vsel %vm20023_vm15, %v15268_v4, %v15272_v63 }
 0x193   : > { %4153 = vmatpush1.bf16.msra.mxu1 %v4024_v10  ;;  %4184 = vmatprep.mubr.bf16.mxu1 %v20052_v0  ;;  %v4688_v10 = vsel %vm20022_vm14, %v15252_v15, %v15253_v17  ;;  %v17219_v59 = vpop.permute.xlu0 %15275  ;;  %v5139_v17 = vpop.permute.xlu1 %5138  ;;  %v4919_v15 = vsel %vm20023_vm15, %v15272_v63, %v15273_v62 }
 0x194   : > { %13794 = vmatmul.mubr.msk.bf16.vlgmr.msra.gmra.mrb[0].mxu0 %vm20057_vm2, %v3968_v20  ;;  %13803 = vmatprep.subr.msk.bf16.mxu1 %vm20058_vm1, %v4230_v6  ;;  %v4434_v6 = vpack.c.bf16 %v241_v19, %v241_v19  ;;  %v4696_v5 = vpack.c.bf16 %v4688_v10, %v4688_v10  ;;  %v4918_v19 = vsel %vm20023_vm15, %v15273_v62, %v4916_v9  ;;  %v243_v10 = vld [vmem:[%s20002_s2 + $0xa0] sm:$0xff]  ;;  %v15277_v28 = vunpack.i.l.bf16 %v17219_v59 }
 0x195   : > { %4112 = vmatpush1.bf16.msra.mxu0 %v4018_v26  ;;  %4143 = vmatprep.mubr.bf16.mxu0 %v20052_v0  ;;  %v4931_v2 = vpack.c.bf16 %v4919_v15, %v4919_v15 }
 0x196   : > { %13801 = vmatprep.subr.msk.bf16.mxu0 %vm20058_vm1, %v4228_v35  ;;  %v4490_v35 = vsel %vm20058_vm1, %v4466_v22, 0 }
 0x197   : > { %v17234_v14 = vpop.permute.xlu0 %15280 }
 0x198   : > { %v15282_v21 = vunpack.i.l.bf16 %v17234_v14 }
 0x19a   : > { %13800 = vmatmul.mubr.msk.bf16.vlgmr.msra.gmra.mrb[4].mxu1 %vm20057_vm2, %v3968_v20 }
 0x19b   : > { %4304 = vmatpush1.bf16.msra.mxu1 %v4245_v11  ;;  %4335 = vmatprep.mubr.bf16.mxu1 %v20052_v0 }
 0x19c   : > { %13798 = vmatmul.mubr.msk.bf16.vlgmr.msra.gmra.mrb[4].mxu0 %vm20057_vm2, %v3968_v20  ;;  %13807 = vmatprep.subr.msk.bf16.mxu1 %vm20058_vm1, %v4234_v34  ;;  %v15248_v20 = vunpack.i.h.bf16 %v17131_v53  ;;  %v4692_v34 = vsel %vm20022_vm14, %v4683_v24, %v15247_v25  ;;  %v4697_v53 = vpack.c.bf16 %v4687_v36, %v4687_v36 }
 0x19d   : > { %4263 = vmatpush1.bf16.msra.mxu0 %v4239_v8  ;;  %4294 = vmatprep.mubr.bf16.mxu0 %v20052_v0  ;;  %v4700_v8 = vpack.c.bf16 %v4692_v34, %v4692_v34  ;;  %v5149_v34 = vpop.permute.xlu0 %5148 }
 0x19e   : > { %13805 = vmatprep.subr.msk.bf16.mxu0 %vm20058_vm1, %v4232_v40  ;;  %v4690_v26 = vsel %vm20022_vm14, %v15248_v20, %v4673_v7  ;;  %v4691_v23 = vsel %vm20022_vm14, %v15247_v25, %v15248_v20  ;;  %v4711_v40 = vsel %vm20058_vm1, %v4695_v55, 0  ;;  %v4717_v61 = vsel %vm20058_vm1, %v4697_v53, 0 }
 0x19f   : > { %v4694_v30 = vpack.c.bf16 %v4690_v26, %v4690_v26  ;;  %v4693_v11 = vpack.c.bf16 %v4691_v23, %v4691_v23  ;;  %v15283_v20 = vunpack.i.h.bf16 %v17234_v14  ;;  %vm20024_vm14 = vcmp.lt.s32.totalorder %v16134_v13, 29  ;;  %v15286_v26 = vpop.permute.xlu1 %15285 }
 0x1a0   : > { %v4932_v25 = vpack.c.bf16 %v4918_v19, %v4918_v19  ;;  %v5155_v33 = vsel %vm20024_vm14, %v5139_v17, %v15282_v21  ;;  %v15287_v27 = vunpack.i.l.bf16 %v15286_v26 }
 0x1a1   : > { %v4705_v43 = vsel %vm20058_vm1, %v4693_v11, 0  ;;  %v15288_v11 = vunpack.i.h.bf16 %v15286_v26  ;;  %v5161_v39 = vpack.c.bf16 %v5155_v33, %v5155_v33 }
 0x1a2   : > { %13804 = vmatmul.mubr.msk.bf16.vlgmr.msra.gmra.mrb[0].mxu1 %vm20057_vm2, %v4201_v46  ;;  %v5153_v53 = vsel %vm20024_vm14, %v15283_v20, %v15287_v27 }
 0x1a3   : > { %4386 = vmatpush1.bf16.msra.mxu1 %v4257_v51  ;;  %4417 = vmatprep.mubr.bf16.mxu1 %v20052_v0  ;;  %v4921_v51 = vsel %vm20023_vm15, %v15267_v42, %v15268_v4  ;;  %v17263_v31 = vpop.permute.xlu1 %15290  ;;  %v5372_v4 = vpop.permute.xlu0 %5371  ;;  %v5152_v42 = vsel %vm20024_vm14, %v15287_v27, %v15288_v11 }
 0x1a4   : > { %13802 = vmatmul.mubr.msk.bf16.vlgmr.msra.gmra.mrb[0].mxu0 %vm20057_vm2, %v4201_v46  ;;  %13811 = vmatprep.subr.msk.bf16.mxu1 %vm20058_vm1, %v4463_v52  ;;  %v4667_v52 = vpack.c.bf16 %v242_v45, %v242_v45  ;;  %v4929_v58 = vpack.c.bf16 %v4921_v51, %v4921_v51  ;;  %v5151_v45 = vsel %vm20024_vm14, %v15288_v11, %v5149_v34  ;;  %v244_v51 = vld [vmem:[%s20002_s2 + $0xa8] sm:$0xff]  ;;  %v15292_v60 = vunpack.i.l.bf16 %v17263_v31 }
 0x1a5   : > { %4345 = vmatpush1.bf16.msra.mxu0 %v4251_v56  ;;  %4376 = vmatprep.mubr.bf16.mxu0 %v20052_v0  ;;  %v5164_v50 = vpack.c.bf16 %v5152_v42, %v5152_v42 }
 0x1a6   : > { %13809 = vmatprep.subr.msk.bf16.mxu0 %vm20058_vm1, %v4461_v57  ;;  %v4723_v57 = vsel %vm20058_vm1, %v4699_v47, 0 }
 0x1a7   : > { %v17278_v41 = vpop.permute.xlu1 %15295 }
 0x1a8   : > { %v15297_v36 = vunpack.i.l.bf16 %v17278_v41 }
 0x1aa   : > { %13808 = vmatmul.mubr.msk.bf16.vlgmr.msra.gmra.mrb[4].mxu1 %vm20057_vm2, %v4201_v46 }
 0x1ab   : > { %4537 = vmatpush1.bf16.msra.mxu1 %v4478_v3  ;;  %4568 = vmatprep.mubr.bf16.mxu1 %v20052_v0 }
 0x1ac   : > { %13806 = vmatmul.mubr.msk.bf16.vlgmr.msra.gmra.mrb[4].mxu0 %vm20057_vm2, %v4201_v46  ;;  %13815 = vmatprep.subr.msk.bf16.mxu1 %vm20058_vm1, %v4467_v1  ;;  %v15263_v46 = vunpack.i.h.bf16 %v17175_v48  ;;  %v4925_v1 = vsel %vm20023_vm15, %v4916_v9, %v15262_v54  ;;  %v4930_v48 = vpack.c.bf16 %v4920_v32, %v4920_v32 }
 0x1ad   : > { %4496 = vmatpush1.bf16.msra.mxu0 %v4472_v16  ;;  %4527 = vmatprep.mubr.bf16.mxu0 %v20052_v0  ;;  %v4933_v16 = vpack.c.bf16 %v4925_v1, %v4925_v1  ;;  %v5382_v1 = vpop.permute.xlu1 %5381 }
 0x1ae   : > { %13813 = vmatprep.subr.msk.bf16.mxu0 %vm20058_vm1, %v4465_v18  ;;  %v4923_v56 = vsel %vm20023_vm15, %v15263_v46, %v4906_v38  ;;  %v4924_v7 = vsel %vm20023_vm15, %v15262_v54, %v15263_v46  ;;  %v4944_v18 = vsel %vm20058_vm1, %v4928_v37, 0  ;;  %v4950_v23 = vsel %vm20058_vm1, %v4930_v48, 0 }
 0x1af   : > { %v4927_v49 = vpack.c.bf16 %v4923_v56, %v4923_v56  ;;  %v4926_v3 = vpack.c.bf16 %v4924_v7, %v4924_v7  ;;  %v15298_v46 = vunpack.i.h.bf16 %v17278_v41  ;;  %vm20025_vm15 = vcmp.lt.s32.totalorder %v16134_v13, 28  ;;  %v15301_v56 = vpop.permute.xlu0 %15300 }
 0x1b0   : > { %v5165_v54 = vpack.c.bf16 %v5151_v45, %v5151_v45  ;;  %v5388_v63 = vsel %vm20025_vm15, %v5372_v4, %v15297_v36  ;;  %v15302_v14 = vunpack.i.l.bf16 %v15301_v56 }
 0x1b1   : > { %v4938_v22 = vsel %vm20058_vm1, %v4926_v3, 0  ;;  %v15303_v3 = vunpack.i.h.bf16 %v15301_v56  ;;  %v5394_v15 = vpack.c.bf16 %v5388_v63, %v5388_v63 }
 0x1b2   : > { %13812 = vmatmul.mubr.msk.bf16.vlgmr.msra.gmra.mrb[0].mxu1 %vm20057_vm2, %v4434_v6  ;;  %v5386_v48 = vsel %vm20025_vm15, %v15298_v46, %v15302_v14 }
 0x1b3   : > { %4619 = vmatpush1.bf16.msra.mxu1 %v4490_v35  ;;  %4650 = vmatprep.mubr.bf16.mxu1 %v20052_v0  ;;  %v5154_v35 = vsel %vm20024_vm14, %v15282_v21, %v15283_v20  ;;  %v17307_v62 = vpop.permute.xlu0 %15305  ;;  %v5605_v20 = vpop.permute.xlu1 %5604  ;;  %v5385_v21 = vsel %vm20025_vm15, %v15302_v14, %v15303_v3 }
 0x1b4   : > { %13810 = vmatmul.mubr.msk.bf16.vlgmr.msra.gmra.mrb[0].mxu0 %vm20057_vm2, %v4434_v6  ;;  %13819 = vmatprep.subr.msk.bf16.mxu1 %vm20058_vm1, %v4696_v5  ;;  %v4900_v5 = vpack.c.bf16 %v243_v10, %v243_v10  ;;  %v5162_v24 = vpack.c.bf16 %v5154_v35, %v5154_v35  ;;  %v5384_v10 = vsel %vm20025_vm15, %v15303_v3, %v5382_v1  ;;  %v245_v35 = vld [vmem:[%s20002_s2 + $0xb0] sm:$0xff]  ;;  %v15307_v33 = vunpack.i.l.bf16 %v17307_v62 }
 0x1b5   : > { %4578 = vmatpush1.bf16.msra.mxu0 %v4484_v29  ;;  %4609 = vmatprep.mubr.bf16.mxu0 %v20052_v0  ;;  %v5397_v26 = vpack.c.bf16 %v5385_v21, %v5385_v21 }
 0x1b6   : > { %13817 = vmatprep.subr.msk.bf16.mxu0 %vm20058_vm1, %v4694_v30  ;;  %v4956_v30 = vsel %vm20058_vm1, %v4932_v25, 0 }
 0x1b7   : > { %v17322_v19 = vpop.permute.xlu0 %15310 }
 0x1b8   : > { %v15312_v32 = vunpack.i.l.bf16 %v17322_v19 }
 0x1ba   : > { %13816 = vmatmul.mubr.msk.bf16.vlgmr.msra.gmra.mrb[4].mxu1 %vm20057_vm2, %v4434_v6 }
 0x1bb   : > { %4770 = vmatpush1.bf16.msra.mxu1 %v4711_v40  ;;  %4801 = vmatprep.mubr.bf16.mxu1 %v20052_v0 }
 0x1bc   : > { %13814 = vmatmul.mubr.msk.bf16.vlgmr.msra.gmra.mrb[4].mxu0 %vm20057_vm2, %v4434_v6  ;;  %13823 = vmatprep.subr.msk.bf16.mxu1 %vm20058_vm1, %v4700_v8  ;;  %v15278_v6 = vunpack.i.h.bf16 %v17219_v59  ;;  %v5158_v8 = vsel %vm20024_vm14, %v5149_v34, %v15277_v28  ;;  %v5163_v59 = vpack.c.bf16 %v5153_v53, %v5153_v53 }
 0x1bd   : > { %4729 = vmatpush1.bf16.msra.mxu0 %v4705_v43  ;;  %4760 = vmatprep.mubr.bf16.mxu0 %v20052_v0  ;;  %v5166_v43 = vpack.c.bf16 %v5158_v8, %v5158_v8  ;;  %v5615_v8 = vpop.permute.xlu0 %5614 }
 0x1be   : > { %13821 = vmatprep.subr.msk.bf16.mxu0 %vm20058_vm1, %v4698_v44  ;;  %v5156_v29 = vsel %vm20024_vm14, %v15278_v6, %v5139_v17  ;;  %v5157_v38 = vsel %vm20024_vm14, %v15277_v28, %v15278_v6  ;;  %v5177_v44 = vsel %vm20058_vm1, %v5161_v39, 0  ;;  %v5183_v7 = vsel %vm20058_vm1, %v5163_v59, 0 }
 0x1bf   : > { %v5160_v55 = vpack.c.bf16 %v5156_v29, %v5156_v29  ;;  %v5159_v40 = vpack.c.bf16 %v5157_v38, %v5157_v38  ;;  %v15313_v6 = vunpack.i.h.bf16 %v17322_v19  ;;  %vm20026_vm14 = vcmp.lt.s32.totalorder %v16134_v13, 27  ;;  %v15316_v29 = vpop.permute.xlu1 %15315 }
 0x1c0   : > { %v5398_v28 = vpack.c.bf16 %v5384_v10, %v5384_v10  ;;  %v5621_v27 = vsel %vm20026_vm14, %v5605_v20, %v15312_v32  ;;  %v15317_v41 = vunpack.i.l.bf16 %v15316_v29 }
 0x1c1   : > { %v5171_v47 = vsel %vm20058_vm1, %v5159_v40, 0  ;;  %v15318_v40 = vunpack.i.h.bf16 %v15316_v29  ;;  %v5627_v42 = vpack.c.bf16 %v5621_v27, %v5621_v27 }
 0x1c2   : > { %13820 = vmatmul.mubr.msk.bf16.vlgmr.msra.gmra.mrb[0].mxu1 %vm20057_vm2, %v4667_v52  ;;  %v5619_v59 = vsel %vm20026_vm14, %v15313_v6, %v15317_v41 }
 0x1c3   : > { %4852 = vmatpush1.bf16.msra.mxu1 %v4723_v57  ;;  %4883 = vmatprep.mubr.bf16.mxu1 %v20052_v0  ;;  %v5387_v57 = vsel %vm20025_vm15, %v15297_v36, %v15298_v46  ;;  %v17351_v11 = vpop.permute.xlu1 %15320  ;;  %v5838_v46 = vpop.permute.xlu0 %5837  ;;  %v5618_v36 = vsel %vm20026_vm14, %v15317_v41, %v15318_v40 }
 0x1c4   : > { %13818 = vmatmul.mubr.msk.bf16.vlgmr.msra.gmra.mrb[0].mxu0 %vm20057_vm2, %v4667_v52  ;;  %13827 = vmatprep.subr.msk.bf16.mxu1 %vm20058_vm1, %v4929_v58  ;;  %v5133_v58 = vpack.c.bf16 %v244_v51, %v244_v51  ;;  %v5395_v9 = vpack.c.bf16 %v5387_v57, %v5387_v57  ;;  %v5617_v51 = vsel %vm20026_vm14, %v15318_v40, %v5615_v8  ;;  %v246_v57 = vld [vmem:[%s20002_s2 + $0xb8] sm:$0xff]  ;;  %v15322_v63 = vunpack.i.l.bf16 %v17351_v11 }
 0x1c5   : > { %4811 = vmatpush1.bf16.msra.mxu0 %v4717_v61  ;;  %4842 = vmatprep.mubr.bf16.mxu0 %v20052_v0  ;;  %v5630_v56 = vpack.c.bf16 %v5618_v36, %v5618_v36 }
 0x1c6   : > { %13825 = vmatprep.subr.msk.bf16.mxu0 %vm20058_vm1, %v4927_v49  ;;  %v5189_v49 = vsel %vm20058_vm1, %v5165_v54, 0 }
 0x1c7   : > { %v17366_v45 = vpop.permute.xlu1 %15325 }
 0x1c8   : > { %v15327_v53 = vunpack.i.l.bf16 %v17366_v45 }
 0x1ca   : > { %13824 = vmatmul.mubr.msk.bf16.vlgmr.msra.gmra.mrb[4].mxu1 %vm20057_vm2, %v4667_v52 }
 0x1cb   : > { %5003 = vmatpush1.bf16.msra.mxu1 %v4944_v18  ;;  %5034 = vmatprep.mubr.bf16.mxu1 %v20052_v0 }
 0x1cc   : > { %13822 = vmatmul.mubr.msk.bf16.vlgmr.msra.gmra.mrb[4].mxu0 %vm20057_vm2, %v4667_v52  ;;  %13831 = vmatprep.subr.msk.bf16.mxu1 %vm20058_vm1, %v4933_v16  ;;  %v15293_v52 = vunpack.i.h.bf16 %v17263_v31  ;;  %v5391_v16 = vsel %vm20025_vm15, %v5382_v1, %v15292_v60  ;;  %v5396_v31 = vpack.c.bf16 %v5386_v48, %v5386_v48 }
 0x1cd   : > { %4962 = vmatpush1.bf16.msra.mxu0 %v4938_v22  ;;  %4993 = vmatprep.mubr.bf16.mxu0 %v20052_v0  ;;  %v5399_v22 = vpack.c.bf16 %v5391_v16, %v5391_v16  ;;  %v5848_v16 = vpop.permute.xlu1 %5847 }
 0x1ce   : > { %13829 = vmatprep.subr.msk.bf16.mxu0 %vm20058_vm1, %v4931_v2  ;;  %v5389_v61 = vsel %vm20025_vm15, %v15293_v52, %v5372_v4  ;;  %v5390_v17 = vsel %vm20025_vm15, %v15292_v60, %v15293_v52  ;;  %v5410_v2 = vsel %vm20058_vm1, %v5394_v15, 0  ;;  %v5416_v38 = vsel %vm20058_vm1, %v5396_v31, 0 }
 0x1cf   : > { %v5393_v37 = vpack.c.bf16 %v5389_v61, %v5389_v61  ;;  %v5392_v18 = vpack.c.bf16 %v5390_v17, %v5390_v17  ;;  %v15328_v52 = vunpack.i.h.bf16 %v17366_v45  ;;  %vm20027_vm15 = vcmp.lt.s32.totalorder %v16134_v13, 19  ;;  %v15331_v61 = vpop.permute.xlu0 %15330 }
 0x1d0   : > { %v5631_v60 = vpack.c.bf16 %v5617_v51, %v5617_v51  ;;  %v5854_v14 = vsel %vm20027_vm15, %v5838_v46, %v15327_v53  ;;  %v15332_v19 = vunpack.i.l.bf16 %v15331_v61 }
 0x1d1   : > { %v5404_v25 = vsel %vm20058_vm1, %v5392_v18, 0  ;;  %v15333_v18 = vunpack.i.h.bf16 %v15331_v61  ;;  %v5860_v21 = vpack.c.bf16 %v5854_v14, %v5854_v14 }
 0x1d2   : > { %13828 = vmatmul.mubr.msk.bf16.vlgmr.msra.gmra.mrb[0].mxu1 %vm20057_vm2, %v4900_v5  ;;  %v5852_v31 = vsel %vm20027_vm15, %v15328_v52, %v15332_v19 }
 0x1d3   : > { %5085 = vmatpush1.bf16.msra.mxu1 %v4956_v30  ;;  %5116 = vmatprep.mubr.bf16.mxu1 %v20052_v0  ;;  %v5620_v30 = vsel %vm20026_vm14, %v15312_v32, %v15313_v6  ;;  %v17395_v3 = vpop.permute.xlu0 %15335  ;;  %v6071_v6 = vpop.permute.xlu1 %6070  ;;  %v5851_v32 = vsel %vm20027_vm15, %v15332_v19, %v15333_v18 }
 0x1d4   : > { %13826 = vmatmul.mubr.msk.bf16.vlgmr.msra.gmra.mrb[0].mxu0 %vm20057_vm2, %v4900_v5  ;;  %13835 = vmatprep.subr.msk.bf16.mxu1 %vm20058_vm1, %v5162_v24  ;;  %v5366_v24 = vpack.c.bf16 %v245_v35, %v245_v35  ;;  %v5628_v34 = vpack.c.bf16 %v5620_v30, %v5620_v30  ;;  %v5850_v35 = vsel %vm20027_vm15, %v15333_v18, %v5848_v16  ;;  %v247_v30 = vld [vmem:[%s20002_s2 + $0xc0] sm:$0xff]  ;;  %v15337_v27 = vunpack.i.l.bf16 %v17395_v3 }
 0x1d5   : > { %5044 = vmatpush1.bf16.msra.mxu0 %v4950_v23  ;;  %5075 = vmatprep.mubr.bf16.mxu0 %v20052_v0  ;;  %v5863_v29 = vpack.c.bf16 %v5851_v32, %v5851_v32 }
 0x1d6   : > { %13833 = vmatprep.subr.msk.bf16.mxu0 %vm20058_vm1, %v5160_v55  ;;  %v5422_v55 = vsel %vm20058_vm1, %v5398_v28, 0 }
 0x1d7   : > { %v17410_v10 = vpop.permute.xlu0 %15340 }
 0x1d8   : > { %v15342_v48 = vunpack.i.l.bf16 %v17410_v10 }
 0x1da   : > { %13832 = vmatmul.mubr.msk.bf16.vlgmr.msra.gmra.mrb[4].mxu1 %vm20057_vm2, %v4900_v5 }
 0x1db   : > { %5236 = vmatpush1.bf16.msra.mxu1 %v5177_v44  ;;  %5267 = vmatprep.mubr.bf16.mxu1 %v20052_v0 }
 0x1dc   : > { %13830 = vmatmul.mubr.msk.bf16.vlgmr.msra.gmra.mrb[4].mxu0 %vm20057_vm2, %v4900_v5  ;;  %13839 = vmatprep.subr.msk.bf16.mxu1 %vm20058_vm1, %v5166_v43  ;;  %v15308_v5 = vunpack.i.h.bf16 %v17307_v62  ;;  %v5624_v43 = vsel %vm20026_vm14, %v5615_v8, %v15307_v33  ;;  %v5629_v62 = vpack.c.bf16 %v5619_v59, %v5619_v59 }
 0x1dd   : > { %5195 = vmatpush1.bf16.msra.mxu0 %v5171_v47  ;;  %5226 = vmatprep.mubr.bf16.mxu0 %v20052_v0  ;;  %v5632_v47 = vpack.c.bf16 %v5624_v43, %v5624_v43  ;;  %v6081_v43 = vpop.permute.xlu0 %6080 }
 0x1de   : > { %13837 = vmatprep.subr.msk.bf16.mxu0 %vm20058_vm1, %v5164_v50  ;;  %v5622_v23 = vsel %vm20026_vm14, %v15308_v5, %v5605_v20  ;;  %v5623_v4 = vsel %vm20026_vm14, %v15307_v33, %v15308_v5  ;;  %v5643_v50 = vsel %vm20058_vm1, %v5627_v42, 0  ;;  %v5649_v17 = vsel %vm20058_vm1, %v5629_v62, 0 }
 0x1df   : > { %v5626_v39 = vpack.c.bf16 %v5622_v23, %v5622_v23  ;;  %v5625_v44 = vpack.c.bf16 %v5623_v4, %v5623_v4  ;;  %v15343_v5 = vunpack.i.h.bf16 %v17410_v10  ;;  %vm20041_vm14 = vcmp.lt.s32.totalorder %v16134_v13, 18  ;;  %v15346_v23 = vpop.permute.xlu1 %15345 }
 0x1e0   : > { %v5864_v33 = vpack.c.bf16 %v5850_v35, %v5850_v35  ;;  %v6087_v41 = vsel %vm20041_vm14, %v6071_v6, %v15342_v48  ;;  %v15347_v45 = vunpack.i.l.bf16 %v15346_v23 }
 0x1e1   : > { %v5637_v54 = vsel %vm20058_vm1, %v5625_v44, 0  ;;  %v15348_v44 = vunpack.i.h.bf16 %v15346_v23  ;;  %v6093_v36 = vpack.c.bf16 %v6087_v41, %v6087_v41  ;;  %v6304_v61 = vpop.permute.xlu0 %6303 }
 0x1e2   : > { %13836 = vmatmul.mubr.msk.bf16.vlgmr.msra.gmra.mrb[0].mxu1 %vm20057_vm2, %v5133_v58  ;;  %v6085_v62 = vsel %vm20041_vm14, %v15343_v5, %v15347_v45 }
 0x1e3   : > { %5318 = vmatpush1.bf16.msra.mxu1 %v5189_v49  ;;  %5349 = vmatprep.mubr.bf16.mxu1 %v20052_v0  ;;  %v5853_v49 = vsel %vm20027_vm15, %v15327_v53, %v15328_v52  ;;  %v17439_v40 = vpop.permute.xlu1 %15350  ;;  %v6084_v52 = vsel %vm20041_vm14, %v15347_v45, %v15348_v44 }
 0x1e4   : > { %13834 = vmatmul.mubr.msk.bf16.vlgmr.msra.gmra.mrb[0].mxu0 %vm20057_vm2, %v5133_v58  ;;  %13843 = vmatprep.subr.msk.bf16.mxu1 %vm20058_vm1, %v5395_v9  ;;  %v5599_v9 = vpack.c.bf16 %v246_v57, %v246_v57  ;;  %v5861_v1 = vpack.c.bf16 %v5853_v49, %v5853_v49  ;;  %v248_v49 = vld [vmem:[%s20002_s2 + $0xc8] sm:$0xff] }
 0x1e5   : > { %5277 = vmatpush1.bf16.msra.mxu0 %v5183_v7  ;;  %5308 = vmatprep.mubr.bf16.mxu0 %v20052_v0 }
 0x1e6   : > { %13841 = vmatprep.subr.msk.bf16.mxu0 %vm20058_vm1, %v5393_v37  ;;  %v5655_v37 = vsel %vm20058_vm1, %v5631_v60, 0  ;;  %v6096_v60 = vpack.c.bf16 %v6084_v52, %v6084_v52 }
 0x1e7   : > { %v15356_v51 = vpop.permute.xlu1 %15355 }
 0x1e8   : > { %v15358_v57 = vunpack.i.h.bf16 %v15356_v51 }
 0x1ea   : > { %13840 = vmatmul.mubr.msk.bf16.vlgmr.msra.gmra.mrb[4].mxu1 %vm20057_vm2, %v5133_v58 }
 0x1eb   : > { %5469 = vmatpush1.bf16.msra.mxu1 %v5410_v2  ;;  %5500 = vmatprep.mubr.bf16.mxu1 %v20052_v0 }
 0x1ec   : > { %13838 = vmatmul.mubr.msk.bf16.vlgmr.msra.gmra.mrb[4].mxu0 %vm20057_vm2, %v5133_v58  ;;  %13847 = vmatprep.subr.msk.bf16.mxu1 %vm20058_vm1, %v5399_v22  ;;  %v15323_v58 = vunpack.i.h.bf16 %v17351_v11  ;;  %v5857_v22 = vsel %vm20027_vm15, %v5848_v16, %v15322_v63  ;;  %v5862_v11 = vpack.c.bf16 %v5852_v31, %v5852_v31 }
 0x1ed   : > { %5428 = vmatpush1.bf16.msra.mxu0 %v5404_v25  ;;  %5459 = vmatprep.mubr.bf16.mxu0 %v20052_v0  ;;  %v5865_v25 = vpack.c.bf16 %v5857_v22, %v5857_v22 }
 0x1ee   : > { %13845 = vmatprep.subr.msk.bf16.mxu0 %vm20058_vm1, %v5397_v26  ;;  %v5855_v7 = vsel %vm20027_vm15, %v15323_v58, %v5838_v46  ;;  %v5856_v20 = vsel %vm20027_vm15, %v15322_v63, %v15323_v58  ;;  %v5876_v26 = vsel %vm20058_vm1, %v5860_v21, 0  ;;  %v5882_v4 = vsel %vm20058_vm1, %v5862_v11, 0  ;;  %v6314_v21 = vpop.permute.xlu1 %6313 }
 0x1ef   : > { %v5859_v15 = vpack.c.bf16 %v5855_v7, %v5855_v7  ;;  %v5858_v2 = vpack.c.bf16 %v5856_v20, %v5856_v20  ;;  %v15357_v58 = vunpack.i.l.bf16 %v15356_v51  ;;  %vm20040_vm15 = vcmp.lt.s32.totalorder %v16134_v13, 17 }
 0x1f0   : > { %v17520_v11 = vshrl.u32 %v294_v12, 7  ;;  %v17541_v12 = vld [vmem:[%s20001_s1 + $0x18] sm:$0xff] }
 0x1f1   : > { %v5870_v28 = vsel %vm20058_vm1, %v5858_v2, 0  ;;  %v6319_v7 = vsel %vm20040_vm15, %v15357_v58, %v15358_v57  ;;  %v6320_v18 = vsel %vm20040_vm15, %v6304_v61, %v15357_v58  ;;  %v17578_v58 = vld [vmem:[%s20001_s1 + $0x28] sm:$0xff] }
 0x1f2   : > { %13844 = vmatmul.mubr.msk.bf16.vlgmr.msra.gmra.mrb[0].mxu1 %vm20057_vm2, %v5366_v24  ;;  %v6327_v16 = vpack.c.bf16 %v6319_v7, %v6319_v7  ;;  %20128 = vst [vmem:[#allocation2_spill] sm:$0xff] %v17520_v11 }
 0x1f3   : > { %5551 = vmatpush1.bf16.msra.mxu1 %v5422_v55  ;;  %5582 = vmatprep.mubr.bf16.mxu1 %v20052_v0  ;;  %v6086_v55 = vsel %vm20041_vm14, %v15342_v48, %v15343_v5 }
 0x1f4   : > { %13842 = vmatmul.mubr.msk.bf16.vlgmr.msra.gmra.mrb[0].mxu0 %vm20057_vm2, %v5366_v24  ;;  %13851 = vmatprep.subr.msk.bf16.mxu1 %vm20058_vm1, %v5628_v34  ;;  %v5832_v34 = vpack.c.bf16 %v247_v30, %v247_v30  ;;  %v6094_v8 = vpack.c.bf16 %v6086_v55, %v6086_v55  ;;  %v249_v30 = vld [vmem:[%s20002_s2 + $0xd0] sm:$0xff] }
 0x1f5   : > { %5510 = vmatpush1.bf16.msra.mxu0 %v5416_v38  ;;  %5541 = vmatprep.mubr.bf16.mxu0 %v20052_v0 }
 0x1f6   : > { %13849 = vmatprep.subr.msk.bf16.mxu0 %vm20058_vm1, %v5626_v39  ;;  %v5888_v39 = vsel %vm20058_vm1, %v5864_v33, 0  ;;  %v6298_v33 = vpack.c.bf16 %v249_v30, %v249_v30 }
 0x1fa   : > { %13848 = vmatmul.mubr.msk.bf16.vlgmr.msra.gmra.mrb[4].mxu1 %vm20057_vm2, %v5366_v24 }
 0x1fb   : > { %5702 = vmatpush1.bf16.msra.mxu1 %v5643_v50  ;;  %5733 = vmatprep.mubr.bf16.mxu1 %v20052_v0 }
 0x1fc   : > { %13846 = vmatmul.mubr.msk.bf16.vlgmr.msra.gmra.mrb[4].mxu0 %vm20057_vm2, %v5366_v24  ;;  %13855 = vmatprep.subr.msk.bf16.mxu1 %vm20058_vm1, %v5632_v47  ;;  %v15338_v24 = vunpack.i.h.bf16 %v17395_v3  ;;  %v6090_v47 = vsel %vm20041_vm14, %v6081_v43, %v15337_v27  ;;  %v15352_v3 = vunpack.i.l.bf16 %v17439_v40 }
 0x1fd   : > { %5661 = vmatpush1.bf16.msra.mxu0 %v5637_v54  ;;  %5692 = vmatprep.mubr.bf16.mxu0 %v20052_v0  ;;  %v6098_v53 = vpack.c.bf16 %v6090_v47, %v6090_v47  ;;  %v6109_v54 = vsel %vm20058_vm1, %v6093_v36, 0 }
 0x1fe   : > { %13853 = vmatprep.subr.msk.bf16.mxu0 %vm20058_vm1, %v5630_v56  ;;  %v6088_v38 = vsel %vm20041_vm14, %v15338_v24, %v6071_v6  ;;  %v6089_v46 = vsel %vm20041_vm14, %v15337_v27, %v15338_v24  ;;  %v6083_v56 = vsel %vm20041_vm14, %v15348_v44, %v6081_v43  ;;  %v6326_v6 = vpack.c.bf16 %v6320_v18, %v6320_v18 }
 0x1ff   : > { %v6092_v42 = vpack.c.bf16 %v6088_v38, %v6088_v38  ;;  %v6091_v50 = vpack.c.bf16 %v6089_v46, %v6089_v46  ;;  %v6097_v63 = vpack.c.bf16 %v6083_v56, %v6083_v56  ;;  %v6323_v32 = vsel %vm20040_vm15, %v6314_v21, %v15352_v3  ;;  %v17526_v38 = vld [vmem:[%s20001_s1] sm:$0xff] }
 0x200   : > { %v6331_v35 = vpack.c.bf16 %v6323_v32, %v6323_v32  ;;  %v6342_v5 = vsel %vm20058_vm1, %v6326_v6, 0  ;;  %v6533_v27 = vsub.s32 0, %v17520_v11  ;;  %vm215_vm14 = vcmp.ne.f32.partialorder %v17526_v38, 0.0 }
 0x201   : > { %v6103_v59 = vsel %vm20058_vm1, %v6091_v50, 0 }
 0x202   : > { %13852 = vmatmul.mubr.msk.bf16.vlgmr.msra.gmra.mrb[0].mxu1 %vm20057_vm2, %v5599_v9  ;;  %v17557_v44 = vrot.slane %v17541_v12, %v6533_v27 }
 0x203   : > { %5784 = vmatpush1.bf16.msra.mxu1 %v5655_v37  ;;  %5815 = vmatprep.mubr.bf16.mxu1 %v20052_v0  ;;  %v6065_v37 = vpack.c.bf16 %v248_v49, %v248_v49  ;;  %v17586_v49 = vld [vmem:[%s20001_s1 + $0x30] sm:$0xff] }
 0x204   : > { %13850 = vmatmul.mubr.msk.bf16.vlgmr.msra.gmra.mrb[0].mxu0 %vm20057_vm2, %v5599_v9  ;;  %13859 = vmatprep.subr.msk.bf16.mxu1 %vm20058_vm1, %v5861_v1  ;;  %v6095_v1 = vpack.c.bf16 %v6085_v62, %v6085_v62  ;;  %vm221_vm12 = vcmp.ne.f32.partialorder %v17586_v49, 0.0 }
 0x205   : > { %5743 = vmatpush1.bf16.msra.mxu0 %v5649_v17  ;;  %5774 = vmatprep.mubr.bf16.mxu0 %v20052_v0  ;;  %v6121_v17 = vsel %vm20058_vm1, %v6097_v63, 0 }
 0x206   : > { %13857 = vmatprep.subr.msk.bf16.mxu0 %vm20058_vm1, %v5859_v15  ;;  %v15361_v15 = vpop.permute.xlu0 %15360  ;;  %v6115_v19 = vsel %vm20058_vm1, %v6095_v1, 0  ;;  %v17595_v1 = vld [vmem:[%s20001_s1 + $0x38] sm:$0xff] }
 0x207   : > { %v15363_v22 = vunpack.i.h.bf16 %v15361_v15  ;;  %v15362_v2 = vunpack.i.l.bf16 %v15361_v15  ;;  %vm222_vm11 = vcmp.ne.f32.partialorder %v17595_v1, 0.0 }
 0x209   : > { %v6316_v48 = vsel %vm20040_vm15, %v15363_v22, %v6314_v21  ;;  %v6318_v24 = vsel %vm20040_vm15, %v15358_v57, %v15362_v2  ;;  %v17605_v21 = vrot.slane %v17595_v1, %v6533_v27 }
 0x20a   : > { %13856 = vmatmul.mubr.msk.bf16.vlgmr.msra.gmra.mrb[4].mxu1 %vm20057_vm2, %v5599_v9  ;;  %v6330_v31 = vpack.c.bf16 %v6316_v48, %v6316_v48  ;;  %v6328_v23 = vpack.c.bf16 %v6318_v24, %v6318_v24 }
 0x20b   : > { %5935 = vmatpush1.bf16.msra.mxu1 %v5876_v26  ;;  %5966 = vmatprep.mubr.bf16.mxu1 %v20052_v0  ;;  %v6317_v26 = vsel %vm20040_vm15, %v15362_v2, %v15363_v22 }
 0x20c   : > { %13854 = vmatmul.mubr.msk.bf16.vlgmr.msra.gmra.mrb[4].mxu0 %vm20057_vm2, %v5599_v9  ;;  %13863 = vmatprep.subr.msk.bf16.mxu1 %vm20058_vm1, %v5865_v25  ;;  %v15353_v9 = vunpack.i.h.bf16 %v17439_v40  ;;  %v6354_v55 = vsel %vm20058_vm1, %v6330_v31, 0  ;;  %v17544_v40 = vrot.slane %v17526_v38, %v6533_v27 }
 0x20d   : > { %5894 = vmatpush1.bf16.msra.mxu0 %v5870_v28  ;;  %5925 = vmatprep.mubr.bf16.mxu0 %v20052_v0 }
 0x20e   : > { %13861 = vmatprep.subr.msk.bf16.mxu0 %vm20058_vm1, %v5863_v29  ;;  %v6321_v14 = vsel %vm20040_vm15, %v15353_v9, %v6304_v61  ;;  %v6322_v10 = vsel %vm20040_vm15, %v15352_v3, %v15353_v9  ;;  %v6329_v29 = vpack.c.bf16 %v6317_v26, %v6317_v26  ;;  %v17598_v3 = vrot.slane %v17578_v58, %v6533_v27 }
 0x20f   : > { %v6325_v20 = vpack.c.bf16 %v6321_v14, %v6321_v14  ;;  %v6324_v25 = vpack.c.bf16 %v6322_v10, %v6322_v10  ;;  %v17601_v14 = vrot.slane %v17586_v49, %v6533_v27  ;;  %vm220_vm15 = vcmp.ne.f32.partialorder %v17578_v58, 0.0 }
 0x210   : > { %v17676_v58 = vsel %vm221_vm12, 1, %v20052_v0  ;;  %vm20060_vm12 = vcmp.lt.s32.totalorder %v16134_v13, 2 }
 0x211   : > { %v6336_v28 = vsel %vm20058_vm1, %v6324_v25, 0 }
 0x212   : > { %13860 = vmatmul.mubr.msk.bf16.vlgmr.msra.gmra.mrb[0].mxu1 %vm20057_vm2, %v5832_v34 }
 0x213   : > { %6017 = vmatpush1.bf16.msra.mxu1 %v5888_v39  ;;  %6048 = vmatprep.mubr.bf16.mxu1 %v20052_v0  ;;  %v17531_v39 = vld [vmem:[%s20001_s1 + $0x10] sm:$0xff] }
 0x214   : > { %13858 = vmatmul.mubr.msk.bf16.vlgmr.msra.gmra.mrb[0].mxu0 %vm20057_vm2, %v5832_v34  ;;  %13867 = vmatprep.subr.msk.bf16.mxu1 %vm20058_vm1, %v6094_v8  ;;  %v17536_v8 = vld [vmem:[%s20001_s1 + $0x8] sm:$0xff]  ;;  %vm217_vm9 = vcmp.ne.f32.partialorder %v17531_v39, 0.0 }
 0x215   : > { %5976 = vmatpush1.bf16.msra.mxu0 %v5882_v4  ;;  %6007 = vmatprep.mubr.bf16.mxu0 %v20052_v0  ;;  %v17549_v4 = vrot.slane %v17531_v39, %v6533_v27  ;;  %vm216_vm10 = vcmp.ne.f32.partialorder %v17536_v8, 0.0  ;;  %v17700_v39 = vsel %vm217_vm9, 1, %v20052_v0 }
 0x216   : > { %13865 = vmatprep.subr.msk.bf16.mxu0 %vm20058_vm1, %v6092_v42  ;;  %v17552_v42 = vrot.slane %v17536_v8, %v6533_v27  ;;  %v17694_v8 = vsel %vm216_vm10, 1, %v20052_v0 }
 0x21a   : > { %13864 = vmatmul.mubr.msk.bf16.vlgmr.msra.gmra.mrb[4].mxu1 %vm20057_vm2, %v5832_v34 }
 0x21b   : > { %6168 = vmatpush1.bf16.msra.mxu1 %v6109_v54  ;;  %6199 = vmatprep.mubr.bf16.mxu1 %v20052_v0  ;;  %v17572_v54 = vld [vmem:[%s20001_s1 + $0x20] sm:$0xff] }
 0x21c   : > { %13862 = vmatmul.mubr.msk.bf16.vlgmr.msra.gmra.mrb[4].mxu0 %vm20057_vm2, %v5832_v34  ;;  %13871 = vmatprep.subr.msk.bf16.mxu1 %vm20058_vm1, %v6098_v53  ;;  %v6348_v34 = vsel %vm20058_vm1, %v6328_v23, 0  ;;  %v17589_v9 = vrot.slane %v17572_v54, %v6533_v27  ;;  %vm219_vm13 = vcmp.ne.f32.partialorder %v17572_v54, 0.0 }
 0x21d   : > { %6127 = vmatpush1.bf16.msra.mxu0 %v6103_v59  ;;  %6158 = vmatprep.mubr.bf16.mxu0 %v20052_v0 }
 0x21e   : > { %13869 = vmatprep.subr.msk.bf16.mxu0 %vm20058_vm1, %v6096_v60 }
 0x222   : > { %13868 = vmatmul.mubr.msk.bf16.vlgmr.msra.gmra.mrb[0].mxu1 %vm20057_vm2, %v6065_v37 }
 0x223   : > { %6250 = vmatpush1.bf16.msra.mxu1 %v6121_v17  ;;  %6281 = vmatprep.mubr.bf16.mxu1 %v20052_v0 }
 0x224   : > { %13866 = vmatmul.mubr.msk.bf16.vlgmr.msra.gmra.mrb[0].mxu0 %vm20057_vm2, %v6065_v37  ;;  %13875 = vmatprep.subr.msk.bf16.mxu1 %vm20058_vm1, %v6327_v16 }
 0x225   : > { %6209 = vmatpush1.bf16.msra.mxu0 %v6115_v19  ;;  %6240 = vmatprep.mubr.bf16.mxu0 %v20052_v0 }
 0x226   : > { %13873 = vmatprep.subr.msk.bf16.mxu0 %vm20058_vm1, %v6325_v20 }
 0x22a   : > { %13872 = vmatmul.mubr.msk.bf16.vlgmr.msra.gmra.mrb[4].mxu1 %vm20057_vm2, %v6065_v37 }
 0x22b   : > { %6401 = vmatpush1.bf16.msra.mxu1 %v6342_v5  ;;  %6432 = vmatprep.mubr.bf16.mxu1 %v20052_v0 }
 0x22c   : > { %13870 = vmatmul.mubr.msk.bf16.vlgmr.msra.gmra.mrb[4].mxu0 %vm20057_vm2, %v6065_v37  ;;  %13879 = vmatprep.subr.msk.bf16.mxu1 %vm20058_vm1, %v6331_v35 }
 0x22d   : > { %6360 = vmatpush1.bf16.msra.mxu0 %v6336_v28  ;;  %6391 = vmatprep.mubr.bf16.mxu0 %v20052_v0 }
 0x22e   : > { %13877 = vmatprep.subr.msk.bf16.mxu0 %vm20058_vm1, %v6329_v29 }
 0x232   : > { %13876 = vmatmul.mubr.msk.bf16.vlgmr.msra.gmra.mrb[0].mxu1 %vm20057_vm2, %v6298_v33 }
 0x233   : > { %6483 = vmatpush1.bf16.msra.mxu1 %v6354_v55  ;;  %6514 = vmatprep.mubr.bf16.mxu1 %v20052_v0 }
 0x234   : > { %13874 = vmatmul.mubr.msk.bf16.vlgmr.msra.gmra.mrb[0].mxu0 %vm20057_vm2, %v6298_v33 }
 0x235   : > { %6442 = vmatpush1.bf16.msra.mxu0 %v6348_v34  ;;  %6473 = vmatprep.mubr.bf16.mxu0 %v20052_v0 }
 0x23a   : > { %13880 = vmatmul.mubr.msk.bf16.vlgmr.msra.gmra.mrb[4].mxu1 %vm20057_vm2, %v6298_v33 }
 0x23b   : > { %7239 = vmatprep.mubr.bf16.mxu1 %v20052_v0 }
 0x23c   : > { %13878 = vmatmul.mubr.msk.bf16.vlgmr.msra.gmra.mrb[4].mxu0 %vm20057_vm2, %v6298_v33 }
 0x23d   : > { %7198 = vmatprep.mubr.bf16.mxu0 %v20052_v0 }
 0x305   : > { %v17546_v41 = vpop.f32.mrb[0].mxu1 }
 0x306   : > { %v17554_v43 = vpop.f32.mrb[1].mxu1  ;;  %v6565_v51 = vmul.f32 %v17549_v4, %v17546_v41 }
 0x307   : > { %v17559_v45 = vpop.f32.mrb[0].mxu0  ;;  %v6438_v46 = vpop.f32.mrb[2].mxu1  ;;  %v6566_v59 = vmul.f32 %v17557_v44, %v17554_v43 }
 0x308   : > { %v6563_v36 = vmul.f32 %v17544_v40, %v17559_v45  ;;  %v17563_v47 = vpop.f32.mrb[1].mxu0  ;;  %v6439_v50 = vpop.f32.mrb[3].mxu1  ;;  %v6583_v62 = vmul.f32 %v6565_v51, %v17546_v41 }
 0x309   : > { %v6564_v52 = vmul.f32 %v17552_v42, %v17563_v47  ;;  %v6397_v53 = vpop.f32.mrb[2].mxu0  ;;  %v6584_v15 = vmul.f32 %v6566_v59, %v17554_v43 }
 0x30a   : > { %v6581_v56 = vmul.f32 %v6563_v36, %v17559_v45  ;;  %v6398_v57 = vpop.f32.mrb[3].mxu0 }
 0x30b   : > { %v6571_v60 = vadd.f32 %v6564_v52, %v6563_v36  ;;  %v6582_v61 = vmul.f32 %v6564_v52, %v17563_v47 }
 0x30d   : > { %v6572_v63 = vadd.f32 %v6571_v60, %v6565_v51  ;;  %v6589_v7 = vadd.f32 %v6582_v61, %v6581_v56  ;;  %v6516_v37 = vpop.f32.mrb[4].mxu1 }
 0x30e   : > { %v6518_v17 = vpop.f32.mrb[5].mxu1  ;;  %v6569_v26 = vmul.f32 %v17601_v14, %v6516_v37 }
 0x30f   : > { %v6590_v16 = vadd.f32 %v6589_v7, %v6583_v62  ;;  %v6475_v18 = vpop.f32.mrb[4].mxu0  ;;  %v6573_v19 = vadd.f32 %v6572_v63, %v6566_v59  ;;  %v6520_v20 = vpop.f32.mrb[6].mxu1  ;;  %v6570_v29 = vmul.f32 %v17605_v21, %v6518_v17 }
 0x310   : > { %v6567_v22 = vmul.f32 %v17589_v9, %v6475_v18  ;;  %v6477_v2 = vpop.f32.mrb[5].mxu0  ;;  %v6521_v10 = vpop.f32.mrb[7].mxu1  ;;  %v6587_v31 = vmul.f32 %v6569_v26, %v6516_v37 }
 0x311   : > { %v6591_v6 = vadd.f32 %v6590_v16, %v6584_v15  ;;  %v6568_v32 = vmul.f32 %v17598_v3, %v6477_v2  ;;  %v6479_v25 = vpop.f32.mrb[6].mxu0  ;;  %v6588_v55 = vmul.f32 %v6570_v29, %v6518_v17 }
 0x312   : > { %v6574_v35 = vadd.f32 %v6573_v19, %v6567_v22  ;;  %v6585_v5 = vmul.f32 %v6567_v22, %v6475_v18  ;;  %v6480_v48 = vpop.f32.mrb[7].mxu0 }
 0x313   : > { %v6586_v28 = vmul.f32 %v6568_v32, %v6477_v2 }
 0x314   : > { %v6592_v30 = vadd.f32 %v6591_v6, %v6585_v5  ;;  %v6575_v24 = vadd.f32 %v6574_v35, %v6568_v32 }
 0x316   : > { %v6593_v33 = vadd.f32 %v6592_v30, %v6586_v28  ;;  %v6576_v23 = vadd.f32 %v6575_v24, %v6569_v26 }
 0x318   : > { %v6577_v34 = vadd.f32 %v6576_v23, %v6570_v29  ;;  %v6594_v27 = vadd.f32 %v6593_v33, %v6587_v31  ;;  %v17664_v31 = vsub.s32 2, %v17520_v11  ;;  %v17667_v33 = vsel %vm220_vm15, 1, %v20052_v0 }
 0x319   : > { %v17670_v23 = vsel %vm215_vm14, 1, %v20052_v0  ;;  %vm218_vm15 = vcmp.ne.f32.partialorder %v17541_v12, 0.0 }
 0x31a   : > { %6578 = vadd.xlane.f32.xlu0 %v6577_v34  ;;  %v6595_v46 = vadd.f32 %v6594_v27, %v6588_v55  ;;  %v17673_v55 = vsel %vm219_vm13, 1, %v20052_v0  ;;  %v6708_v38 = vrot.slane %v17667_v33, %v17664_v31  ;;  %v6688_v49 = vrot.slane %v17670_v23, %v17664_v31 }
 0x31b   : > { %v6704_v54 = vrot.slane %v17673_v55, %v17664_v31  ;;  %v17689_v34 = vsel %vm222_vm11, 1, %v20052_v0  ;;  %v6712_v1 = vrot.slane %v17676_v58, %v17664_v31  ;;  %v17697_v27 = vsub.s32 1, %v17520_v11 }
 0x31c   : > { %6596 = vadd.xlane.f32.xlu1 %v6595_v46  ;;  %v17703_v12 = vsel %vm218_vm15, 1, %v20052_v0  ;;  %vm17706_vm13 = vcmp.eq.s32.totalorder %v6708_v38, 1  ;;  %v20129_v46 = vmov 0  ;;  %vm20062_vm11 = vcmp.lt.s32.totalorder %v16134_v13, 126 }
 0x31d   : > { %v20130_v46 = vsel %vm17706_vm13, 4294967295, %v20129_v46  ;;  %vm17712_vm10 = vcmp.eq.s32.totalorder %v6704_v54, 1  ;;  %vm17719_vm9 = vcmp.eq.s32.totalorder %v6688_v49, 1  ;;  %vm17723_vm14 = vcmp.eq.s32.totalorder %v6712_v1, 1 }
 0x31e   : > { %20131 = vst [vmem:[#allocation3_spill] sm:$0xff] %v20130_v46  ;;  %v20149_v38 = vmov 0  ;;  %v6740_v54 = vrot.slane %v17694_v8, %v17697_v27 }
 0x320   : > { %vm17836_vm2 = vcmp.eq.s32.totalorder %v6740_v54, 1 }
 0x3a7   : > { %v6579_v36 = vpop.xlane.xlu0 %6578 }
 0x3a8   : > { %v6580_v50 = vmul.f32 0.001953125, %v6579_v36 }
 0x3a9   : > { %v6597_v51 = vpop.xlane.xlu1 %6596 }
 0x3aa   : > { %v6598_v52 = vmul.f32 0.001953125, %v6597_v51  ;;  %v6599_v53 = vmul.f32 %v6580_v50, %v6580_v50  ;;  %v6605_v59 = vsub.f32 %v6475_v18, %v6580_v50  ;;  %v6606_v60 = vsub.f32 %v6477_v2, %v6580_v50 }
 0x3ab   : > { %v6601_v61 = vsub.f32 %v17559_v45, %v6580_v50  ;;  %v6604_v62 = vsub.f32 %v17554_v43, %v6580_v50  ;;  %v6602_v7 = vsub.f32 %v17563_v47, %v6580_v50  ;;  %v6607_v15 = vsub.f32 %v6516_v37, %v6580_v50 }
 0x3ac   : > { %v6600_v56 = vsub.f32 %v6598_v52, %v6599_v53  ;;  %v6608_v16 = vsub.f32 %v6518_v17, %v6580_v50  ;;  %v6603_v5 = vsub.f32 %v17546_v41, %v6580_v50  ;;  %v20132_v51 = vmov 0 }
 0x3ad   : > { %v20133_v51 = vsel %vm17712_vm10, 4294967295, %v20132_v51  ;;  %v6716_v52 = vrot.slane %v17689_v34, %v17664_v31  ;;  %v20135_v53 = vmov 0 }
 0x3ae   : > { %v6609_v57 = vadd.f32 1e-05, %v6600_v56  ;;  %20134 = vst [vmem:[#allocation4_spill] sm:$0xff] %v20133_v51  ;;  %v20136_v53 = vsel %vm17719_vm9, 4294967295, %v20135_v53  ;;  %v20137_v56 = vmov 0 }
 0x3af   : > { %v20138_v56 = vsel %vm17723_vm14, 4294967295, %v20137_v56  ;;  %vm17743_vm15 = vcmp.eq.s32.totalorder %v6716_v52, 1  ;;  %v20152_v52 = vmov 0 }
 0x3b0   : > { %15874 = vrsqrt.f32 %v6609_v57  ;;  %20139 = vst [vmem:[#allocation5_spill] sm:$0xff] %v20138_v56  ;;  %v6692_v57 = vrot.slane %v17694_v8, %v17664_v31 }
 0x3b2   : > { %vm17747_vm8 = vcmp.eq.s32.totalorder %v6692_v57, 1 }
 0x3ba   : > { %v15875_v63 = vpop.eup %15874 }
 0x3bb   : > { %v17614_v19 = vmul.f32 %v15875_v63, %v6605_v59  ;;  %v17616_v20 = vmul.f32 %v15875_v63, %v6606_v60  ;;  %v6611_v22 = vmul.f32 %v15875_v63, %v6601_v61  ;;  %v6614_v10 = vmul.f32 %v15875_v63, %v6604_v62 }
 0x3bc   : > { %v6612_v6 = vmul.f32 %v15875_v63, %v6602_v7  ;;  %v17618_v32 = vmul.f32 %v15875_v63, %v6607_v15  ;;  %v17620_v18 = vmul.f32 %v15875_v63, %v6608_v16  ;;  %v6613_v29 = vmul.f32 %v15875_v63, %v6603_v5 }
 0x3bd   : > { %v6623_v45 = vmax.f32 %v17614_v19, 0.0  ;;  %v6624_v43 = vmax.f32 %v17616_v20, 0.0  ;;  %v17624_v2 = vmax.f32 %v6611_v22, 0.0  ;;  %v17626_v47 = vmax.f32 %v6614_v10, 0.0 }
 0x3be   : > { %v17628_v37 = vmax.f32 %v6612_v6, 0.0  ;;  %v6625_v26 = vmax.f32 %v17618_v32, 0.0  ;;  %v20055_v35 = vmax.f32 %v17620_v18, 0.0  ;;  %v17649_v30 = vmax.f32 %v6613_v29, 0.0 }
 0x3bf   : > { %v15369_v17 = vpack.i.bf16 %v6624_v43, %v6623_v45  ;;  %v15364_v25 = vpack.i.bf16 %v17626_v47, %v17624_v2  ;;  %v6756_v59 = vrot.slane %v17667_v33, %v17697_v27  ;;  %v6760_v60 = vrot.slane %v17676_v58, %v17697_v27 }
 0x3c0   : > { %v15379_v48 = vpack.i.bf16 %v17628_v37, %v17624_v2  ;;  %v15374_v28 = vpack.i.bf16 %v20055_v35, %v6625_v26  ;;  %v15399_v41 = vpack.i.bf16 %v17626_v47, %v17649_v30  ;;  %v15394_v24 = vpack.i.bf16 %v17649_v30, %v17628_v37 }
 0x3c1   : > { %15370 = vrot.lane.b32.xlu1 %v15369_v17, %s15937_s19  ;;  %15365 = vrot.lane.b32.xlu0 %v15364_v25, %s15937_s19  ;;  %v6736_v7 = vrot.slane %v17670_v23, %v17697_v27  ;;  %v6696_v10 = vrot.slane %v17700_v39, %v17664_v31  ;;  %v20140_v29 = vmov 0  ;;  %vm17751_vm7 = vcmp.eq.s32.totalorder %v6756_v59, 1 }
 0x3c2   : > { %v20141_v29 = vsel %vm17743_vm15, 4294967295, %v20140_v29  ;;  %vm17755_vm6 = vcmp.eq.s32.totalorder %v6760_v60, 1  ;;  %v20169_v54 = vmax.f32 %v17620_v18, 0.0 }
 0x3c3   : > { %20142 = vst [vmem:[#allocation6_spill] sm:$0xff] %v20141_v29  ;;  %v20150_v38 = vsel %vm17755_vm6, 4294967295, %v20149_v38  ;;  %vm17769_vm5 = vcmp.eq.s32.totalorder %v6736_v7, 1  ;;  %vm17824_vm3 = vcmp.eq.s32.totalorder %v6696_v10, 1  ;;  %v20163_v10 = vmov 0 }
 0x3c4   : > { %20151 = vst [vmem:[#allocation9_spill] sm:$0xff] %v20150_v38  ;;  %v20153_v52 = vsel %vm17769_vm5, 4294967295, %v20152_v52  ;;  %v20191_v29 = vmov 0  ;;  %v20193_v38 = vmov 0 }
 0x3c5   : > { %15380 = vrot.lane.b32.xlu1 %v15379_v48, %s15938_s11  ;;  %15375 = vrot.lane.b32.xlu0 %v15374_v28, %s15937_s19 }
 0x3c9   : > { %15390 = vrot.lane.b32.xlu1 %v15374_v28, %s15938_s11  ;;  %15385 = vrot.lane.b32.xlu0 %v15369_v17, %s15938_s11  ;;  %v6752_v17 = vrot.slane %v17673_v55, %v17697_v27 }
 0x3cb   : > { %vm17780_vm4 = vcmp.eq.s32.totalorder %v6752_v17, 1  ;;  %v6744_v17 = vrot.slane %v17700_v39, %v17697_v27 }
 0x3cd   : > { %15400 = vrot.lane.b32.xlu1 %v15399_v41, %s15938_s11  ;;  %15395 = vrot.lane.b32.xlu0 %v15394_v24, %s15937_s19  ;;  %v20143_v41 = vmov 0  ;;  %v20146_v24 = vmov 0  ;;  %vm17850_vm0 = vcmp.eq.s32.totalorder %v6744_v17, 1 }
 0x3ce   : > { %v20144_v41 = vsel %vm17747_vm8, 4294967295, %v20143_v41  ;;  %v20147_v24 = vsel %vm17751_vm7, 4294967295, %v20146_v24 }
 0x3cf   : > { %20145 = vst [vmem:[#allocation7_spill] sm:$0xff] %v20144_v41  ;;  %20148 = vst [vmem:[#allocation8_spill] sm:$0xff] %v20147_v24 }
 0x433   : > { %v15371_v36 = vpop.permute.xlu1 %15370  ;;  %v17710_v50 = vpop.permute.xlu0 %15365 }
 0x434   : > { %v15373_v61 = vunpack.i.h.bf16 %v15371_v36  ;;  %v15372_v62 = vunpack.i.l.bf16 %v15371_v36  ;;  %v20054_v63 = vunpack.i.h.bf16 %v17710_v50  ;;  %v15367_v15 = vunpack.i.l.bf16 %v17710_v50 }
 0x435   : > { %v20174_v18 = vunpack.i.h.bf16 %v17710_v50 }
 0x436   : > { %v6671_v49 = vsel %vm20060_vm12, %v15372_v62, %v15373_v61  ;;  %v6672_v1 = vsel %vm20060_vm12, %v20054_v63, %v15372_v62  ;;  %v20154_v62 = vmov 0 }
 0x437   : > { %v15381_v16 = vpop.permute.xlu1 %15380  ;;  %v15376_v22 = vpop.permute.xlu0 %15375  ;;  %v20155_v62 = vsel %vm17780_vm4, 4294967295, %v20154_v62  ;;  %v6730_v35 = vsel %vm17706_vm13, %v6671_v49, %v6624_v43 }
 0x438   : > { %v15383_v25 = vunpack.i.h.bf16 %v15381_v16  ;;  %v15382_v5 = vunpack.i.l.bf16 %v15381_v16  ;;  %v15378_v48 = vunpack.i.h.bf16 %v15376_v22  ;;  %v15377_v28 = vunpack.i.l.bf16 %v15376_v22  ;;  %20156 = vst [vmem:[#allocation10_spill] sm:$0xff] %v20155_v62 }
 0x439   : > { %v20198_v62 = vmov 0 }
 0x43a   : > { %v6676_v36 = vsel %vm20060_vm12, %v15378_v48, %v15367_v15  ;;  %v6650_v57 = vsel %vm20062_vm11, %v15382_v5, %v15383_v25  ;;  %v6670_v59 = vsel %vm20060_vm12, %v15373_v61, %v15377_v28  ;;  %v6764_v61 = vrot.slane %v17689_v34, %v17697_v27 }
 0x43b   : > { %v6725_v60 = vsel %vm17719_vm9, %v6676_v36, %v17624_v2  ;;  %v15391_v16 = vpop.permute.xlu1 %15390  ;;  %v15386_v22 = vpop.permute.xlu0 %15385  ;;  %v6729_v2 = vsel %vm17712_vm10, %v6672_v1, %v6623_v45  ;;  %v6731_v36 = vsel %vm17723_vm14, %v6670_v59, %v6625_v26 }
 0x43c   : > { %v15393_v7 = vunpack.i.h.bf16 %v15391_v16  ;;  %v15392_v0 = vunpack.i.l.bf16 %v15391_v16  ;;  %v15388_v63 = vunpack.i.h.bf16 %v15386_v22  ;;  %v15387_v6 = vunpack.i.l.bf16 %v15386_v22 }
 0x43d   : > { %v17816_v26 = vsel %vm17769_vm5, %v6650_v57, %v6725_v60  ;;  %vm17840_vm1 = vcmp.eq.s32.totalorder %v6764_v61, 1 }
 0x43e   : > { %v6644_v20 = vsel %vm20062_vm11, %v15392_v0, %v15393_v7  ;;  %v6645_v19 = vsel %vm20062_vm11, %v15388_v63, %v15392_v0  ;;  %v6646_v45 = vsel %vm20062_vm11, %v15387_v6, %v15388_v63  ;;  %v6651_v60 = vsel %vm20062_vm11, %v15393_v7, %v15382_v5 }
 0x43f   : > { %v15401_v43 = vpop.permute.xlu1 %15400  ;;  %v15396_v49 = vpop.permute.xlu0 %15395  ;;  %v17808_v1 = vsel %vm17751_vm7, %v6645_v19, %v6730_v35  ;;  %v17812_v32 = vsel %vm17755_vm6, %v6644_v20, %v6731_v36  ;;  %v17820_v0 = vsel %vm17780_vm4, %v6646_v45, %v6729_v2  ;;  %v6669_v35 = vsel %vm20060_vm12, %v15377_v28, %v15378_v48 }
 0x440   : > { %v15403_v59 = vunpack.i.h.bf16 %v15401_v43  ;;  %v15402_v63 = vunpack.i.l.bf16 %v15401_v43  ;;  %v15398_v16 = vunpack.i.h.bf16 %v15396_v49  ;;  %v15397_v22 = vunpack.i.l.bf16 %v15396_v49 }
 0x441   : > { %v20157_v19 = vmov 0  ;;  %v15409_v36 = vpack.i.bf16 %v17812_v32, %v17808_v1  ;;  %v15404_v57 = vpack.i.bf16 %v17820_v0, %v17816_v26  ;;  %v20160_v20 = vmov 0 }
 0x442   : > { %v20158_v19 = vsel %vm17824_vm3, 4294967295, %v20157_v19  ;;  %v6649_v2 = vsel %vm20062_vm11, %v15383_v25, %v15402_v63  ;;  %v20161_v20 = vsel %vm17836_vm2, 4294967295, %v20160_v20  ;;  %v20164_v10 = vsel %vm17840_vm1, 4294967295, %v20163_v10 }
 0x443   : > { %20159 = vst [vmem:[#allocation11_spill] sm:$0xff] %v20158_v19  ;;  %20162 = vst [vmem:[#allocation12_spill] sm:$0xff] %v20161_v20  ;;  %v6674_v48 = vsel %vm20060_vm12, %v15397_v22, %v15398_v16  ;;  %v6675_v28 = vsel %vm20060_vm12, %v15367_v15, %v15397_v22  ;;  %15410 = vrot.lane.b32.xlu1 %v15409_v36, %s15939_s18  ;;  %15405 = vrot.lane.b32.xlu0 %v15404_v57, %s15939_s18  ;;  %v20166_v25 = vmov 0  ;;  %v20176_v22 = vmov 0 }
 0x444   : > { %20165 = vst [vmem:[#allocation13_spill] sm:$0xff] %v20164_v10  ;;  %v20167_v25 = vsel %vm17850_vm0, 4294967295, %v20166_v25  ;;  %v6748_v5 = vrot.slane %v17703_v12, %v17697_v27  ;;  %v6732_v7 = vsel %vm17743_vm15, %v6669_v35, %v20169_v54  ;;  %v6648_v15 = vsel %vm20062_vm11, %v15402_v63, %v15403_v59 }
 0x445   : > { %20168 = vst [vmem:[#allocation14_spill] sm:$0xff] %v20167_v25  ;;  %v6726_v61 = vsel %vm17747_vm8, %v6675_v28, %v17628_v37  ;;  %v6727_v17 = vsel %vm17824_vm3, %v6674_v48, %v17649_v30  ;;  %v20170_v45 = vrot.slane %v17703_v12, %v17664_v31  ;;  %v20171_v27 = vmov 0 }
 0x446   : > { %vm20175_vm15 = vcmp.lt.s32.totalorder %v16134_v13, 2  ;;  %v17881_v49 = vsel %vm17836_vm2, %v6649_v2, %v6726_v61  ;;  %v17885_v37 = vsel %vm17840_vm1, %v6651_v60, %v6732_v7  ;;  %v17893_v50 = vsel %vm17850_vm0, %v6648_v15, %v6727_v17 }
 0x447   : > { %vm17871_vm12 = vcmp.eq.s32.totalorder %v20170_v45, 1  ;;  %v6673_v43 = vsel %vm20175_vm15, %v15398_v16, %v20174_v18  ;;  %v15419_v30 = vpack.i.bf16 %v17881_v49, %v17816_v26  ;;  %v15414_v31 = vpack.i.bf16 %v17881_v49, %v17885_v37 }
 0x448   : > { %v20172_v27 = vsel %vm17871_vm12, 4294967295, %v20171_v27  ;;  %v6647_v63 = vsel %vm20062_vm11, %v15403_v59, %v15387_v6  ;;  %v6728_v16 = vsel %vm17871_vm12, %v6673_v43, %v17626_v47  ;;  %vm17902_vm15 = vcmp.eq.s32.totalorder %v6748_v5, 1 }
 0x449   : > { %20173 = vst [vmem:[#allocation15_spill] sm:$0xff] %v20172_v27  ;;  %15420 = vrot.lane.b32.xlu1 %v15419_v30, %s15940_s12  ;;  %15415 = vrot.lane.b32.xlu0 %v15414_v31, %s15939_s18  ;;  %v20177_v22 = vsel %vm17902_vm15, 4294967295, %v20176_v22  ;;  %v15429_v35 = vpack.i.bf16 %v17893_v50, %v17885_v37  ;;  %v17910_v57 = vsel %vm17902_vm15, %v6647_v63, %v6728_v16  ;;  %v6833_v59 = vsub.s32 4, %v17520_v11 }
 0x44a   : > { %20178 = vst [vmem:[#allocation16_spill] sm:$0xff] %v20177_v22  ;;  %v15439_v47 = vpack.i.bf16 %v17820_v0, %v17910_v57  ;;  %v15434_v6 = vpack.i.bf16 %v17910_v57, %v17893_v50  ;;  %v17923_v2 = vsub.s32 3, %v17520_v11  ;;  %v20179_v15 = vmov 0 }
 0x44b   : > { %v6858_v60 = vrot.slane %v17676_v58, %v6833_v59  ;;  %v6854_v48 = vrot.slane %v17667_v33, %v6833_v59  ;;  %v6838_v54 = vrot.slane %v17694_v8, %v6833_v59  ;;  %v6862_v7 = vrot.slane %v17689_v34, %v6833_v59 }
 0x44c   : > { %v6882_v61 = vrot.slane %v17670_v23, %v17923_v2  ;;  %v6902_v17 = vrot.slane %v17667_v33, %v17923_v2  ;;  %v6906_v45 = vrot.slane %v17676_v58, %v17923_v2  ;;  %v20182_v18 = vmov 0 }
 0x44d   : > { %15430 = vrot.lane.b32.xlu1 %v15429_v35, %s15940_s12  ;;  %15425 = vrot.lane.b32.xlu0 %v15409_v36, %s15940_s12  ;;  %v6834_v36 = vrot.slane %v17670_v23, %v6833_v59  ;;  %vm17932_vm1 = vcmp.eq.s32.totalorder %v6858_v60, 1  ;;  %vm17942_vm11 = vcmp.eq.s32.totalorder %v6854_v48, 1  ;;  %v6842_v30 = vrot.slane %v17700_v39, %v6833_v59 }
 0x44e   : > { %v20180_v15 = vsel %vm17932_vm1, 4294967295, %v20179_v15  ;;  %v20183_v18 = vsel %vm17942_vm11, 4294967295, %v20182_v18  ;;  %v6846_v31 = vrot.slane %v17703_v12, %v6833_v59  ;;  %v6850_v63 = vrot.slane %v17673_v55, %v6833_v59 }
 0x44f   : > { %20181 = vst [vmem:[#allocation17_spill] sm:$0xff] %v20180_v15  ;;  %vm17947_vm7 = vcmp.eq.s32.totalorder %v6834_v36, 1  ;;  %v6910_v16 = vrot.slane %v17689_v34, %v17923_v2  ;;  %v6886_v35 = vrot.slane %v17694_v8, %v17923_v2  ;;  %vm17959_vm6 = vcmp.eq.s32.totalorder %v6838_v54, 1 }
 0x450   : > { %vm17963_vm14 = vcmp.eq.s32.totalorder %v6862_v7, 1  ;;  %v20188_v36 = vmov 0  ;;  %vm17967_vm13 = vcmp.eq.s32.totalorder %v6882_v61, 1  ;;  %vm17971_vm4 = vcmp.eq.s32.totalorder %v6902_v17, 1 }
 0x451   : > { %15440 = vrot.lane.b32.xlu1 %v15439_v47, %s15940_s12  ;;  %15435 = vrot.lane.b32.xlu0 %v15434_v6, %s15939_s18  ;;  %v20189_v36 = vsel %vm17963_vm14, 4294967295, %v20188_v36  ;;  %v20192_v29 = vsel %vm17967_vm13, 4294967295, %v20191_v29  ;;  %v20194_v38 = vsel %vm17971_vm4, 4294967295, %v20193_v38  ;;  %vm17975_vm15 = vcmp.eq.s32.totalorder %v6906_v45, 1 }
 0x452   : > { %20190 = vst [vmem:[#allocation18_spill] sm:$0xff] %v20189_v36  ;;  %v6890_v54 = vrot.slane %v17700_v39, %v17923_v2  ;;  %vm17982_vm10 = vcmp.eq.s32.totalorder %v6842_v30, 1  ;;  %vm17986_vm12 = vcmp.eq.s32.totalorder %v6846_v31, 1  ;;  %v20200_v17 = vmov 0 }
 0x453   : > { %v20199_v62 = vsel %vm17982_vm10, 4294967295, %v20198_v62  ;;  %v20201_v17 = vsel %vm17986_vm12, 4294967295, %v20200_v17  ;;  %vm17990_vm0 = vcmp.eq.s32.totalorder %v6850_v63, 1  ;;  %v20202_v45 = vmov 0 }
 0x454   : > { %v20203_v45 = vsel %vm17990_vm0, 4294967295, %v20202_v45  ;;  %vm17994_vm2 = vcmp.eq.s32.totalorder %v6910_v16, 1  ;;  %v20204_v22 = vmov 0  ;;  %vm17998_vm3 = vcmp.eq.s32.totalorder %v6886_v35, 1 }
 0x455   : > { %v20205_v22 = vsel %vm17994_vm2, 4294967295, %v20204_v22  ;;  %vm20209_vm8 = vcmp.lt.s32.totalorder %v16134_v13, 20  ;;  %vm20213_vm10 = vcmp.lt.s32.totalorder %v16134_v13, 108  ;;  %vm18017_vm0 = vcmp.eq.s32.totalorder %v6890_v54, 1 }
 0x456   : > { %20206 = vst [vmem:[#allocation20_spill] sm:$0xff] %v20205_v22  ;;  %vm20210_vm5 = vmmov %vm20209_vm8  ;;  %v20214_v25 = vmov 0  ;;  %v20252_v36 = vmov 0 }
 0x457   : > { %vm20211_vm9 = vmmov %vm20210_vm5  ;;  %v20215_v25 = vsel %vm18017_vm0, 4294967295, %v20214_v25 }
 0x458   : > { %vm20212_vm12 = vmmov %vm20210_vm5 }
 0x4b5   : > { %v15411_v28 = vpop.permute.xlu1 %15410  ;;  %v17928_v5 = vpop.permute.xlu0 %15405 }
 0x4b6   : > { %v15413_v47 = vunpack.i.h.bf16 %v15411_v28  ;;  %v15412_v6 = vunpack.i.l.bf16 %v15411_v28  ;;  %v15408_v60 = vunpack.i.h.bf16 %v17928_v5  ;;  %v20195_v28 = vmov 0 }
 0x4b7   : > { %v20196_v28 = vsel %vm17975_vm15, 4294967295, %v20195_v28  ;;  %v15407_v7 = vunpack.i.l.bf16 %v17928_v5  ;;  %v6894_v5 = vrot.slane %v17703_v12, %v17923_v2 }
 0x4b8   : > { %20197 = vst [vmem:[#allocation19_spill] sm:$0xff] %v20196_v28  ;;  %v6824_v30 = vsel %vm20209_vm8, %v15412_v6, %v15413_v47  ;;  %v6825_v31 = vsel %vm20210_vm5, %v15408_v60, %v15412_v6  ;;  %v6898_v6 = vrot.slane %v17673_v55, %v17923_v2  ;;  %vm20216_vm8 = vmmov %vm20213_vm10 }
 0x4b9   : > { %v6877_v41 = vsel %vm17932_vm1, %v6824_v30, %v17812_v32 }
 0x4bb   : > { %v15421_v10 = vpop.permute.xlu1 %15420  ;;  %v15416_v59 = vpop.permute.xlu0 %15415 }
 0x4bc   : > { %v15423_v24 = vunpack.i.h.bf16 %v15421_v10  ;;  %v15422_v56 = vunpack.i.l.bf16 %v15421_v10  ;;  %v15417_v46 = vunpack.i.l.bf16 %v15416_v59  ;;  %v15418_v61 = vunpack.i.h.bf16 %v15416_v59 }
 0x4bd   : > { %v20207_v10 = vmov 0 }
 0x4be   : > { %v20208_v10 = vsel %vm17998_vm3, 4294967295, %v20207_v10  ;;  %v6823_v63 = vsel %vm20211_vm9, %v15413_v47, %v15417_v46  ;;  %v6830_v16 = vsel %vm20212_vm12, %v15417_v46, %v15407_v7  ;;  %v6804_v35 = vsel %vm20213_vm10, %v15422_v56, %v15423_v24  ;;  %vm20217_vm12 = vmmov %vm20216_vm8 }
 0x4bf   : > { %v6871_v59 = vsel %vm17947_vm7, %v6830_v16, %v17816_v26  ;;  %v15431_v51 = vpop.permute.xlu1 %15430  ;;  %v15426_v27 = vpop.permute.xlu0 %15425  ;;  %v6876_v26 = vsel %vm17942_vm11, %v6825_v31, %v17808_v1  ;;  %v6829_v54 = vsel %vm20210_vm5, %v15407_v7, %v15418_v61  ;;  %v6878_v16 = vsel %vm17963_vm14, %v6823_v63, %v17885_v37  ;;  %vm20218_vm10 = vmmov %vm20216_vm8 }
 0x4c0   : > { %v15433_v47 = vunpack.i.h.bf16 %v15431_v51  ;;  %v15432_v20 = vunpack.i.l.bf16 %v15431_v51  ;;  %v15428_v19 = vunpack.i.h.bf16 %v15426_v27  ;;  %v15427_v46 = vunpack.i.l.bf16 %v15426_v27  ;;  %vm20219_vm9 = vmmov %vm20216_vm8 }
 0x4c1   : > { %v18042_v2 = vsel %vm17967_vm13, %v6804_v35, %v6871_v59  ;;  %vm18065_vm5 = vcmp.eq.s32.totalorder %v6894_v5, 1 }
 0x4c2   : > { %v6805_v51 = vsel %vm20216_vm8, %v15432_v20, %v15422_v56  ;;  %v6798_v27 = vsel %vm20217_vm12, %v15428_v19, %v15432_v20  ;;  %v6799_v32 = vsel %vm20218_vm10, %v15427_v46, %v15428_v19  ;;  %v6803_v1 = vsel %vm20219_vm9, %v15423_v24, %v15433_v47  ;;  %vm20222_vm12 = vmmov %vm20216_vm8 }
 0x4c3   : > { %v15441_v7 = vpop.permute.xlu1 %15440  ;;  %v15436_v30 = vpop.permute.xlu0 %15435  ;;  %v18048_v37 = vsel %vm17971_vm4, %v6799_v32, %v6876_v26  ;;  %v18052_v56 = vsel %vm17975_vm15, %v6798_v27, %v6877_v41  ;;  %v18056_v19 = vsel %vm17994_vm2, %v6805_v51, %v6878_v16  ;;  %v6872_v24 = vsel %vm17959_vm6, %v6829_v54, %v17881_v49 }
 0x4c4   : > { %v15443_v20 = vunpack.i.h.bf16 %v15441_v7  ;;  %v15442_v31 = vunpack.i.l.bf16 %v15441_v7  ;;  %v15438_v63 = vunpack.i.h.bf16 %v15436_v30  ;;  %v15437_v35 = vunpack.i.l.bf16 %v15436_v30 }
 0x4c5   : > { %v15444_v59 = vpack.i.bf16 %v18048_v37, %v18042_v2  ;;  %v15449_v26 = vpack.i.bf16 %v18056_v19, %v18052_v56  ;;  %v20220_v41 = vmov 0  ;;  %vm20223_vm10 = vcmp.lt.s32.totalorder %v16134_v13, 20 }
 0x4c6   : > { %v20221_v41 = vsel %vm18065_vm5, 4294967295, %v20220_v41  ;;  %v6801_v16 = vsel %vm20216_vm8, %v15442_v31, %v15443_v20  ;;  %v6802_v51 = vsel %vm20222_vm12, %v15433_v47, %v15442_v31  ;;  %v6826_v27 = vsel %vm20223_vm10, %v15438_v63, %v15408_v60  ;;  %vm20224_vm9 = vmmov %vm20223_vm10 }
 0x4c7   : > { %v18077_v49 = vsel %vm17998_vm3, %v6803_v1, %v6872_v24  ;;  %v6827_v54 = vsel %vm20224_vm9, %v15437_v35, %v15438_v63  ;;  %vm20225_vm15 = vmmov %vm20224_vm9  ;;  %15445 = vrot.lane.b32.xlu0 %v15444_v59, %s15941_s14  ;;  %15450 = vrot.lane.b32.xlu1 %v15449_v26, %s15941_s14  ;;  %vm18085_vm8 = vcmp.eq.s32.totalorder %v6898_v6, 1  ;;  %v20226_v47 = vmov 0 }
 0x4c8   : > { %v6828_v5 = vsel %vm20225_vm15, %v15418_v61, %v15437_v35  ;;  %v20227_v47 = vsel %vm18085_vm8, 4294967295, %v20226_v47  ;;  %v6800_v60 = vsel %vm20222_vm12, %v15443_v20, %v15427_v46  ;;  %vm20228_vm10 = vnez %v20203_v45 }
 0x4c9   : > { %v6875_v32 = vsel %vm20228_vm10, %v6826_v27, %v17820_v0  ;;  %vm20229_vm9 = vnez %v20199_v62  ;;  %vm20230_vm15 = vnez %v20201_v17  ;;  %v15454_v6 = vpack.i.bf16 %v18077_v49, %v18042_v2 }
 0x4ca   : > { %v6873_v61 = vsel %vm20229_vm9, %v6828_v5, %v17893_v50  ;;  %v6874_v1 = vsel %vm20230_vm15, %v6827_v54, %v17910_v57  ;;  %v18115_v50 = vsel %vm18085_vm8, %v6800_v60, %v6875_v32  ;;  %v6979_v31 = vsub.s32 6, %v17520_v11 }
 0x4cb   : > { %v18104_v7 = vsel %vm18017_vm0, %v6802_v51, %v6873_v61  ;;  %v18108_v46 = vsel %vm18065_vm5, %v6801_v16, %v6874_v1  ;;  %15455 = vrot.lane.b32.xlu0 %v15454_v6, %s15942_s8  ;;  %v15469_v30 = vpack.i.bf16 %v18048_v37, %v18115_v50  ;;  %v18131_v35 = vsub.s32 5, %v17520_v11 }
 0x4cc   : > { %v15459_v0 = vpack.i.bf16 %v18108_v46, %v18104_v7  ;;  %v15464_v57 = vpack.i.bf16 %v18104_v7, %v18077_v49  ;;  %v15474_v20 = vpack.i.bf16 %v18115_v50, %v18108_v46  ;;  %v6980_v63 = vrot.slane %v17670_v23, %v6979_v31 }
 0x4cd   : > { %v6984_v24 = vrot.slane %v17694_v8, %v6979_v31  ;;  %v7008_v59 = vrot.slane %v17689_v34, %v6979_v31  ;;  %v7028_v51 = vrot.slane %v17670_v23, %v18131_v35  ;;  %v20233_v27 = vmov 0 }
 0x4ce   : > { %15460 = vrot.lane.b32.xlu1 %v15459_v0, %s15942_s8  ;;  %vm18136_vm2 = vcmp.eq.s32.totalorder %v6980_v63, 1  ;;  %v20235_v54 = vmov 0  ;;  %v7032_v5 = vrot.slane %v17694_v8, %v18131_v35  ;;  %v6988_v60 = vrot.slane %v17700_v39, %v6979_v31 }
 0x4cf   : > { %15465 = vrot.lane.b32.xlu0 %v15464_v57, %s15941_s14  ;;  %vm18144_vm14 = vcmp.eq.s32.totalorder %v6984_v24, 1  ;;  %vm18148_vm1 = vcmp.eq.s32.totalorder %v7008_v59, 1  ;;  %v6992_v23 = vrot.slane %v17703_v12, %v6979_v31  ;;  %v7040_v1 = vrot.slane %v17703_v12, %v18131_v35 }
 0x4d0   : > { %v20234_v27 = vsel %vm18144_vm14, 4294967295, %v20233_v27  ;;  %v20236_v54 = vsel %vm18148_vm1, 4294967295, %v20235_v54  ;;  %vm18169_vm8 = vcmp.eq.s32.totalorder %v7028_v51, 1  ;;  %v6996_v63 = vrot.slane %v17673_v55, %v6979_v31 }
 0x4d1   : > { %vm18175_vm12 = vcmp.eq.s32.totalorder %v7032_v5, 1  ;;  %vm18179_vm11 = vcmp.eq.s32.totalorder %v6988_v60, 1  ;;  %v7004_v59 = vrot.slane %v17676_v58, %v6979_v31  ;;  %vm20245_vm10 = vcmp.lt.s32.totalorder %v16134_v13, 72 }
 0x4d2   : > { %15470 = vrot.lane.b32.xlu1 %v15469_v30, %s15942_s8  ;;  %vm20246_vm5 = vmmov %vm20245_vm10  ;;  %vm18192_vm0 = vcmp.eq.s32.totalorder %v6992_v23, 1  ;;  %v20247_v11 = vmov 0  ;;  %v20249_v60 = vmov 0  ;;  %v20255_v23 = vmov 0 }
 0x4d3   : > { %15475 = vrot.lane.b32.xlu0 %v15474_v20, %s15941_s14  ;;  %v20248_v11 = vsel %vm18192_vm0, 4294967295, %v20247_v11  ;;  %vm20251_vm9 = vmmov %vm20246_vm5  ;;  %vm18222_vm13 = vcmp.eq.s32.totalorder %v7004_v59, 1 }
 0x4d6   : > { %15480 = vrot.lane.b32.xlu1 %v15449_v26, %s15942_s8  ;;  %v7056_v26 = vrot.slane %v17689_v34, %v18131_v35  ;;  %v7036_v34 = vrot.slane %v17700_v39, %v18131_v35  ;;  %v7000_v39 = vrot.slane %v17667_v33, %v6979_v31 }
 0x4d8   : > { %vm18165_vm4 = vcmp.eq.s32.totalorder %v7056_v26, 1  ;;  %v7044_v26 = vrot.slane %v17673_v55, %v18131_v35  ;;  %vm18196_vm15 = vcmp.eq.s32.totalorder %v7036_v34, 1  ;;  %vm18210_vm3 = vcmp.eq.s32.totalorder %v7000_v39, 1 }
 0x4d9   : > { %v20250_v60 = vsel %vm18196_vm15, 4294967295, %v20249_v60  ;;  %v20258_v34 = vmov 0 }
 0x4da   : > { %v20259_v34 = vsel %vm18210_vm3, 4294967295, %v20258_v34 }
 0x4db   : > { %20260 = vst [vmem:[#allocation23_spill] sm:$0xff] %v20259_v34 }
 0x539   : > { %v18155_v32 = vpop.permute.xlu0 %15445  ;;  %v15451_v61 = vpop.permute.xlu1 %15450 }
 0x53a   : > { %v20108_v6 = vunpack.i.h.bf16 %v18155_v32  ;;  %v15447_v0 = vunpack.i.l.bf16 %v18155_v32  ;;  %v15453_v8 = vunpack.i.h.bf16 %v15451_v61  ;;  %v15452_v57 = vunpack.i.l.bf16 %v15451_v61 }
 0x53c   : > { %v6976_v51 = vsel %vm20245_vm10, %v15453_v8, %v15447_v0  ;;  %v6970_v5 = vsel %vm20246_vm5, %v20108_v6, %v15452_v57  ;;  %v6969_v55 = vsel %vm20251_vm9, %v15452_v57, %v15453_v8  ;;  %vm18202_vm10 = vcmp.eq.s32.totalorder %v7040_v1, 1 }
 0x53d   : > { %v15456_v61 = vpop.permute.xlu0 %15455  ;;  %v20253_v36 = vsel %vm18202_vm10, 4294967295, %v20252_v36  ;;  %vm18206_vm5 = vcmp.eq.s32.totalorder %v6996_v63, 1  ;;  %v7018_v8 = vsel %vm18144_vm14, %v6976_v51, %v18077_v49  ;;  %v7024_v1 = vsel %vm18148_vm1, %v6970_v5, %v18056_v19 }
 0x53e   : > { %v15458_v31 = vunpack.i.h.bf16 %v15456_v61  ;;  %v15457_v28 = vunpack.i.l.bf16 %v15456_v61  ;;  %20254 = vst [vmem:[#allocation21_spill] sm:$0xff] %v20253_v36  ;;  %v20256_v23 = vsel %vm18206_vm5, 4294967295, %v20255_v23  ;;  %vm20261_vm9 = vcmp.lt.s32.totalorder %v16134_v13, 56  ;;  %v250_v36 = vld [vmem:[%s20003_s3] sm:$0xff] }
 0x53f   : > { %20257 = vst [vmem:[#allocation22_spill] sm:$0xff] %v20256_v23  ;;  %v7017_v63 = vsel %vm18136_vm2, %v6969_v55, %v18042_v2  ;;  %vm20265_vm14 = vmmov %vm20261_vm9 }
 0x540   : > { %v15461_v22 = vpop.permute.xlu1 %15460  ;;  %v6950_v57 = vsel %vm20261_vm9, %v15457_v28, %v15458_v31  ;;  %vm20266_vm1 = vmmov %vm20261_vm9  ;;  %vm18259_vm9 = vcmp.eq.s32.totalorder %v7044_v26, 1 }
 0x541   : > { %v15463_v6 = vunpack.i.h.bf16 %v15461_v22  ;;  %v15462_v15 = vunpack.i.l.bf16 %v15461_v22  ;;  %v20262_v22 = vmov 0  ;;  %v18231_v39 = vsel %vm18165_vm4, %v6950_v57, %v7024_v1  ;;  %v15466_v51 = vpop.permute.xlu0 %15465 }
 0x542   : > { %v20263_v22 = vsel %vm18222_vm13, 4294967295, %v20262_v22  ;;  %v15468_v2 = vunpack.i.h.bf16 %v15466_v51  ;;  %v15467_v61 = vunpack.i.l.bf16 %v15466_v51  ;;  %7121 = vrot.lane.b32.xlu1 %v18231_v39, %s15911_s21 }
 0x543   : > { %20264 = vst [vmem:[#allocation24_spill] sm:$0xff] %v20263_v22  ;;  %v6948_v49 = vsel %vm20265_vm14, %v15462_v15, %v15463_v6  ;;  %v6949_v19 = vsel %vm20266_vm1, %v15458_v31, %v15462_v15  ;;  %v7048_v31 = vrot.slane %v17667_v33, %v18131_v35  ;;  %vm20267_vm1 = vcmp.lt.s32.totalorder %v16134_v13, 72 }
 0x544   : > { %v18239_v59 = vsel %vm18169_vm8, %v6949_v19, %v7017_v63  ;;  %v18243_v5 = vsel %vm18175_vm12, %v6948_v49, %v7018_v8  ;;  %v15471_v55 = vpop.permute.xlu1 %15470  ;;  %v6974_v63 = vsel %vm20267_vm1, %v15467_v61, %v15468_v2  ;;  %vm20268_vm14 = vmmov %vm20267_vm1  ;;  %v7052_v49 = vrot.slane %v17676_v58, %v18131_v35 }
 0x545   : > { %v15473_v1 = vunpack.i.h.bf16 %v15471_v55  ;;  %v15472_v57 = vunpack.i.l.bf16 %v15471_v55  ;;  %v18249_v15 = vpack.i.bf16 %v18243_v5, %v18239_v59  ;;  %v6975_v8 = vsel %vm20268_vm14, %v15447_v0, %v15467_v61  ;;  %v15476_v61 = vpop.permute.xlu0 %15475 }
 0x546   : > { %v20269_v19 = vmov 0  ;;  %v7019_v51 = vsel %vm18179_vm11, %v6975_v8, %v18104_v7  ;;  %v7020_v33 = vsel %vm18192_vm0, %v6974_v63, %v18108_v46  ;;  %vm20272_vm1 = vcmp.lt.s32.totalorder %v16134_v13, 56 }
 0x547   : > { %v20270_v19 = vsel %vm18259_vm9, 4294967295, %v20269_v19  ;;  %v6946_v55 = vsel %vm20272_vm1, %v15472_v57, %v15473_v1  ;;  %vm20273_vm14 = vmmov %vm20272_vm1  ;;  %15485 = vrot.lane.b32.xlu0 %v18249_v15, %s15911_s21  ;;  %v15478_v35 = vunpack.i.h.bf16 %v15476_v61  ;;  %v15477_v46 = vunpack.i.l.bf16 %v15476_v61 }
 0x548   : > { %20271 = vst [vmem:[#allocation25_spill] sm:$0xff] %v20270_v19  ;;  %v6947_v0 = vsel %vm20273_vm14, %v15463_v6, %v15472_v57  ;;  %v18281_v7 = vsel %vm18202_vm10, %v6946_v55, %v7020_v33  ;;  %v15481_v26 = vpop.permute.xlu1 %15480  ;;  %vm18283_vm0 = vcmp.eq.s32.totalorder %v7048_v31, 1  ;;  %v20274_v63 = vmov 0 }
 0x549   : > { %v18277_v58 = vsel %vm18196_vm15, %v6947_v0, %v7019_v51  ;;  %v20275_v63 = vsel %vm18283_vm0, 4294967295, %v20274_v63  ;;  %v15483_v6 = vunpack.i.h.bf16 %v15481_v26  ;;  %v15482_v57 = vunpack.i.l.bf16 %v15481_v26 }
 0x54a   : > { %20276 = vst [vmem:[#allocation26_spill] sm:$0xff] %v20275_v63  ;;  %v18289_v8 = vpack.i.bf16 %v18281_v7, %v18277_v58  ;;  %v20277_v51 = vunpack.i.h.bf16 %v18155_v32  ;;  %vm20278_vm1 = vcmp.lt.s32.totalorder %v16134_v13, 72  ;;  %vm18299_vm15 = vcmp.eq.s32.totalorder %v7052_v49, 1 }
 0x54b   : > { %vm20279_vm14 = vmmov %vm20278_vm1  ;;  %v20281_v55 = vmov 0 }
 0x54c   : > { %v6971_v0 = vsel %vm20278_vm1, %v15478_v35, %v20277_v51  ;;  %v6972_v33 = vsel %vm20279_vm14, %v15477_v46, %v15478_v35  ;;  %vm20280_vm10 = vmmov %vm20278_vm1  ;;  %v20282_v55 = vsel %vm18299_vm15, 4294967295, %v20281_v55  ;;  %vm20284_vm1 = vcmp.lt.s32.totalorder %v16134_v13, 56  ;;  %15490 = vrot.lane.b32.xlu0 %v18289_v8, %s15911_s21 }
 0x54d   : > { %v6973_v31 = vsel %vm20280_vm10, %v15468_v2, %v15477_v46  ;;  %20283 = vst [vmem:[#allocation27_spill] sm:$0xff] %v20282_v55  ;;  %v7022_v32 = vsel %vm18210_vm3, %v6972_v33, %v18048_v37  ;;  %v7023_v26 = vsel %vm18222_vm13, %v6971_v0, %v18052_v56  ;;  %v6951_v35 = vsel %vm20284_vm1, %v15483_v6, %v15457_v28  ;;  %vm20285_vm10 = vmmov %vm20284_vm1 }
 0x54e   : > { %v7021_v61 = vsel %vm18206_vm5, %v6973_v31, %v18115_v50  ;;  %v6944_v2 = vsel %vm20285_vm10, %v15482_v57, %v15483_v6  ;;  %vm20286_vm14 = vmmov %vm20284_vm1  ;;  %v18330_v28 = vsel %vm18299_vm15, %v6951_v35, %v7023_v26  ;;  %vm20287_vm1 = vcmp.lt.s32.totalorder %v16134_v13, 110  ;;  %v251_v31 = vld [vmem:[%s20003_s3 + $0x8] sm:$0xff] }
 0x54f   : > { %v6945_v50 = vsel %vm20286_vm14, %v15473_v1, %v15482_v57  ;;  %v18326_v37 = vsel %vm18283_vm0, %v6944_v2, %v7022_v32  ;;  %vm20288_vm10 = vmmov %vm20287_vm1  ;;  %vm20289_vm14 = vcmask 1043456  }
 0x550   : > { %v18322_v49 = vsel %vm18259_vm9, %v6945_v50, %v7021_v61  ;;  %7119 = vrot.lane.b32.xlu0 %v18330_v28, %s15911_s21  ;;  %vm20290_vm0 = vmmov %vm20289_vm14 }
 0x551   : > { %v18334_v56 = vpack.i.bf16 %v18326_v37, %v18322_v49  ;;  %v18346_v1 = vpack.i.bf16 %v18322_v49, %v18281_v7 }
 0x553   : > { %15495 = vrot.lane.b32.xlu1 %v18334_v56, %s15911_s21  ;;  %s20387_s21 = smov 29  }
 0x554   : > { %7088 = vrot.lane.b32.xlu0 %v18231_v39, %s15912_s22 }
 0x557   : > { %15500 = vrot.lane.b32.xlu1 %v18249_v15, %s15912_s22 }
 0x558   : > { %15510 = vrot.lane.b32.xlu0 %v18334_v56, %s15912_s22 }
 0x55b   : > { %15505 = vrot.lane.b32.xlu1 %v18289_v8, %s15912_s22 }
 0x55c   : > { %15515 = vrot.lane.b32.xlu0 %v18249_v15, %s15913_s23 }
 0x55f   : > { %7086 = vrot.lane.b32.xlu1 %v18330_v28, %s15912_s22  ;;  %s20402_s22 = smov 28  }
 0x560   : > { %15520 = vrot.lane.b32.xlu0 %v18289_v8, %s15913_s23 }
 0x563   : > { %7536 = vrot.lane.b32.xlu1 %v18231_v39, %s15913_s23 }
 0x564   : > { %7534 = vrot.lane.b32.xlu0 %v18330_v28, %s15913_s23 }
 0x567   : > { %15525 = vrot.lane.b32.xlu1 %v18334_v56, %s15913_s23 }
 0x568   : > { %7768 = vrot.lane.b32.xlu0 %v18231_v39, %s15914_s24 }
 0x56b   : > { %15530 = vrot.lane.b32.xlu1 %v18249_v15, %s15914_s24 }
 0x56c   : > { %15540 = vrot.lane.b32.xlu0 %v18334_v56, %s15914_s24 }
 0x56f   : > { %15535 = vrot.lane.b32.xlu1 %v18289_v8, %s15914_s24 }
 0x570   : > { %15545 = vrot.lane.b32.xlu0 %v18249_v15, %s15915_s25 }
 0x573   : > { %7766 = vrot.lane.b32.xlu1 %v18330_v28, %s15914_s24 }
 0x574   : > { %15550 = vrot.lane.b32.xlu0 %v18289_v8, %s15915_s25 }
 0x577   : > { %8000 = vrot.lane.b32.xlu1 %v18231_v39, %s15915_s25 }
 0x578   : > { %7998 = vrot.lane.b32.xlu0 %v18330_v28, %s15915_s25 }
 0x57b   : > { %15555 = vrot.lane.b32.xlu1 %v18334_v56, %s15915_s25  ;;  %s20410_s25 = smov 27  }
 0x57c   : > { %8232 = vrot.lane.b32.xlu0 %v18231_v39, %s15916_s26 }
 0x57f   : > { %15560 = vrot.lane.b32.xlu1 %v18249_v15, %s15916_s26 }
 0x580   : > { %15570 = vrot.lane.b32.xlu0 %v18334_v56, %s15916_s26 }
 0x583   : > { %15565 = vrot.lane.b32.xlu1 %v18289_v8, %s15916_s26 }
 0x584   : > { %15575 = vrot.lane.b32.xlu0 %v18249_v15, %s15917_s27 }
 0x587   : > { %8230 = vrot.lane.b32.xlu1 %v18330_v28, %s15916_s26 }
 0x588   : > { %15580 = vrot.lane.b32.xlu0 %v18289_v8, %s15917_s27 }
 0x58b   : > { %8464 = vrot.lane.b32.xlu1 %v18231_v39, %s15917_s27 }
 0x58c   : > { %8462 = vrot.lane.b32.xlu0 %v18330_v28, %s15917_s27 }
 0x58f   : > { %15585 = vrot.lane.b32.xlu1 %v18334_v56, %s15917_s27  ;;  %s20332_s27 = smov 118  }
 0x590   : > { %8696 = vrot.lane.b32.xlu0 %v18231_v39, %s15918_s28 }
 0x593   : > { %15590 = vrot.lane.b32.xlu1 %v18249_v15, %s15918_s28 }
 0x594   : > { %15600 = vrot.lane.b32.xlu0 %v18334_v56, %s15918_s28 }
 0x597   : > { %15595 = vrot.lane.b32.xlu1 %v18289_v8, %s15918_s28 }
 0x598   : > { %15605 = vrot.lane.b32.xlu0 %v18249_v15, %s15919_s29 }
 0x59b   : > { %8694 = vrot.lane.b32.xlu1 %v18330_v28, %s15918_s28  ;;  %s20343_s28 = smov 117  }
 0x59c   : > { %15610 = vrot.lane.b32.xlu0 %v18289_v8, %s15919_s29 }
 0x59f   : > { %8928 = vrot.lane.b32.xlu1 %v18231_v39, %s15919_s29 }
 0x5a0   : > { %8926 = vrot.lane.b32.xlu0 %v18330_v28, %s15919_s29 }
 0x5a3   : > { %15615 = vrot.lane.b32.xlu1 %v18334_v56, %s15919_s29  ;;  %s20434_s29 = smov 18  }
 0x5a4   : > { %9160 = vrot.lane.b32.xlu0 %v18231_v39, %s15920_s30 }
 0x5a7   : > { %15620 = vrot.lane.b32.xlu1 %v18249_v15, %s15920_s30 }
 0x5a8   : > { %15630 = vrot.lane.b32.xlu0 %v18334_v56, %s15920_s30 }
 0x5ab   : > { %15625 = vrot.lane.b32.xlu1 %v18289_v8, %s15920_s30 }
 0x5ac   : > { %15635 = vrot.lane.b32.xlu0 %v18249_v15, %s15921_s5 }
 0x5af   : > { %9158 = vrot.lane.b32.xlu1 %v18330_v28, %s15920_s30 }
 0x5b0   : > { %15640 = vrot.lane.b32.xlu0 %v18289_v8, %s15921_s5 }
 0x5b3   : > { %9392 = vrot.lane.b32.xlu1 %v18231_v39, %s15921_s5 }
 0x5b4   : > { %9390 = vrot.lane.b32.xlu0 %v18330_v28, %s15921_s5  ;;  %v7122_v51 = vpop.permute.xlu1 %7121 }
 0x5b7   : > { %15645 = vrot.lane.b32.xlu1 %v18334_v56, %s15921_s5  ;;  %s20355_s5 = smov 39  }
 0x5b8   : > { %9624 = vrot.lane.b32.xlu0 %v18231_v39, %s15922_s6 }
 0x5b9   : > { %v15486_v46 = vpop.permute.xlu0 %15485 }
 0x5ba   : > { %v15488_v6 = vunpack.i.h.bf16 %v15486_v46  ;;  %v15487_v57 = vunpack.i.l.bf16 %v15486_v46  ;;  %v18463_v46 = vpack.c.bf16 %v251_v31, %v251_v31 }
 0x5bb   : > { %15650 = vrot.lane.b32.xlu1 %v18249_v15, %s15922_s6 }
 0x5bc   : > { %15660 = vrot.lane.b32.xlu0 %v18334_v56, %s15922_s6  ;;  %v7129_v0 = vsel %vm20287_vm1, %v15487_v57, %v15488_v6  ;;  %v7130_v33 = vsel %vm20288_vm10, %v7122_v51, %v15487_v57  ;;  %vm20291_vm10 = vmmov %vm20287_vm1 }
 0x5bd   : > { %v7132_v32 = vpack.c.bf16 %v7129_v0, %v7129_v0  ;;  %v7131_v26 = vpack.c.bf16 %v7130_v33, %v7130_v33 }
 0x5be   : > { %v15491_v61 = vpop.permute.xlu0 %15490 }
 0x5bf   : > { %15655 = vrot.lane.b32.xlu1 %v18289_v8, %s15922_s6  ;;  %v15493_v35 = vunpack.i.h.bf16 %v15491_v61  ;;  %v15492_v2 = vunpack.i.l.bf16 %v15491_v61  ;;  %13881 = vmatprep.subr.msk.bf16.mxu0 %vm20289_vm14, %v7132_v32  ;;  %v7143_v50 = vsel %vm20290_vm0, %v7131_v26, 0  ;;  %vm20292_vm14 = vmmov %vm20287_vm1  ;;  %vm20293_vm0 = vcmask 64512  }
 0x5c0   : > { %15665 = vrot.lane.b32.xlu0 %v18249_v15, %s15923_s9  ;;  %7167 = vmatpush1.bf16.msra.mxu0 %v7143_v50  ;;  %vm20296_vm9 = vmmov %vm20292_vm14 }
 0x5c1   : > { %v7127_v57 = vsel %vm20287_vm1, %v15492_v2, %v15493_v35  ;;  %v7128_v0 = vsel %vm20291_vm10, %v15488_v6, %v15492_v2  ;;  %vm20294_vm1 = vcmask 1043456   ;;  %vm20298_vm15 = vmmov %vm20296_vm9  ;;  %v20299_v2 = vmov 0  }
 0x5c2   : > { %v7120_v33 = vpop.permute.xlu0 %7119  ;;  %v7134_v61 = vpack.c.bf16 %v7127_v57, %v7127_v57  ;;  %v7133_v63 = vpack.c.bf16 %v7128_v0, %v7128_v0  ;;  %vm20295_vm10 = vmmov %vm20294_vm1 }
 0x5c3   : > { %9622 = vrot.lane.b32.xlu1 %v18330_v28, %s15922_s6  ;;  %v7123_v32 = vsel %vm20292_vm14, %v7120_v33, %v7122_v51  ;;  %13882 = vmatmul.mubr.msk.bf16.vlgmr.msra.gmra.mrb[8].mxu0 %vm20293_vm0, %v18463_v46  ;;  %vm20297_vm14 = vmmov %vm20296_vm9  ;;  %s20365_s6 = smov 38  }
 0x5c4   : > { %v7138_v55 = vpack.c.bf16 %v7123_v32, %v7123_v32  ;;  %15670 = vrot.lane.b32.xlu0 %v18289_v8, %s15923_s9  ;;  %v7149_v50 = vsel %vm20294_vm1, %v7133_v63, 0  ;;  %13883 = vmatprep.subr.msk.bf16.mxu1 %vm20295_vm10, %v7134_v61  ;;  %vm20300_vm0 = vmmov %vm20294_vm1  ;;  %vm20304_vm10 = vcmp.lt.s32.totalorder %v16134_v13, 111 }
 0x5c5   : > { %v15496_v19 = vpop.permute.xlu1 %15495  ;;  %7208 = vmatpush1.bf16.msra.mxu1 %v7149_v50  ;;  %7280 = vmatprep.mubr.bf16.mxu0 %v20299_v2  ;;  %vm20303_vm1 = vmmov %vm20300_vm0 }
 0x5c6   : > { %v15498_v26 = vunpack.i.h.bf16 %v15496_v19  ;;  %v15497_v31 = vunpack.i.l.bf16 %v15496_v19  ;;  %v7089_v51 = vpop.permute.xlu0 %7088  ;;  %13887 = vmatprep.subr.msk.bf16.mxu1 %vm20300_vm0, %v7138_v55 }
 0x5c7   : > { %9856 = vrot.lane.b32.xlu1 %v18231_v39, %s15923_s9 }
 0x5c8   : > { %v7124_v6 = vsel %vm20296_vm9, %v15498_v26, %v7120_v33  ;;  %v7125_v19 = vsel %vm20297_vm14, %v15497_v31, %v15498_v26  ;;  %v7126_v8 = vsel %vm20298_vm15, %v15493_v35, %v15497_v31  ;;  %9854 = vrot.lane.b32.xlu0 %v18330_v28, %s15923_s9  ;;  %vm20301_vm9 = vcmask 64512   ;;  %vm20302_vm15 = vmmov %vm20300_vm0 }
 0x5c9   : > { %v7137_v57 = vpack.c.bf16 %v7124_v6, %v7124_v6  ;;  %v15501_v63 = vpop.permute.xlu1 %15500  ;;  %v7136_v0 = vpack.c.bf16 %v7125_v19, %v7125_v19  ;;  %v7135_v32 = vpack.c.bf16 %v7126_v8, %v7126_v8  ;;  %13884 = vmatmul.mubr.msk.bf16.vlgmr.msra.gmra.mrb[8].mxu1 %vm20301_vm9, %v18463_v46  ;;  %vm20305_vm14 = vmmov %vm20300_vm0 }
 0x5ca   : > { %v15503_v61 = vunpack.i.h.bf16 %v15501_v63  ;;  %v15502_v22 = vunpack.i.l.bf16 %v15501_v63  ;;  %v15511_v26 = vpop.permute.xlu0 %15510  ;;  %vm20306_vm0 = vmmov %vm20304_vm10  ;;  %7321 = vmatprep.mubr.bf16.mxu1 %v20299_v2 }
 0x5cb   : > { %15675 = vrot.lane.b32.xlu1 %v18334_v56, %s15923_s9  ;;  %v7155_v35 = vsel %vm20302_vm15, %v7135_v32, 0  ;;  %v7161_v33 = vsel %vm20303_vm1, %v7137_v57, 0  ;;  %13885 = vmatprep.subr.msk.bf16.mxu0 %vm20305_vm14, %v7136_v0  ;;  %v15513_v6 = vunpack.i.h.bf16 %v15511_v26  ;;  %v15512_v19 = vunpack.i.l.bf16 %v15511_v26  ;;  %vm20307_vm9 = vmmov %vm20303_vm1 }
 0x5cc   : > { %v7097_v55 = vsel %vm20304_vm10, %v7089_v51, %v15502_v22  ;;  %7290 = vmatpush1.bf16.msra.mxu1 %v7161_v33  ;;  %v7096_v31 = vsel %vm20306_vm0, %v15502_v22, %v15503_v61  ;;  %7249 = vmatpush1.bf16.msra.mxu0 %v7155_v35  ;;  %vm20308_vm15 = vmmov %vm20303_vm1  ;;  %v18511_v0 = vpack.i.bf16 %v18330_v28, %v18326_v37  ;;  %vm20310_vm10 = vcmask 64512  }
 0x5cd   : > { %v7098_v50 = vpack.c.bf16 %v7097_v55, %v7097_v55  ;;  %v15506_v56 = vpop.permute.xlu1 %15505  ;;  %v7099_v8 = vpack.c.bf16 %v7096_v31, %v7096_v31  ;;  %10286 = vrot.lane.b32.xlu0 %v18277_v58, %s15924_s10  ;;  %vm20309_vm1 = vmmov %vm20306_vm0 }
 0x5ce   : > { %v15508_v63 = vunpack.i.h.bf16 %v15506_v56  ;;  %v15507_v57 = vunpack.i.l.bf16 %v15506_v56  ;;  %v7092_v32 = vsel %vm20309_vm1, %v15512_v19, %v15513_v6  ;;  %v15516_v35 = vpop.permute.xlu0 %15515  ;;  %vm20311_vm14 = vmmov %vm20306_vm0  ;;  %vm20314_vm1 = vcmask 1043456  }
 0x5cf   : > { %15680 = vrot.lane.b32.xlu1 %v18249_v15, %s15924_s10  ;;  %13889 = vmatprep.subr.msk.bf16.mxu0 %vm20307_vm9, %v7099_v8  ;;  %v7334_v22 = vsel %vm20308_vm15, %v7098_v50, 0  ;;  %v7103_v55 = vpack.c.bf16 %v7092_v32, %v7092_v32  ;;  %vm20312_vm9 = vmmov %vm20306_vm0  ;;  %v15518_v56 = vunpack.i.h.bf16 %v15516_v35  ;;  %v15517_v8 = vunpack.i.l.bf16 %v15516_v35 }
 0x5d0   : > { %13886 = vmatmul.mubr.msk.bf16.vlgmr.msra.gmra.mrb[12].mxu0 %vm20310_vm10, %v18463_v46  ;;  %v7094_v33 = vsel %vm20311_vm14, %v15507_v57, %v15508_v63  ;;  %v7095_v26 = vsel %vm20306_vm0, %v15503_v61, %v15507_v57  ;;  %v7093_v31 = vsel %vm20312_vm9, %v15508_v63, %v15512_v19  ;;  %vm20313_vm15 = vmmov %vm20306_vm0  ;;  %vm20316_vm0 = vcmp.lt.s32.totalorder %v16134_v13, 109 }
 0x5d1   : > { %7358 = vmatpush1.bf16.msra.mxu0 %v7334_v22  ;;  %v7087_v50 = vpop.permute.xlu1 %7086  ;;  %v7101_v34 = vpack.c.bf16 %v7094_v33, %v7094_v33  ;;  %v7100_v23 = vpack.c.bf16 %v7095_v26, %v7095_v26  ;;  %7389 = vmatprep.mubr.bf16.mxu0 %v20299_v2  ;;  %vm20315_vm14 = vmmov %vm20314_vm1  ;;  %v7544_v63 = vsel %vm20316_vm0, %v15517_v8, %v15518_v56 }
 0x5d2   : > { %v7090_v32 = vsel %vm20313_vm15, %v7087_v50, %v7089_v51  ;;  %15690 = vrot.lane.b32.xlu0 %v18511_v0, %s15924_s10  ;;  %13893 = vmatprep.subr.msk.bf16.mxu0 %vm20314_vm1, %v7103_v55  ;;  %v7091_v51 = vsel %vm20312_vm9, %v15513_v6, %v7087_v50  ;;  %vm20317_vm15 = vmmov %vm20314_vm1  ;;  %v15521_v57 = vpop.permute.xlu0 %15520  ;;  %v7073_v22 = vpack.c.bf16 %v250_v36, %v250_v36 }
 0x5d3   : > { %v7105_v61 = vpack.c.bf16 %v7090_v32, %v7090_v32  ;;  %15685 = vrot.lane.b32.xlu1 %v18346_v1, %s15924_s10  ;;  %13888 = vmatmul.mubr.msk.bf16.vlgmr.msra.gmra.mrb[12].mxu1 %vm20310_vm10, %v18463_v46  ;;  %v7340_v19 = vsel %vm20315_vm14, %v7100_v23, 0  ;;  %v7102_v35 = vpack.c.bf16 %v7093_v31, %v7093_v31  ;;  %v15523_v55 = vunpack.i.h.bf16 %v15521_v57  ;;  %vm20318_vm10 = vmmov %vm20316_vm0 }
 0x5d4   : > { %13891 = vmatprep.subr.msk.bf16.mxu1 %vm20317_vm15, %v7101_v34  ;;  %7430 = vmatprep.mubr.bf16.mxu1 %v20299_v2  ;;  %v15522_v26 = vunpack.i.l.bf16 %v15521_v57  ;;  %v7547_v23 = vpack.c.bf16 %v7544_v63, %v7544_v63  ;;  %v7104_v46 = vpack.c.bf16 %v7091_v51, %v7091_v51  ;;  %vm20319_vm14 = vcmask 64512   ;;  %vm20320_vm0 = vmmov %vm20314_vm1 }
 0x5d5   : > { %7399 = vmatpush1.bf16.msra.mxu1 %v7340_v19  ;;  %v7537_v33 = vpop.permute.xlu1 %7536  ;;  %v7346_v34 = vsel %vm20320_vm0, %v7102_v35, 0  ;;  %vm20321_vm9 = vmmov %vm20318_vm10 }
 0x5d6   : > { %13895 = vmatprep.subr.msk.bf16.mxu1 %vm20314_vm1, %v7105_v61  ;;  %15695 = vrot.lane.b32.xlu0 %v18249_v15, %s15925_s13  ;;  %v7542_v36 = vsel %vm20318_vm10, %v15522_v26, %v15523_v55  ;;  %v7545_v6 = vsel %vm20321_vm9, %v7537_v33, %v15517_v8  ;;  %v7535_v50 = vpop.permute.xlu0 %7534  ;;  %vm20322_vm15 = vmmov %vm20320_vm0 }
 0x5d7   : > { %10296 = vrot.lane.b32.xlu1 %v18231_v39, %s15924_s10  ;;  %v7549_v32 = vpack.c.bf16 %v7542_v36, %v7542_v36  ;;  %vm20323_vm1 = vmmov %vm20319_vm14  ;;  %v7546_v63 = vpack.c.bf16 %v7545_v6, %v7545_v6 }
 0x5d8   : > { %13890 = vmatmul.mubr.msk.bf16.vlgmr.msra.gmra.mrb[8].mxu0 %vm20319_vm14, %v7073_v22  ;;  %vm20324_vm10 = vmmov %vm20320_vm0 }
 0x5d9   : > { %7440 = vmatpush1.bf16.msra.mxu0 %v7346_v34  ;;  %v15526_v31 = vpop.permute.xlu1 %15525  ;;  %7471 = vmatprep.mubr.bf16.mxu0 %v20299_v2  ;;  %v7352_v8 = vsel %vm20324_vm10, %v7104_v46, 0  ;;  %vm20325_vm14 = vmmov %vm20321_vm9 }
 0x5da   : > { %13897 = vmatprep.subr.msk.bf16.mxu0 %vm20322_vm15, %v7547_v23  ;;  %v15528_v61 = vunpack.i.h.bf16 %v15526_v31  ;;  %v15527_v19 = vunpack.i.l.bf16 %v15526_v31  ;;  %15700 = vrot.lane.b32.xlu0 %v18346_v1, %s15925_s13  ;;  %vm20326_vm0 = vmmov %vm20321_vm9  ;;  %v7769_v36 = vpop.permute.xlu0 %7768 }
 0x5db   : > { %10518 = vrot.lane.b32.xlu1 %v18277_v58, %s15925_s13  ;;  %13892 = vmatmul.mubr.msk.bf16.vlgmr.msra.gmra.mrb[8].mxu1 %vm20323_vm1, %v7073_v22  ;;  %v7543_v57 = vsel %vm20326_vm0, %v15518_v56, %v15522_v26  ;;  %vm20327_vm9 = vmmov %vm20324_vm10  ;;  %v252_v56 = vld [vmem:[%s20003_s3 + $0x10] sm:$0xff] }
 0x5dc   : > { %7481 = vmatpush1.bf16.msra.mxu1 %v7352_v8  ;;  %v7540_v51 = vsel %vm20325_vm14, %v15527_v19, %v15528_v61  ;;  %7512 = vmatprep.mubr.bf16.mxu1 %v20299_v2  ;;  %v7548_v46 = vpack.c.bf16 %v7543_v57, %v7543_v57  ;;  %vm20328_vm15 = vmmov %vm20326_vm0 }
 0x5dd   : > { %13899 = vmatprep.subr.msk.bf16.mxu1 %vm20327_vm9, %v7549_v32  ;;  %v15531_v35 = vpop.permute.xlu1 %15530  ;;  %v7551_v23 = vpack.c.bf16 %v7540_v51, %v7540_v51  ;;  %v7538_v34 = vsel %vm20328_vm15, %v7535_v50, %v7537_v33  ;;  %vm20329_vm10 = vmmov %vm20327_vm9  ;;  %v7521_v51 = vpack.c.bf16 %v252_v56, %v252_v56 }
 0x5de   : > { %10528 = vrot.lane.b32.xlu0 %v18231_v39, %s15925_s13  ;;  %v7558_v6 = vsel %vm20329_vm10, %v7546_v63, 0  ;;  %v15533_v26 = vunpack.i.h.bf16 %v15531_v35  ;;  %v15532_v31 = vunpack.i.l.bf16 %v15531_v35  ;;  %vm20330_vm14 = vmmov %vm20326_vm0  ;;  %v7553_v33 = vpack.c.bf16 %v7538_v34, %v7538_v34 }
 0x5df   : > { %15705 = vrot.lane.b32.xlu1 %v18511_v0, %s15925_s13  ;;  %v7541_v8 = vsel %vm20330_vm14, %v15523_v55, %v15527_v19  ;;  %vm20331_vm0 = vmmov %vm20327_vm9  ;;  %v15541_v19 = vpop.permute.xlu0 %15540  ;;  %s20379_s13 = smov 37  }
 0x5e0   : > { %13894 = vmatmul.mubr.msk.bf16.vlgmr.msra.gmra.mrb[12].mxu0 %vm20323_vm1, %v7073_v22  ;;  %vm20333_vm9 = vmmov %vm20323_vm1  ;;  %v7550_v55 = vpack.c.bf16 %v7541_v8, %v7541_v8  ;;  %v15543_v56 = vunpack.i.h.bf16 %v15541_v19 }
 0x5e1   : > { %7582 = vmatpush1.bf16.msra.mxu0 %v7558_v6  ;;  %v15536_v32 = vpop.permute.xlu1 %15535  ;;  %7613 = vmatprep.mubr.bf16.mxu0 %v20299_v2  ;;  %vm20334_vm15 = vmmov %vm20331_vm0 }
 0x5e2   : > { %13901 = vmatprep.subr.msk.bf16.mxu0 %vm20331_vm0, %v7551_v23  ;;  %10750 = vrot.lane.b32.xlu0 %v18277_v58, %s20332_s27  ;;  %v7564_v63 = vsel %vm20334_vm15, %v7548_v46, 0  ;;  %vm20335_vm1 = vmmov %vm20330_vm14  ;;  %v15538_v35 = vunpack.i.h.bf16 %v15536_v32  ;;  %v15537_v6 = vunpack.i.l.bf16 %v15536_v32  ;;  %vm20337_vm14 = vcmp.lt.s32.totalorder %v16134_v13, 101 }
 0x5e3   : > { %15710 = vrot.lane.b32.xlu1 %v18249_v15, %s20332_s27  ;;  %13896 = vmatmul.mubr.msk.bf16.vlgmr.msra.gmra.mrb[12].mxu1 %vm20333_vm9, %v7073_v22  ;;  %v7539_v57 = vsel %vm20335_vm1, %v15528_v61, %v7535_v50  ;;  %vm20336_vm10 = vmmov %vm20331_vm0  ;;  %v7776_v23 = vsel %vm20337_vm14, %v15532_v31, %v15533_v26  ;;  %v15542_v32 = vunpack.i.l.bf16 %v15541_v19 }
 0x5e4   : > { %7623 = vmatpush1.bf16.msra.mxu1 %v7564_v63  ;;  %7654 = vmatprep.mubr.bf16.mxu1 %v20299_v2  ;;  %v7552_v22 = vpack.c.bf16 %v7539_v57, %v7539_v57  ;;  %vm20338_vm0 = vmmov %vm20333_vm9  ;;  %v7779_v61 = vpack.c.bf16 %v7776_v23, %v7776_v23 }
 0x5e5   : > { %13903 = vmatprep.subr.msk.bf16.mxu1 %vm20336_vm10, %v7553_v33  ;;  %vm20339_vm9 = vmmov %vm20336_vm10  ;;  %v7767_v8 = vpop.permute.xlu1 %7766  ;;  %v18609_v33 = vpop.permute.xlu0 %15545 }
 0x5e6   : > { %15720 = vrot.lane.b32.xlu0 %v18511_v0, %s20332_s27  ;;  %v7570_v50 = vsel %vm20339_vm9, %v7550_v55, 0  ;;  %vm20340_vm15 = vmmov %vm20337_vm14 }
 0x5e7   : > { %15715 = vrot.lane.b32.xlu1 %v18346_v1, %s20332_s27  ;;  %v7774_v46 = vsel %vm20340_vm15, %v15537_v6, %v15538_v35  ;;  %vm20341_vm1 = vmmov %vm20337_vm14 }
 0x5e8   : > { %13898 = vmatmul.mubr.msk.bf16.vlgmr.msra.gmra.mrb[8].mxu0 %vm20338_vm0, %v7521_v51  ;;  %v7777_v34 = vsel %vm20341_vm1, %v7769_v36, %v15532_v31  ;;  %vm20342_vm10 = vmmov %vm20339_vm9  ;;  %v7781_v63 = vpack.c.bf16 %v7774_v46, %v7774_v46  ;;  %v7772_v19 = vsel %vm20341_vm1, %v15542_v32, %v15543_v56  ;;  %v15548_v46 = vunpack.i.h.bf16 %v18609_v33 }
 0x5e9   : > { %7664 = vmatpush1.bf16.msra.mxu0 %v7570_v50  ;;  %7695 = vmatprep.mubr.bf16.mxu0 %v20299_v2  ;;  %vm20344_vm14 = vmmov %vm20338_vm0  ;;  %v7778_v57 = vpack.c.bf16 %v7777_v34, %v7777_v34  ;;  %v8001_v23 = vpop.permute.xlu1 %8000  ;;  %v15547_v34 = vunpack.i.l.bf16 %v18609_v33 }
 0x5ea   : > { %13905 = vmatprep.subr.msk.bf16.mxu0 %vm20342_vm10, %v7779_v61  ;;  %15725 = vrot.lane.b32.xlu0 %v18249_v15, %s20343_s28  ;;  %vm20345_vm0 = vmmov %vm20339_vm9  ;;  %v253_v61 = vld [vmem:[%s20003_s3 + $0x18] sm:$0xff] }
 0x5eb   : > { %10760 = vrot.lane.b32.xlu1 %v18231_v39, %s20332_s27  ;;  %13900 = vmatmul.mubr.msk.bf16.vlgmr.msra.gmra.mrb[8].mxu1 %vm20344_vm14, %v7521_v51  ;;  %v7576_v31 = vsel %vm20345_vm0, %v7552_v22, 0  ;;  %vm20346_vm9 = vmmov %vm20341_vm1 }
 0x5ec   : > { %7705 = vmatpush1.bf16.msra.mxu1 %v7576_v31  ;;  %7736 = vmatprep.mubr.bf16.mxu1 %v20299_v2  ;;  %v7775_v55 = vsel %vm20346_vm9, %v15533_v26, %v15537_v6  ;;  %vm20347_vm15 = vmmov %vm20345_vm0  ;;  %v7790_v26 = vsel %vm20345_vm0, %v7778_v57, 0  ;;  %v7783_v6 = vpack.c.bf16 %v7772_v19, %v7772_v19  ;;  %v15551_v31 = vpop.permute.xlu0 %15550  ;;  %v7753_v57 = vpack.c.bf16 %v253_v61, %v253_v61 }
 0x5ed   : > { %13907 = vmatprep.subr.msk.bf16.mxu1 %vm20347_vm15, %v7781_v63  ;;  %v7780_v22 = vpack.c.bf16 %v7775_v55, %v7775_v55  ;;  %vm20348_vm10 = vmmov %vm20341_vm1  ;;  %v15553_v19 = vunpack.i.h.bf16 %v15551_v31 }
 0x5ee   : > { %15730 = vrot.lane.b32.xlu0 %v18346_v1, %s20343_s28  ;;  %v7770_v50 = vsel %vm20348_vm10, %v7767_v8, %v7769_v36  ;;  %vm20349_vm9 = vmmov %vm20341_vm1 }
 0x5ef   : > { %10982 = vrot.lane.b32.xlu1 %v18277_v58, %s20343_s28  ;;  %v7773_v36 = vsel %vm20349_vm9, %v15538_v35, %v15542_v32  ;;  %vm20350_vm15 = vmmov %vm20345_vm0  ;;  %v7785_v63 = vpack.c.bf16 %v7770_v50, %v7770_v50  ;;  %v15556_v32 = vpop.permute.xlu1 %15555 }
 0x5f0   : > { %13902 = vmatmul.mubr.msk.bf16.vlgmr.msra.gmra.mrb[12].mxu0 %vm20344_vm14, %v7521_v51  ;;  %vm20351_vm1 = vmmov %vm20344_vm14  ;;  %v7782_v35 = vpack.c.bf16 %v7773_v36, %v7773_v36  ;;  %v15558_v61 = vunpack.i.h.bf16 %v15556_v32  ;;  %v7999_v36 = vpop.permute.xlu0 %7998 }
 0x5f1   : > { %7814 = vmatpush1.bf16.msra.mxu0 %v7790_v26  ;;  %7845 = vmatprep.mubr.bf16.mxu0 %v20299_v2  ;;  %vm20352_vm10 = vmmov %vm20345_vm0  ;;  %v15552_v26 = vunpack.i.l.bf16 %v15551_v31  ;;  %v15557_v31 = vunpack.i.l.bf16 %v15556_v32 }
 0x5f2   : > { %13909 = vmatprep.subr.msk.bf16.mxu0 %vm20350_vm15, %v7783_v6  ;;  %10992 = vrot.lane.b32.xlu0 %v18231_v39, %s20343_s28  ;;  %v7796_v33 = vsel %vm20352_vm10, %v7780_v22, 0  ;;  %vm20353_vm14 = vmmov %vm20349_vm9  ;;  %vm20354_vm9 = vcmp.lt.s32.totalorder %v16134_v13, 100 }
 0x5f3   : > { %15735 = vrot.lane.b32.xlu1 %v18511_v0, %s20343_s28  ;;  %13904 = vmatmul.mubr.msk.bf16.vlgmr.msra.gmra.mrb[12].mxu1 %vm20351_vm1, %v7521_v51  ;;  %v7771_v55 = vsel %vm20353_vm14, %v15543_v56, %v7767_v8  ;;  %v8008_v50 = vsel %vm20354_vm9, %v15547_v34, %v15548_v46  ;;  %vm20356_vm15 = vmmov %vm20351_vm1  ;;  %s20423_s28 = smov 19  }
 0x5f4   : > { %7855 = vmatpush1.bf16.msra.mxu1 %v7796_v33  ;;  %7886 = vmatprep.mubr.bf16.mxu1 %v20299_v2  ;;  %v7784_v51 = vpack.c.bf16 %v7771_v55, %v7771_v55  ;;  %vm20357_vm1 = vmmov %vm20345_vm0  ;;  %v8011_v8 = vpack.c.bf16 %v8008_v50, %v8008_v50  ;;  %v8233_v50 = vpop.permute.xlu0 %8232 }
 0x5f5   : > { %13911 = vmatprep.subr.msk.bf16.mxu1 %vm20345_vm0, %v7785_v63  ;;  %v7802_v56 = vsel %vm20357_vm1, %v7782_v35, 0  ;;  %vm20358_vm10 = vmmov %vm20354_vm9  ;;  %v18664_v63 = vpop.permute.xlu1 %15560 }
 0x5f6   : > { %11214 = vrot.lane.b32.xlu0 %v18277_v58, %s20355_s5  ;;  %v8006_v22 = vsel %vm20358_vm10, %v15552_v26, %v15553_v19  ;;  %vm20359_vm14 = vmmov %vm20354_vm9 }
 0x5f7   : > { %15740 = vrot.lane.b32.xlu1 %v18249_v15, %s20355_s5  ;;  %v8009_v6 = vsel %vm20359_vm14, %v8001_v23, %v15547_v34  ;;  %vm20360_vm9 = vmmov %vm20356_vm15  ;;  %v8013_v33 = vpack.c.bf16 %v8006_v22, %v8006_v22  ;;  %v15563_v22 = vunpack.i.h.bf16 %v18664_v63 }
 0x5f8   : > { %13906 = vmatmul.mubr.msk.bf16.vlgmr.msra.gmra.mrb[8].mxu0 %vm20356_vm15, %v7753_v57  ;;  %vm20361_vm15 = vmmov %vm20345_vm0  ;;  %v8010_v55 = vpack.c.bf16 %v8009_v6, %v8009_v6  ;;  %v15562_v6 = vunpack.i.l.bf16 %v18664_v63 }
 0x5f9   : > { %7896 = vmatpush1.bf16.msra.mxu0 %v7802_v56  ;;  %7927 = vmatprep.mubr.bf16.mxu0 %v20299_v2  ;;  %v7808_v34 = vsel %vm20361_vm15, %v7784_v51, 0  ;;  %vm20362_vm1 = vmmov %vm20358_vm10 }
 0x5fa   : > { %13913 = vmatprep.subr.msk.bf16.mxu0 %vm20345_vm0, %v8011_v8  ;;  %15750 = vrot.lane.b32.xlu0 %v18511_v0, %s20355_s5  ;;  %v8007_v35 = vsel %vm20362_vm1, %v15548_v46, %v15552_v26  ;;  %vm20363_vm10 = vmmov %vm20345_vm0  ;;  %v254_v8 = vld [vmem:[%s20003_s3 + $0x20] sm:$0xff] }
 0x5fb   : > { %15745 = vrot.lane.b32.xlu1 %v18346_v1, %s20355_s5  ;;  %13908 = vmatmul.mubr.msk.bf16.vlgmr.msra.gmra.mrb[8].mxu1 %vm20360_vm9, %v7753_v57  ;;  %vm20364_vm14 = vmmov %vm20362_vm1  ;;  %v8012_v51 = vpack.c.bf16 %v8007_v35, %v8007_v35 }
 0x5fc   : > { %7937 = vmatpush1.bf16.msra.mxu1 %v7808_v34  ;;  %7968 = vmatprep.mubr.bf16.mxu1 %v20299_v2  ;;  %v8004_v32 = vsel %vm20364_vm14, %v15557_v31, %v15558_v61  ;;  %vm20366_vm0 = vmmov %vm20362_vm1  ;;  %v15566_v34 = vpop.permute.xlu1 %15565 }
 0x5fd   : > { %13915 = vmatprep.subr.msk.bf16.mxu1 %vm20363_vm10, %v8013_v33  ;;  %v8002_v56 = vsel %vm20366_vm0, %v7999_v36, %v8001_v23  ;;  %vm20367_vm15 = vmmov %vm20363_vm10  ;;  %v8015_v26 = vpack.c.bf16 %v8004_v32, %v8004_v32  ;;  %v15568_v32 = vunpack.i.h.bf16 %v15566_v34 }
 0x5fe   : > { %15755 = vrot.lane.b32.xlu0 %v18249_v15, %s20365_s6  ;;  %v8022_v46 = vsel %vm20367_vm15, %v8010_v55, 0  ;;  %vm20368_vm1 = vmmov %vm20366_vm0  ;;  %v8017_v33 = vpack.c.bf16 %v8002_v56, %v8002_v56  ;;  %v7985_v55 = vpack.c.bf16 %v254_v8, %v254_v8 }
 0x5ff   : > { %11224 = vrot.lane.b32.xlu1 %v18231_v39, %s20355_s5  ;;  %v8005_v23 = vsel %vm20368_vm1, %v15553_v19, %v15557_v31  ;;  %vm20369_vm14 = vmmov %vm20360_vm9  ;;  %v15571_v31 = vpop.permute.xlu0 %15570 }
 0x600   : > { %13910 = vmatmul.mubr.msk.bf16.vlgmr.msra.gmra.mrb[12].mxu0 %vm20360_vm9, %v7753_v57  ;;  %vm20370_vm0 = vmmov %vm20363_vm10  ;;  %v8014_v19 = vpack.c.bf16 %v8005_v23, %v8005_v23  ;;  %v15573_v8 = vunpack.i.h.bf16 %v15571_v31  ;;  %v8231_v23 = vpop.permute.xlu1 %8230 }
 0x601   : > { %8046 = vmatpush1.bf16.msra.mxu0 %v8022_v46  ;;  %8077 = vmatprep.mubr.bf16.mxu0 %v20299_v2  ;;  %v8028_v63 = vsel %vm20370_vm0, %v8012_v51, 0  ;;  %vm20371_vm9 = vmmov %vm20368_vm1  ;;  %v15567_v46 = vunpack.i.l.bf16 %v15566_v34  ;;  %vm20373_vm1 = vcmp.lt.s32.totalorder %v16134_v13, 99  ;;  %v15572_v34 = vunpack.i.l.bf16 %v15571_v31 }
 0x602   : > { %13917 = vmatprep.subr.msk.bf16.mxu0 %vm20363_vm10, %v8015_v26  ;;  %15760 = vrot.lane.b32.xlu0 %v18346_v1, %s20365_s6  ;;  %v8003_v35 = vsel %vm20371_vm9, %v15558_v61, %v7999_v36  ;;  %vm20372_vm15 = vmmov %vm20370_vm0  ;;  %v8240_v56 = vsel %vm20373_vm1, %v15562_v6, %v15563_v22 }
 0x603   : > { %11446 = vrot.lane.b32.xlu1 %v18277_v58, %s20365_s6  ;;  %13912 = vmatmul.mubr.msk.bf16.vlgmr.msra.gmra.mrb[12].mxu1 %vm20369_vm14, %v7753_v57  ;;  %v8016_v57 = vpack.c.bf16 %v8003_v35, %v8003_v35  ;;  %vm20374_vm10 = vmmov %vm20369_vm14  ;;  %v8243_v36 = vpack.c.bf16 %v8240_v56, %v8240_v56 }
 0x604   : > { %8087 = vmatpush1.bf16.msra.mxu1 %v8028_v63  ;;  %8118 = vmatprep.mubr.bf16.mxu1 %v20299_v2  ;;  %vm20375_vm14 = vmmov %vm20370_vm0  ;;  %v8465_v56 = vpop.permute.xlu1 %8464 }
 0x605   : > { %13919 = vmatprep.subr.msk.bf16.mxu1 %vm20372_vm15, %v8017_v33  ;;  %v8034_v61 = vsel %vm20375_vm14, %v8014_v19, 0  ;;  %vm20376_vm0 = vmmov %vm20373_vm1  ;;  %v18719_v33 = vpop.permute.xlu0 %15575 }
 0x606   : > { %11456 = vrot.lane.b32.xlu0 %v18231_v39, %s20365_s6  ;;  %v8238_v51 = vsel %vm20376_vm0, %v15567_v46, %v15568_v32  ;;  %vm20377_vm9 = vmmov %vm20376_vm0 }
 0x607   : > { %15765 = vrot.lane.b32.xlu1 %v18511_v0, %s20365_s6  ;;  %v8241_v26 = vsel %vm20377_vm9, %v8233_v50, %v15562_v6  ;;  %vm20378_vm15 = vmmov %vm20375_vm14  ;;  %v8245_v63 = vpack.c.bf16 %v8238_v51, %v8238_v51  ;;  %v8236_v31 = vsel %vm20377_vm9, %v15572_v34, %v15573_v8  ;;  %v15578_v51 = vunpack.i.h.bf16 %v18719_v33  ;;  %s20447_s6 = smov 17  }
 0x608   : > { %13914 = vmatmul.mubr.msk.bf16.vlgmr.msra.gmra.mrb[8].mxu0 %vm20374_vm10, %v7985_v55  ;;  %vm20380_vm1 = vmmov %vm20374_vm10  ;;  %v8242_v35 = vpack.c.bf16 %v8241_v26, %v8241_v26  ;;  %v15577_v26 = vunpack.i.l.bf16 %v18719_v33 }
 0x609   : > { %8128 = vmatpush1.bf16.msra.mxu0 %v8034_v61  ;;  %8159 = vmatprep.mubr.bf16.mxu0 %v20299_v2  ;;  %vm20381_vm10 = vmmov %vm20375_vm14 }
 0x60a   : > { %13921 = vmatprep.subr.msk.bf16.mxu0 %vm20378_vm15, %v8243_v36  ;;  %11678 = vrot.lane.b32.xlu0 %v18277_v58, %s20379_s13  ;;  %v8040_v6 = vsel %vm20381_vm10, %v8016_v57, 0  ;;  %vm20382_vm14 = vmmov %vm20376_vm0  ;;  %v255_v36 = vld [vmem:[%s20003_s3 + $0x28] sm:$0xff] }
 0x60b   : > { %15770 = vrot.lane.b32.xlu1 %v18249_v15, %s20379_s13  ;;  %13916 = vmatmul.mubr.msk.bf16.vlgmr.msra.gmra.mrb[8].mxu1 %vm20380_vm1, %v7985_v55  ;;  %v8239_v19 = vsel %vm20382_vm14, %v15563_v22, %v15567_v46  ;;  %vm20383_vm0 = vmmov %vm20381_vm10  ;;  %v8247_v46 = vpack.c.bf16 %v8236_v31, %v8236_v31 }
 0x60c   : > { %8169 = vmatpush1.bf16.msra.mxu1 %v8040_v6  ;;  %8200 = vmatprep.mubr.bf16.mxu1 %v20299_v2  ;;  %v8244_v57 = vpack.c.bf16 %v8239_v19, %v8239_v19  ;;  %vm20384_vm15 = vmmov %vm20377_vm9  ;;  %v15581_v6 = vpop.permute.xlu0 %15580 }
 0x60d   : > { %13923 = vmatprep.subr.msk.bf16.mxu1 %vm20383_vm0, %v8245_v63  ;;  %v8234_v61 = vsel %vm20384_vm15, %v8231_v23, %v8233_v50  ;;  %vm20385_vm10 = vmmov %vm20383_vm0  ;;  %v15583_v31 = vunpack.i.h.bf16 %v15581_v6 }
 0x60e   : > { %15780 = vrot.lane.b32.xlu0 %v18511_v0, %s20379_s13  ;;  %v8254_v22 = vsel %vm20385_vm10, %v8242_v35, 0  ;;  %vm20386_vm14 = vmmov %vm20377_vm9  ;;  %v8249_v63 = vpack.c.bf16 %v8234_v61, %v8234_v61  ;;  %v8217_v35 = vpack.c.bf16 %v255_v36, %v255_v36 }
 0x60f   : > { %15775 = vrot.lane.b32.xlu1 %v18346_v1, %s20379_s13  ;;  %v8237_v50 = vsel %vm20386_vm14, %v15568_v32, %v15572_v34  ;;  %vm20388_vm9 = vmmov %vm20380_vm1  ;;  %v15586_v34 = vpop.permute.xlu1 %15585 }
 0x610   : > { %13918 = vmatmul.mubr.msk.bf16.vlgmr.msra.gmra.mrb[12].mxu0 %vm20380_vm1, %v7985_v55  ;;  %vm20389_vm15 = vmmov %vm20383_vm0  ;;  %v8246_v32 = vpack.c.bf16 %v8237_v50, %v8237_v50  ;;  %v15588_v36 = vunpack.i.h.bf16 %v15586_v34  ;;  %v8463_v50 = vpop.permute.xlu0 %8462 }
 0x611   : > { %8278 = vmatpush1.bf16.msra.mxu0 %v8254_v22  ;;  %8309 = vmatprep.mubr.bf16.mxu0 %v20299_v2  ;;  %v8260_v33 = vsel %vm20389_vm15, %v8244_v57, 0  ;;  %vm20390_vm1 = vmmov %vm20386_vm14  ;;  %v15582_v22 = vunpack.i.l.bf16 %v15581_v6  ;;  %vm20392_vm14 = vcmp.lt.s32.totalorder %v16134_v13, 91  ;;  %v15587_v6 = vunpack.i.l.bf16 %v15586_v34 }
 0x612   : > { %13925 = vmatprep.subr.msk.bf16.mxu0 %vm20383_vm0, %v8247_v46  ;;  %15785 = vrot.lane.b32.xlu0 %v18249_v15, %s20387_s21  ;;  %v8235_v19 = vsel %vm20390_vm1, %v15573_v8, %v8231_v23  ;;  %vm20391_vm10 = vmmov %vm20383_vm0  ;;  %v8472_v61 = vsel %vm20392_vm14, %v15577_v26, %v15578_v51 }
 0x613   : > { %11688 = vrot.lane.b32.xlu1 %v18231_v39, %s20379_s13  ;;  %13920 = vmatmul.mubr.msk.bf16.vlgmr.msra.gmra.mrb[12].mxu1 %vm20388_vm9, %v7985_v55  ;;  %v8248_v55 = vpack.c.bf16 %v8235_v19, %v8235_v19  ;;  %vm20393_vm0 = vmmov %vm20388_vm9  ;;  %v8475_v23 = vpack.c.bf16 %v8472_v61, %v8472_v61 }
 0x614   : > { %8319 = vmatpush1.bf16.msra.mxu1 %v8260_v33  ;;  %8350 = vmatprep.mubr.bf16.mxu1 %v20299_v2  ;;  %vm20394_vm9 = vmmov %vm20391_vm10  ;;  %v8697_v61 = vpop.permute.xlu0 %8696 }
 0x615   : > { %13927 = vmatprep.subr.msk.bf16.mxu1 %vm20391_vm10, %v8249_v63  ;;  %v8266_v8 = vsel %vm20394_vm9, %v8246_v32, 0  ;;  %vm20395_vm15 = vmmov %vm20392_vm14  ;;  %v18774_v63 = vpop.permute.xlu1 %15590 }
 0x616   : > { %15790 = vrot.lane.b32.xlu0 %v18346_v1, %s20387_s21  ;;  %v8470_v57 = vsel %vm20395_vm15, %v15582_v22, %v15583_v31  ;;  %vm20396_vm1 = vmmov %vm20392_vm14 }
 0x617   : > { %11910 = vrot.lane.b32.xlu1 %v18277_v58, %s20387_s21  ;;  %v8473_v46 = vsel %vm20396_vm1, %v8465_v56, %v15577_v26  ;;  %vm20397_vm10 = vmmov %vm20394_vm9  ;;  %v8477_v33 = vpack.c.bf16 %v8470_v57, %v8470_v57  ;;  %v8468_v34 = vsel %vm20396_vm1, %v15587_v6, %v15588_v36  ;;  %v15593_v57 = vunpack.i.h.bf16 %v18774_v63 }
 0x618   : > { %13922 = vmatmul.mubr.msk.bf16.vlgmr.msra.gmra.mrb[8].mxu0 %vm20393_vm0, %v8217_v35  ;;  %vm20398_vm14 = vmmov %vm20393_vm0  ;;  %v8474_v19 = vpack.c.bf16 %v8473_v46, %v8473_v46  ;;  %v15592_v46 = vunpack.i.l.bf16 %v18774_v63 }
 0x619   : > { %8360 = vmatpush1.bf16.msra.mxu0 %v8266_v8  ;;  %8391 = vmatprep.mubr.bf16.mxu0 %v20299_v2  ;;  %vm20399_vm0 = vmmov %vm20394_vm9 }
 0x61a   : > { %13929 = vmatprep.subr.msk.bf16.mxu0 %vm20397_vm10, %v8475_v23  ;;  %11920 = vrot.lane.b32.xlu0 %v18231_v39, %s20387_s21  ;;  %v8272_v26 = vsel %vm20399_vm0, %v8248_v55, 0  ;;  %vm20400_vm9 = vmmov %vm20396_vm1  ;;  %v256_v23 = vld [vmem:[%s20003_s3 + $0x30] sm:$0xff] }
 0x61b   : > { %15795 = vrot.lane.b32.xlu1 %v18511_v0, %s20387_s21  ;;  %13924 = vmatmul.mubr.msk.bf16.vlgmr.msra.gmra.mrb[8].mxu1 %vm20398_vm14, %v8217_v35  ;;  %v8471_v32 = vsel %vm20400_vm9, %v15578_v51, %v15582_v22  ;;  %vm20401_vm15 = vmmov %vm20399_vm0  ;;  %v8486_v51 = vsel %vm20399_vm0, %v8474_v19, 0  ;;  %v8479_v22 = vpack.c.bf16 %v8468_v34, %v8468_v34  ;;  %v8449_v19 = vpack.c.bf16 %v256_v23, %v256_v23 }
 0x61c   : > { %8401 = vmatpush1.bf16.msra.mxu1 %v8272_v26  ;;  %8432 = vmatprep.mubr.bf16.mxu1 %v20299_v2  ;;  %v8476_v55 = vpack.c.bf16 %v8471_v32, %v8471_v32  ;;  %vm20403_vm10 = vmmov %vm20396_vm1  ;;  %v15596_v26 = vpop.permute.xlu1 %15595 }
 0x61d   : > { %13931 = vmatprep.subr.msk.bf16.mxu1 %vm20401_vm15, %v8477_v33  ;;  %v8466_v8 = vsel %vm20403_vm10, %v8463_v50, %v8465_v56  ;;  %vm20404_vm9 = vmmov %vm20396_vm1  ;;  %v15598_v34 = vunpack.i.h.bf16 %v15596_v26 }
 0x61e   : > { %12142 = vrot.lane.b32.xlu0 %v18277_v58, %s20402_s22  ;;  %v8469_v56 = vsel %vm20404_vm9, %v15583_v31, %v15587_v6  ;;  %vm20405_vm15 = vmmov %vm20399_vm0  ;;  %v8481_v33 = vpack.c.bf16 %v8466_v8, %v8466_v8  ;;  %v15601_v6 = vpop.permute.xlu0 %15600 }
 0x61f   : > { %15800 = vrot.lane.b32.xlu1 %v18249_v15, %s20402_s22  ;;  %vm20406_vm1 = vmmov %vm20398_vm14  ;;  %v8478_v31 = vpack.c.bf16 %v8469_v56, %v8469_v56  ;;  %v15603_v23 = vunpack.i.h.bf16 %v15601_v6 }
 0x620   : > { %13926 = vmatmul.mubr.msk.bf16.vlgmr.msra.gmra.mrb[12].mxu0 %vm20398_vm14, %v8217_v35  ;;  %vm20407_vm10 = vmmov %vm20399_vm0  ;;  %v8695_v56 = vpop.permute.xlu1 %8694 }
 0x621   : > { %8510 = vmatpush1.bf16.msra.mxu0 %v8486_v51  ;;  %8541 = vmatprep.mubr.bf16.mxu0 %v20299_v2  ;;  %v8492_v63 = vsel %vm20407_vm10, %v8476_v55, 0  ;;  %vm20408_vm14 = vmmov %vm20404_vm9  ;;  %v15597_v51 = vunpack.i.l.bf16 %v15596_v26  ;;  %vm20409_vm9 = vcmp.lt.s32.totalorder %v16134_v13, 90  ;;  %v15602_v26 = vunpack.i.l.bf16 %v15601_v6 }
 0x622   : > { %13933 = vmatprep.subr.msk.bf16.mxu0 %vm20405_vm15, %v8479_v22  ;;  %15810 = vrot.lane.b32.xlu0 %v18511_v0, %s20402_s22  ;;  %v8467_v32 = vsel %vm20408_vm14, %v15588_v36, %v8463_v50  ;;  %v8704_v8 = vsel %vm20409_vm9, %v15592_v46, %v15593_v57  ;;  %vm20411_vm15 = vmmov %vm20406_vm1 }
 0x623   : > { %15805 = vrot.lane.b32.xlu1 %v18346_v1, %s20402_s22  ;;  %13928 = vmatmul.mubr.msk.bf16.vlgmr.msra.gmra.mrb[12].mxu1 %vm20406_vm1, %v8217_v35  ;;  %v8480_v35 = vpack.c.bf16 %v8467_v32, %v8467_v32  ;;  %vm20412_vm1 = vmmov %vm20399_vm0  ;;  %v8707_v50 = vpack.c.bf16 %v8704_v8, %v8704_v8 }
 0x624   : > { %8551 = vmatpush1.bf16.msra.mxu1 %v8492_v63  ;;  %8582 = vmatprep.mubr.bf16.mxu1 %v20299_v2  ;;  %v8498_v36 = vsel %vm20412_vm1, %v8478_v31, 0  ;;  %vm20413_vm10 = vmmov %vm20409_vm9  ;;  %v8929_v8 = vpop.permute.xlu1 %8928 }
 0x625   : > { %13935 = vmatprep.subr.msk.bf16.mxu1 %vm20399_vm0, %v8481_v33  ;;  %v8702_v55 = vsel %vm20413_vm10, %v15597_v51, %v15598_v34  ;;  %vm20414_vm14 = vmmov %vm20409_vm9  ;;  %v18829_v33 = vpop.permute.xlu0 %15605 }
 0x626   : > { %15815 = vrot.lane.b32.xlu0 %v18249_v15, %s20410_s25  ;;  %v8705_v22 = vsel %vm20414_vm14, %v8697_v61, %v15592_v46  ;;  %vm20415_vm9 = vmmov %vm20411_vm15  ;;  %v8709_v63 = vpack.c.bf16 %v8702_v55, %v8702_v55  ;;  %v15608_v55 = vunpack.i.h.bf16 %v18829_v33 }
 0x627   : > { %12152 = vrot.lane.b32.xlu1 %v18231_v39, %s20402_s22  ;;  %v8706_v32 = vpack.c.bf16 %v8705_v22, %v8705_v22  ;;  %vm20417_vm1 = vmmov %vm20413_vm10  ;;  %v15607_v22 = vunpack.i.l.bf16 %v18829_v33 }
 0x628   : > { %13930 = vmatmul.mubr.msk.bf16.vlgmr.msra.gmra.mrb[8].mxu0 %vm20411_vm15, %v8449_v19  ;;  %vm20416_vm15 = vmmov %vm20399_vm0  ;;  %v8703_v31 = vsel %vm20417_vm1, %v15593_v57, %v15597_v51 }
 0x629   : > { %8592 = vmatpush1.bf16.msra.mxu0 %v8498_v36  ;;  %8623 = vmatprep.mubr.bf16.mxu0 %v20299_v2  ;;  %v8504_v46 = vsel %vm20416_vm15, %v8480_v35, 0  ;;  %vm20418_vm10 = vmmov %vm20399_vm0  ;;  %v8708_v35 = vpack.c.bf16 %v8703_v31, %v8703_v31 }
 0x62a   : > { %13937 = vmatprep.subr.msk.bf16.mxu0 %vm20399_vm0, %v8707_v50  ;;  %15820 = vrot.lane.b32.xlu0 %v18346_v1, %s20410_s25  ;;  %vm20419_vm14 = vmmov %vm20417_vm1  ;;  %v257_v50 = vld [vmem:[%s20003_s3 + $0x38] sm:$0xff] }
 0x62b   : > { %12374 = vrot.lane.b32.xlu1 %v18277_v58, %s20410_s25  ;;  %13932 = vmatmul.mubr.msk.bf16.vlgmr.msra.gmra.mrb[8].mxu1 %vm20415_vm9, %v8449_v19  ;;  %v8700_v6 = vsel %vm20419_vm14, %v15602_v26, %v15603_v23  ;;  %vm20420_vm0 = vmmov %vm20417_vm1 }
 0x62c   : > { %8633 = vmatpush1.bf16.msra.mxu1 %v8504_v46  ;;  %8664 = vmatprep.mubr.bf16.mxu1 %v20299_v2  ;;  %v8698_v36 = vsel %vm20420_vm0, %v8695_v56, %v8697_v61  ;;  %vm20421_vm15 = vmmov %vm20418_vm10  ;;  %v8711_v51 = vpack.c.bf16 %v8700_v6, %v8700_v6  ;;  %v15611_v46 = vpop.permute.xlu0 %15610 }
 0x62d   : > { %13939 = vmatprep.subr.msk.bf16.mxu1 %vm20418_vm10, %v8709_v63  ;;  %v8718_v57 = vsel %vm20421_vm15, %v8706_v32, 0  ;;  %vm20422_vm1 = vmmov %vm20420_vm0  ;;  %v8713_v63 = vpack.c.bf16 %v8698_v36, %v8698_v36  ;;  %v8681_v32 = vpack.c.bf16 %v257_v50, %v257_v50  ;;  %v15613_v6 = vunpack.i.h.bf16 %v15611_v46 }
 0x62e   : > { %12384 = vrot.lane.b32.xlu0 %v18231_v39, %s20410_s25  ;;  %v8701_v61 = vsel %vm20422_vm1, %v15598_v34, %v15602_v26  ;;  %vm20424_vm14 = vmmov %vm20415_vm9  ;;  %v15616_v26 = vpop.permute.xlu1 %15615 }
 0x62f   : > { %15825 = vrot.lane.b32.xlu1 %v18511_v0, %s20410_s25  ;;  %vm20425_vm0 = vmmov %vm20418_vm10  ;;  %v8710_v34 = vpack.c.bf16 %v8701_v61, %v8701_v61  ;;  %v15618_v50 = vunpack.i.h.bf16 %v15616_v26 }
 0x630   : > { %13934 = vmatmul.mubr.msk.bf16.vlgmr.msra.gmra.mrb[12].mxu0 %vm20415_vm9, %v8449_v19  ;;  %v8724_v33 = vsel %vm20425_vm0, %v8708_v35, 0  ;;  %vm20426_vm9 = vmmov %vm20422_vm1  ;;  %vm20428_vm1 = vcmp.lt.s32.totalorder %v16134_v13, 89  ;;  %v8927_v61 = vpop.permute.xlu0 %8926 }
 0x631   : > { %8742 = vmatpush1.bf16.msra.mxu0 %v8718_v57  ;;  %8773 = vmatprep.mubr.bf16.mxu0 %v20299_v2  ;;  %v8699_v31 = vsel %vm20426_vm9, %v15603_v23, %v8695_v56  ;;  %v15612_v57 = vunpack.i.l.bf16 %v15611_v46  ;;  %vm20427_vm15 = vmmov %vm20425_vm0  ;;  %v8936_v36 = vsel %vm20428_vm1, %v15607_v22, %v15608_v55  ;;  %v15617_v46 = vunpack.i.l.bf16 %v15616_v26 }
 0x632   : > { %13941 = vmatprep.subr.msk.bf16.mxu0 %vm20418_vm10, %v8711_v51  ;;  %12606 = vrot.lane.b32.xlu0 %v18277_v58, %s20423_s28  ;;  %vm20429_vm10 = vmmov %vm20424_vm14  ;;  %v8939_v56 = vpack.c.bf16 %v8936_v36, %v8936_v36 }
 0x633   : > { %15830 = vrot.lane.b32.xlu1 %v18249_v15, %s20423_s28  ;;  %13936 = vmatmul.mubr.msk.bf16.vlgmr.msra.gmra.mrb[12].mxu1 %vm20424_vm14, %v8449_v19  ;;  %v8712_v19 = vpack.c.bf16 %v8699_v31, %v8699_v31  ;;  %vm20430_vm14 = vmmov %vm20425_vm0 }
 0x634   : > { %8783 = vmatpush1.bf16.msra.mxu1 %v8724_v33  ;;  %8814 = vmatprep.mubr.bf16.mxu1 %v20299_v2  ;;  %v8730_v23 = vsel %vm20430_vm14, %v8710_v34, 0  ;;  %vm20431_vm0 = vmmov %vm20428_vm1  ;;  %v9161_v36 = vpop.permute.xlu0 %9160 }
 0x635   : > { %13943 = vmatprep.subr.msk.bf16.mxu1 %vm20427_vm15, %v8713_v63  ;;  %v8934_v35 = vsel %vm20431_vm0, %v15612_v57, %v15613_v6  ;;  %vm20432_vm9 = vmmov %vm20431_vm0  ;;  %v18884_v63 = vpop.permute.xlu1 %15620 }
 0x636   : > { %15840 = vrot.lane.b32.xlu0 %v18511_v0, %s20423_s28  ;;  %v8937_v51 = vsel %vm20432_vm9, %v8929_v8, %v15607_v22  ;;  %vm20433_vm15 = vmmov %vm20430_vm14  ;;  %v8941_v33 = vpack.c.bf16 %v8934_v35, %v8934_v35  ;;  %v8932_v26 = vsel %vm20432_vm9, %v15617_v46, %v15618_v50  ;;  %v15623_v35 = vunpack.i.h.bf16 %v18884_v63 }
 0x637   : > { %15835 = vrot.lane.b32.xlu1 %v18346_v1, %s20423_s28  ;;  %vm20435_vm1 = vmmov %vm20429_vm10  ;;  %v8938_v31 = vpack.c.bf16 %v8937_v51, %v8937_v51  ;;  %v15622_v51 = vunpack.i.l.bf16 %v18884_v63 }
 0x638   : > { %13938 = vmatmul.mubr.msk.bf16.vlgmr.msra.gmra.mrb[8].mxu0 %vm20429_vm10, %v8681_v32  ;;  %vm20436_vm10 = vmmov %vm20430_vm14 }
 0x639   : > { %8824 = vmatpush1.bf16.msra.mxu0 %v8730_v23  ;;  %8855 = vmatprep.mubr.bf16.mxu0 %v20299_v2  ;;  %v8736_v22 = vsel %vm20436_vm10, %v8712_v19, 0  ;;  %vm20437_vm14 = vmmov %vm20431_vm0 }
 0x63a   : > { %13945 = vmatprep.subr.msk.bf16.mxu0 %vm20433_vm15, %v8939_v56  ;;  %15845 = vrot.lane.b32.xlu0 %v18249_v15, %s20434_s29  ;;  %v8935_v34 = vsel %vm20437_vm14, %v15608_v55, %v15612_v57  ;;  %vm20438_vm0 = vmmov %vm20436_vm10  ;;  %v8943_v57 = vpack.c.bf16 %v8932_v26, %v8932_v26  ;;  %v258_v56 = vld [vmem:[%s20003_s3 + $0x40] sm:$0xff] }
 0x63b   : > { %12616 = vrot.lane.b32.xlu1 %v18231_v39, %s20423_s28  ;;  %13940 = vmatmul.mubr.msk.bf16.vlgmr.msra.gmra.mrb[8].mxu1 %vm20435_vm1, %v8681_v32  ;;  %v8940_v19 = vpack.c.bf16 %v8935_v34, %v8935_v34  ;;  %vm20439_vm15 = vmmov %vm20432_vm9 }
 0x63c   : > { %8865 = vmatpush1.bf16.msra.mxu1 %v8736_v22  ;;  %8896 = vmatprep.mubr.bf16.mxu1 %v20299_v2  ;;  %v8930_v23 = vsel %vm20439_vm15, %v8927_v61, %v8929_v8  ;;  %vm20440_vm10 = vmmov %vm20438_vm0  ;;  %v15626_v22 = vpop.permute.xlu1 %15625 }
 0x63d   : > { %13947 = vmatprep.subr.msk.bf16.mxu1 %vm20438_vm0, %v8941_v33  ;;  %v8950_v55 = vsel %vm20440_vm10, %v8938_v31, 0  ;;  %vm20441_vm14 = vmmov %vm20432_vm9  ;;  %v8945_v33 = vpack.c.bf16 %v8930_v23, %v8930_v23  ;;  %v8913_v31 = vpack.c.bf16 %v258_v56, %v258_v56  ;;  %v15628_v26 = vunpack.i.h.bf16 %v15626_v22 }
 0x63e   : > { %15850 = vrot.lane.b32.xlu0 %v18346_v1, %s20434_s29  ;;  %v8933_v8 = vsel %vm20441_vm14, %v15613_v6, %v15617_v46  ;;  %vm20442_vm9 = vmmov %vm20435_vm1  ;;  %v15631_v46 = vpop.permute.xlu0 %15630 }
 0x63f   : > { %12838 = vrot.lane.b32.xlu1 %v18277_v58, %s20434_s29  ;;  %vm20443_vm15 = vmmov %vm20438_vm0  ;;  %v8942_v6 = vpack.c.bf16 %v8933_v8, %v8933_v8  ;;  %v15633_v56 = vunpack.i.h.bf16 %v15631_v46 }
 0x640   : > { %13942 = vmatmul.mubr.msk.bf16.vlgmr.msra.gmra.mrb[12].mxu0 %vm20435_vm1, %v8681_v32  ;;  %v8956_v63 = vsel %vm20443_vm15, %v8940_v19, 0  ;;  %vm20444_vm1 = vmmov %vm20441_vm14  ;;  %vm20446_vm14 = vcmp.lt.s32.totalorder %v16134_v13, 11  ;;  %v9159_v8 = vpop.permute.xlu1 %9158 }
 0x641   : > { %8974 = vmatpush1.bf16.msra.mxu0 %v8950_v55  ;;  %9005 = vmatprep.mubr.bf16.mxu0 %v20299_v2  ;;  %v8931_v34 = vsel %vm20444_vm1, %v15618_v50, %v8927_v61  ;;  %v15627_v55 = vunpack.i.l.bf16 %v15626_v22  ;;  %vm20445_vm10 = vmmov %vm20438_vm0  ;;  %v9168_v23 = vsel %vm20446_vm14, %v15622_v51, %v15623_v35  ;;  %v15632_v22 = vunpack.i.l.bf16 %v15631_v46 }
 0x642   : > { %13949 = vmatprep.subr.msk.bf16.mxu0 %vm20438_vm0, %v8943_v57  ;;  %12848 = vrot.lane.b32.xlu0 %v18231_v39, %s20434_s29  ;;  %vm20448_vm0 = vmmov %vm20442_vm9  ;;  %v9171_v61 = vpack.c.bf16 %v9168_v23, %v9168_v23 }
 0x643   : > { %15855 = vrot.lane.b32.xlu1 %v18511_v0, %s20434_s29  ;;  %13944 = vmatmul.mubr.msk.bf16.vlgmr.msra.gmra.mrb[12].mxu1 %vm20442_vm9, %v8681_v32  ;;  %v8944_v32 = vpack.c.bf16 %v8931_v34, %v8931_v34  ;;  %vm20449_vm9 = vmmov %vm20445_vm10 }
 0x644   : > { %9015 = vmatpush1.bf16.msra.mxu1 %v8956_v63  ;;  %9046 = vmatprep.mubr.bf16.mxu1 %v20299_v2  ;;  %v8962_v50 = vsel %vm20449_vm9, %v8942_v6, 0  ;;  %vm20450_vm15 = vmmov %vm20446_vm14  ;;  %v9393_v6 = vpop.permute.xlu1 %9392 }
 0x645   : > { %13951 = vmatprep.subr.msk.bf16.mxu1 %vm20445_vm10, %v8945_v33  ;;  %v9166_v19 = vsel %vm20450_vm15, %v15627_v55, %v15628_v26  ;;  %vm20451_vm1 = vmmov %vm20446_vm14 }
 0x646   : > { %13070 = vrot.lane.b32.xlu0 %v18277_v58, %s20447_s6  ;;  %v9169_v57 = vsel %vm20451_vm1, %v9161_v36, %v15622_v51  ;;  %vm20452_vm10 = vmmov %vm20449_vm9  ;;  %v9173_v51 = vpack.c.bf16 %v9166_v19, %v9166_v19 }
 0x647   : > { %15860 = vrot.lane.b32.xlu1 %v18249_v15, %s20447_s6  ;;  %v15636_v15 = vpop.permute.xlu0 %15635  ;;  %vm20453_vm14 = vmmov %vm20448_vm0  ;;  %v9170_v63 = vpack.c.bf16 %v9169_v57, %v9169_v57 }
 0x648   : > { %13946 = vmatmul.mubr.msk.bf16.vlgmr.msra.gmra.mrb[8].mxu0 %vm20448_vm0, %v8913_v31  ;;  %vm20454_vm0 = vmmov %vm20449_vm9 }
 0x649   : > { %9056 = vmatpush1.bf16.msra.mxu0 %v8962_v50  ;;  %9087 = vmatprep.mubr.bf16.mxu0 %v20299_v2  ;;  %v8968_v33 = vsel %vm20454_vm0, %v8944_v32, 0  ;;  %vm20455_vm9 = vmmov %vm20451_vm1  ;;  %v9182_v23 = vsel %vm20454_vm0, %v9170_v63, 0  ;;  %v15637_v50 = vunpack.i.l.bf16 %v15636_v15 }
 0x64a   : > { %13953 = vmatprep.subr.msk.bf16.mxu0 %vm20452_vm10, %v9171_v61  ;;  %15870 = vrot.lane.b32.xlu0 %v18511_v0, %s20447_s6  ;;  %v9167_v34 = vsel %vm20455_vm9, %v15623_v35, %v15627_v55  ;;  %vm20456_vm15 = vmmov %vm20454_vm0  ;;  %v9164_v0 = vsel %vm20451_vm1, %v15632_v22, %v15633_v56  ;;  %v259_v35 = vld [vmem:[%s20003_s3 + $0x48] sm:$0xff]  ;;  %v15638_v55 = vunpack.i.h.bf16 %v15636_v15 }
 0x64b   : > { %15865 = vrot.lane.b32.xlu1 %v18346_v1, %s20447_s6  ;;  %13948 = vmatmul.mubr.msk.bf16.vlgmr.msra.gmra.mrb[8].mxu1 %vm20453_vm14, %v8913_v31  ;;  %v9172_v1 = vpack.c.bf16 %v9167_v34, %v9167_v34  ;;  %vm20457_vm10 = vmmov %vm20451_vm1  ;;  %v9175_v32 = vpack.c.bf16 %v9164_v0, %v9164_v0  ;;  %v15641_v61 = vpop.permute.xlu0 %15640  ;;  %v15646_v0 = vpop.permute.xlu1 %15645 }
 0x64c   : > { %9097 = vmatpush1.bf16.msra.mxu1 %v8968_v33  ;;  %9128 = vmatprep.mubr.bf16.mxu1 %v20299_v2  ;;  %v9162_v46 = vsel %vm20457_vm10, %v9159_v8, %v9161_v36  ;;  %vm20458_vm9 = vmmov %vm20451_vm1  ;;  %v9145_v33 = vpack.c.bf16 %v259_v35, %v259_v35  ;;  %v15643_v63 = vunpack.i.h.bf16 %v15641_v61  ;;  %v15642_v15 = vunpack.i.l.bf16 %v15641_v61 }
 0x64d   : > { %13955 = vmatprep.subr.msk.bf16.mxu1 %vm20456_vm15, %v9173_v51  ;;  %v9165_v19 = vsel %vm20458_vm9, %v15628_v26, %v15632_v22  ;;  %vm20459_vm15 = vmmov %vm20454_vm0  ;;  %v9177_v36 = vpack.c.bf16 %v9162_v46, %v9162_v46  ;;  %v15648_v46 = vunpack.i.h.bf16 %v15646_v0 }
 0x64e   : > { %vm20460_vm1 = vmmov %vm20453_vm14  ;;  %v9174_v34 = vpack.c.bf16 %v9165_v19, %v9165_v19 }
 0x64f   : > { %13080 = vrot.lane.b32.xlu1 %v18231_v39, %s20447_s6  ;;  %vm20461_vm10 = vmmov %vm20454_vm0  ;;  %v15651_v35 = vpop.permute.xlu1 %15650 }
 0x650   : > { %13950 = vmatmul.mubr.msk.bf16.vlgmr.msra.gmra.mrb[12].mxu0 %vm20453_vm14, %v8913_v31  ;;  %v9188_v57 = vsel %vm20461_vm10, %v9172_v1, 0  ;;  %vm20462_vm14 = vmmov %vm20458_vm9  ;;  %vm20463_vm9 = vcmp.lt.s32.totalorder %v16134_v13, 10 }
 0x651   : > { %9206 = vmatpush1.bf16.msra.mxu0 %v9182_v23  ;;  %9237 = vmatprep.mubr.bf16.mxu0 %v20299_v2  ;;  %v9163_v51 = vsel %vm20462_vm14, %v15633_v56, %v9159_v8  ;;  %v9400_v26 = vsel %vm20463_vm9, %v15637_v50, %v15638_v55  ;;  %vm20466_vm10 = vmmov %vm20463_vm9  ;;  %v15647_v23 = vunpack.i.l.bf16 %v15646_v0 }
 0x652   : > { %13957 = vmatprep.subr.msk.bf16.mxu0 %vm20459_vm15, %v9175_v32  ;;  %v9176_v22 = vpack.c.bf16 %v9163_v51, %v9163_v51  ;;  %vm20464_vm15 = vmmov %vm20460_vm1  ;;  %v9403_v1 = vpack.c.bf16 %v9400_v26, %v9400_v26  ;;  %v9398_v56 = vsel %vm20466_vm10, %v15642_v15, %v15643_v63  ;;  %v9391_v32 = vpop.permute.xlu0 %9390 }
 0x653   : > { %13952 = vmatmul.mubr.msk.bf16.vlgmr.msra.gmra.mrb[12].mxu1 %vm20460_vm1, %v8913_v31  ;;  %vm20465_vm1 = vmmov %vm20454_vm0  ;;  %v9405_v19 = vpack.c.bf16 %v9398_v56, %v9398_v56 }
 0x654   : > { %9247 = vmatpush1.bf16.msra.mxu1 %v9188_v57  ;;  %9278 = vmatprep.mubr.bf16.mxu1 %v20299_v2  ;;  %v9194_v31 = vsel %vm20465_vm1, %v9174_v34, 0  ;;  %vm20467_vm14 = vmmov %vm20463_vm9 }
 0x655   : > { %13959 = vmatprep.subr.msk.bf16.mxu1 %vm20454_vm0, %v9177_v36  ;;  %v9401_v8 = vsel %vm20467_vm14, %v9393_v6, %v15637_v50  ;;  %vm20468_vm9 = vmmov %vm20464_vm15 }
 0x656   : > { %v9402_v36 = vpack.c.bf16 %v9401_v8, %v9401_v8  ;;  %vm20470_vm1 = vmmov %vm20466_vm10  ;;  %v9625_v51 = vpop.permute.xlu0 %9624 }
 0x657   : > { %v9399_v50 = vsel %vm20470_vm1, %v15638_v55, %v15642_v15  ;;  %vm20471_vm10 = vmmov %vm20454_vm0  ;;  %v15653_v55 = vunpack.i.h.bf16 %v15651_v35  ;;  %v15652_v15 = vunpack.i.l.bf16 %v15651_v35 }
 0x658   : > { %13954 = vmatmul.mubr.msk.bf16.vlgmr.msra.gmra.mrb[8].mxu0 %vm20464_vm15, %v9145_v33  ;;  %vm20469_vm15 = vmmov %vm20454_vm0  ;;  %v9404_v34 = vpack.c.bf16 %v9399_v50, %v9399_v50 }
 0x659   : > { %9288 = vmatpush1.bf16.msra.mxu0 %v9194_v31  ;;  %9319 = vmatprep.mubr.bf16.mxu0 %v20299_v2  ;;  %v9200_v61 = vsel %vm20469_vm15, %v9176_v22, 0  ;;  %vm20472_vm14 = vmmov %vm20470_vm1  ;;  %v260_v31 = vld [vmem:[%s20003_s3 + $0x50] sm:$0xff] }
 0x65a   : > { %13961 = vmatprep.subr.msk.bf16.mxu0 %vm20454_vm0, %v9403_v1  ;;  %v9396_v57 = vsel %vm20472_vm14, %v15647_v23, %v15648_v46  ;;  %vm20473_vm0 = vmmov %vm20470_vm1  ;;  %v15656_v1 = vpop.permute.xlu1 %15655 }
 0x65b   : > { %13956 = vmatmul.mubr.msk.bf16.vlgmr.msra.gmra.mrb[8].mxu1 %vm20468_vm9, %v9145_v33  ;;  %v9394_v0 = vsel %vm20473_vm0, %v9391_v32, %v9393_v6  ;;  %vm20474_vm15 = vmmov %vm20471_vm10  ;;  %v9407_v22 = vpack.c.bf16 %v9396_v57, %v9396_v57  ;;  %v15657_v35 = vunpack.i.l.bf16 %v15656_v1  ;;  %v15661_v57 = vpop.permute.xlu0 %15660 }
 0x65c   : > { %9329 = vmatpush1.bf16.msra.mxu1 %v9200_v61  ;;  %9360 = vmatprep.mubr.bf16.mxu1 %v20299_v2  ;;  %v9414_v26 = vsel %vm20474_vm15, %v9402_v36, 0  ;;  %vm20475_vm1 = vmmov %vm20473_vm0  ;;  %v9409_v6 = vpack.c.bf16 %v9394_v0, %v9394_v0  ;;  %v9377_v61 = vpack.c.bf16 %v260_v31, %v260_v31  ;;  %v15658_v36 = vunpack.i.h.bf16 %v15656_v1 }
 0x65d   : > { %13963 = vmatprep.subr.msk.bf16.mxu1 %vm20471_vm10, %v9405_v19  ;;  %v9397_v56 = vsel %vm20475_vm1, %v15643_v63, %v15647_v23  ;;  %vm20476_vm14 = vmmov %vm20468_vm9  ;;  %v15663_v0 = vunpack.i.h.bf16 %v15661_v57 }
 0x65e   : > { %vm20477_vm0 = vmmov %vm20471_vm10  ;;  %v9406_v50 = vpack.c.bf16 %v9397_v56, %v9397_v56 }
 0x65f   : > { %v9420_v8 = vsel %vm20477_vm0, %v9404_v34, 0  ;;  %vm20479_vm15 = vmmov %vm20477_vm0  ;;  %v15666_v31 = vpop.permute.xlu0 %15665 }
 0x660   : > { %13958 = vmatmul.mubr.msk.bf16.vlgmr.msra.gmra.mrb[12].mxu0 %vm20468_vm9, %v9145_v33  ;;  %vm20478_vm9 = vmmov %vm20475_vm1  ;;  %vm20480_vm1 = vcmp.lt.s32.totalorder %v16134_v13, 9 }
 0x661   : > { %9438 = vmatpush1.bf16.msra.mxu0 %v9414_v26  ;;  %9469 = vmatprep.mubr.bf16.mxu0 %v20299_v2  ;;  %v9395_v19 = vsel %vm20478_vm9, %v15648_v46, %v9391_v32  ;;  %v9632_v63 = vsel %vm20480_vm1, %v15652_v15, %v15653_v55  ;;  %v15662_v26 = vunpack.i.l.bf16 %v15661_v57 }
 0x662   : > { %13965 = vmatprep.subr.msk.bf16.mxu0 %vm20471_vm10, %v9407_v22  ;;  %v9408_v23 = vpack.c.bf16 %v9395_v19, %v9395_v19  ;;  %vm20481_vm10 = vmmov %vm20476_vm14  ;;  %v9635_v34 = vpack.c.bf16 %v9632_v63, %v9632_v63  ;;  %v9623_v22 = vpop.permute.xlu1 %9622 }
 0x663   : > { %13960 = vmatmul.mubr.msk.bf16.vlgmr.msra.gmra.mrb[12].mxu1 %vm20476_vm14, %v9145_v33  ;;  %vm20482_vm14 = vmmov %vm20477_vm0 }
 0x664   : > { %9479 = vmatpush1.bf16.msra.mxu1 %v9420_v8  ;;  %9510 = vmatprep.mubr.bf16.mxu1 %v20299_v2  ;;  %v9426_v33 = vsel %vm20482_vm14, %v9406_v50, 0  ;;  %vm20483_vm0 = vmmov %vm20480_vm1 }
 0x665   : > { %13967 = vmatprep.subr.msk.bf16.mxu1 %vm20479_vm15, %v9409_v6  ;;  %v9630_v46 = vsel %vm20483_vm0, %v15657_v35, %v15658_v36  ;;  %vm20484_vm9 = vmmov %vm20483_vm0 }
 0x666   : > { %v9633_v32 = vsel %vm20484_vm9, %v9625_v51, %v15652_v15  ;;  %vm20485_vm15 = vmmov %vm20482_vm14  ;;  %v9637_v56 = vpack.c.bf16 %v9630_v46, %v9630_v46  ;;  %v9628_v8 = vsel %vm20484_vm9, %v15662_v26, %v15663_v0  ;;  %v9857_v57 = vpop.permute.xlu1 %9856 }
 0x667   : > { %vm20486_vm1 = vmmov %vm20481_vm10  ;;  %v9634_v6 = vpack.c.bf16 %v9633_v32, %v9633_v32 }
 0x668   : > { %13962 = vmatmul.mubr.msk.bf16.vlgmr.msra.gmra.mrb[8].mxu0 %vm20481_vm10, %v9377_v61  ;;  %vm20487_vm10 = vmmov %vm20482_vm14 }
 0x669   : > { %9520 = vmatpush1.bf16.msra.mxu0 %v9426_v33  ;;  %9551 = vmatprep.mubr.bf16.mxu0 %v20299_v2  ;;  %v9432_v1 = vsel %vm20487_vm10, %v9408_v23, 0  ;;  %vm20488_vm14 = vmmov %vm20483_vm0  ;;  %v9639_v23 = vpack.c.bf16 %v9628_v8, %v9628_v8  ;;  %v261_v33 = vld [vmem:[%s20003_s3 + $0x58] sm:$0xff] }
 0x66a   : > { %13969 = vmatprep.subr.msk.bf16.mxu0 %vm20485_vm15, %v9635_v34  ;;  %v9631_v15 = vsel %vm20488_vm14, %v15653_v55, %v15657_v35  ;;  %vm20489_vm0 = vmmov %vm20487_vm10  ;;  %v15668_v55 = vunpack.i.h.bf16 %v15666_v31  ;;  %v15667_v35 = vunpack.i.l.bf16 %v15666_v31  ;;  %v15671_v34 = vpop.permute.xlu0 %15670 }
 0x66b   : > { %13964 = vmatmul.mubr.msk.bf16.vlgmr.msra.gmra.mrb[8].mxu1 %vm20486_vm1, %v9377_v61  ;;  %v9636_v19 = vpack.c.bf16 %v9631_v15, %v9631_v15  ;;  %vm20490_vm15 = vmmov %vm20484_vm9  ;;  %v15672_v31 = vunpack.i.l.bf16 %v15671_v34 }
 0x66c   : > { %9561 = vmatpush1.bf16.msra.mxu1 %v9432_v1  ;;  %9592 = vmatprep.mubr.bf16.mxu1 %v20299_v2  ;;  %v9626_v50 = vsel %vm20490_vm15, %v9623_v22, %v9625_v51  ;;  %vm20491_vm10 = vmmov %vm20489_vm0  ;;  %v9609_v1 = vpack.c.bf16 %v261_v33, %v261_v33 }
 0x66d   : > { %13971 = vmatprep.subr.msk.bf16.mxu1 %vm20489_vm0, %v9637_v56  ;;  %v9646_v63 = vsel %vm20491_vm10, %v9634_v6, 0  ;;  %vm20492_vm14 = vmmov %vm20484_vm9  ;;  %v9641_v51 = vpack.c.bf16 %v9626_v50, %v9626_v50  ;;  %v15673_v6 = vunpack.i.h.bf16 %v15671_v34 }
 0x66e   : > { %v9629_v46 = vsel %vm20492_vm14, %v15658_v36, %v15662_v26  ;;  %vm20493_vm9 = vmmov %vm20486_vm1  ;;  %v15676_v26 = vpop.permute.xlu1 %15675 }
 0x66f   : > { %vm20494_vm15 = vmmov %vm20489_vm0  ;;  %v9638_v15 = vpack.c.bf16 %v9629_v46, %v9629_v46  ;;  %v15678_v50 = vunpack.i.h.bf16 %v15676_v26 }
 0x670   : > { %13966 = vmatmul.mubr.msk.bf16.vlgmr.msra.gmra.mrb[12].mxu0 %vm20486_vm1, %v9377_v61  ;;  %v9652_v32 = vsel %vm20494_vm15, %v9636_v19, 0  ;;  %vm20495_vm1 = vmmov %vm20492_vm14  ;;  %vm20497_vm14 = vcmp.lt.s32.totalorder %v16134_v13, 1 }
 0x671   : > { %9670 = vmatpush1.bf16.msra.mxu0 %v9646_v63  ;;  %9701 = vmatprep.mubr.bf16.mxu0 %v20299_v2  ;;  %v9627_v56 = vsel %vm20495_vm1, %v15663_v0, %v9623_v22  ;;  %vm20496_vm10 = vmmov %vm20489_vm0  ;;  %v9864_v36 = vsel %vm20497_vm14, %v15667_v35, %v15668_v55  ;;  %v15677_v63 = vunpack.i.l.bf16 %v15676_v26 }
 0x672   : > { %13973 = vmatprep.subr.msk.bf16.mxu0 %vm20489_vm0, %v9639_v23  ;;  %v9640_v8 = vpack.c.bf16 %v9627_v56, %v9627_v56  ;;  %vm20498_vm0 = vmmov %vm20493_vm9  ;;  %v9867_v19 = vpack.c.bf16 %v9864_v36, %v9864_v36 }
 0x673   : > { %13968 = vmatmul.mubr.msk.bf16.vlgmr.msra.gmra.mrb[12].mxu1 %vm20493_vm9, %v9377_v61  ;;  %vm20499_vm9 = vmmov %vm20496_vm10 }
 0x674   : > { %9711 = vmatpush1.bf16.msra.mxu1 %v9652_v32  ;;  %9742 = vmatprep.mubr.bf16.mxu1 %v20299_v2  ;;  %v9658_v61 = vsel %vm20499_vm9, %v9638_v15, 0  ;;  %vm20500_vm15 = vmmov %vm20497_vm14 }
 0x675   : > { %13975 = vmatprep.subr.msk.bf16.mxu1 %vm20496_vm10, %v9641_v51  ;;  %v9862_v0 = vsel %vm20500_vm15, %v15672_v31, %v15673_v6  ;;  %vm20501_vm1 = vmmov %vm20497_vm14 }
 0x676   : > { %v9865_v22 = vsel %vm20501_vm1, %v9857_v57, %v15667_v35  ;;  %vm20502_vm10 = vmmov %vm20499_vm9  ;;  %v9869_v33 = vpack.c.bf16 %v9862_v0, %v9862_v0  ;;  %v9855_v35 = vpop.permute.xlu0 %9854 }
 0x677   : > { %vm20503_vm14 = vmmov %vm20498_vm0  ;;  %v9866_v34 = vpack.c.bf16 %v9865_v22, %v9865_v22  ;;  %v15681_v22 = vpop.permute.xlu1 %15680 }
 0x678   : > { %13970 = vmatmul.mubr.msk.bf16.vlgmr.msra.gmra.mrb[8].mxu0 %vm20498_vm0, %v9609_v1  ;;  %vm20504_vm13 = vmmov %vm20499_vm9 }
 0x679   : > { %9752 = vmatpush1.bf16.msra.mxu0 %v9658_v61  ;;  %9783 = vmatprep.mubr.bf16.mxu0 %v20299_v2  ;;  %v9664_v23 = vsel %vm20504_vm13, %v9640_v8, 0  ;;  %vm20505_vm0 = vmmov %vm20501_vm1 }
 0x67a   : > { %13977 = vmatprep.subr.msk.bf16.mxu0 %vm20502_vm10, %v9867_v19  ;;  %v9863_v46 = vsel %vm20505_vm0, %v15668_v55, %v15672_v31  ;;  %vm20506_vm15 = vmmov %vm20505_vm0  ;;  %v262_v55 = vld [vmem:[%s20003_s3 + $0x60] sm:$0xff] }
 0x67b   : > { %13972 = vmatmul.mubr.msk.bf16.vlgmr.msra.gmra.mrb[8].mxu1 %vm20503_vm14, %v9609_v1  ;;  %v9860_v51 = vsel %vm20506_vm15, %v15677_v63, %v15678_v50  ;;  %v9868_v32 = vpack.c.bf16 %v9863_v46, %v9863_v46  ;;  %vm20507_vm1 = vmmov %vm20505_vm0  ;;  %v9841_v61 = vpack.c.bf16 %v262_v55, %v262_v55  ;;  %v10079_v46 = vpack.c.bf16 %v18326_v37, %v18326_v37 }
 0x67c   : > { %9793 = vmatpush1.bf16.msra.mxu1 %v9664_v23  ;;  %9824 = vmatprep.mubr.bf16.mxu1 %v20299_v2  ;;  %v9858_v56 = vsel %vm20507_vm1, %v9855_v35, %v9857_v57  ;;  %vm20508_vm10 = vmmov %vm20503_vm14  ;;  %v9871_v36 = vpack.c.bf16 %v9860_v51, %v9860_v51  ;;  %v9859_v8 = vsel %vm20507_vm1, %v15678_v50, %v9855_v35  ;;  %v15686_v35 = vpop.permute.xlu1 %15685 }
 0x67d   : > { %13979 = vmatprep.subr.msk.bf16.mxu1 %vm20499_vm9, %v9869_v33  ;;  %vm20509_vm13 = vmmov %vm20499_vm9  ;;  %v9873_v26 = vpack.c.bf16 %v9858_v56, %v9858_v56  ;;  %v9872_v0 = vpack.c.bf16 %v9859_v8, %v9859_v8  ;;  %v10074_v23 = vpack.c.bf16 %v18239_v59, %v18239_v59  ;;  %v10076_v33 = vpack.c.bf16 %v18277_v58, %v18277_v58  ;;  %v263_v59 = vld [vmem:[%s20003_s3 + $0x68] sm:$0xff] }
 0x67e   : > { %v9878_v15 = vsel %vm20509_vm13, %v9866_v34, 0  ;;  %vm20510_vm14 = vmmov %vm20505_vm0  ;;  %v10081_v51 = vpack.c.bf16 %v18231_v39, %v18231_v39  ;;  %v15687_v37 = vunpack.i.l.bf16 %v15686_v35  ;;  %v10073_v56 = vpack.c.bf16 %v263_v59, %v263_v59 }
 0x67f   : > { %v9861_v31 = vsel %vm20510_vm14, %v15673_v6, %v15677_v63  ;;  %vm20511_vm0 = vmmov %vm20499_vm9  ;;  %v10077_v63 = vpack.c.bf16 %v18281_v7, %v18281_v7  ;;  %v15683_v7 = vunpack.i.h.bf16 %v15681_v22 }
 0x680   : > { %13974 = vmatmul.mubr.msk.bf16.vlgmr.msra.gmra.mrb[12].mxu0 %vm20508_vm10, %v9609_v1  ;;  %vm20512_vm9 = vmmov %vm20508_vm10  ;;  %v9870_v19 = vpack.c.bf16 %v9861_v31, %v9861_v31 }
 0x681   : > { %9902 = vmatpush1.bf16.msra.mxu0 %v9878_v15  ;;  %9933 = vmatprep.mubr.bf16.mxu0 %v20299_v2  ;;  %vm20513_vm15 = vmmov %vm20511_vm0  ;;  %v10078_v15 = vpack.c.bf16 %v18322_v49, %v18322_v49 }
 0x682   : > { %13981 = vmatprep.subr.msk.bf16.mxu0 %vm20511_vm0, %v9871_v36  ;;  %v9884_v57 = vsel %vm20513_vm15, %v9868_v32, 0  ;;  %vm20514_vm10 = vmmov %vm20511_vm0  ;;  %v15688_v32 = vunpack.i.h.bf16 %v15686_v35  ;;  %v15682_v36 = vunpack.i.l.bf16 %v15681_v22  ;;  %v264_v35 = vld [vmem:[%s20003_s3 + $0x70] sm:$0xff] }
 0x683   : > { %13976 = vmatmul.mubr.msk.bf16.vlgmr.msra.gmra.mrb[12].mxu1 %vm20512_vm9, %v9609_v1  ;;  %vm20515_vm13 = vmmov %vm20512_vm9  ;;  %v10075_v1 = vpack.c.bf16 %v18243_v5, %v18243_v5  ;;  %v10287_v5 = vpop.permute.xlu0 %10286 }
 0x684   : > { %9943 = vmatpush1.bf16.msra.mxu1 %v9884_v57  ;;  %9974 = vmatprep.mubr.bf16.mxu1 %v20299_v2  ;;  %vm20516_vm14 = vmmov %vm20511_vm0 }
 0x685   : > { %13983 = vmatprep.subr.msk.bf16.mxu1 %vm20514_vm10, %v9873_v26  ;;  %v9890_v6 = vsel %vm20516_vm14, %v9870_v19, 0  ;;  %vm20517_vm15 = vmmov %vm20511_vm0  ;;  %v10080_v26 = vpack.c.bf16 %v18330_v28, %v18330_v28  ;;  %v10297_v19 = vpop.permute.xlu1 %10296 }
 0x686   : > { %v9896_v50 = vsel %vm20517_vm15, %v9872_v0, 0  ;;  %vm20518_vm1 = vmmov %vm20511_vm0  ;;  %vm20524_vm15 = vcmp.lt.s32.totalorder %v16134_v13, 127 }
 0x687   : > { %vm20519_vm10 = vmmov %vm20512_vm9  ;;  %v10303_v55 = vsel %vm20524_vm15, %v15683_v7, %v10287_v5  ;;  %v15691_v31 = vpop.permute.xlu0 %15690 }
 0x688   : > { %13978 = vmatmul.mubr.msk.bf16.vlgmr.msra.gmra.mrb[8].mxu0 %vm20515_vm13, %v9841_v61  ;;  %vm20520_vm13 = vmmov %vm20511_vm0  ;;  %v10307_v39 = vpack.c.bf16 %v10303_v55, %v10303_v55  ;;  %v15693_v8 = vunpack.i.h.bf16 %v15691_v31 }
 0x689   : > { %9984 = vmatpush1.bf16.msra.mxu0 %v9890_v6  ;;  %10015 = vmatprep.mubr.bf16.mxu0 %v20299_v2  ;;  %v10086_v34 = vsel %vm20520_vm13, %v10074_v23, 0  ;;  %vm20521_vm14 = vmmov %vm20511_vm0  ;;  %v10104_v6 = vsel %vm20518_vm1, %v10080_v26, 0  ;;  %v10519_v23 = vpop.permute.xlu1 %10518 }
 0x68a   : > { %13985 = vmatprep.subr.msk.bf16.mxu0 %vm20511_vm0, %v10075_v1  ;;  %vm20522_vm0 = vmmov %vm20512_vm9 }
 0x68b   : > { %13980 = vmatmul.mubr.msk.bf16.vlgmr.msra.gmra.mrb[8].mxu1 %vm20512_vm9, %v9841_v61  ;;  %vm20523_vm9 = vmmov %vm20518_vm1  ;;  %v19118_v28 = vpop.permute.xlu0 %15695 }
 0x68c   : > { %10025 = vmatpush1.bf16.msra.mxu1 %v9896_v50  ;;  %10056 = vmatprep.mubr.bf16.mxu1 %v20299_v2  ;;  %v10092_v58 = vsel %vm20523_vm9, %v10076_v33, 0  ;;  %vm20526_vm13 = vmmov %vm20518_vm1 }
 0x68d   : > { %13987 = vmatprep.subr.msk.bf16.mxu1 %vm20518_vm1, %v10077_v63  ;;  %v10098_v57 = vsel %vm20526_vm13, %v10078_v15, 0  ;;  %vm20529_vm9 = vmmov %vm20518_vm1  ;;  %v10281_v15 = vpack.c.bf16 %v264_v35, %v264_v35 }
 0x68e   : > { %vm20532_vm13 = vmmov %vm20518_vm1 }
 0x690   : > { %13982 = vmatmul.mubr.msk.bf16.vlgmr.msra.gmra.mrb[12].mxu0 %vm20519_vm10, %v9841_v61  ;;  %vm20525_vm10 = vmmov %vm20522_vm0 }
 0x691   : > { %10110 = vmatpush1.bf16.msra.mxu0 %v10086_v34  ;;  %10141 = vmatprep.mubr.bf16.mxu0 %v20299_v2 }
 0x692   : > { %13989 = vmatprep.subr.msk.bf16.mxu0 %vm20521_vm14, %v10079_v46  ;;  %vm20527_vm14 = vmmov %vm20524_vm15 }
 0x693   : > { %13984 = vmatmul.mubr.msk.bf16.vlgmr.msra.gmra.mrb[12].mxu1 %vm20522_vm0, %v9841_v61  ;;  %v10301_v49 = vsel %vm20527_vm14, %v15687_v37, %v15688_v32  ;;  %v15692_v61 = vunpack.i.l.bf16 %v15691_v31  ;;  %vm20528_vm0 = vmmov %vm20527_vm14 }
 0x694   : > { %10151 = vmatpush1.bf16.msra.mxu1 %v10092_v58  ;;  %10182 = vmatprep.mubr.bf16.mxu1 %v20299_v2  ;;  %v10304_v0 = vsel %vm20528_vm0, %v15682_v36, %v15683_v7  ;;  %vm20530_vm15 = vmmov %vm20525_vm10  ;;  %v10309_v1 = vpack.c.bf16 %v10301_v49, %v10301_v49  ;;  %v10305_v34 = vsel %vm20528_vm0, %v10297_v19, %v15682_v36 }
 0x695   : > { %13991 = vmatprep.subr.msk.bf16.mxu1 %vm20518_vm1, %v10081_v51  ;;  %v10306_v22 = vpack.c.bf16 %v10304_v0, %v10304_v0  ;;  %vm20533_vm14 = vmmov %vm20528_vm0  ;;  %v10313_v58 = vpack.c.bf16 %v10305_v34, %v10305_v34  ;;  %v15698_v51 = vunpack.i.h.bf16 %v19118_v28  ;;  %v10298_v36 = vsel %vm20528_vm0, %v15693_v8, %v10297_v19 }
 0x696   : > { %v10299_v63 = vsel %vm20533_vm14, %v15692_v61, %v15693_v8 }
 0x697   : > { %v10311_v7 = vpack.c.bf16 %v10299_v63, %v10299_v63 }
 0x698   : > { %13986 = vmatmul.mubr.msk.bf16.vlgmr.msra.gmra.mrb[8].mxu0 %vm20525_vm10, %v10073_v56  ;;  %vm20531_vm10 = vmmov %vm20528_vm0 }
 0x699   : > { %10192 = vmatpush1.bf16.msra.mxu0 %v10098_v57  ;;  %10223 = vmatprep.mubr.bf16.mxu0 %v20299_v2  ;;  %v10302_v50 = vsel %vm20531_vm10, %v10287_v5, %v15687_v37  ;;  %v15701_v5 = vpop.permute.xlu0 %15700  ;;  %vm20537_vm10 = vmmov %vm20532_vm13  ;;  %v15706_v57 = vpop.permute.xlu1 %15705 }
 0x69a   : > { %13993 = vmatprep.subr.msk.bf16.mxu0 %vm20529_vm9, %v10307_v39  ;;  %v10308_v33 = vpack.c.bf16 %v10302_v50, %v10302_v50  ;;  %vm20534_vm9 = vmmov %vm20530_vm15  ;;  %v15703_v55 = vunpack.i.h.bf16 %v15701_v5  ;;  %v15702_v31 = vunpack.i.l.bf16 %v15701_v5  ;;  %v15708_v19 = vunpack.i.h.bf16 %v15706_v57 }
 0x69b   : > { %13988 = vmatmul.mubr.msk.bf16.vlgmr.msra.gmra.mrb[8].mxu1 %vm20530_vm15, %v10073_v56  ;;  %vm20535_vm15 = vmmov %vm20518_vm1  ;;  %v15707_v0 = vunpack.i.l.bf16 %v15706_v57 }
 0x69c   : > { %10233 = vmatpush1.bf16.msra.mxu1 %v10104_v6  ;;  %10264 = vmatprep.mubr.bf16.mxu1 %v20299_v2  ;;  %v10318_v46 = vsel %vm20535_vm15, %v10306_v22, 0  ;;  %vm20536_vm1 = vmmov %vm20528_vm0 }
 0x69d   : > { %13995 = vmatprep.subr.msk.bf16.mxu1 %vm20532_vm13, %v10309_v1  ;;  %v10300_v59 = vsel %vm20536_vm1, %v15688_v32, %v15692_v61  ;;  %vm20538_vm13 = vmmov %vm20534_vm9  ;;  %v15697_v32 = vunpack.i.l.bf16 %v19118_v28  ;;  %v10529_v6 = vpop.permute.xlu0 %10528  ;;  %v19157_v1 = vpop.permute.xlu1 %15710 }
 0x69e   : > { %vm20539_vm14 = vmmov %vm20537_vm10  ;;  %v10310_v26 = vpack.c.bf16 %v10300_v59, %v10300_v59 }
 0x69f   : > { %v10324_v37 = vsel %vm20539_vm14, %v10308_v33, 0  ;;  %vm20541_vm15 = vmmov %vm20537_vm10 }
 0x6a0   : > { %13990 = vmatmul.mubr.msk.bf16.vlgmr.msra.gmra.mrb[12].mxu0 %vm20534_vm9, %v10073_v56  ;;  %vm20540_vm9 = vcmp.lt.s32.totalorder %v16134_v13, 119  ;;  %vm20542_vm1 = vmmov %vm20538_vm13  ;;  %v10330_v8 = vsel %vm20537_vm10, %v10310_v26, 0 }
 0x6a1   : > { %10342 = vmatpush1.bf16.msra.mxu0 %v10318_v46  ;;  %10373 = vmatprep.mubr.bf16.mxu0 %v20299_v2  ;;  %v10535_v39 = vsel %vm20540_vm9, %v15698_v51, %v10519_v23  ;;  %vm20544_vm14 = vmmov %vm20540_vm9  ;;  %v10751_v46 = vpop.permute.xlu0 %10750 }
 0x6a2   : > { %13997 = vmatprep.subr.msk.bf16.mxu0 %vm20537_vm10, %v10311_v7  ;;  %v10539_v49 = vpack.c.bf16 %v10535_v39, %v10535_v39  ;;  %v10536_v28 = vsel %vm20544_vm14, %v15697_v32, %v15698_v51  ;;  %vm20545_vm0 = vmmov %vm20537_vm10  ;;  %v15716_v51 = vpop.permute.xlu1 %15715 }
 0x6a3   : > { %13992 = vmatmul.mubr.msk.bf16.vlgmr.msra.gmra.mrb[12].mxu1 %vm20538_vm13, %v10073_v56  ;;  %v10312_v56 = vpack.c.bf16 %v10298_v36, %v10298_v36  ;;  %vm20543_vm13 = vmmov %vm20540_vm9  ;;  %v10538_v63 = vpack.c.bf16 %v10536_v28, %v10536_v28  ;;  %v15718_v39 = vunpack.i.h.bf16 %v15716_v51  ;;  %v15717_v57 = vunpack.i.l.bf16 %v15716_v51 }
 0x6a4   : > { %10383 = vmatpush1.bf16.msra.mxu1 %v10324_v37  ;;  %10414 = vmatprep.mubr.bf16.mxu1 %v20299_v2  ;;  %v10533_v61 = vsel %vm20543_vm13, %v15702_v31, %v15703_v55  ;;  %vm20546_vm9 = vmmov %vm20542_vm1 }
 0x6a5   : > { %13999 = vmatprep.subr.msk.bf16.mxu1 %vm20541_vm15, %v10313_v58  ;;  %vm20547_vm15 = vmmov %vm20545_vm0  ;;  %v10541_v50 = vpack.c.bf16 %v10533_v61, %v10533_v61  ;;  %v265_v58 = vld [vmem:[%s20003_s3 + $0x78] sm:$0xff] }
 0x6a6   : > { %v10336_v22 = vsel %vm20547_vm15, %v10312_v56, 0  ;;  %vm20549_vm10 = vmmov %vm20545_vm0  ;;  %v10513_v26 = vpack.c.bf16 %v265_v58, %v265_v58 }
 0x6a8   : > { %13994 = vmatmul.mubr.msk.bf16.vlgmr.msra.gmra.mrb[8].mxu0 %vm20542_vm1, %v10281_v15  ;;  %vm20548_vm1 = vmmov %vm20543_vm13 }
 0x6a9   : > { %10424 = vmatpush1.bf16.msra.mxu0 %v10330_v8  ;;  %10455 = vmatprep.mubr.bf16.mxu0 %v20299_v2  ;;  %v10534_v33 = vsel %vm20548_vm1, %v10519_v23, %v15702_v31  ;;  %vm20550_vm13 = vmmov %vm20548_vm1  ;;  %v15713_v23 = vunpack.i.h.bf16 %v19157_v1  ;;  %v15721_v8 = vpop.permute.xlu0 %15720 }
 0x6aa   : > { %14001 = vmatprep.subr.msk.bf16.mxu0 %vm20545_vm0, %v10539_v49  ;;  %v10531_v34 = vsel %vm20550_vm13, %v15707_v0, %v15708_v19  ;;  %v10540_v7 = vpack.c.bf16 %v10534_v33, %v10534_v33  ;;  %vm20551_vm14 = vmmov %vm20548_vm1  ;;  %v15712_v49 = vunpack.i.l.bf16 %v19157_v1  ;;  %v15722_v28 = vunpack.i.l.bf16 %v15721_v8 }
 0x6ab   : > { %13996 = vmatmul.mubr.msk.bf16.vlgmr.msra.gmra.mrb[8].mxu1 %vm20546_vm9, %v10281_v15  ;;  %v10537_v35 = vsel %vm20551_vm14, %v10529_v6, %v15697_v32  ;;  %vm20552_vm0 = vmmov %vm20546_vm9  ;;  %v10543_v59 = vpack.c.bf16 %v10531_v34, %v10531_v34  ;;  %v10530_v32 = vsel %vm20551_vm14, %v15708_v19, %v10529_v6  ;;  %v15723_v6 = vunpack.i.h.bf16 %v15721_v8 }
 0x6ac   : > { %10465 = vmatpush1.bf16.msra.mxu1 %v10336_v22  ;;  %10496 = vmatprep.mubr.bf16.mxu1 %v20299_v2  ;;  %vm20553_vm9 = vmmov %vm20549_vm10  ;;  %v10545_v36 = vpack.c.bf16 %v10537_v35, %v10537_v35  ;;  %v10761_v22 = vpop.permute.xlu1 %10760 }
 0x6ad   : > { %14003 = vmatprep.subr.msk.bf16.mxu1 %vm20549_vm10, %v10541_v50  ;;  %v10550_v5 = vsel %vm20553_vm9, %v10538_v63, 0  ;;  %vm20554_vm15 = vmmov %vm20548_vm1  ;;  %v19196_v50 = vpop.permute.xlu0 %15725 }
 0x6ae   : > { %v10532_v37 = vsel %vm20554_vm15, %v15703_v55, %v15707_v0  ;;  %vm20555_vm1 = vmmov %vm20553_vm9 }
 0x6af   : > { %vm20556_vm10 = vmmov %vm20552_vm0  ;;  %v10542_v56 = vpack.c.bf16 %v10532_v37, %v10532_v37  ;;  %v266_v37 = vld [vmem:[%s20003_s3 + $0x80] sm:$0xff] }
 0x6b0   : > { %13998 = vmatmul.mubr.msk.bf16.vlgmr.msra.gmra.mrb[12].mxu0 %vm20552_vm0, %v10281_v15  ;;  %vm20557_vm13 = vmmov %vm20555_vm1  ;;  %vm20558_vm0 = vcmp.lt.s32.totalorder %v16134_v13, 118 }
 0x6b1   : > { %10574 = vmatpush1.bf16.msra.mxu0 %v10550_v5  ;;  %10605 = vmatprep.mubr.bf16.mxu0 %v20299_v2  ;;  %v10556_v31 = vsel %vm20557_vm13, %v10540_v7, 0  ;;  %v10767_v55 = vsel %vm20558_vm0, %v15713_v23, %v10751_v46  ;;  %vm20559_vm9 = vmmov %vm20555_vm1  ;;  %v10562_v19 = vsel %vm20555_vm1, %v10542_v56, 0  ;;  %v10983_v5 = vpop.permute.xlu1 %10982  ;;  %v10745_v56 = vpack.c.bf16 %v266_v37, %v266_v37 }
 0x6b2   : > { %14005 = vmatprep.subr.msk.bf16.mxu0 %vm20555_vm1, %v10543_v59  ;;  %v10771_v61 = vpack.c.bf16 %v10767_v55, %v10767_v55  ;;  %vm20560_vm15 = vmmov %vm20556_vm10 }
 0x6b3   : > { %14000 = vmatmul.mubr.msk.bf16.vlgmr.msra.gmra.mrb[12].mxu1 %vm20556_vm10, %v10281_v15  ;;  %v10544_v15 = vpack.c.bf16 %v10530_v32, %v10530_v32  ;;  %vm20561_vm10 = vmmov %vm20558_vm0  ;;  %v15728_v32 = vunpack.i.h.bf16 %v19196_v50 }
 0x6b4   : > { %10615 = vmatpush1.bf16.msra.mxu1 %v10556_v31  ;;  %10646 = vmatprep.mubr.bf16.mxu1 %v20299_v2  ;;  %v10765_v0 = vsel %vm20561_vm10, %v15717_v57, %v15718_v39  ;;  %vm20562_vm13 = vmmov %vm20558_vm0  ;;  %v10763_v35 = vsel %vm20561_vm10, %v15722_v28, %v15723_v6 }
 0x6b5   : > { %14007 = vmatprep.subr.msk.bf16.mxu1 %vm20559_vm9, %v10545_v36  ;;  %v10768_v1 = vsel %vm20562_vm13, %v15712_v49, %v15713_v23  ;;  %vm20563_vm14 = vmmov %vm20555_vm1  ;;  %v10773_v33 = vpack.c.bf16 %v10765_v0, %v10765_v0  ;;  %v10775_v51 = vpack.c.bf16 %v10763_v35, %v10763_v35 }
 0x6b6   : > { %vm20564_vm0 = vmmov %vm20560_vm15  ;;  %v10770_v34 = vpack.c.bf16 %v10768_v1, %v10768_v1 }
 0x6b7   : > { %vm20565_vm9 = vmmov %vm20555_vm1 }
 0x6b8   : > { %14002 = vmatmul.mubr.msk.bf16.vlgmr.msra.gmra.mrb[8].mxu0 %vm20560_vm15, %v10513_v26  ;;  %v10568_v63 = vsel %vm20565_vm9, %v10544_v15, 0  ;;  %vm20566_vm15 = vmmov %vm20561_vm10 }
 0x6b9   : > { %10656 = vmatpush1.bf16.msra.mxu0 %v10562_v19  ;;  %10687 = vmatprep.mubr.bf16.mxu0 %v20299_v2  ;;  %v10766_v7 = vsel %vm20566_vm15, %v10751_v46, %v15717_v57  ;;  %vm20567_vm13 = vmmov %vm20561_vm10  ;;  %v15731_v46 = vpop.permute.xlu0 %15730  ;;  %v15736_v19 = vpop.permute.xlu1 %15735 }
 0x6ba   : > { %14009 = vmatprep.subr.msk.bf16.mxu0 %vm20563_vm14, %v10771_v61  ;;  %v10772_v59 = vpack.c.bf16 %v10766_v7, %v10766_v7  ;;  %v10769_v58 = vsel %vm20567_vm13, %v10761_v22, %v15712_v49  ;;  %vm20568_vm14 = vmmov %vm20564_vm0  ;;  %v15733_v55 = vunpack.i.h.bf16 %v15731_v46  ;;  %v15732_v8 = vunpack.i.l.bf16 %v15731_v46 }
 0x6bb   : > { %14004 = vmatmul.mubr.msk.bf16.vlgmr.msra.gmra.mrb[8].mxu1 %vm20564_vm0, %v10513_v26  ;;  %vm20569_vm0 = vmmov %vm20555_vm1  ;;  %v10777_v31 = vpack.c.bf16 %v10769_v58, %v10769_v58  ;;  %v15737_v1 = vunpack.i.l.bf16 %v15736_v19 }
 0x6bc   : > { %10697 = vmatpush1.bf16.msra.mxu1 %v10568_v63  ;;  %10728 = vmatprep.mubr.bf16.mxu1 %v20299_v2  ;;  %v10782_v23 = vsel %vm20569_vm0, %v10770_v34, 0  ;;  %vm20570_vm9 = vmmov %vm20561_vm10 }
 0x6bd   : > { %14011 = vmatprep.subr.msk.bf16.mxu1 %vm20555_vm1, %v10773_v33  ;;  %v10764_v36 = vsel %vm20570_vm9, %v15718_v39, %v15722_v28  ;;  %vm20571_vm15 = vmmov %vm20569_vm0  ;;  %v15727_v39 = vunpack.i.l.bf16 %v19196_v50  ;;  %v10993_v63 = vpop.permute.xlu0 %10992  ;;  %v19235_v34 = vpop.permute.xlu1 %15740 }
 0x6be   : > { %vm20572_vm1 = vmmov %vm20568_vm14  ;;  %v10774_v15 = vpack.c.bf16 %v10764_v36, %v10764_v36 }
 0x6bf   : > { %vm20573_vm10 = vmmov %vm20569_vm0 }
 0x6c0   : > { %14006 = vmatmul.mubr.msk.bf16.vlgmr.msra.gmra.mrb[12].mxu0 %vm20568_vm14, %v10513_v26  ;;  %v10788_v57 = vsel %vm20573_vm10, %v10772_v59, 0  ;;  %vm20574_vm13 = vmmov %vm20570_vm9  ;;  %vm20575_vm14 = vcmp.lt.s32.totalorder %v16134_v13, 117 }
 0x6c1   : > { %10806 = vmatpush1.bf16.msra.mxu0 %v10782_v23  ;;  %10837 = vmatprep.mubr.bf16.mxu0 %v20299_v2  ;;  %v10762_v49 = vsel %vm20574_vm13, %v15723_v6, %v10761_v22  ;;  %v10999_v61 = vsel %vm20575_vm14, %v15728_v32, %v10983_v5  ;;  %vm20576_vm9 = vmmov %vm20575_vm14  ;;  %v15738_v22 = vunpack.i.h.bf16 %v15736_v19  ;;  %v11215_v23 = vpop.permute.xlu0 %11214 }
 0x6c2   : > { %14013 = vmatprep.subr.msk.bf16.mxu0 %vm20571_vm15, %v10775_v51  ;;  %v11003_v0 = vpack.c.bf16 %v10999_v61, %v10999_v61  ;;  %v10997_v28 = vsel %vm20576_vm9, %v15732_v8, %v15733_v55  ;;  %vm20577_vm15 = vmmov %vm20572_vm1  ;;  %v10998_v59 = vsel %vm20576_vm9, %v10983_v5, %v15732_v8  ;;  %v15743_v5 = vunpack.i.h.bf16 %v19235_v34 }
 0x6c3   : > { %14008 = vmatmul.mubr.msk.bf16.vlgmr.msra.gmra.mrb[12].mxu1 %vm20572_vm1, %v10513_v26  ;;  %v10776_v26 = vpack.c.bf16 %v10762_v49, %v10762_v49  ;;  %vm20578_vm1 = vmmov %vm20569_vm0  ;;  %v11005_v33 = vpack.c.bf16 %v10997_v28, %v10997_v28  ;;  %v11004_v51 = vpack.c.bf16 %v10998_v59, %v10998_v59 }
 0x6c4   : > { %10847 = vmatpush1.bf16.msra.mxu1 %v10788_v57  ;;  %10878 = vmatprep.mubr.bf16.mxu1 %v20299_v2  ;;  %v10794_v6 = vsel %vm20578_vm1, %v10774_v15, 0  ;;  %vm20579_vm10 = vmmov %vm20576_vm9 }
 0x6c5   : > { %14015 = vmatprep.subr.msk.bf16.mxu1 %vm20569_vm0, %v10777_v31  ;;  %v11000_v50 = vsel %vm20579_vm10, %v15727_v39, %v15728_v32  ;;  %vm20580_vm13 = vmmov %vm20569_vm0  ;;  %v10800_v7 = vsel %vm20569_vm0, %v10776_v26, 0  ;;  %v267_v31 = vld [vmem:[%s20003_s3 + $0x88] sm:$0xff]  ;;  %v15746_v32 = vpop.permute.xlu1 %15745  ;;  %v15751_v28 = vpop.permute.xlu0 %15750 }
 0x6c6   : > { %vm20581_vm14 = vmmov %vm20577_vm15  ;;  %v11002_v35 = vpack.c.bf16 %v11000_v50, %v11000_v50  ;;  %v10977_v15 = vpack.c.bf16 %v267_v31, %v267_v31  ;;  %v15748_v61 = vunpack.i.h.bf16 %v15746_v32  ;;  %v15747_v19 = vunpack.i.l.bf16 %v15746_v32 }
 0x6c7   : > { %vm20583_vm1 = vmmov %vm20569_vm0  ;;  %v15752_v50 = vunpack.i.l.bf16 %v15751_v28 }
 0x6c8   : > { %14010 = vmatmul.mubr.msk.bf16.vlgmr.msra.gmra.mrb[8].mxu0 %vm20577_vm15, %v10745_v56  ;;  %vm20582_vm15 = vmmov %vm20576_vm9  ;;  %v11020_v8 = vsel %vm20583_vm1, %v11004_v51, 0 }
 0x6c9   : > { %10888 = vmatpush1.bf16.msra.mxu0 %v10794_v6  ;;  %10919 = vmatprep.mubr.bf16.mxu0 %v20299_v2  ;;  %v10995_v58 = vsel %vm20582_vm15, %v15737_v1, %v15738_v22  ;;  %vm20584_vm10 = vmmov %vm20576_vm9 }
 0x6ca   : > { %14017 = vmatprep.subr.msk.bf16.mxu0 %vm20580_vm13, %v11003_v0  ;;  %v11007_v37 = vpack.c.bf16 %v10995_v58, %v10995_v58  ;;  %v11001_v46 = vsel %vm20584_vm10, %v10993_v63, %v15727_v39  ;;  %vm20585_vm13 = vmmov %vm20581_vm14  ;;  %v15742_v0 = vunpack.i.l.bf16 %v19235_v34 }
 0x6cb   : > { %14012 = vmatmul.mubr.msk.bf16.vlgmr.msra.gmra.mrb[8].mxu1 %vm20581_vm14, %v10745_v56  ;;  %vm20586_vm14 = vmmov %vm20569_vm0  ;;  %v11009_v49 = vpack.c.bf16 %v11001_v46, %v11001_v46 }
 0x6cc   : > { %10929 = vmatpush1.bf16.msra.mxu1 %v10800_v7  ;;  %10960 = vmatprep.mubr.bf16.mxu1 %v20299_v2  ;;  %v11014_v36 = vsel %vm20586_vm14, %v11002_v35, 0  ;;  %vm20587_vm0 = vmmov %vm20576_vm9  ;;  %v19274_v35 = vpop.permute.xlu0 %15755 }
 0x6cd   : > { %14019 = vmatprep.subr.msk.bf16.mxu1 %vm20583_vm1, %v11005_v33  ;;  %v10996_v57 = vsel %vm20587_vm0, %v15733_v55, %v15737_v1  ;;  %vm20588_vm9 = vmmov %vm20583_vm1  ;;  %v11225_v33 = vpop.permute.xlu1 %11224 }
 0x6ce   : > { %vm20589_vm15 = vmmov %vm20585_vm13  ;;  %v11006_v26 = vpack.c.bf16 %v10996_v57, %v10996_v57  ;;  %v268_v57 = vld [vmem:[%s20003_s3 + $0x90] sm:$0xff] }
 0x6cf   : > { %vm20590_vm10 = vmmov %vm20587_vm0 }
 0x6d0   : > { %14014 = vmatmul.mubr.msk.bf16.vlgmr.msra.gmra.mrb[12].mxu0 %vm20585_vm13, %v10745_v56  ;;  %v10994_v39 = vsel %vm20590_vm10, %v15738_v22, %v10993_v63  ;;  %vm20591_vm13 = vcmp.lt.s32.totalorder %v16134_v13, 39  ;;  %vm20592_vm14 = vmmov %vm20583_vm1  ;;  %v15753_v63 = vunpack.i.h.bf16 %v15751_v28 }
 0x6d1   : > { %11038 = vmatpush1.bf16.msra.mxu0 %v11014_v36  ;;  %11069 = vmatprep.mubr.bf16.mxu0 %v20299_v2  ;;  %v11231_v55 = vsel %vm20591_vm13, %v15743_v5, %v11215_v23  ;;  %vm20593_vm0 = vmmov %vm20591_vm13  ;;  %v11447_v46 = vpop.permute.xlu1 %11446 }
 0x6d2   : > { %14021 = vmatprep.subr.msk.bf16.mxu0 %vm20588_vm9, %v11007_v37  ;;  %v11235_v6 = vpack.c.bf16 %v11231_v55, %v11231_v55  ;;  %v11229_v1 = vsel %vm20593_vm0, %v15747_v19, %v15748_v61  ;;  %vm20594_vm9 = vmmov %vm20589_vm15  ;;  %v11230_v51 = vsel %vm20593_vm0, %v11215_v23, %v15747_v19  ;;  %v15761_v23 = vpop.permute.xlu0 %15760 }
 0x6d3   : > { %14016 = vmatmul.mubr.msk.bf16.vlgmr.msra.gmra.mrb[12].mxu1 %vm20589_vm15, %v10745_v56  ;;  %v11008_v56 = vpack.c.bf16 %v10994_v39, %v10994_v39  ;;  %vm20595_vm15 = vmmov %vm20583_vm1  ;;  %v11237_v7 = vpack.c.bf16 %v11229_v1, %v11229_v1  ;;  %v11236_v36 = vpack.c.bf16 %v11230_v51, %v11230_v51  ;;  %v15758_v39 = vunpack.i.h.bf16 %v19274_v35 }
 0x6d4   : > { %11079 = vmatpush1.bf16.msra.mxu1 %v11020_v8  ;;  %11110 = vmatprep.mubr.bf16.mxu1 %v20299_v2  ;;  %v11026_v22 = vsel %vm20595_vm15, %v11006_v26, 0  ;;  %vm20596_vm1 = vmmov %vm20593_vm0  ;;  %v11209_v26 = vpack.c.bf16 %v268_v57, %v268_v57  ;;  %v15763_v55 = vunpack.i.h.bf16 %v15761_v23  ;;  %v15762_v28 = vunpack.i.l.bf16 %v15761_v23 }
 0x6d5   : > { %14023 = vmatprep.subr.msk.bf16.mxu1 %vm20592_vm14, %v11009_v49  ;;  %v11232_v34 = vsel %vm20596_vm1, %v15742_v0, %v15743_v5  ;;  %vm20597_vm10 = vmmov %vm20592_vm14  ;;  %v15766_v1 = vpop.permute.xlu1 %15765 }
 0x6d6   : > { %vm20598_vm13 = vmmov %vm20594_vm9  ;;  %v11234_v58 = vpack.c.bf16 %v11232_v34, %v11232_v34  ;;  %v15767_v34 = vunpack.i.l.bf16 %v15766_v1 }
 0x6d7   : > { %vm20599_vm14 = vmmov %vm20597_vm10 }
 0x6d8   : > { %14018 = vmatmul.mubr.msk.bf16.vlgmr.msra.gmra.mrb[8].mxu0 %vm20594_vm9, %v10977_v15  ;;  %v11032_v59 = vsel %vm20599_vm14, %v11008_v56, 0  ;;  %vm20600_vm9 = vmmov %vm20593_vm0 }
 0x6d9   : > { %11120 = vmatpush1.bf16.msra.mxu0 %v11026_v22  ;;  %11151 = vmatprep.mubr.bf16.mxu0 %v20299_v2  ;;  %v11227_v37 = vsel %vm20600_vm9, %v15752_v50, %v15753_v63  ;;  %vm20601_vm15 = vmmov %vm20597_vm10 }
 0x6da   : > { %14025 = vmatprep.subr.msk.bf16.mxu0 %vm20597_vm10, %v11235_v6  ;;  %v11239_v31 = vpack.c.bf16 %v11227_v37, %v11227_v37  ;;  %vm20602_vm1 = vmmov %vm20593_vm0 }
 0x6db   : > { %14020 = vmatmul.mubr.msk.bf16.vlgmr.msra.gmra.mrb[8].mxu1 %vm20598_vm13, %v10977_v15  ;;  %v11233_v5 = vsel %vm20602_vm1, %v11225_v33, %v15742_v0  ;;  %vm20603_vm10 = vmmov %vm20598_vm13  ;;  %v11226_v0 = vsel %vm20602_vm1, %v15753_v63, %v11225_v33  ;;  %v15768_v33 = vunpack.i.h.bf16 %v15766_v1 }
 0x6dc   : > { %11161 = vmatpush1.bf16.msra.mxu1 %v11032_v59  ;;  %11192 = vmatprep.mubr.bf16.mxu1 %v20299_v2  ;;  %vm20604_vm13 = vmmov %vm20599_vm14  ;;  %v11241_v8 = vpack.c.bf16 %v11233_v5, %v11233_v5 }
 0x6dd   : > { %14027 = vmatprep.subr.msk.bf16.mxu1 %vm20601_vm15, %v11237_v7  ;;  %v11246_v32 = vsel %vm20604_vm13, %v11234_v58, 0  ;;  %vm20605_vm14 = vmmov %vm20593_vm0  ;;  %v11457_v7 = vpop.permute.xlu0 %11456  ;;  %v19313_v58 = vpop.permute.xlu1 %15770 }
 0x6de   : > { %v11228_v49 = vsel %vm20605_vm14, %v15748_v61, %v15752_v50  ;;  %vm20606_vm0 = vmmov %vm20604_vm13  ;;  %v15757_v61 = vunpack.i.l.bf16 %v19274_v35 }
 0x6df   : > { %vm20607_vm9 = vmmov %vm20603_vm10  ;;  %v11238_v56 = vpack.c.bf16 %v11228_v49, %v11228_v49 }
 0x6e0   : > { %14022 = vmatmul.mubr.msk.bf16.vlgmr.msra.gmra.mrb[12].mxu0 %vm20603_vm10, %v10977_v15  ;;  %vm20608_vm15 = vmmov %vm20606_vm0  ;;  %vm20609_vm10 = vcmp.lt.s32.totalorder %v16134_v13, 38 }
 0x6e1   : > { %11270 = vmatpush1.bf16.msra.mxu0 %v11246_v32  ;;  %11301 = vmatprep.mubr.bf16.mxu0 %v20299_v2  ;;  %v11252_v19 = vsel %vm20608_vm15, %v11236_v36, 0  ;;  %v11463_v6 = vsel %vm20609_vm10, %v15758_v39, %v11447_v46  ;;  %vm20610_vm13 = vmmov %vm20606_vm0  ;;  %v11679_v5 = vpop.permute.xlu0 %11678 }
 0x6e2   : > { %14029 = vmatprep.subr.msk.bf16.mxu0 %vm20606_vm0, %v11239_v31  ;;  %v11467_v22 = vpack.c.bf16 %v11463_v6, %v11463_v6  ;;  %vm20611_vm14 = vmmov %vm20609_vm10 }
 0x6e3   : > { %14024 = vmatmul.mubr.msk.bf16.vlgmr.msra.gmra.mrb[12].mxu1 %vm20607_vm9, %v10977_v15  ;;  %v11240_v15 = vpack.c.bf16 %v11226_v0, %v11226_v0  ;;  %v11461_v50 = vsel %vm20611_vm14, %v15762_v28, %v15763_v55  ;;  %vm20612_vm0 = vmmov %vm20607_vm9  ;;  %v11462_v36 = vsel %vm20611_vm14, %v11447_v46, %v15762_v28  ;;  %v15773_v46 = vunpack.i.h.bf16 %v19313_v58 }
 0x6e4   : > { %11311 = vmatpush1.bf16.msra.mxu1 %v11252_v19  ;;  %11342 = vmatprep.mubr.bf16.mxu1 %v20299_v2  ;;  %vm20613_vm9 = vmmov %vm20610_vm13  ;;  %v11469_v59 = vpack.c.bf16 %v11461_v50, %v11461_v50  ;;  %v11468_v32 = vpack.c.bf16 %v11462_v36, %v11462_v36 }
 0x6e5   : > { %14031 = vmatprep.subr.msk.bf16.mxu1 %vm20610_vm13, %v11241_v8  ;;  %v11258_v63 = vsel %vm20613_vm9, %v11238_v56, 0  ;;  %vm20614_vm15 = vmmov %vm20609_vm10  ;;  %v269_v8 = vld [vmem:[%s20003_s3 + $0x98] sm:$0xff]  ;;  %v15781_v50 = vpop.permute.xlu0 %15780 }
 0x6e6   : > { %v11464_v35 = vsel %vm20614_vm15, %v15757_v61, %v15758_v39  ;;  %vm20615_vm1 = vmmov %vm20613_vm9  ;;  %v15776_v39 = vpop.permute.xlu1 %15775  ;;  %v11441_v56 = vpack.c.bf16 %v269_v8, %v269_v8 }
 0x6e7   : > { %vm20616_vm10 = vmmov %vm20612_vm0  ;;  %v11466_v37 = vpack.c.bf16 %v11464_v35, %v11464_v35  ;;  %v15778_v6 = vunpack.i.h.bf16 %v15776_v39  ;;  %v15777_v1 = vunpack.i.l.bf16 %v15776_v39  ;;  %v15782_v35 = vunpack.i.l.bf16 %v15781_v50 }
 0x6e8   : > { %14026 = vmatmul.mubr.msk.bf16.vlgmr.msra.gmra.mrb[8].mxu0 %vm20612_vm0, %v11209_v26  ;;  %vm20617_vm13 = vmmov %vm20615_vm1 }
 0x6e9   : > { %11352 = vmatpush1.bf16.msra.mxu0 %v11258_v63  ;;  %11383 = vmatprep.mubr.bf16.mxu0 %v20299_v2  ;;  %v11264_v51 = vsel %vm20617_vm13, %v11240_v15, 0  ;;  %vm20618_vm0 = vmmov %vm20611_vm14 }
 0x6ea   : > { %14033 = vmatprep.subr.msk.bf16.mxu0 %vm20615_vm1, %v11467_v22  ;;  %v11459_v31 = vsel %vm20618_vm0, %v15767_v34, %v15768_v33  ;;  %vm20619_vm9 = vmmov %vm20615_vm1  ;;  %v15772_v22 = vunpack.i.l.bf16 %v19313_v58 }
 0x6eb   : > { %14028 = vmatmul.mubr.msk.bf16.vlgmr.msra.gmra.mrb[8].mxu1 %vm20616_vm10, %v11209_v26  ;;  %v11471_v57 = vpack.c.bf16 %v11459_v31, %v11459_v31  ;;  %vm20620_vm15 = vmmov %vm20618_vm0  ;;  %v11484_v28 = vsel %vm20619_vm9, %v11468_v32, 0 }
 0x6ec   : > { %11393 = vmatpush1.bf16.msra.mxu1 %v11264_v51  ;;  %11424 = vmatprep.mubr.bf16.mxu1 %v20299_v2  ;;  %v11465_v23 = vsel %vm20620_vm15, %v11457_v7, %v15757_v61  ;;  %vm20621_vm1 = vmmov %vm20616_vm10 }
 0x6ed   : > { %14035 = vmatprep.subr.msk.bf16.mxu1 %vm20619_vm9, %v11469_v59  ;;  %vm20622_vm10 = vmmov %vm20619_vm9  ;;  %v11473_v0 = vpack.c.bf16 %v11465_v23, %v11465_v23  ;;  %v11689_v59 = vpop.permute.xlu1 %11688 }
 0x6ee   : > { %v11478_v49 = vsel %vm20622_vm10, %v11466_v37, 0  ;;  %vm20623_vm13 = vmmov %vm20618_vm0  ;;  %v19352_v37 = vpop.permute.xlu0 %15785 }
 0x6ef   : > { %v11460_v19 = vsel %vm20623_vm13, %v15763_v55, %v15767_v34  ;;  %vm20624_vm14 = vmmov %vm20619_vm9 }
 0x6f0   : > { %14030 = vmatmul.mubr.msk.bf16.vlgmr.msra.gmra.mrb[12].mxu0 %vm20621_vm1, %v11209_v26  ;;  %vm20625_vm0 = vmmov %vm20621_vm1  ;;  %v11470_v15 = vpack.c.bf16 %v11460_v19, %v11460_v19  ;;  %vm20627_vm1 = vcmp.lt.s32.totalorder %v16134_v13, 37 }
 0x6f1   : > { %11502 = vmatpush1.bf16.msra.mxu0 %v11478_v49  ;;  %11533 = vmatprep.mubr.bf16.mxu0 %v20299_v2  ;;  %vm20626_vm15 = vmmov %vm20623_vm13  ;;  %v11695_v55 = vsel %vm20627_vm1, %v15773_v46, %v11679_v5  ;;  %v11911_v23 = vpop.permute.xlu1 %11910 }
 0x6f2   : > { %14037 = vmatprep.subr.msk.bf16.mxu0 %vm20624_vm14, %v11471_v57  ;;  %v11458_v61 = vsel %vm20626_vm15, %v15768_v33, %v11457_v7  ;;  %vm20628_vm10 = vmmov %vm20619_vm9  ;;  %v11699_v63 = vpack.c.bf16 %v11695_v55, %v11695_v55  ;;  %v15783_v7 = vunpack.i.h.bf16 %v15781_v50  ;;  %v15791_v19 = vpop.permute.xlu0 %15790 }
 0x6f3   : > { %14032 = vmatmul.mubr.msk.bf16.vlgmr.msra.gmra.mrb[12].mxu1 %vm20625_vm0, %v11209_v26  ;;  %v11472_v26 = vpack.c.bf16 %v11458_v61, %v11458_v61  ;;  %vm20629_vm13 = vmmov %vm20627_vm1  ;;  %v15792_v55 = vunpack.i.l.bf16 %v15791_v19 }
 0x6f4   : > { %11543 = vmatpush1.bf16.msra.mxu1 %v11484_v28  ;;  %11574 = vmatprep.mubr.bf16.mxu1 %v20299_v2  ;;  %v11693_v34 = vsel %vm20629_vm13, %v15777_v1, %v15778_v6  ;;  %vm20630_vm14 = vmmov %vm20625_vm0 }
 0x6f5   : > { %14039 = vmatprep.subr.msk.bf16.mxu1 %vm20628_vm10, %v11473_v0  ;;  %vm20631_vm0 = vmmov %vm20619_vm9  ;;  %v11701_v51 = vpack.c.bf16 %v11693_v34, %v11693_v34  ;;  %v15796_v34 = vpop.permute.xlu1 %15795 }
 0x6f6   : > { %v11490_v33 = vsel %vm20631_vm0, %v11470_v15, 0  ;;  %vm20632_vm9 = vmmov %vm20627_vm1 }
 0x6f7   : > { %v11696_v58 = vsel %vm20632_vm9, %v15772_v22, %v15773_v46  ;;  %vm20633_vm15 = vmmov %vm20631_vm0  ;;  %v11697_v46 = vsel %vm20632_vm9, %v11689_v59, %v15772_v22  ;;  %v15793_v22 = vunpack.i.h.bf16 %v15791_v19 }
 0x6f8   : > { %14034 = vmatmul.mubr.msk.bf16.vlgmr.msra.gmra.mrb[8].mxu0 %vm20630_vm14, %v11441_v56  ;;  %vm20634_vm1 = vmmov %vm20630_vm14  ;;  %v11698_v31 = vpack.c.bf16 %v11696_v58, %v11696_v58  ;;  %v11705_v61 = vpack.c.bf16 %v11697_v46, %v11697_v46  ;;  %v15797_v58 = vunpack.i.l.bf16 %v15796_v34 }
 0x6f9   : > { %11584 = vmatpush1.bf16.msra.mxu0 %v11490_v33  ;;  %11615 = vmatprep.mubr.bf16.mxu0 %v20299_v2  ;;  %vm20635_vm10 = vmmov %vm20631_vm0 }
 0x6fa   : > { %14041 = vmatprep.subr.msk.bf16.mxu0 %vm20633_vm15, %v11699_v63  ;;  %v11496_v36 = vsel %vm20635_vm10, %v11472_v26, 0  ;;  %vm20636_vm13 = vmmov %vm20632_vm9 }
 0x6fb   : > { %14036 = vmatmul.mubr.msk.bf16.vlgmr.msra.gmra.mrb[8].mxu1 %vm20634_vm1, %v11441_v56  ;;  %v11694_v32 = vsel %vm20636_vm13, %v11679_v5, %v15777_v1  ;;  %vm20637_vm14 = vmmov %vm20632_vm9  ;;  %v270_v5 = vld [vmem:[%s20003_s3 + $0xa0] sm:$0xff]  ;;  %v15788_v1 = vunpack.i.h.bf16 %v19352_v37 }
 0x6fc   : > { %11625 = vmatpush1.bf16.msra.mxu1 %v11496_v36  ;;  %11656 = vmatprep.mubr.bf16.mxu1 %v20299_v2  ;;  %v11691_v57 = vsel %vm20637_vm14, %v15782_v35, %v15783_v7  ;;  %v11700_v49 = vpack.c.bf16 %v11694_v32, %v11694_v32  ;;  %vm20638_vm15 = vmmov %vm20634_vm1  ;;  %v11673_v50 = vpack.c.bf16 %v270_v5, %v270_v5 }
 0x6fd   : > { %14043 = vmatprep.subr.msk.bf16.mxu1 %vm20631_vm0, %v11701_v51  ;;  %v11703_v8 = vpack.c.bf16 %v11691_v57, %v11691_v57  ;;  %vm20639_vm1 = vmmov %vm20631_vm0  ;;  %v11921_v51 = vpop.permute.xlu0 %11920 }
 0x6fe   : > { %v11710_v39 = vsel %vm20639_vm1, %v11698_v31, 0  ;;  %vm20640_vm10 = vmmov %vm20632_vm9  ;;  %v19391_v31 = vpop.permute.xlu1 %15800 }
 0x6ff   : > { %v11692_v0 = vsel %vm20640_vm10, %v15778_v6, %v15782_v35  ;;  %vm20641_vm13 = vmmov %vm20631_vm0  ;;  %v15787_v6 = vunpack.i.l.bf16 %v19352_v37 }
 0x700   : > { %14038 = vmatmul.mubr.msk.bf16.vlgmr.msra.gmra.mrb[12].mxu0 %vm20638_vm15, %v11441_v56  ;;  %vm20642_vm14 = vmmov %vm20632_vm9  ;;  %v11702_v26 = vpack.c.bf16 %v11692_v0, %v11692_v0 }
 0x701   : > { %11734 = vmatpush1.bf16.msra.mxu0 %v11710_v39  ;;  %11765 = vmatprep.mubr.bf16.mxu0 %v20299_v2  ;;  %v11690_v28 = vsel %vm20642_vm14, %v15783_v7, %v11689_v59  ;;  %vm20643_vm0 = vmmov %vm20638_vm15  ;;  %vm20645_vm15 = vcmp.lt.s32.totalorder %v16134_v13, 29  ;;  %v15798_v59 = vunpack.i.h.bf16 %v15796_v34  ;;  %v12143_v46 = vpop.permute.xlu0 %12142 }
 0x702   : > { %14045 = vmatprep.subr.msk.bf16.mxu0 %vm20641_vm13, %v11703_v8  ;;  %vm20644_vm9 = vmmov %vm20639_vm1  ;;  %v11927_v63 = vsel %vm20645_vm15, %v15788_v1, %v11911_v23  ;;  %v11704_v33 = vpack.c.bf16 %v11690_v28, %v11690_v28  ;;  %v15803_v28 = vunpack.i.h.bf16 %v19391_v31 }
 0x703   : > { %14040 = vmatmul.mubr.msk.bf16.vlgmr.msra.gmra.mrb[12].mxu1 %vm20643_vm0, %v11441_v56  ;;  %v11716_v15 = vsel %vm20644_vm9, %v11700_v49, 0  ;;  %v11931_v7 = vpack.c.bf16 %v11927_v63, %v11927_v63  ;;  %vm20646_vm10 = vmmov %vm20645_vm15 }
 0x704   : > { %11775 = vmatpush1.bf16.msra.mxu1 %v11716_v15  ;;  %11806 = vmatprep.mubr.bf16.mxu1 %v20299_v2  ;;  %v11925_v56 = vsel %vm20646_vm10, %v15792_v55, %v15793_v22  ;;  %vm20647_vm13 = vmmov %vm20643_vm0  ;;  %v11728_v32 = vsel %vm20639_vm1, %v11704_v33, 0 }
 0x705   : > { %14047 = vmatprep.subr.msk.bf16.mxu1 %vm20639_vm1, %v11705_v61  ;;  %vm20648_vm14 = vmmov %vm20639_vm1  ;;  %v11933_v36 = vpack.c.bf16 %v11925_v56, %v11925_v56  ;;  %v15806_v61 = vpop.permute.xlu1 %15805  ;;  %v15811_v56 = vpop.permute.xlu0 %15810 }
 0x706   : > { %v11722_v35 = vsel %vm20648_vm14, %v11702_v26, 0  ;;  %vm20649_vm0 = vmmov %vm20646_vm10  ;;  %v15807_v63 = vunpack.i.l.bf16 %v15806_v61 }
 0x707   : > { %v11928_v37 = vsel %vm20649_vm0, %v15787_v6, %v15788_v1  ;;  %vm20650_vm9 = vmmov %vm20639_vm1  ;;  %v11929_v5 = vsel %vm20649_vm0, %v11921_v51, %v15787_v6  ;;  %v15808_v6 = vunpack.i.h.bf16 %v15806_v61 }
 0x708   : > { %14042 = vmatmul.mubr.msk.bf16.vlgmr.msra.gmra.mrb[8].mxu0 %vm20647_vm13, %v11673_v50  ;;  %vm20651_vm15 = vmmov %vm20647_vm13  ;;  %v11930_v57 = vpack.c.bf16 %v11928_v37, %v11928_v37  ;;  %v15812_v37 = vunpack.i.l.bf16 %v15811_v56 }
 0x709   : > { %11816 = vmatpush1.bf16.msra.mxu0 %v11722_v35  ;;  %11847 = vmatprep.mubr.bf16.mxu0 %v20299_v2  ;;  %vm20652_vm10 = vmmov %vm20649_vm0 }
 0x70a   : > { %14049 = vmatprep.subr.msk.bf16.mxu0 %vm20650_vm9, %v11931_v7  ;;  %v11926_v49 = vsel %vm20652_vm10, %v11911_v23, %v15792_v55  ;;  %vm20653_vm13 = vmmov %vm20649_vm0  ;;  %v271_v23 = vld [vmem:[%s20003_s3 + $0xa8] sm:$0xff]  ;;  %v11937_v55 = vpack.c.bf16 %v11929_v5, %v11929_v5  ;;  %v15802_v7 = vunpack.i.l.bf16 %v19391_v31 }
 0x70b   : > { %14044 = vmatmul.mubr.msk.bf16.vlgmr.msra.gmra.mrb[8].mxu1 %vm20651_vm15, %v11673_v50  ;;  %v11923_v8 = vsel %vm20653_vm13, %v15797_v58, %v15798_v59  ;;  %vm20654_vm14 = vmmov %vm20639_vm1  ;;  %v11932_v39 = vpack.c.bf16 %v11926_v49, %v11926_v49  ;;  %v11905_v34 = vpack.c.bf16 %v271_v23, %v271_v23 }
 0x70c   : > { %11857 = vmatpush1.bf16.msra.mxu1 %v11728_v32  ;;  %11888 = vmatprep.mubr.bf16.mxu1 %v20299_v2  ;;  %v11935_v19 = vpack.c.bf16 %v11923_v8, %v11923_v8  ;;  %vm20655_vm9 = vmmov %vm20651_vm15 }
 0x70d   : > { %14051 = vmatprep.subr.msk.bf16.mxu1 %vm20654_vm14, %v11933_v36  ;;  %vm20656_vm15 = vmmov %vm20639_vm1  ;;  %v12153_v36 = vpop.permute.xlu1 %12152 }
 0x70e   : > { %v11942_v0 = vsel %vm20656_vm15, %v11930_v57, 0  ;;  %vm20657_vm1 = vmmov %vm20649_vm0  ;;  %v19430_v57 = vpop.permute.xlu0 %15815 }
 0x70f   : > { %v11924_v1 = vsel %vm20657_vm1, %v15793_v22, %v15797_v58  ;;  %vm20658_vm10 = vmmov %vm20654_vm14 }
 0x710   : > { %14046 = vmatmul.mubr.msk.bf16.vlgmr.msra.gmra.mrb[12].mxu0 %vm20655_vm9, %v11673_v50  ;;  %vm20659_vm13 = vmmov %vm20649_vm0  ;;  %v11934_v33 = vpack.c.bf16 %v11924_v1, %v11924_v1 }
 0x711   : > { %11966 = vmatpush1.bf16.msra.mxu0 %v11942_v0  ;;  %11997 = vmatprep.mubr.bf16.mxu0 %v20299_v2  ;;  %v11922_v15 = vsel %vm20659_vm13, %v15798_v59, %v11921_v51  ;;  %vm20660_vm14 = vmmov %vm20655_vm9  ;;  %vm20662_vm9 = vcmp.lt.s32.totalorder %v16134_v13, 28  ;;  %v15813_v51 = vunpack.i.h.bf16 %v15811_v56  ;;  %v12375_v5 = vpop.permute.xlu1 %12374 }
 0x712   : > { %14053 = vmatprep.subr.msk.bf16.mxu0 %vm20658_vm10, %v11935_v19  ;;  %vm20661_vm0 = vmmov %vm20658_vm10  ;;  %v12159_v22 = vsel %vm20662_vm9, %v15803_v28, %v12143_v46  ;;  %v11936_v35 = vpack.c.bf16 %v11922_v15, %v11922_v15  ;;  %v15821_v1 = vpop.permute.xlu0 %15820 }
 0x713   : > { %14048 = vmatmul.mubr.msk.bf16.vlgmr.msra.gmra.mrb[12].mxu1 %vm20660_vm14, %v11673_v50  ;;  %v11948_v26 = vsel %vm20661_vm0, %v11932_v39, 0  ;;  %vm20663_vm15 = vmmov %vm20661_vm0  ;;  %v12163_v59 = vpack.c.bf16 %v12159_v22, %v12159_v22  ;;  %v15822_v22 = vunpack.i.l.bf16 %v15821_v1 }
 0x714   : > { %12007 = vmatpush1.bf16.msra.mxu1 %v11948_v26  ;;  %12038 = vmatprep.mubr.bf16.mxu1 %v20299_v2  ;;  %vm20664_vm1 = vmmov %vm20662_vm9 }
 0x715   : > { %14055 = vmatprep.subr.msk.bf16.mxu1 %vm20663_vm15, %v11937_v55  ;;  %v12157_v50 = vsel %vm20664_vm1, %v15807_v63, %v15808_v6  ;;  %vm20665_vm10 = vmmov %vm20660_vm14  ;;  %v12158_v39 = vsel %vm20664_vm1, %v12143_v46, %v15807_v63  ;;  %v272_v46 = vld [vmem:[%s20003_s3 + $0xb0] sm:$0xff]  ;;  %v15818_v63 = vunpack.i.h.bf16 %v19430_v57 }
 0x716   : > { %vm20666_vm13 = vmmov %vm20661_vm0  ;;  %v12165_v32 = vpack.c.bf16 %v12157_v50, %v12157_v50  ;;  %v12164_v0 = vpack.c.bf16 %v12158_v39, %v12158_v39  ;;  %v12137_v56 = vpack.c.bf16 %v272_v46, %v272_v46  ;;  %v15826_v50 = vpop.permute.xlu1 %15825 }
 0x717   : > { %v11954_v58 = vsel %vm20666_vm13, %v11934_v33, 0  ;;  %vm20667_vm14 = vmmov %vm20664_vm1 }
 0x718   : > { %14050 = vmatmul.mubr.msk.bf16.vlgmr.msra.gmra.mrb[8].mxu0 %vm20665_vm10, %v11905_v34  ;;  %v12160_v31 = vsel %vm20667_vm14, %v15802_v7, %v15803_v28  ;;  %vm20668_vm9 = vmmov %vm20665_vm10 }
 0x719   : > { %12048 = vmatpush1.bf16.msra.mxu0 %v11954_v58  ;;  %12079 = vmatprep.mubr.bf16.mxu0 %v20299_v2  ;;  %vm20669_vm15 = vmmov %vm20661_vm0  ;;  %v12162_v8 = vpack.c.bf16 %v12160_v31, %v12160_v31  ;;  %v15827_v31 = vunpack.i.l.bf16 %v15826_v50 }
 0x71a   : > { %14057 = vmatprep.subr.msk.bf16.mxu0 %vm20661_vm0, %v12163_v59  ;;  %v11960_v49 = vsel %vm20669_vm15, %v11936_v35, 0  ;;  %vm20670_vm10 = vmmov %vm20664_vm1 }
 0x71b   : > { %14052 = vmatmul.mubr.msk.bf16.vlgmr.msra.gmra.mrb[8].mxu1 %vm20668_vm9, %v11905_v34  ;;  %v12155_v19 = vsel %vm20670_vm10, %v15812_v37, %v15813_v51  ;;  %vm20671_vm13 = vmmov %vm20661_vm0  ;;  %v12154_v55 = vsel %vm20670_vm10, %v15813_v51, %v12153_v36 }
 0x71c   : > { %12089 = vmatpush1.bf16.msra.mxu1 %v11960_v49  ;;  %12120 = vmatprep.mubr.bf16.mxu1 %v20299_v2  ;;  %v12167_v28 = vpack.c.bf16 %v12155_v19, %v12155_v19  ;;  %vm20672_vm14 = vmmov %vm20664_vm1  ;;  %v12168_v58 = vpack.c.bf16 %v12154_v55, %v12154_v55 }
 0x71d   : > { %14059 = vmatprep.subr.msk.bf16.mxu1 %vm20671_vm13, %v12165_v32  ;;  %v12161_v61 = vsel %vm20672_vm14, %v12153_v36, %v15802_v7  ;;  %vm20673_vm0 = vmmov %vm20668_vm9  ;;  %v15823_v7 = vunpack.i.h.bf16 %v15821_v1  ;;  %v15828_v36 = vunpack.i.h.bf16 %v15826_v50  ;;  %v12385_v32 = vpop.permute.xlu0 %12384 }
 0x71e   : > { %vm20674_vm9 = vmmov %vm20671_vm13  ;;  %v12169_v26 = vpack.c.bf16 %v12161_v61, %v12161_v61 }
 0x71f   : > { %v12174_v23 = vsel %vm20674_vm9, %v12162_v8, 0  ;;  %vm20675_vm15 = vmmov %vm20664_vm1  ;;  %v19469_v8 = vpop.permute.xlu1 %15830 }
 0x720   : > { %14054 = vmatmul.mubr.msk.bf16.vlgmr.msra.gmra.mrb[12].mxu0 %vm20673_vm0, %v11905_v34  ;;  %v12156_v15 = vsel %vm20675_vm15, %v15808_v6, %v15812_v37  ;;  %vm20676_vm1 = vmmov %vm20674_vm9  ;;  %v15817_v6 = vunpack.i.l.bf16 %v19430_v57  ;;  %v15833_v55 = vunpack.i.h.bf16 %v19469_v8 }
 0x721   : > { %12198 = vmatpush1.bf16.msra.mxu0 %v12174_v23  ;;  %12229 = vmatprep.mubr.bf16.mxu0 %v20299_v2  ;;  %vm20677_vm13 = vmmov %vm20673_vm0  ;;  %v12166_v35 = vpack.c.bf16 %v12156_v15, %v12156_v15  ;;  %vm20679_vm0 = vcmp.lt.s32.totalorder %v16134_v13, 27  ;;  %v12607_v61 = vpop.permute.xlu0 %12606 }
 0x722   : > { %14061 = vmatprep.subr.msk.bf16.mxu0 %vm20676_vm1, %v12167_v28  ;;  %vm20678_vm14 = vmmov %vm20676_vm1  ;;  %v12391_v59 = vsel %vm20679_vm0, %v15818_v63, %v12375_v5 }
 0x723   : > { %14056 = vmatmul.mubr.msk.bf16.vlgmr.msra.gmra.mrb[12].mxu1 %vm20677_vm13, %v11905_v34  ;;  %v12180_v33 = vsel %vm20678_vm14, %v12164_v0, 0  ;;  %vm20680_vm9 = vmmov %vm20676_vm1  ;;  %v12395_v51 = vpack.c.bf16 %v12391_v59, %v12391_v59 }
 0x724   : > { %12239 = vmatpush1.bf16.msra.mxu1 %v12180_v33  ;;  %12270 = vmatprep.mubr.bf16.mxu1 %v20299_v2  ;;  %vm20681_vm15 = vmmov %vm20679_vm0  ;;  %v12192_v39 = vsel %vm20680_vm9, %v12168_v58, 0 }
 0x725   : > { %14063 = vmatprep.subr.msk.bf16.mxu1 %vm20680_vm9, %v12169_v26  ;;  %v12389_v34 = vsel %vm20681_vm15, %v15822_v22, %v15823_v7  ;;  %vm20682_vm1 = vmmov %vm20677_vm13  ;;  %v15836_v26 = vpop.permute.xlu1 %15835 }
 0x726   : > { %vm20683_vm10 = vmmov %vm20680_vm9  ;;  %v12397_v49 = vpack.c.bf16 %v12389_v34, %v12389_v34  ;;  %v15837_v59 = vunpack.i.l.bf16 %v15836_v26  ;;  %v15841_v34 = vpop.permute.xlu0 %15840 }
 0x727   : > { %v12186_v37 = vsel %vm20683_vm10, %v12166_v35, 0  ;;  %vm20684_vm13 = vmmov %vm20679_vm0 }
 0x728   : > { %14058 = vmatmul.mubr.msk.bf16.vlgmr.msra.gmra.mrb[8].mxu0 %vm20682_vm1, %v12137_v56  ;;  %v12392_v57 = vsel %vm20684_vm13, %v15817_v6, %v15818_v63  ;;  %vm20685_vm14 = vmmov %vm20680_vm9 }
 0x729   : > { %12280 = vmatpush1.bf16.msra.mxu0 %v12186_v37  ;;  %12311 = vmatprep.mubr.bf16.mxu0 %v20299_v2  ;;  %vm20686_vm0 = vmmov %vm20682_vm1  ;;  %v12394_v19 = vpack.c.bf16 %v12392_v57, %v12392_v57  ;;  %v15842_v57 = vunpack.i.l.bf16 %v15841_v34 }
 0x72a   : > { %14065 = vmatprep.subr.msk.bf16.mxu0 %vm20685_vm14, %v12395_v51  ;;  %vm20687_vm15 = vmmov %vm20684_vm13  ;;  %v15832_v51 = vunpack.i.l.bf16 %v19469_v8 }
 0x72b   : > { %14060 = vmatmul.mubr.msk.bf16.vlgmr.msra.gmra.mrb[8].mxu1 %vm20686_vm0, %v12137_v56  ;;  %v12390_v0 = vsel %vm20687_vm15, %v12375_v5, %v15822_v22  ;;  %vm20688_vm1 = vmmov %vm20684_vm13  ;;  %v273_v5 = vld [vmem:[%s20003_s3 + $0xb8] sm:$0xff] }
 0x72c   : > { %12321 = vmatpush1.bf16.msra.mxu1 %v12192_v39  ;;  %12352 = vmatprep.mubr.bf16.mxu1 %v20299_v2  ;;  %v12387_v28 = vsel %vm20688_vm1, %v15827_v31, %v15828_v36  ;;  %vm20689_vm10 = vmmov %vm20680_vm9  ;;  %v12396_v23 = vpack.c.bf16 %v12390_v0, %v12390_v0  ;;  %v12386_v33 = vsel %vm20688_vm1, %v15828_v36, %v12385_v32 }
 0x72d   : > { %14067 = vmatprep.subr.msk.bf16.mxu1 %vm20689_vm10, %v12397_v49  ;;  %v12399_v1 = vpack.c.bf16 %v12387_v28, %v12387_v28  ;;  %vm20690_vm13 = vmmov %vm20688_vm1  ;;  %v12369_v50 = vpack.c.bf16 %v273_v5, %v273_v5  ;;  %v12400_v37 = vpack.c.bf16 %v12386_v33, %v12386_v33  ;;  %v12617_v49 = vpop.permute.xlu1 %12616 }
 0x72e   : > { %v12393_v46 = vsel %vm20690_vm13, %v12385_v32, %v15817_v6  ;;  %vm20691_vm14 = vmmov %vm20686_vm0  ;;  %v15838_v6 = vunpack.i.h.bf16 %v15836_v26  ;;  %v15843_v32 = vunpack.i.h.bf16 %v15841_v34 }
 0x72f   : > { %vm20692_vm0 = vmmov %vm20680_vm9  ;;  %v12401_v22 = vpack.c.bf16 %v12393_v46, %v12393_v46 }
 0x730   : > { %14062 = vmatmul.mubr.msk.bf16.vlgmr.msra.gmra.mrb[12].mxu0 %vm20691_vm14, %v12137_v56  ;;  %v12406_v15 = vsel %vm20692_vm0, %v12394_v19, 0  ;;  %vm20693_vm9 = vmmov %vm20688_vm1  ;;  %v15846_v19 = vpop.permute.xlu0 %15845  ;;  %v12424_v0 = vsel %vm20692_vm0, %v12400_v37, 0 }
 0x731   : > { %12430 = vmatpush1.bf16.msra.mxu0 %v12406_v15  ;;  %12461 = vmatprep.mubr.bf16.mxu0 %v20299_v2  ;;  %v12388_v63 = vsel %vm20693_vm9, %v15823_v7, %v15827_v31  ;;  %vm20694_vm15 = vmmov %vm20692_vm0  ;;  %v12839_v46 = vpop.permute.xlu1 %12838 }
 0x732   : > { %14069 = vmatprep.subr.msk.bf16.mxu0 %vm20694_vm15, %v12399_v1  ;;  %vm20695_vm10 = vmmov %vm20691_vm14  ;;  %v12398_v58 = vpack.c.bf16 %v12388_v63, %v12388_v63  ;;  %vm20697_vm14 = vcmp.lt.s32.totalorder %v16134_v13, 19 }
 0x733   : > { %14064 = vmatmul.mubr.msk.bf16.vlgmr.msra.gmra.mrb[12].mxu1 %vm20695_vm10, %v12137_v56  ;;  %vm20696_vm13 = vmmov %vm20692_vm0  ;;  %v12623_v7 = vsel %vm20697_vm14, %v15833_v55, %v12607_v61 }
 0x734   : > { %v12412_v35 = vsel %vm20696_vm13, %v12396_v23, 0  ;;  %12502 = vmatprep.mubr.bf16.mxu1 %v20299_v2  ;;  %v12627_v36 = vpack.c.bf16 %v12623_v7, %v12623_v7  ;;  %vm20698_vm9 = vmmov %vm20697_vm14  ;;  %v15851_v63 = vpop.permute.xlu0 %15850 }
 0x735   : > { %12471 = vmatpush1.bf16.msra.mxu1 %v12412_v35  ;;  %v12621_v56 = vsel %vm20698_vm9, %v15837_v59, %v15838_v6  ;;  %vm20699_vm15 = vmmov %vm20695_vm10  ;;  %v12622_v23 = vsel %vm20698_vm9, %v12607_v61, %v15837_v59  ;;  %v274_v61 = vld [vmem:[%s20003_s3 + $0xc0] sm:$0xff]  ;;  %v15848_v59 = vunpack.i.h.bf16 %v15846_v19  ;;  %v15852_v7 = vunpack.i.l.bf16 %v15851_v63 }
 0x736   : > { %14071 = vmatprep.subr.msk.bf16.mxu1 %vm20692_vm0, %v12401_v22  ;;  %vm20700_vm1 = vmmov %vm20692_vm0  ;;  %v12629_v39 = vpack.c.bf16 %v12621_v56, %v12621_v56  ;;  %v12628_v15 = vpack.c.bf16 %v12622_v23, %v12622_v23  ;;  %v12601_v34 = vpack.c.bf16 %v274_v61, %v274_v61  ;;  %v15856_v56 = vpop.permute.xlu1 %15855 }
 0x737   : > { %v12418_v31 = vsel %vm20700_vm1, %v12398_v58, 0  ;;  %vm20701_vm10 = vmmov %vm20698_vm9 }
 0x738   : > { %14066 = vmatmul.mubr.msk.bf16.vlgmr.msra.gmra.mrb[8].mxu0 %vm20699_vm15, %v12369_v50  ;;  %v12624_v8 = vsel %vm20701_vm10, %v15832_v51, %v15833_v55  ;;  %vm20702_vm13 = vmmov %vm20692_vm0 }
 0x739   : > { %12512 = vmatpush1.bf16.msra.mxu0 %v12418_v31  ;;  %12543 = vmatprep.mubr.bf16.mxu0 %v20299_v2  ;;  %vm20703_vm14 = vmmov %vm20699_vm15  ;;  %v12626_v28 = vpack.c.bf16 %v12624_v8, %v12624_v8  ;;  %v15857_v8 = vunpack.i.l.bf16 %v15856_v56 }
 0x73a   : > { %14073 = vmatprep.subr.msk.bf16.mxu0 %vm20702_vm13, %v12627_v36  ;;  %vm20704_vm15 = vmmov %vm20698_vm9  ;;  %v15847_v36 = vunpack.i.l.bf16 %v15846_v19  ;;  %v12849_v19 = vpop.permute.xlu0 %12848 }
 0x73b   : > { %14068 = vmatmul.mubr.msk.bf16.vlgmr.msra.gmra.mrb[8].mxu1 %vm20703_vm14, %v12369_v50  ;;  %v12619_v1 = vsel %vm20704_vm15, %v15842_v57, %v15843_v32  ;;  %vm20705_vm1 = vmmov %vm20692_vm0 }
 0x73c   : > { %12553 = vmatpush1.bf16.msra.mxu1 %v12424_v0  ;;  %12584 = vmatprep.mubr.bf16.mxu1 %v20299_v2  ;;  %v12631_v55 = vpack.c.bf16 %v12619_v1, %v12619_v1  ;;  %vm20706_vm10 = vmmov %vm20698_vm9 }
 0x73d   : > { %14075 = vmatprep.subr.msk.bf16.mxu1 %vm20705_vm1, %v12629_v39  ;;  %v12625_v26 = vsel %vm20706_vm10, %v12617_v49, %v15832_v51  ;;  %vm20707_vm13 = vmmov %vm20703_vm14  ;;  %v15853_v51 = vunpack.i.h.bf16 %v15851_v63 }
 0x73e   : > { %vm20708_vm14 = vmmov %vm20692_vm0  ;;  %v12633_v35 = vpack.c.bf16 %v12625_v26, %v12625_v26  ;;  %v13071_v61 = vpop.permute.xlu0 %13070 }
 0x73f   : > { %v12638_v5 = vsel %vm20708_vm14, %v12626_v28, 0  ;;  %vm20709_vm0 = vmmov %vm20698_vm9  ;;  %v15861_v28 = vpop.permute.xlu1 %15860 }
 0x740   : > { %14070 = vmatmul.mubr.msk.bf16.vlgmr.msra.gmra.mrb[12].mxu0 %vm20707_vm13, %v12369_v50  ;;  %v12620_v33 = vsel %vm20709_vm0, %v15838_v6, %v15842_v57  ;;  %vm20710_vm9 = vmmov %vm20705_vm1 }
 0x741   : > { %12662 = vmatpush1.bf16.msra.mxu0 %v12638_v5  ;;  %12693 = vmatprep.mubr.bf16.mxu0 %v20299_v2  ;;  %vm20711_vm15 = vmmov %vm20709_vm0  ;;  %v12630_v37 = vpack.c.bf16 %v12620_v33, %v12620_v33 }
 0x742   : > { %14077 = vmatprep.subr.msk.bf16.mxu0 %vm20710_vm9, %v12631_v55  ;;  %v12618_v22 = vsel %vm20711_vm15, %v15843_v32, %v12617_v49  ;;  %vm20712_vm1 = vmmov %vm20707_vm13  ;;  %vm20714_vm13 = vcmp.lt.s32.totalorder %v16134_v13, 18  ;;  %v15858_v49 = vunpack.i.h.bf16 %v15856_v56 }
 0x743   : > { %14072 = vmatmul.mubr.msk.bf16.vlgmr.msra.gmra.mrb[12].mxu1 %vm20712_vm1, %v12369_v50  ;;  %vm20713_vm10 = vmmov %vm20710_vm9  ;;  %v12855_v6 = vsel %vm20714_vm13, %v15848_v59, %v12839_v46  ;;  %v12632_v31 = vpack.c.bf16 %v12618_v22, %v12618_v22  ;;  %v15863_v22 = vunpack.i.h.bf16 %v15861_v28 }
 0x744   : > { %v12644_v58 = vsel %vm20713_vm10, %v12628_v15, 0  ;;  %12734 = vmatprep.mubr.bf16.mxu1 %v20299_v2  ;;  %vm20715_vm14 = vmmov %vm20710_vm9  ;;  %v12859_v32 = vpack.c.bf16 %v12855_v6, %v12855_v6 }
 0x745   : > { %12703 = vmatpush1.bf16.msra.mxu1 %v12644_v58  ;;  %vm20716_vm0 = vmmov %vm20714_vm13 }
 0x746   : > { %14079 = vmatprep.subr.msk.bf16.mxu1 %vm20715_vm14, %v12633_v35  ;;  %v12853_v50 = vsel %vm20716_vm0, %v15852_v7, %v15853_v51  ;;  %vm20717_vm9 = vmmov %vm20712_vm1  ;;  %v12854_v15 = vsel %vm20716_vm0, %v12839_v46, %v15852_v7  ;;  %v15866_v35 = vpop.permute.xlu1 %15865  ;;  %v275_v46 = vld [vmem:[%s20003_s3 + $0xc8] sm:$0xff] }
 0x747   : > { %vm20718_vm15 = vmmov %vm20713_vm10  ;;  %v12861_v0 = vpack.c.bf16 %v12853_v50, %v12853_v50  ;;  %v12860_v26 = vpack.c.bf16 %v12854_v15, %v12854_v15  ;;  %v15867_v6 = vunpack.i.l.bf16 %v15866_v35  ;;  %v12833_v56 = vpack.c.bf16 %v275_v46, %v275_v46  ;;  %v15871_v50 = vpop.permute.xlu0 %15870 }
 0x748   : > { %14074 = vmatmul.mubr.msk.bf16.vlgmr.msra.gmra.mrb[8].mxu0 %vm20717_vm9, %v12601_v34  ;;  %v12650_v57 = vsel %vm20718_vm15, %v12630_v37, 0  ;;  %vm20719_vm1 = vmmov %vm20716_vm0 }
 0x749   : > { %12744 = vmatpush1.bf16.msra.mxu0 %v12650_v57  ;;  %12775 = vmatprep.mubr.bf16.mxu0 %v20299_v2  ;;  %v12856_v39 = vsel %vm20719_vm1, %v15847_v36, %v15848_v59  ;;  %vm20720_vm13 = vmmov %vm20717_vm9 }
 0x74a   : > { %14081 = vmatprep.subr.msk.bf16.mxu0 %vm20713_vm10, %v12859_v32  ;;  %vm20721_vm14 = vmmov %vm20713_vm10  ;;  %v12858_v1 = vpack.c.bf16 %v12856_v39, %v12856_v39  ;;  %v15862_v32 = vunpack.i.l.bf16 %v15861_v28  ;;  %v15873_v39 = vunpack.i.h.bf16 %v15871_v50 }
 0x74b   : > { %14076 = vmatmul.mubr.msk.bf16.vlgmr.msra.gmra.mrb[8].mxu1 %vm20720_vm13, %v12601_v34  ;;  %v12656_v23 = vsel %vm20721_vm14, %v12632_v31, 0  ;;  %vm20722_vm9 = vmmov %vm20716_vm0 }
 0x74c   : > { %12785 = vmatpush1.bf16.msra.mxu1 %v12656_v23  ;;  %12816 = vmatprep.mubr.bf16.mxu1 %v20299_v2  ;;  %v12851_v55 = vsel %vm20722_vm9, %v15857_v8, %v15858_v49  ;;  %vm20723_vm15 = vmmov %vm20713_vm10 }
 0x74d   : > { %14083 = vmatprep.subr.msk.bf16.mxu1 %vm20723_vm15, %v12861_v0  ;;  %v12863_v5 = vpack.c.bf16 %v12851_v55, %v12851_v55  ;;  %vm20724_vm1 = vmmov %vm20716_vm0 }
 0x74e   : > { %v12857_v63 = vsel %vm20724_vm1, %v12849_v19, %v15847_v36  ;;  %vm20725_vm10 = vmmov %vm20720_vm13  ;;  %v15868_v36 = vunpack.i.h.bf16 %v15866_v35 }
 0x74f   : > { %vm20726_vm13 = vmmov %vm20721_vm14  ;;  %v12865_v7 = vpack.c.bf16 %v12857_v63, %v12857_v63 }
 0x750   : > { %14078 = vmatmul.mubr.msk.bf16.vlgmr.msra.gmra.mrb[12].mxu0 %vm20725_vm10, %v12601_v34  ;;  %v12870_v33 = vsel %vm20726_vm13, %v12858_v1, 0  ;;  %vm20727_vm14 = vmmov %vm20716_vm0 }
 0x751   : > { %12894 = vmatpush1.bf16.msra.mxu0 %v12870_v33  ;;  %12925 = vmatprep.mubr.bf16.mxu0 %v20299_v2  ;;  %v12852_v59 = vsel %vm20727_vm14, %v15853_v51, %v15857_v8  ;;  %vm20728_vm0 = vmmov %vm20726_vm13 }
 0x752   : > { %14085 = vmatprep.subr.msk.bf16.mxu0 %vm20728_vm0, %v12863_v5  ;;  %vm20729_vm9 = vmmov %vm20724_vm1  ;;  %v12862_v31 = vpack.c.bf16 %v12852_v59, %v12852_v59 }
 0x753   : > { %v12850_v58 = vsel %vm20729_vm9, %v15858_v49, %v12849_v19  ;;  %vm20730_vm15 = vmmov %vm20725_vm10  ;;  %vm20732_vm10 = vcmp.lt.s32.totalorder %v16134_v13, 17  ;;  %v15872_v19 = vunpack.i.l.bf16 %v15871_v50 }
 0x754   : > { %14080 = vmatmul.mubr.msk.bf16.vlgmr.msra.gmra.mrb[12].mxu1 %vm20730_vm15, %v12601_v34  ;;  %vm20731_vm1 = vmmov %vm20728_vm0  ;;  %v13087_v51 = vsel %vm20732_vm10, %v15863_v22, %v13071_v61  ;;  %v12864_v57 = vpack.c.bf16 %v12850_v58, %v12850_v58 }
 0x755   : > { %v12876_v37 = vsel %vm20731_vm1, %v12860_v26, 0  ;;  %12966 = vmatprep.mubr.bf16.mxu1 %v20299_v2  ;;  %vm20733_vm13 = vmmov %vm20728_vm0  ;;  %v13091_v49 = vpack.c.bf16 %v13087_v51, %v13087_v51  ;;  %v13081_v26 = vpop.permute.xlu1 %13080 }
 0x756   : > { %12935 = vmatpush1.bf16.msra.mxu1 %v12876_v37  ;;  %vm20734_vm14 = vmmov %vm20732_vm10 }
 0x757   : > { %14087 = vmatprep.subr.msk.bf16.mxu1 %vm20733_vm13, %v12865_v7  ;;  %v13085_v34 = vsel %vm20734_vm14, %v15867_v6, %v15868_v36  ;;  %vm20735_vm0 = vmmov %vm20730_vm15  ;;  %v13086_v15 = vsel %vm20734_vm14, %v13071_v61, %v15867_v6  ;;  %v276_v61 = vld [vmem:[%s20003_s3 + $0xd0] sm:$0xff] }
 0x758   : > { %14082 = vmatmul.mubr.msk.bf16.vlgmr.msra.gmra.mrb[8].mxu0 %vm20735_vm0, %v12833_v56  ;;  %vm20736_vm9 = vmmov %vm20731_vm1  ;;  %v13093_v28 = vpack.c.bf16 %v13085_v34, %v13085_v34  ;;  %v13092_v5 = vpack.c.bf16 %v13086_v15, %v13086_v15  ;;  %v13065_v7 = vpack.c.bf16 %v276_v61, %v276_v61 }
 0x759   : > { %v12882_v8 = vsel %vm20736_vm9, %v12862_v31, 0  ;;  %13007 = vmatprep.mubr.bf16.mxu0 %v20299_v2  ;;  %vm20737_vm15 = vmmov %vm20732_vm10 }
 0x75a   : > { %12976 = vmatpush1.bf16.msra.mxu0 %v12882_v8  ;;  %v13088_v0 = vsel %vm20737_vm15, %v15862_v32, %v15863_v22  ;;  %vm20738_vm10 = vmmov %vm20735_vm0 }
 0x75b   : > { %14089 = vmatprep.subr.msk.bf16.mxu0 %vm20731_vm1, %v13091_v49  ;;  %vm20739_vm13 = vmmov %vm20731_vm1  ;;  %v13090_v1 = vpack.c.bf16 %v13088_v0, %v13088_v0 }
 0x75c   : > { %14084 = vmatmul.mubr.msk.bf16.vlgmr.msra.gmra.mrb[8].mxu1 %vm20738_vm10, %v12833_v56  ;;  %v12888_v23 = vsel %vm20739_vm13, %v12864_v57, 0  ;;  %vm20740_vm0 = vmmov %vm20734_vm14 }
 0x75d   : > { %13017 = vmatpush1.bf16.msra.mxu1 %v12888_v23  ;;  %13048 = vmatprep.mubr.bf16.mxu1 %v20299_v2  ;;  %v13083_v55 = vsel %vm20740_vm0, %v15872_v19, %v15873_v39  ;;  %vm20741_vm9 = vmmov %vm20731_vm1 }
 0x75e   : > { %14091 = vmatprep.subr.msk.bf16.mxu1 %vm20741_vm9, %v13093_v28  ;;  %v13095_v63 = vpack.c.bf16 %v13083_v55, %v13083_v55  ;;  %vm20742_vm15 = vmmov %vm20740_vm0  ;;  %v13108_v59 = vsel %vm20741_vm9, %v13092_v5, 0 }
 0x75f   : > { %v13089_v33 = vsel %vm20742_vm15, %v13081_v26, %v15862_v32  ;;  %vm20743_vm1 = vmmov %vm20738_vm10 }
 0x760   : > { %14086 = vmatmul.mubr.msk.bf16.vlgmr.msra.gmra.mrb[12].mxu0 %vm20743_vm1, %v12833_v56  ;;  %vm20744_vm10 = vmmov %vm20741_vm9  ;;  %v13097_v46 = vpack.c.bf16 %v13089_v33, %v13089_v33 }
 0x761   : > { %v13102_v22 = vsel %vm20744_vm10, %v13090_v1, 0  ;;  %13157 = vmatprep.mubr.bf16.mxu0 %v20299_v2  ;;  %vm20745_vm13 = vmmov %vm20740_vm0 }
 0x762   : > { %13126 = vmatpush1.bf16.msra.mxu0 %v13102_v22  ;;  %v13084_v35 = vsel %vm20745_vm13, %v15868_v36, %v15872_v19  ;;  %vm20746_vm14 = vmmov %vm20741_vm9 }
 0x763   : > { %14093 = vmatprep.subr.msk.bf16.mxu0 %vm20746_vm14, %v13095_v63  ;;  %vm20747_vm0 = vmmov %vm20743_vm1  ;;  %v13094_v37 = vpack.c.bf16 %v13084_v35, %v13084_v35 }
 0x764   : > { %14088 = vmatmul.mubr.msk.bf16.vlgmr.msra.gmra.mrb[12].mxu1 %vm20747_vm0, %v12833_v56  ;;  %vm20748_vm15 = vmmov %vm20745_vm13 }
 0x765   : > { %v13082_v58 = vsel %vm20748_vm15, %v15873_v39, %v13081_v26  ;;  %13167 = vmatpush1.bf16.msra.mxu1 %v13108_v59  ;;  %13198 = vmatprep.mubr.bf16.mxu1 %v20299_v2  ;;  %vm20749_vm1 = vmmov %vm20741_vm9 }
 0x766   : > { %14095 = vmatprep.subr.msk.bf16.mxu1 %vm20749_vm1, %v13097_v46  ;;  %v13096_v6 = vpack.c.bf16 %v13082_v58, %v13082_v58  ;;  %vm20750_vm10 = vmmov %vm20747_vm0 }
 0x767   : > { %vm20751_vm13 = vmmov %vm20749_vm1 }
 0x768   : > { %14090 = vmatmul.mubr.msk.bf16.vlgmr.msra.gmra.mrb[8].mxu0 %vm20750_vm10, %v13065_v7  ;;  %v13114_v36 = vsel %vm20751_vm13, %v13094_v37, 0  ;;  %vm20752_vm14 = vmmov %vm20747_vm0  ;;  %vm20758_vm13 = vcmp.lt.s32.totalorder %v16134_v13, 126 }
 0x769   : > { %13208 = vmatpush1.bf16.msra.mxu0 %v13114_v36  ;;  %13239 = vmatprep.mubr.bf16.mxu0 %v20299_v2  ;;  %vm20753_vm0 = vmmov %vm20749_vm1  ;;  %vm20756_vm1 = vcmp.lt.s32.totalorder %v16134_v13, 2 }
 0x76a   : > { %v13120_v56 = vsel %vm20753_vm0, %v13096_v6, 0  ;;  %vm20754_vm9 = vmmov %vm20750_vm10  ;;  %vm20757_vm10 = vnez %v20136_v53  ;;  %v20762_v53 = vld [vmem:[#allocation7_spill] sm:$0xff] }
 0x76b   : > { %vm20755_vm15 = vmmov %vm20754_vm9 }
 0x76c   : > { %14092 = vmatmul.mubr.msk.bf16.vlgmr.msra.gmra.mrb[8].mxu1 %vm20752_vm14, %v13065_v7  ;;  %vm20759_vm14 = vmmov %vm20756_vm1 }
 0x76d   : > { %13249 = vmatpush1.bf16.msra.mxu1 %v13120_v56  ;;  %13280 = vmatprep.mubr.bf16.mxu1 %v20299_v2  ;;  %vm20760_vm0 = vmmov %vm20756_vm1 }
 0x770   : > { %14094 = vmatmul.mubr.msk.bf16.vlgmr.msra.gmra.mrb[12].mxu0 %vm20754_vm9, %v13065_v7  ;;  %vm20761_vm9 = vnez %v20153_v52 }
 0x774   : > { %14096 = vmatmul.mubr.msk.bf16.vlgmr.msra.gmra.mrb[12].mxu1 %vm20755_vm15, %v13065_v7  ;;  %vm20763_vm15 = vnez %v20762_v53  ;;  %v20788_v53 = vld [vmem:[#allocation8_spill] sm:$0xff] }
 0x83b   : > { %v13159_v31 = vpop.f32.mrb[8].mxu0 }
 0x83c   : > { %v13297_v32 = vmul.f32 %v13159_v31, %v17544_v40  ;;  %v13161_v51 = vpop.f32.mrb[9].mxu0 }
 0x83d   : > { %v13298_v50 = vmul.f32 %v13161_v51, %v17552_v42  ;;  %v13163_v57 = vpop.f32.mrb[10].mxu0 }
 0x83e   : > { %v13315_v49 = vmul.f32 %v13297_v32, %v13159_v31  ;;  %v13164_v34 = vpop.f32.mrb[11].mxu0 }
 0x83f   : > { %v13200_v8 = vpop.f32.mrb[8].mxu1  ;;  %v13305_v39 = vadd.f32 %v13298_v50, %v13297_v32  ;;  %v13316_v19 = vmul.f32 %v13298_v50, %v13161_v51 }
 0x840   : > { %v13299_v0 = vmul.f32 %v13200_v8, %v17549_v4  ;;  %v13202_v28 = vpop.f32.mrb[9].mxu1 }
 0x841   : > { %v13300_v2 = vmul.f32 %v13202_v28, %v17557_v44  ;;  %v13204_v23 = vpop.f32.mrb[10].mxu1  ;;  %v13323_v1 = vadd.f32 %v13316_v19, %v13315_v49 }
 0x842   : > { %v13306_v15 = vadd.f32 %v13305_v39, %v13299_v0  ;;  %v13317_v55 = vmul.f32 %v13299_v0, %v13200_v8  ;;  %v13205_v26 = vpop.f32.mrb[11].mxu1 }
 0x843   : > { %v13318_v40 = vmul.f32 %v13300_v2, %v13202_v28  ;;  %v13241_v42 = vpop.f32.mrb[12].mxu0 }
 0x844   : > { %v13324_v5 = vadd.f32 %v13323_v1, %v13317_v55  ;;  %v13307_v63 = vadd.f32 %v13306_v15, %v13300_v2  ;;  %v13301_v33 = vmul.f32 %v13241_v42, %v17589_v9  ;;  %v13243_v22 = vpop.f32.mrb[13].mxu0 }
 0x845   : > { %v13302_v35 = vmul.f32 %v13243_v22, %v17598_v3  ;;  %v13245_v46 = vpop.f32.mrb[14].mxu0 }
 0x846   : > { %v13325_v61 = vadd.f32 %v13324_v5, %v13318_v40  ;;  %v13308_v4 = vadd.f32 %v13307_v63, %v13301_v33  ;;  %v13319_v59 = vmul.f32 %v13301_v33, %v13241_v42  ;;  %v13246_v58 = vpop.f32.mrb[15].mxu0  ;;  %v15886_v46 = vld [vmem:[%s15984_s20 + $0x8] sm:$0xff] }
 0x847   : > { %v13282_v44 = vpop.f32.mrb[12].mxu1  ;;  %v13320_v7 = vmul.f32 %v13302_v35, %v13243_v22 }
 0x848   : > { %v13303_v37 = vmul.f32 %v13282_v44, %v17601_v14  ;;  %v13284_v6 = vpop.f32.mrb[13].mxu1  ;;  %v13326_v36 = vadd.f32 %v13325_v61, %v13319_v59  ;;  %v13309_v56 = vadd.f32 %v13308_v4, %v13302_v35  ;;  %v15887_v59 = vld [vmem:[%s15984_s20] sm:$0xff] }
 0x849   : > { %v13304_v32 = vmul.f32 %v13284_v6, %v17605_v21  ;;  %v13286_v50 = vpop.f32.mrb[14].mxu1 }
 0x84a   : > { %v13321_v57 = vmul.f32 %v13303_v37, %v13282_v44  ;;  %v13287_v9 = vpop.f32.mrb[15].mxu1  ;;  %v13327_v49 = vadd.f32 %v13326_v36, %v13320_v7  ;;  %v13310_v34 = vadd.f32 %v13309_v56, %v13303_v37  ;;  %v15888_v36 = vld [vmem:[%s15984_s20 + $0x18] sm:$0xff] }
 0x84b   : > { %v13322_v39 = vmul.f32 %v13304_v32, %v13284_v6 }
 0x84c   : > { %v13328_v3 = vadd.f32 %v13327_v49, %v13321_v57  ;;  %v13311_v19 = vadd.f32 %v13310_v34, %v13304_v32  ;;  %v15890_v49 = vld [vmem:[%s15984_s20 + $0x28] sm:$0xff] }
 0x84e   : > { %13312 = vadd.xlane.f32.xlu0 %v13311_v19  ;;  %v13329_v0 = vadd.f32 %v13328_v3, %v13322_v39  ;;  %v15892_v19 = vld [vmem:[%s15984_s20 + $0x38] sm:$0xff] }
 0x850   : > { %13330 = vadd.xlane.f32.xlu1 %v13329_v0 }
 0x8db   : > { %v13313_v2 = vpop.xlane.xlu0 %13312 }
 0x8dc   : > { %v13314_v23 = vmul.f32 0.001953125, %v13313_v2  ;;  %v15893_v2 = vld [vmem:[%s15984_s20 + $0x30] sm:$0xff] }
 0x8dd   : > { %v13331_v14 = vpop.xlane.xlu1 %13330 }
 0x8de   : > { %v13332_v1 = vmul.f32 0.001953125, %v13331_v14  ;;  %v13333_v15 = vmul.f32 %v13314_v23, %v13314_v23  ;;  %v13336_v26 = vsub.f32 %v13161_v51, %v13314_v23  ;;  %v13335_v40 = vsub.f32 %v13159_v31, %v13314_v23 }
 0x8df   : > { %v13338_v61 = vsub.f32 %v13202_v28, %v13314_v23  ;;  %v13337_v35 = vsub.f32 %v13200_v8, %v13314_v23  ;;  %v13340_v31 = vsub.f32 %v13243_v22, %v13314_v23  ;;  %v13339_v51 = vsub.f32 %v13241_v42, %v13314_v23  ;;  %v15889_v8 = vld [vmem:[%s15984_s20 + $0x10] sm:$0xff]  ;;  %v15891_v42 = vld [vmem:[%s15984_s20 + $0x20] sm:$0xff] }
 0x8e0   : > { %v13334_v55 = vsub.f32 %v13332_v1, %v13333_v15  ;;  %v13342_v57 = vsub.f32 %v13284_v6, %v13314_v23  ;;  %v13341_v9 = vsub.f32 %v13282_v44, %v13314_v23 }
 0x8e2   : > { %v13343_v21 = vadd.f32 1e-05, %v13334_v55 }
 0x8e4   : > { %15876 = vrsqrt.f32 %v13343_v21 }
 0x8ee   : > { %v15877_v5 = vpop.eup %15876 }
 0x8ef   : > { %v13346_v63 = vmul.f32 %v15877_v5, %v13336_v26  ;;  %v13345_v33 = vmul.f32 %v15877_v5, %v13335_v40  ;;  %v13348_v7 = vmul.f32 %v15877_v5, %v13338_v61  ;;  %v13347_v37 = vmul.f32 %v15877_v5, %v13337_v35 }
 0x8f0   : > { %v13350_v32 = vmul.f32 %v15877_v5, %v13340_v31  ;;  %v13349_v50 = vmul.f32 %v15877_v5, %v13339_v51  ;;  %v13352_v39 = vmul.f32 %v15877_v5, %v13342_v57  ;;  %v13351_v3 = vmul.f32 %v15877_v5, %v13341_v9  ;;  %v20764_v31 = vld [vmem:[#allocation11_spill] sm:$0xff]  ;;  %v20771_v9 = vld [vmem:[#allocation14_spill] sm:$0xff] }
 0x8f1   : > { %v19620_v4 = vadd.f32 %v15886_v46, %v13346_v63  ;;  %v13353_v58 = vadd.f32 %v15887_v59, %v13345_v33  ;;  %v19627_v56 = vadd.f32 %v15888_v36, %v13348_v7  ;;  %v13355_v28 = vadd.f32 %v15889_v8, %v13347_v37 }
 0x8f2   : > { %v19634_v34 = vadd.f32 %v15890_v49, %v13350_v32  ;;  %v13357_v22 = vadd.f32 %v15891_v42, %v13349_v50  ;;  %v19641_v0 = vadd.f32 %v15892_v19, %v13352_v39  ;;  %v13359_v14 = vadd.f32 %v15893_v2, %v13351_v3  ;;  %v20769_v50 = vld [vmem:[#allocation12_spill] sm:$0xff]  ;;  %v20773_v42 = vld [vmem:[#allocation15_spill] sm:$0xff] }
 0x8f3   : > { %13387 = vrot.lane.b32.xlu1 %v19620_v4, %s15937_s19  ;;  %13385 = vrot.lane.b32.xlu0 %v13353_v58, %s15937_s19  ;;  %v20775_v3 = vld [vmem:[#allocation4_spill] sm:$0xff] }
 0x8f7   : > { %13391 = vrot.lane.b32.xlu1 %v19627_v56, %s15937_s19  ;;  %13389 = vrot.lane.b32.xlu0 %v13355_v28, %s15937_s19 }
 0x8fb   : > { %13395 = vrot.lane.b32.xlu1 %v19634_v34, %s15937_s19  ;;  %13393 = vrot.lane.b32.xlu0 %v13357_v22, %s15937_s19 }
 0x8ff   : > { %13399 = vrot.lane.b32.xlu1 %v19641_v0, %s15937_s19  ;;  %13397 = vrot.lane.b32.xlu0 %v13359_v14, %s15937_s19 }
 0x903   : > { %13363 = vrot.lane.b32.xlu1 %v19620_v4, %s15938_s11  ;;  %13361 = vrot.lane.b32.xlu0 %v13353_v58, %s15938_s11 }
 0x907   : > { %13367 = vrot.lane.b32.xlu1 %v19627_v56, %s15938_s11  ;;  %13365 = vrot.lane.b32.xlu0 %v13355_v28, %s15938_s11 }
 0x90b   : > { %13371 = vrot.lane.b32.xlu1 %v19634_v34, %s15938_s11  ;;  %13369 = vrot.lane.b32.xlu0 %v13357_v22, %s15938_s11 }
 0x90f   : > { %13375 = vrot.lane.b32.xlu1 %v19641_v0, %s15938_s11  ;;  %13373 = vrot.lane.b32.xlu0 %v13359_v14, %s15938_s11  ;;  %s20835_s11 = sshll.u32 %s20864_s16, 6 }
 0x965   : > { %v13388_v44 = vpop.permute.xlu1 %13387  ;;  %v13386_v6 = vpop.permute.xlu0 %13385 }
 0x966   : > { %v13407_v35 = vsel %vm20759_vm14, %v13386_v6, %v13388_v44  ;;  %vm20768_vm14 = vmmov %vm20760_vm0 }
 0x969   : > { %v13392_v23 = vpop.permute.xlu1 %13391  ;;  %v13390_v1 = vpop.permute.xlu0 %13389 }
 0x96a   : > { %v13406_v46 = vsel %vm20760_vm0, %v13388_v44, %v13390_v1  ;;  %v13405_v8 = vsel %vm20768_vm14, %v13390_v1, %v13392_v23  ;;  %v20779_v1 = vld [vmem:[#allocation16_spill] sm:$0xff] }
 0x96d   : > { %v13396_v15 = vpop.permute.xlu1 %13395  ;;  %v13394_v55 = vpop.permute.xlu0 %13393 }
 0x96e   : > { %v13404_v32 = vsel %vm20760_vm0, %v13392_v23, %v13394_v55 }
 0x971   : > { %v13400_v21 = vpop.permute.xlu1 %13399  ;;  %v13398_v26 = vpop.permute.xlu0 %13397 }
 0x972   : > { %v13408_v40 = vsel %vm20756_vm1, %v13400_v21, %v13386_v6  ;;  %vm20765_vm1 = vnez %v20764_v31  ;;  %v13403_v6 = vsel %vm20760_vm0, %v13394_v55, %v13396_v15  ;;  %v20790_v31 = vld [vmem:[#allocation9_spill] sm:$0xff] }
 0x973   : > { %v13409_v33 = vsel %vm20757_vm10, %v13408_v40, %v13353_v58  ;;  %v13410_v58 = vsel %vm20763_vm15, %v13407_v35, %v19620_v4  ;;  %v13411_v51 = vsel %vm20765_vm1, %v13406_v46, %v13355_v28  ;;  %vm20766_vm10 = vmmov %vm20758_vm13  ;;  %vm20772_vm15 = vnez %v20771_v9  ;;  %v20785_v35 = vld [vmem:[#allocation5_spill] sm:$0xff] }
 0x974   : > { %vm20774_vm1 = vnez %v20773_v42 }
 0x975   : > { %v13364_v5 = vpop.permute.xlu1 %13363  ;;  %v13362_v63 = vpop.permute.xlu0 %13361  ;;  %v13412_v39 = vsel %vm20774_vm1, %v13405_v8, %v19627_v56 }
 0x976   : > { %v13383_v61 = vsel %vm20758_vm13, %v13362_v63, %v13364_v5  ;;  %vm20767_vm13 = vmmov %vm20766_vm10 }
 0x977   : > { %v19671_v59 = vsel %vm20761_vm9, %v13383_v61, %v13409_v33  ;;  %vm20770_vm9 = vnez %v20769_v50  ;;  %vm20777_vm14 = vmmov %vm20767_vm13  ;;  %v20783_v61 = vld [vmem:[#allocation3_spill] sm:$0xff] }
 0x978   : > { %13449 = vrot.lane.b32.xlu0 %v19671_v59, %s15939_s18 }
 0x979   : > { %v13368_v7 = vpop.permute.xlu1 %13367  ;;  %v13366_v37 = vpop.permute.xlu0 %13365 }
 0x97a   : > { %v13381_v36 = vsel %vm20766_vm10, %v13366_v37, %v13368_v7  ;;  %v13382_v52 = vsel %vm20767_vm13, %v13364_v5, %v13366_v37  ;;  %vm20776_vm10 = vnez %v20775_v3  ;;  %v20781_v5 = vld [vmem:[#allocation10_spill] sm:$0xff] }
 0x97b   : > { %v13418_v57 = vsel %vm20770_vm9, %v13382_v52, %v13410_v58  ;;  %v19692_v4 = vsel %vm20772_vm15, %v13381_v36, %v13411_v51  ;;  %v13413_v19 = vsel %vm20776_vm10, %v13404_v32, %v13357_v22  ;;  %vm20778_vm9 = vmmov %vm20760_vm0  ;;  %vm20780_vm15 = vnez %v20779_v1 }
 0x97c   : > { %13451 = vrot.lane.b32.xlu1 %v13418_v57, %s15939_s18  ;;  %13453 = vrot.lane.b32.xlu0 %v19692_v4, %s15939_s18  ;;  %v13402_v23 = vsel %vm20778_vm9, %v13396_v15, %v13398_v26  ;;  %vm20782_vm1 = vnez %v20781_v5  ;;  %vm20784_vm10 = vnez %v20783_v61  ;;  %vm20787_vm0 = vmmov %vm20777_vm14  ;;  %v13401_v37 = vsel %vm20778_vm9, %v13398_v26, %v13400_v21  ;;  %v20795_v21 = vld [vmem:[#allocation13_spill] sm:$0xff] }
 0x97d   : > { %v13372_v28 = vpop.permute.xlu1 %13371  ;;  %v13370_v49 = vpop.permute.xlu0 %13369  ;;  %v13414_v55 = vsel %vm20784_vm10, %v13403_v6, %v19634_v34  ;;  %vm20792_vm10 = vmmov %vm20787_vm0 }
 0x97e   : > { %v13379_v2 = vsel %vm20767_vm13, %v13370_v49, %v13372_v28  ;;  %v13380_v44 = vsel %vm20777_vm14, %v13368_v7, %v13370_v49  ;;  %vm20786_vm13 = vnez %v20785_v35 }
 0x97f   : > { %v13420_v40 = vsel %vm20780_vm15, %v13380_v44, %v13412_v39  ;;  %v19714_v56 = vsel %vm20782_vm1, %v13379_v2, %v13413_v19  ;;  %v13415_v15 = vsel %vm20786_vm13, %v13402_v23, %v13359_v14  ;;  %vm20789_vm15 = vnez %v20788_v53  ;;  %v20793_v14 = vld [vmem:[#allocation6_spill] sm:$0xff] }
 0x980   : > { %13455 = vrot.lane.b32.xlu1 %v13420_v40, %s15939_s18  ;;  %13457 = vrot.lane.b32.xlu0 %v19714_v56, %s15939_s18  ;;  %vm20791_vm1 = vnez %v20790_v31  ;;  %vm20794_vm13 = vnez %v20793_v14 }
 0x981   : > { %v13376_v22 = vpop.permute.xlu1 %13375  ;;  %v13374_v33 = vpop.permute.xlu0 %13373  ;;  %v13416_v36 = vsel %vm20794_vm13, %v13401_v37, %v19641_v0 }
 0x982   : > { %v13377_v46 = vsel %vm20777_vm14, %v13374_v33, %v13376_v22  ;;  %v13378_v7 = vsel %vm20787_vm0, %v13372_v28, %v13374_v33  ;;  %v13384_v34 = vsel %vm20792_vm10, %v13376_v22, %v13362_v63  ;;  %vm20796_vm14 = vnez %v20795_v21 }
 0x983   : > { %v13422_v58 = vsel %vm20789_vm15, %v13378_v7, %v13414_v55  ;;  %v19734_v51 = vsel %vm20791_vm1, %v13377_v46, %v13415_v15  ;;  %v19746_v26 = vsel %vm20796_vm14, %v13384_v34, %v13416_v36  ;;  %vm20797_vm0 = vcmp.lt.s32.totalorder %v16134_v13, 20  ;;  %v20825_v34 = vld [vmem:[#allocation20_spill] sm:$0xff]  ;;  %v20827_v36 = vld [vmem:[#allocation19_spill] sm:$0xff] }
 0x984   : > { %13459 = vrot.lane.b32.xlu1 %v13422_v58, %s15939_s18  ;;  %13461 = vrot.lane.b32.xlu0 %v19734_v51, %s15939_s18  ;;  %vm20798_vm9 = vmmov %vm20797_vm0  ;;  %vm20799_vm15 = vcmp.lt.s32.totalorder %v16134_v13, 108  ;;  %vm20803_vm14 = vnez %v20192_v29 }
 0x985   : > { %vm20800_vm1 = vmmov %vm20799_vm15 }
 0x986   : > { %vm20801_vm10 = vmmov %vm20797_vm0 }
 0x987   : > { %vm20802_vm13 = vmmov %vm20797_vm0 }
 0x988   : > { %13463 = vrot.lane.b32.xlu1 %v19746_v26, %s15939_s18  ;;  %13425 = vrot.lane.b32.xlu0 %v19671_v59, %s15940_s12 }
 0x98c   : > { %13427 = vrot.lane.b32.xlu1 %v13418_v57, %s15940_s12  ;;  %13429 = vrot.lane.b32.xlu0 %v19692_v4, %s15940_s12 }
 0x990   : > { %13431 = vrot.lane.b32.xlu1 %v13420_v40, %s15940_s12  ;;  %13433 = vrot.lane.b32.xlu0 %v19714_v56, %s15940_s12 }
 0x994   : > { %13435 = vrot.lane.b32.xlu1 %v13422_v58, %s15940_s12  ;;  %13437 = vrot.lane.b32.xlu0 %v19734_v51, %s15940_s12 }
 0x998   : > { %13439 = vrot.lane.b32.xlu1 %v19746_v26, %s15940_s12 }
 0x9ea   : > { %v13450_v0 = vpop.permute.xlu0 %13449 }
 0x9ee   : > { %v13452_v63 = vpop.permute.xlu1 %13451  ;;  %v13454_v52 = vpop.permute.xlu0 %13453 }
 0x9ef   : > { %v13471_v42 = vsel %vm20797_vm0, %v13450_v0, %v13452_v63  ;;  %v13470_v1 = vsel %vm20801_vm10, %v13452_v63, %v13454_v52  ;;  %vm20806_vm0 = vnez %v20201_v17 }
 0x9f0   : > { %v13474_v2 = vsel %vm17959_vm6, %v13471_v42, %v13418_v57  ;;  %vm20804_vm6 = vnez %v20208_v10  ;;  %v15894_v42 = vld [vmem:[%s20001_s1 + $0x38] sm:$0xff] }
 0x9f2   : > { %v13456_v8 = vpop.permute.xlu1 %13455  ;;  %v13458_v32 = vpop.permute.xlu0 %13457 }
 0x9f3   : > { %v13469_v5 = vsel %vm20802_vm13, %v13454_v52, %v13456_v8  ;;  %vm20811_vm13 = vnez %v20215_v25 }
 0x9f4   : > { %v13476_v29 = vsel %vm20806_vm0, %v13469_v5, %v13420_v40  ;;  %v15895_v5 = vld [vmem:[%s20001_s1] sm:$0xff] }
 0x9f6   : > { %v13460_v50 = vpop.permute.xlu1 %13459  ;;  %v13462_v9 = vpop.permute.xlu0 %13461 }
 0x9fa   : > { %v13464_v28 = vpop.permute.xlu1 %13463  ;;  %v13426_v49 = vpop.permute.xlu0 %13425 }
 0x9fb   : > { %v13472_v39 = vsel %vm20798_vm9, %v13464_v28, %v13450_v0  ;;  %vm20807_vm9 = vmmov %vm20800_vm1 }
 0x9fc   : > { %v13473_v44 = vsel %vm17947_vm7, %v13472_v39, %v19671_v59  ;;  %vm20805_vm7 = vnez %v20199_v62  ;;  %vm20815_vm0 = vmmov %vm20807_vm9 }
 0x9fd   : > { %v13475_v22 = vsel %vm20805_vm7, %v13470_v1, %v19692_v4  ;;  %vm20814_vm7 = vnez %v20183_v18 }
 0x9fe   : > { %v13428_v3 = vpop.permute.xlu1 %13427  ;;  %v13430_v19 = vpop.permute.xlu0 %13429 }
 0x9ff   : > { %v13447_v6 = vsel %vm20799_vm15, %v13426_v49, %v13428_v3  ;;  %v13446_v23 = vsel %vm20800_vm1, %v13428_v3, %v13430_v19  ;;  %vm20808_vm15 = vmmov %vm20800_vm1 }
 0xa00   : > { %v19782_v48 = vsel %vm20803_vm14, %v13447_v6, %v13473_v44  ;;  %v19786_v43 = vsel %vm20804_vm6, %v13446_v23, %v13474_v2  ;;  %vm20809_vm1 = vmmov %vm20801_vm10  ;;  %vm20812_vm14 = vnez %v20221_v41  ;;  %vm20813_vm6 = vnez %v20203_v45 }
 0xa01   : > { %13513 = vrot.lane.b32.xlu0 %v19782_v48, %s15941_s14  ;;  %13515 = vrot.lane.b32.xlu1 %v19786_v43, %s15941_s14  ;;  %v13468_v61 = vsel %vm20809_vm1, %v13456_v8, %v13458_v32  ;;  %vm20810_vm10 = vmmov %vm20809_vm1  ;;  %v13465_v7 = vsel %vm20809_vm1, %v13462_v9, %v13464_v28 }
 0xa02   : > { %v13432_v59 = vpop.permute.xlu1 %13431  ;;  %v13434_v57 = vpop.permute.xlu0 %13433  ;;  %v13467_v55 = vsel %vm20810_vm10, %v13458_v32, %v13460_v50  ;;  %v13477_v40 = vsel %vm20813_vm6, %v13468_v61, %v19714_v56  ;;  %vm20818_vm10 = vnez %v20227_v47  ;;  %v20820_v56 = vld [vmem:[#allocation17_spill] sm:$0xff]  ;;  %v20829_v32 = vld [vmem:[#allocation2_spill] sm:$0xff] }
 0xa03   : > { %v13445_v10 = vsel %vm20807_vm9, %v13430_v19, %v13432_v59  ;;  %v13444_v33 = vsel %vm20808_vm15, %v13432_v59, %v13434_v57  ;;  %v13478_v25 = vsel %vm20814_vm7, %v13467_v55, %v13422_v58  ;;  %vm20816_vm9 = vmmov %vm20815_vm0  ;;  %v20822_v58 = vld [vmem:[#allocation18_spill] sm:$0xff] }
 0xa04   : > { %v19807_v35 = vsel %vm20811_vm13, %v13445_v10, %v13475_v22  ;;  %v19811_v62 = vsel %vm20812_vm14, %v13444_v33, %v13476_v29  ;;  %vm20817_vm15 = vmmov %vm20809_vm1  ;;  %vm20819_vm13 = vnez %v20194_v38  ;;  %vm20821_vm14 = vnez %v20820_v56 }
 0xa05   : > { %13517 = vrot.lane.b32.xlu0 %v19807_v35, %s15941_s14  ;;  %13519 = vrot.lane.b32.xlu1 %v19811_v62, %s15941_s14  ;;  %v13466_v46 = vsel %vm20817_vm15, %v13460_v50, %v13462_v9  ;;  %vm20823_vm6 = vnez %v20822_v58  ;;  %vm20824_vm7 = vmmov %vm20815_vm0  ;;  %vm20828_vm15 = vnez %v20827_v36  ;;  %v19877_v50 = vsub.s32 7, %v20829_v32  ;;  %v15901_v36 = vld [vmem:[%s20001_s1 + $0x28] sm:$0xff] }
 0xa06   : > { %v13436_v17 = vpop.permute.xlu1 %13435  ;;  %v13438_v4 = vpop.permute.xlu0 %13437  ;;  %v13479_v53 = vsel %vm20821_vm14, %v13466_v46, %v19734_v51  ;;  %v13480_v47 = vsel %vm20823_vm6, %v13465_v7, %v19746_v26  ;;  %vm20830_vm1 = vcmp.lt.s32.totalorder %v16134_v13, 72 }
 0xa07   : > { %v13443_v41 = vsel %vm20815_vm0, %v13434_v57, %v13436_v17  ;;  %v13442_v15 = vsel %vm20816_vm9, %v13436_v17, %v13438_v4  ;;  %vm20826_vm9 = vnez %v20825_v34  ;;  %v13584_v39 = vrot.slane %v15894_v42, %v19877_v50  ;;  %vm20833_vm14 = vmmov %vm20830_vm1  ;;  %v15896_v57 = vld [vmem:[%s20001_s1 + $0x8] sm:$0xff] }
 0xa08   : > { %v19832_v37 = vsel %vm20818_vm10, %v13443_v41, %v13477_v40  ;;  %v19836_v18 = vsel %vm20819_vm13, %v13442_v15, %v13478_v25  ;;  %vm20831_vm10 = vnez %v20236_v54  ;;  %vm20832_vm13 = vcmp.lt.s32.totalorder %v16134_v13, 56  ;;  %vm20834_vm6 = vmmov %vm20830_vm1  ;;  %v15897_v40 = vld [vmem:[%s20001_s1 + $0x10] sm:$0xff]  ;;  %v15898_v41 = vld [vmem:[%s20001_s1 + $0x18] sm:$0xff] }
 0xa09   : > { %13521 = vrot.lane.b32.xlu0 %v19832_v37, %s15941_s14  ;;  %13523 = vrot.lane.b32.xlu1 %v19836_v18, %s15941_s14  ;;  %v13556_v59 = vrot.slane %v15895_v5, %v19877_v50  ;;  %v13560_v22 = vrot.slane %v15896_v57, %v19877_v50  ;;  %v13564_v25 = vrot.slane %v15897_v40, %v19877_v50 }
 0xa0a   : > { %v13440_v45 = vpop.permute.xlu1 %13439  ;;  %v13568_v15 = vrot.slane %v15898_v41, %v19877_v50 }
 0xa0b   : > { %v13441_v38 = vsel %vm20824_vm7, %v13438_v4, %v13440_v45  ;;  %v13448_v31 = vsel %vm20815_vm0, %v13440_v45, %v13426_v49  ;;  %vm20836_vm7 = vmmov %vm20830_vm1 }
 0xa0c   : > { %v13488_v14 = vsel %vm20826_vm9, %v13448_v31, %v13480_v47  ;;  %v19856_v21 = vsel %vm20828_vm15, %v13441_v38, %v13479_v53  ;;  %vm20838_vm0 = vmmov %vm20832_vm13  ;;  %v15899_v47 = vld [vmem:[%s20001_s1 + $0x30] sm:$0xff] }
 0xa0d   : > { %13527 = vrot.lane.b32.xlu1 %v13488_v14, %s15941_s14  ;;  %13525 = vrot.lane.b32.xlu0 %v19856_v21, %s15941_s14  ;;  %s19898_s14 = scalar_lea.vmem %s20004_s4, %s20835_s11  ;;  %vm20839_vm9 = vmmov %vm20838_vm0  ;;  %v13580_v38 = vrot.slane %v15899_v47, %v19877_v50 }
 0xa0e   : > { %vm20840_vm15 = vmmov %vm20830_vm1 }
 0xa11   : > { %13491 = vrot.lane.b32.xlu1 %v19786_v43, %s15942_s8  ;;  %13489 = vrot.lane.b32.xlu0 %v19782_v48, %s15942_s8 }
 0xa15   : > { %13495 = vrot.lane.b32.xlu1 %v19811_v62, %s15942_s8  ;;  %13493 = vrot.lane.b32.xlu0 %v19807_v35, %s15942_s8 }
 0xa19   : > { %13499 = vrot.lane.b32.xlu1 %v19836_v18, %s15942_s8  ;;  %13497 = vrot.lane.b32.xlu0 %v19832_v37, %s15942_s8 }
 0xa1d   : > { %13503 = vrot.lane.b32.xlu1 %v13488_v14, %s15942_s8  ;;  %13501 = vrot.lane.b32.xlu0 %v19856_v21, %s15942_s8 }
 0xa73   : > { %v13516_v51 = vpop.permute.xlu1 %13515  ;;  %v13514_v26 = vpop.permute.xlu0 %13513 }
 0xa74   : > { %v13535_v29 = vsel %vm20836_vm7, %v13514_v26, %v13516_v51  ;;  %vm20854_vm7 = vmmov %vm20838_vm0 }
 0xa75   : > { %v13539_v20 = vsel %vm18179_vm11, %v13535_v29, %v19807_v35 }
 0xa77   : > { %v13520_v0 = vpop.permute.xlu1 %13519  ;;  %v13518_v63 = vpop.permute.xlu0 %13517 }
 0xa78   : > { %v13534_v4 = vsel %vm20840_vm15, %v13516_v51, %v13518_v63  ;;  %v13576_v51 = vrot.slane %v15901_v36, %v19877_v50 }
 0xa7b   : > { %v13524_v52 = vpop.permute.xlu1 %13523  ;;  %v13522_v8 = vpop.permute.xlu0 %13521 }
 0xa7f   : > { %v13528_v9 = vpop.permute.xlu1 %13527  ;;  %v13526_v28 = vpop.permute.xlu0 %13525 }
 0xa80   : > { %v13530_v49 = vsel %vm20830_vm1, %v13524_v52, %v13526_v28  ;;  %v13536_v6 = vsel %vm20833_vm14, %v13528_v9, %v13514_v26  ;;  %v13529_v23 = vsel %vm20834_vm6, %v13526_v28, %v13528_v9  ;;  %v20852_v9 = vld [vmem:[#allocation24_spill] sm:$0xff] }
 0xa81   : > { %v13544_v2 = vsel %vm20831_vm10, %v13530_v49, %v13488_v14  ;;  %v13537_v61 = vsel %vm18136_vm2, %v13529_v23, %v19782_v48  ;;  %vm20841_vm2 = vmmov %vm20830_vm1  ;;  %v15900_v14 = vld [vmem:[%s20001_s1 + $0x20] sm:$0xff]  ;;  %vm20853_vm6 = vnez %v20852_v9 }
 0xa82   : > { %v13533_v12 = vsel %vm20841_vm2, %v13518_v63, %v13520_v0  ;;  %vm20845_vm10 = vmmov %vm20838_vm0 }
 0xa83   : > { %v13492_v3 = vpop.permute.xlu1 %13491  ;;  %v13490_v19 = vpop.permute.xlu0 %13489  ;;  %vm20846_vm11 = vmmov %vm20841_vm2 }
 0xa84   : > { %v13511_v44 = vsel %vm20832_vm13, %v13490_v19, %v13492_v3  ;;  %v13531_v35 = vsel %vm20846_vm11, %v13522_v8, %v13524_v52  ;;  %vm20847_vm13 = vnez %v20250_v60  ;;  %v13572_v60 = vrot.slane %v15900_v14, %v19877_v50 }
 0xa85   : > { %v13552_v54 = vsel %vm18165_vm4, %v13511_v44, %v13544_v2  ;;  %vm20837_vm4 = vnez %v20234_v27  ;;  %v13543_v28 = vsel %vm20853_vm6, %v13531_v35, %v19856_v21  ;;  %v20861_v2 = vld [vmem:[#allocation26_spill] sm:$0xff] }
 0xa86   : > { %v13592_v1 = vmul.f32 %v13584_v39, %v13552_v54  ;;  %v13538_v33 = vsel %vm20837_vm4, %v13536_v6, %v19786_v43  ;;  %vm20856_vm4 = vmmov %vm20838_vm0  ;;  %v20859_v39 = vld [vmem:[#allocation25_spill] sm:$0xff] }
 0xa87   : > { %v13496_v10 = vpop.permute.xlu1 %13495  ;;  %v13494_v30 = vpop.permute.xlu0 %13493 }
 0xa88   : > { %13600 = vst [vmem:[%s19898_s14 + $0x38] sm:$0xff] %v13592_v1  ;;  %v13509_v55 = vsel %vm20838_vm0, %v13494_v30, %v13496_v10  ;;  %v13510_v17 = vsel %vm20839_vm9, %v13492_v3, %v13494_v30  ;;  %vm20862_vm9 = vnez %v20861_v2 }
 0xa89   : > { %v13545_v27 = vsel %vm18169_vm8, %v13510_v17, %v13537_v61  ;;  %v13546_v43 = vsel %vm18175_vm12, %v13509_v55, %v13538_v33  ;;  %vm20842_vm8 = vnez %v20248_v11  ;;  %vm20843_vm12 = vmmov %vm20830_vm1  ;;  %v20848_v11 = vld [vmem:[#allocation21_spill] sm:$0xff] }
 0xa8a   : > { %v13585_v16 = vmul.f32 %v13556_v59, %v13545_v27  ;;  %v13586_v48 = vmul.f32 %v13560_v22, %v13546_v43  ;;  %v13540_v45 = vsel %vm20842_vm8, %v13534_v4, %v19811_v62  ;;  %v13532_v56 = vsel %vm20843_vm12, %v13520_v0, %v13522_v8  ;;  %vm20844_vm1 = vmmov %vm20838_vm0 }
 0xa8b   : > { %v13500_v46 = vpop.permute.xlu1 %13499  ;;  %v13498_v7 = vpop.permute.xlu0 %13497  ;;  %vm20849_vm14 = vnez %v20848_v11  ;;  %v13541_v0 = vsel %vm18206_vm5, %v13533_v12, %v19832_v37  ;;  %v13542_v52 = vsel %vm18210_vm3, %v13532_v56, %v19836_v18  ;;  %vm20855_vm5 = vmmov %vm20838_vm0  ;;  %v20857_v18 = vld [vmem:[#allocation27_spill] sm:$0xff]  ;;  %vm20860_vm0 = vnez %v20859_v39 }
 0xa8c   : > { %13593 = vst [vmem:[%s19898_s14] sm:$0xff] %v13585_v16  ;;  %13594 = vst [vmem:[%s19898_s14 + $0x8] sm:$0xff] %v13586_v48  ;;  %v13507_v53 = vsel %vm20844_vm1, %v13498_v7, %v13500_v46  ;;  %v13508_v24 = vsel %vm20845_vm10, %v13496_v10, %v13498_v7  ;;  %vm20858_vm3 = vnez %v20857_v18 }
 0xa8d   : > { %v13547_v58 = vsel %vm20847_vm13, %v13508_v24, %v13539_v20  ;;  %v13548_v62 = vsel %vm20849_vm14, %v13507_v53, %v13540_v45 }
 0xa8e   : > { %v13587_v31 = vmul.f32 %v13564_v25, %v13547_v58  ;;  %v13588_v34 = vmul.f32 %v13568_v15, %v13548_v62 }
 0xa8f   : > { %v13504_v8 = vpop.permute.xlu1 %13503  ;;  %v13502_v32 = vpop.permute.xlu0 %13501 }
 0xa90   : > { %13595 = vst [vmem:[%s19898_s14 + $0x10] sm:$0xff] %v13587_v31  ;;  %13596 = vst [vmem:[%s19898_s14 + $0x18] sm:$0xff] %v13588_v34  ;;  %v13512_v50 = vsel %vm20854_vm7, %v13504_v8, %v13490_v19  ;;  %v13505_v37 = vsel %vm20855_vm5, %v13502_v32, %v13504_v8  ;;  %v13506_v49 = vsel %vm20856_vm4, %v13500_v46, %v13502_v32 }
 0xa91   : > { %v13551_v42 = vsel %vm20858_vm3, %v13512_v50, %v13543_v28  ;;  %v13549_v3 = vsel %vm20860_vm0, %v13506_v49, %v13541_v0  ;;  %v13550_v21 = vsel %vm20862_vm9, %v13505_v37, %v13542_v52 }
 0xa92   : > { %v13591_v44 = vmul.f32 %v13580_v38, %v13551_v42  ;;  %v13589_v6 = vmul.f32 %v13572_v60, %v13549_v3  ;;  %v13590_v23 = vmul.f32 %v13576_v51, %v13550_v21 }
 0xa94   : > { %13599 = vst [vmem:[%s19898_s14 + $0x30] sm:$0xff] %v13591_v44  ;;  %13597 = vst [vmem:[%s19898_s14 + $0x20] sm:$0xff] %v13589_v6 }
 0xa95   : > { %13598 = vst [vmem:[%s19898_s14 + $0x28] sm:$0xff] %v13590_v23 }
 0xa96 PF: > { %s14_s15 = sadd.s32 1, %s15908_s15  }
 0xa97   : > { %p11_p4 = scmp.ge.s32.totalorder %s14_s15, 4  }
 0xa99   :  { %13 = sbr.rel (!%p11_p4) target bundleno = 1 (0x1), region = 66 }

</bundles_post_ra>
